<compile_context>
chip_gen: v5e
topology: v5e:2x2
jax: 0.10.0
libtpu: 0.0.40
codegen_flags: <defaults>
</compile_context>

<pallas_src>
import functools

import jax
import jax.numpy as jnp
from jax.experimental import pallas as pl
from jax.experimental.pallas import tpu as pltpu

BIGNET_DIM = 128      # hidden size (lane-aligned)
N_BLOCKS = 6
N_LN = N_BLOCKS - 1
LN_EPS = 1e-5


def bignet_kernel(x_ref, w_ref, b_ref, ln_g_ref, ln_b_ref, o_ref):
    """One row-tile of the whole network.

    x_ref   : (TM, C)        fp32 activations tile
    w_ref   : (6, 3, C, C)   linear weights, [in, out] layout, compute dtype
    b_ref   : (6, 3, 1, C)   fp32 linear biases
    ln_g_ref: (5, 1, C)      fp32 LayerNorm gamma
    ln_b_ref: (5, 1, C)      fp32 LayerNorm beta
    o_ref   : (TM, C)        fp32 output tile
    """
    compute_dtype = w_ref.dtype
    x = x_ref[...]                                            # fp32

    for blk in range(N_BLOCKS):
        h = x
        y = x
        for layer in range(3):
            w = w_ref[blk, layer]                             # (C, C) [in, out]
            b = b_ref[blk, layer]                             # (1, C) fp32
            y = jnp.dot(y.astype(compute_dtype), w,
                        preferred_element_type=jnp.float32) + b
            if layer < 2:
                y = jnp.maximum(y, 0.0)                       # ReLU
        x = y + h                                             # residual (fp32)

        if blk < N_LN:                                        # LayerNorm between blocks
            mean = jnp.mean(x, axis=-1, keepdims=True)
            mean_sq = jnp.mean(x * x, axis=-1, keepdims=True)
            var = mean_sq - mean * mean                       # one-pass variance
            x = (x - mean) * jax.lax.rsqrt(var + LN_EPS) * ln_g_ref[blk] + ln_b_ref[blk]

    o_ref[...] = x.astype(o_ref.dtype)


def prepare_params(w_half, b_half, ln_g, ln_b, compute_dtype=jnp.float32):
    """One-time wrapper-side layout plumbing: transpose weights to [in, out] and
    up-cast everything out of fp16 so the kernel never re-casts / re-transposes
    the resident weights on every grid step."""
    w_t = jnp.transpose(w_half.astype(jnp.float32), (0, 1, 3, 2)).astype(compute_dtype)
    b_f = b_half.astype(jnp.float32)
    return w_t, b_f, ln_g.astype(jnp.float32), ln_b.astype(jnp.float32)


@functools.partial(jax.jit, static_argnames=("tm",))
def bignet_forward(x, w_t, b_f, ln_g, ln_b, *, tm=256):
    n, c = x.shape
    assert c == BIGNET_DIM
    assert n % tm == 0 and tm % 8 == 0, "tm must divide N and be a multiple of 8"
    grid = (n // tm,)
    full = lambda shape: pl.BlockSpec(shape, lambda i: (0,) * len(shape))
    return pl.pallas_call(
        bignet_kernel,
        out_shape=jax.ShapeDtypeStruct((n, c), jnp.float32),
        grid_spec=pltpu.PrefetchScalarGridSpec(
            num_scalar_prefetch=0,
            grid=grid,
            in_specs=[
                pl.BlockSpec((tm, c), lambda i: (i, 0)),   # x row-slab
                full(w_t.shape),                           # weights resident in VMEM
                full(b_f.shape),
                full(ln_g.shape),
                full(ln_b.shape),
            ],
            out_specs=pl.BlockSpec((tm, c), lambda i: (i, 0)),
        ),
        compiler_params=pltpu.CompilerParams(
            dimension_semantics=("parallel",)),
    )(x, w_t, b_f, ln_g, ln_b)


def init_params(key, c=BIGNET_DIM):
    """Deterministic synthetic params; linear weights/biases stored in fp16
    (as in CustomLinear.__init__), LayerNorm params at torch defaults (1, 0)."""
    kw, kb = jax.random.split(key)
    bound = 1.0 / jnp.sqrt(jnp.float32(c))  # torch default uniform bound
    w = jax.random.uniform(kw, (N_BLOCKS, 3, c, c), jnp.float32,
                           minval=-bound, maxval=bound).astype(jnp.float16)
    b = jax.random.uniform(kb, (N_BLOCKS, 3, 1, c), jnp.float32,
                           minval=-bound, maxval=bound).astype(jnp.float16)
    ln_g = jnp.ones((N_LN, 1, c), jnp.float32)
    ln_b = jnp.zeros((N_LN, 1, c), jnp.float32)
    return w, b, ln_g, ln_b


def reference_forward(x, w, b, ln_g, ln_b):
    """Pure-JAX reference mirroring the PyTorch forward (fp16 params, fp32 compute)."""
    x = x.astype(jnp.float32)
    for blk in range(N_BLOCKS):
        h = x
        y = h
        for layer in range(3):
            wl = w[blk, layer].astype(jnp.float32)             # [out, in]
            bl = b[blk, layer].astype(jnp.float32)
            y = y @ wl.T + bl
            if layer < 2:
                y = jnp.maximum(y, 0.0)
        x = y + h
        if blk < N_LN:
            mean = jnp.mean(x, axis=-1, keepdims=True)
            var = jnp.mean((x - mean) ** 2, axis=-1, keepdims=True)
            x = (x - mean) / jnp.sqrt(var + LN_EPS) * ln_g[blk] + ln_b[blk]
    return x


if __name__ == "__main__":
    key = jax.random.PRNGKey(0)
    k_x, k_p = jax.random.split(key)

    # Small-but-tile-friendly demo shape: 512 rows -> grid of 2 steps at tm=256
    # (keeps both v7x TensorCores busy; trivially fine on v5e/v6e).
    N = 512
    TM = 256
    x = jax.random.normal(k_x, (N, BIGNET_DIM), jnp.float32)
    w, b, ln_g, ln_b = init_params(k_p)

    # fp32 compute path (matches the PyTorch module's fp32-compute semantics).
    # For a faster MXU path, use compute_dtype=jnp.bfloat16 here (looser tolerance).
    w_t, b_f, ln_g_f, ln_b_f = prepare_params(w, b, ln_g, ln_b,
                                              compute_dtype=jnp.float32)

    out = bignet_forward(x, w_t, b_f, ln_g_f, ln_b_f, tm=TM)
    out = jax.block_until_ready(out)

    ref = reference_forward(x, w, b, ln_g, ln_b)
    assert out.shape == (N, BIGNET_DIM) and out.dtype == jnp.float32
    assert jnp.allclose(out, ref, atol=1e-3, rtol=1e-3), "mismatch vs reference"

    print("KERNEL_OK")
</pallas_src>

<mosaic_0001>
module attributes {stable_mosaic.version = 11 : i64} {
  func.func @bignet_kernel(%arg0: i32, %arg1: memref<256x128xf32, #tpu.memory_space<vmem>>, %arg2: memref<6x3x128x128xf32, #tpu.memory_space<vmem>>, %arg3: memref<6x3x1x128xf32, #tpu.memory_space<vmem>>, %arg4: memref<5x1x128xf32, #tpu.memory_space<vmem>>, %arg5: memref<5x1x128xf32, #tpu.memory_space<vmem>>, %arg6: memref<256x128xf32, #tpu.memory_space<vmem>>) attributes {dimension_semantics = [#tpu.dimension_semantics<parallel>], iteration_bounds = array<i64: 2>, scalar_prefetch = 0 : i64, scratch_operands = 0 : i64, tpu.core_type = #tpu.core_type<tc>, window_params = [{transform_indices = @transform_0, window_bounds = array<i64: 256, 128>}, {pipeline_mode = #tpu.pipeline_mode<synchronous>, transform_indices = @transform_1, window_bounds = array<i64: 6, 3, 128, 128>}, {pipeline_mode = #tpu.pipeline_mode<synchronous>, transform_indices = @transform_2, window_bounds = array<i64: 6, 3, 1, 128>}, {pipeline_mode = #tpu.pipeline_mode<synchronous>, transform_indices = @transform_3, window_bounds = array<i64: 5, 1, 128>}, {pipeline_mode = #tpu.pipeline_mode<synchronous>, transform_indices = @transform_4, window_bounds = array<i64: 5, 1, 128>}, {transform_indices = @transform_5, window_bounds = array<i64: 256, 128>}]} {
    %c0 = arith.constant 0 : index
    %c0_0 = arith.constant 0 : index
    %0 = vector.load %arg1[%c0, %c0_0] : memref<256x128xf32, #tpu.memory_space<vmem>>, vector<256x128xf32>
    %c0_1 = arith.constant 0 : index
    %c0_2 = arith.constant 0 : index
    %c0_3 = arith.constant 0 : index
    %c0_4 = arith.constant 0 : index
    %1 = vector.load %arg2[%c0_1, %c0_2, %c0_3, %c0_4] : memref<6x3x128x128xf32, #tpu.memory_space<vmem>>, vector<1x1x128x128xf32>
    %2 = vector.shape_cast %1 : vector<1x1x128x128xf32> to vector<128x128xf32>
    %c0_5 = arith.constant 0 : index
    %c0_6 = arith.constant 0 : index
    %c0_7 = arith.constant 0 : index
    %c0_8 = arith.constant 0 : index
    %3 = vector.load %arg3[%c0_5, %c0_6, %c0_7, %c0_8] : memref<6x3x1x128xf32, #tpu.memory_space<vmem>>, vector<1x1x1x128xf32>
    %4 = vector.shape_cast %3 : vector<1x1x1x128xf32> to vector<1x128xf32>
    %cst = arith.constant dense<0.000000e+00> : vector<256x128xf32>
    %5 = tpu.matmul %0, %2, %cst {dimension_numbers = #tpu.dot_dimension_numbers<[1], [0], [0], [1], [0, 0, 1, 1], [], []>} : vector<256x128xf32>, vector<128x128xf32>, vector<256x128xf32> -> vector<256x128xf32>
    %6 = vector.broadcast %4 : vector<1x128xf32> to vector<256x128xf32>
    %7 = arith.addf %5, %6 : vector<256x128xf32>
    %cst_9 = arith.constant 0.000000e+00 : f32
    %8 = vector.broadcast %cst_9 : f32 to vector<256x128xf32>
    %9 = arith.maximumf %7, %8 : vector<256x128xf32>
    %c0_10 = arith.constant 0 : index
    %c1 = arith.constant 1 : index
    %c0_11 = arith.constant 0 : index
    %c0_12 = arith.constant 0 : index
    %10 = vector.load %arg2[%c0_10, %c1, %c0_11, %c0_12] : memref<6x3x128x128xf32, #tpu.memory_space<vmem>>, vector<1x1x128x128xf32>
    %11 = vector.shape_cast %10 : vector<1x1x128x128xf32> to vector<128x128xf32>
    %c0_13 = arith.constant 0 : index
    %c1_14 = arith.constant 1 : index
    %c0_15 = arith.constant 0 : index
    %c0_16 = arith.constant 0 : index
    %12 = vector.load %arg3[%c0_13, %c1_14, %c0_15, %c0_16] : memref<6x3x1x128xf32, #tpu.memory_space<vmem>>, vector<1x1x1x128xf32>
    %13 = vector.shape_cast %12 : vector<1x1x1x128xf32> to vector<1x128xf32>
    %cst_17 = arith.constant dense<0.000000e+00> : vector<256x128xf32>
    %14 = tpu.matmul %9, %11, %cst_17 {dimension_numbers = #tpu.dot_dimension_numbers<[1], [0], [0], [1], [0, 0, 1, 1], [], []>} : vector<256x128xf32>, vector<128x128xf32>, vector<256x128xf32> -> vector<256x128xf32>
    %15 = vector.broadcast %13 : vector<1x128xf32> to vector<256x128xf32>
    %16 = arith.addf %14, %15 : vector<256x128xf32>
    %cst_18 = arith.constant 0.000000e+00 : f32
    %17 = vector.broadcast %cst_18 : f32 to vector<256x128xf32>
    %18 = arith.maximumf %16, %17 : vector<256x128xf32>
    %c0_19 = arith.constant 0 : index
    %c2 = arith.constant 2 : index
    %c0_20 = arith.constant 0 : index
    %c0_21 = arith.constant 0 : index
    %19 = vector.load %arg2[%c0_19, %c2, %c0_20, %c0_21] : memref<6x3x128x128xf32, #tpu.memory_space<vmem>>, vector<1x1x128x128xf32>
    %20 = vector.shape_cast %19 : vector<1x1x128x128xf32> to vector<128x128xf32>
    %c0_22 = arith.constant 0 : index
    %c2_23 = arith.constant 2 : index
    %c0_24 = arith.constant 0 : index
    %c0_25 = arith.constant 0 : index
    %21 = vector.load %arg3[%c0_22, %c2_23, %c0_24, %c0_25] : memref<6x3x1x128xf32, #tpu.memory_space<vmem>>, vector<1x1x1x128xf32>
    %22 = vector.shape_cast %21 : vector<1x1x1x128xf32> to vector<1x128xf32>
    %cst_26 = arith.constant dense<0.000000e+00> : vector<256x128xf32>
    %23 = tpu.matmul %18, %20, %cst_26 {dimension_numbers = #tpu.dot_dimension_numbers<[1], [0], [0], [1], [0, 0, 1, 1], [], []>} : vector<256x128xf32>, vector<128x128xf32>, vector<256x128xf32> -> vector<256x128xf32>
    %24 = vector.broadcast %22 : vector<1x128xf32> to vector<256x128xf32>
    %25 = arith.addf %23, %24 : vector<256x128xf32>
    %26 = arith.addf %25, %0 : vector<256x128xf32>
    %cst_27 = arith.constant dense<0.000000e+00> : vector<256xf32>
    %27 = vector.multi_reduction <add>, %26, %cst_27 [1] : vector<256x128xf32> to vector<256xf32>
    %28 = vector.shape_cast %27 : vector<256xf32> to vector<256x1xf32>
    %cst_28 = arith.constant 1.280000e+02 : f32
    %29 = vector.broadcast %cst_28 : f32 to vector<256x1xf32>
    %30 = arith.divf %28, %29 : vector<256x1xf32>
    %31 = arith.mulf %26, %26 : vector<256x128xf32>
    %cst_29 = arith.constant dense<0.000000e+00> : vector<256xf32>
    %32 = vector.multi_reduction <add>, %31, %cst_29 [1] : vector<256x128xf32> to vector<256xf32>
    %33 = vector.shape_cast %32 : vector<256xf32> to vector<256x1xf32>
    %cst_30 = arith.constant 1.280000e+02 : f32
    %34 = vector.broadcast %cst_30 : f32 to vector<256x1xf32>
    %35 = arith.divf %33, %34 : vector<256x1xf32>
    %36 = arith.mulf %30, %30 : vector<256x1xf32>
    %37 = arith.subf %35, %36 : vector<256x1xf32>
    %38 = vector.broadcast %30 : vector<256x1xf32> to vector<256x128xf32>
    %39 = arith.subf %26, %38 : vector<256x128xf32>
    %cst_31 = arith.constant 9.99999974E-6 : f32
    %40 = vector.broadcast %cst_31 : f32 to vector<256x1xf32>
    %41 = arith.addf %37, %40 : vector<256x1xf32>
    %42 = math.rsqrt %41 : vector<256x1xf32>
    %43 = vector.broadcast %42 : vector<256x1xf32> to vector<256x128xf32>
    %44 = arith.mulf %39, %43 : vector<256x128xf32>
    %c0_32 = arith.constant 0 : index
    %c0_33 = arith.constant 0 : index
    %c0_34 = arith.constant 0 : index
    %45 = vector.load %arg4[%c0_32, %c0_33, %c0_34] : memref<5x1x128xf32, #tpu.memory_space<vmem>>, vector<1x1x128xf32>
    %46 = vector.shape_cast %45 : vector<1x1x128xf32> to vector<1x128xf32>
    %47 = vector.broadcast %46 : vector<1x128xf32> to vector<256x128xf32>
    %48 = arith.mulf %44, %47 : vector<256x128xf32>
    %c0_35 = arith.constant 0 : index
    %c0_36 = arith.constant 0 : index
    %c0_37 = arith.constant 0 : index
    %49 = vector.load %arg5[%c0_35, %c0_36, %c0_37] : memref<5x1x128xf32, #tpu.memory_space<vmem>>, vector<1x1x128xf32>
    %50 = vector.shape_cast %49 : vector<1x1x128xf32> to vector<1x128xf32>
    %51 = vector.broadcast %50 : vector<1x128xf32> to vector<256x128xf32>
    %52 = arith.addf %48, %51 : vector<256x128xf32>
    %c1_38 = arith.constant 1 : index
    %c0_39 = arith.constant 0 : index
    %c0_40 = arith.constant 0 : index
    %c0_41 = arith.constant 0 : index
    %53 = vector.load %arg2[%c1_38, %c0_39, %c0_40, %c0_41] : memref<6x3x128x128xf32, #tpu.memory_space<vmem>>, vector<1x1x128x128xf32>
    %54 = vector.shape_cast %53 : vector<1x1x128x128xf32> to vector<128x128xf32>
    %c1_42 = arith.constant 1 : index
    %c0_43 = arith.constant 0 : index
    %c0_44 = arith.constant 0 : index
    %c0_45 = arith.constant 0 : index
    %55 = vector.load %arg3[%c1_42, %c0_43, %c0_44, %c0_45] : memref<6x3x1x128xf32, #tpu.memory_space<vmem>>, vector<1x1x1x128xf32>
    %56 = vector.shape_cast %55 : vector<1x1x1x128xf32> to vector<1x128xf32>
    %cst_46 = arith.constant dense<0.000000e+00> : vector<256x128xf32>
    %57 = tpu.matmul %52, %54, %cst_46 {dimension_numbers = #tpu.dot_dimension_numbers<[1], [0], [0], [1], [0, 0, 1, 1], [], []>} : vector<256x128xf32>, vector<128x128xf32>, vector<256x128xf32> -> vector<256x128xf32>
    %58 = vector.broadcast %56 : vector<1x128xf32> to vector<256x128xf32>
    %59 = arith.addf %57, %58 : vector<256x128xf32>
    %cst_47 = arith.constant 0.000000e+00 : f32
    %60 = vector.broadcast %cst_47 : f32 to vector<256x128xf32>
    %61 = arith.maximumf %59, %60 : vector<256x128xf32>
    %c1_48 = arith.constant 1 : index
    %c1_49 = arith.constant 1 : index
    %c0_50 = arith.constant 0 : index
    %c0_51 = arith.constant 0 : index
    %62 = vector.load %arg2[%c1_48, %c1_49, %c0_50, %c0_51] : memref<6x3x128x128xf32, #tpu.memory_space<vmem>>, vector<1x1x128x128xf32>
    %63 = vector.shape_cast %62 : vector<1x1x128x128xf32> to vector<128x128xf32>
    %c1_52 = arith.constant 1 : index
    %c1_53 = arith.constant 1 : index
    %c0_54 = arith.constant 0 : index
    %c0_55 = arith.constant 0 : index
    %64 = vector.load %arg3[%c1_52, %c1_53, %c0_54, %c0_55] : memref<6x3x1x128xf32, #tpu.memory_space<vmem>>, vector<1x1x1x128xf32>
    %65 = vector.shape_cast %64 : vector<1x1x1x128xf32> to vector<1x128xf32>
    %cst_56 = arith.constant dense<0.000000e+00> : vector<256x128xf32>
    %66 = tpu.matmul %61, %63, %cst_56 {dimension_numbers = #tpu.dot_dimension_numbers<[1], [0], [0], [1], [0, 0, 1, 1], [], []>} : vector<256x128xf32>, vector<128x128xf32>, vector<256x128xf32> -> vector<256x128xf32>
    %67 = vector.broadcast %65 : vector<1x128xf32> to vector<256x128xf32>
    %68 = arith.addf %66, %67 : vector<256x128xf32>
    %cst_57 = arith.constant 0.000000e+00 : f32
    %69 = vector.broadcast %cst_57 : f32 to vector<256x128xf32>
    %70 = arith.maximumf %68, %69 : vector<256x128xf32>
    %c1_58 = arith.constant 1 : index
    %c2_59 = arith.constant 2 : index
    %c0_60 = arith.constant 0 : index
    %c0_61 = arith.constant 0 : index
    %71 = vector.load %arg2[%c1_58, %c2_59, %c0_60, %c0_61] : memref<6x3x128x128xf32, #tpu.memory_space<vmem>>, vector<1x1x128x128xf32>
    %72 = vector.shape_cast %71 : vector<1x1x128x128xf32> to vector<128x128xf32>
    %c1_62 = arith.constant 1 : index
    %c2_63 = arith.constant 2 : index
    %c0_64 = arith.constant 0 : index
    %c0_65 = arith.constant 0 : index
    %73 = vector.load %arg3[%c1_62, %c2_63, %c0_64, %c0_65] : memref<6x3x1x128xf32, #tpu.memory_space<vmem>>, vector<1x1x1x128xf32>
    %74 = vector.shape_cast %73 : vector<1x1x1x128xf32> to vector<1x128xf32>
    %cst_66 = arith.constant dense<0.000000e+00> : vector<256x128xf32>
    %75 = tpu.matmul %70, %72, %cst_66 {dimension_numbers = #tpu.dot_dimension_numbers<[1], [0], [0], [1], [0, 0, 1, 1], [], []>} : vector<256x128xf32>, vector<128x128xf32>, vector<256x128xf32> -> vector<256x128xf32>
    %76 = vector.broadcast %74 : vector<1x128xf32> to vector<256x128xf32>
    %77 = arith.addf %75, %76 : vector<256x128xf32>
    %78 = arith.addf %77, %52 : vector<256x128xf32>
    %cst_67 = arith.constant dense<0.000000e+00> : vector<256xf32>
    %79 = vector.multi_reduction <add>, %78, %cst_67 [1] : vector<256x128xf32> to vector<256xf32>
    %80 = vector.shape_cast %79 : vector<256xf32> to vector<256x1xf32>
    %cst_68 = arith.constant 1.280000e+02 : f32
    %81 = vector.broadcast %cst_68 : f32 to vector<256x1xf32>
    %82 = arith.divf %80, %81 : vector<256x1xf32>
    %83 = arith.mulf %78, %78 : vector<256x128xf32>
    %cst_69 = arith.constant dense<0.000000e+00> : vector<256xf32>
    %84 = vector.multi_reduction <add>, %83, %cst_69 [1] : vector<256x128xf32> to vector<256xf32>
    %85 = vector.shape_cast %84 : vector<256xf32> to vector<256x1xf32>
    %cst_70 = arith.constant 1.280000e+02 : f32
    %86 = vector.broadcast %cst_70 : f32 to vector<256x1xf32>
    %87 = arith.divf %85, %86 : vector<256x1xf32>
    %88 = arith.mulf %82, %82 : vector<256x1xf32>
    %89 = arith.subf %87, %88 : vector<256x1xf32>
    %90 = vector.broadcast %82 : vector<256x1xf32> to vector<256x128xf32>
    %91 = arith.subf %78, %90 : vector<256x128xf32>
    %cst_71 = arith.constant 9.99999974E-6 : f32
    %92 = vector.broadcast %cst_71 : f32 to vector<256x1xf32>
    %93 = arith.addf %89, %92 : vector<256x1xf32>
    %94 = math.rsqrt %93 : vector<256x1xf32>
    %95 = vector.broadcast %94 : vector<256x1xf32> to vector<256x128xf32>
    %96 = arith.mulf %91, %95 : vector<256x128xf32>
    %c1_72 = arith.constant 1 : index
    %c0_73 = arith.constant 0 : index
    %c0_74 = arith.constant 0 : index
    %97 = vector.load %arg4[%c1_72, %c0_73, %c0_74] : memref<5x1x128xf32, #tpu.memory_space<vmem>>, vector<1x1x128xf32>
    %98 = vector.shape_cast %97 : vector<1x1x128xf32> to vector<1x128xf32>
    %99 = vector.broadcast %98 : vector<1x128xf32> to vector<256x128xf32>
    %100 = arith.mulf %96, %99 : vector<256x128xf32>
    %c1_75 = arith.constant 1 : index
    %c0_76 = arith.constant 0 : index
    %c0_77 = arith.constant 0 : index
    %101 = vector.load %arg5[%c1_75, %c0_76, %c0_77] : memref<5x1x128xf32, #tpu.memory_space<vmem>>, vector<1x1x128xf32>
    %102 = vector.shape_cast %101 : vector<1x1x128xf32> to vector<1x128xf32>
    %103 = vector.broadcast %102 : vector<1x128xf32> to vector<256x128xf32>
    %104 = arith.addf %100, %103 : vector<256x128xf32>
    %c2_78 = arith.constant 2 : index
    %c0_79 = arith.constant 0 : index
    %c0_80 = arith.constant 0 : index
    %c0_81 = arith.constant 0 : index
    %105 = vector.load %arg2[%c2_78, %c0_79, %c0_80, %c0_81] : memref<6x3x128x128xf32, #tpu.memory_space<vmem>>, vector<1x1x128x128xf32>
    %106 = vector.shape_cast %105 : vector<1x1x128x128xf32> to vector<128x128xf32>
    %c2_82 = arith.constant 2 : index
    %c0_83 = arith.constant 0 : index
    %c0_84 = arith.constant 0 : index
    %c0_85 = arith.constant 0 : index
    %107 = vector.load %arg3[%c2_82, %c0_83, %c0_84, %c0_85] : memref<6x3x1x128xf32, #tpu.memory_space<vmem>>, vector<1x1x1x128xf32>
    %108 = vector.shape_cast %107 : vector<1x1x1x128xf32> to vector<1x128xf32>
    %cst_86 = arith.constant dense<0.000000e+00> : vector<256x128xf32>
    %109 = tpu.matmul %104, %106, %cst_86 {dimension_numbers = #tpu.dot_dimension_numbers<[1], [0], [0], [1], [0, 0, 1, 1], [], []>} : vector<256x128xf32>, vector<128x128xf32>, vector<256x128xf32> -> vector<256x128xf32>
    %110 = vector.broadcast %108 : vector<1x128xf32> to vector<256x128xf32>
    %111 = arith.addf %109, %110 : vector<256x128xf32>
    %cst_87 = arith.constant 0.000000e+00 : f32
    %112 = vector.broadcast %cst_87 : f32 to vector<256x128xf32>
    %113 = arith.maximumf %111, %112 : vector<256x128xf32>
    %c2_88 = arith.constant 2 : index
    %c1_89 = arith.constant 1 : index
    %c0_90 = arith.constant 0 : index
    %c0_91 = arith.constant 0 : index
    %114 = vector.load %arg2[%c2_88, %c1_89, %c0_90, %c0_91] : memref<6x3x128x128xf32, #tpu.memory_space<vmem>>, vector<1x1x128x128xf32>
    %115 = vector.shape_cast %114 : vector<1x1x128x128xf32> to vector<128x128xf32>
    %c2_92 = arith.constant 2 : index
    %c1_93 = arith.constant 1 : index
    %c0_94 = arith.constant 0 : index
    %c0_95 = arith.constant 0 : index
    %116 = vector.load %arg3[%c2_92, %c1_93, %c0_94, %c0_95] : memref<6x3x1x128xf32, #tpu.memory_space<vmem>>, vector<1x1x1x128xf32>
    %117 = vector.shape_cast %116 : vector<1x1x1x128xf32> to vector<1x128xf32>
    %cst_96 = arith.constant dense<0.000000e+00> : vector<256x128xf32>
    %118 = tpu.matmul %113, %115, %cst_96 {dimension_numbers = #tpu.dot_dimension_numbers<[1], [0], [0], [1], [0, 0, 1, 1], [], []>} : vector<256x128xf32>, vector<128x128xf32>, vector<256x128xf32> -> vector<256x128xf32>
    %119 = vector.broadcast %117 : vector<1x128xf32> to vector<256x128xf32>
    %120 = arith.addf %118, %119 : vector<256x128xf32>
    %cst_97 = arith.constant 0.000000e+00 : f32
    %121 = vector.broadcast %cst_97 : f32 to vector<256x128xf32>
    %122 = arith.maximumf %120, %121 : vector<256x128xf32>
    %c2_98 = arith.constant 2 : index
    %c2_99 = arith.constant 2 : index
    %c0_100 = arith.constant 0 : index
    %c0_101 = arith.constant 0 : index
    %123 = vector.load %arg2[%c2_98, %c2_99, %c0_100, %c0_101] : memref<6x3x128x128xf32, #tpu.memory_space<vmem>>, vector<1x1x128x128xf32>
    %124 = vector.shape_cast %123 : vector<1x1x128x128xf32> to vector<128x128xf32>
    %c2_102 = arith.constant 2 : index
    %c2_103 = arith.constant 2 : index
    %c0_104 = arith.constant 0 : index
    %c0_105 = arith.constant 0 : index
    %125 = vector.load %arg3[%c2_102, %c2_103, %c0_104, %c0_105] : memref<6x3x1x128xf32, #tpu.memory_space<vmem>>, vector<1x1x1x128xf32>
    %126 = vector.shape_cast %125 : vector<1x1x1x128xf32> to vector<1x128xf32>
    %cst_106 = arith.constant dense<0.000000e+00> : vector<256x128xf32>
    %127 = tpu.matmul %122, %124, %cst_106 {dimension_numbers = #tpu.dot_dimension_numbers<[1], [0], [0], [1], [0, 0, 1, 1], [], []>} : vector<256x128xf32>, vector<128x128xf32>, vector<256x128xf32> -> vector<256x128xf32>
    %128 = vector.broadcast %126 : vector<1x128xf32> to vector<256x128xf32>
    %129 = arith.addf %127, %128 : vector<256x128xf32>
    %130 = arith.addf %129, %104 : vector<256x128xf32>
    %cst_107 = arith.constant dense<0.000000e+00> : vector<256xf32>
    %131 = vector.multi_reduction <add>, %130, %cst_107 [1] : vector<256x128xf32> to vector<256xf32>
    %132 = vector.shape_cast %131 : vector<256xf32> to vector<256x1xf32>
    %cst_108 = arith.constant 1.280000e+02 : f32
    %133 = vector.broadcast %cst_108 : f32 to vector<256x1xf32>
    %134 = arith.divf %132, %133 : vector<256x1xf32>
    %135 = arith.mulf %130, %130 : vector<256x128xf32>
    %cst_109 = arith.constant dense<0.000000e+00> : vector<256xf32>
    %136 = vector.multi_reduction <add>, %135, %cst_109 [1] : vector<256x128xf32> to vector<256xf32>
    %137 = vector.shape_cast %136 : vector<256xf32> to vector<256x1xf32>
    %cst_110 = arith.constant 1.280000e+02 : f32
    %138 = vector.broadcast %cst_110 : f32 to vector<256x1xf32>
    %139 = arith.divf %137, %138 : vector<256x1xf32>
    %140 = arith.mulf %134, %134 : vector<256x1xf32>
    %141 = arith.subf %139, %140 : vector<256x1xf32>
    %142 = vector.broadcast %134 : vector<256x1xf32> to vector<256x128xf32>
    %143 = arith.subf %130, %142 : vector<256x128xf32>
    %cst_111 = arith.constant 9.99999974E-6 : f32
    %144 = vector.broadcast %cst_111 : f32 to vector<256x1xf32>
    %145 = arith.addf %141, %144 : vector<256x1xf32>
    %146 = math.rsqrt %145 : vector<256x1xf32>
    %147 = vector.broadcast %146 : vector<256x1xf32> to vector<256x128xf32>
    %148 = arith.mulf %143, %147 : vector<256x128xf32>
    %c2_112 = arith.constant 2 : index
    %c0_113 = arith.constant 0 : index
    %c0_114 = arith.constant 0 : index
    %149 = vector.load %arg4[%c2_112, %c0_113, %c0_114] : memref<5x1x128xf32, #tpu.memory_space<vmem>>, vector<1x1x128xf32>
    %150 = vector.shape_cast %149 : vector<1x1x128xf32> to vector<1x128xf32>
    %151 = vector.broadcast %150 : vector<1x128xf32> to vector<256x128xf32>
    %152 = arith.mulf %148, %151 : vector<256x128xf32>
    %c2_115 = arith.constant 2 : index
    %c0_116 = arith.constant 0 : index
    %c0_117 = arith.constant 0 : index
    %153 = vector.load %arg5[%c2_115, %c0_116, %c0_117] : memref<5x1x128xf32, #tpu.memory_space<vmem>>, vector<1x1x128xf32>
    %154 = vector.shape_cast %153 : vector<1x1x128xf32> to vector<1x128xf32>
    %155 = vector.broadcast %154 : vector<1x128xf32> to vector<256x128xf32>
    %156 = arith.addf %152, %155 : vector<256x128xf32>
    %c3 = arith.constant 3 : index
    %c0_118 = arith.constant 0 : index
    %c0_119 = arith.constant 0 : index
    %c0_120 = arith.constant 0 : index
    %157 = vector.load %arg2[%c3, %c0_118, %c0_119, %c0_120] : memref<6x3x128x128xf32, #tpu.memory_space<vmem>>, vector<1x1x128x128xf32>
    %158 = vector.shape_cast %157 : vector<1x1x128x128xf32> to vector<128x128xf32>
    %c3_121 = arith.constant 3 : index
    %c0_122 = arith.constant 0 : index
    %c0_123 = arith.constant 0 : index
    %c0_124 = arith.constant 0 : index
    %159 = vector.load %arg3[%c3_121, %c0_122, %c0_123, %c0_124] : memref<6x3x1x128xf32, #tpu.memory_space<vmem>>, vector<1x1x1x128xf32>
    %160 = vector.shape_cast %159 : vector<1x1x1x128xf32> to vector<1x128xf32>
    %cst_125 = arith.constant dense<0.000000e+00> : vector<256x128xf32>
    %161 = tpu.matmul %156, %158, %cst_125 {dimension_numbers = #tpu.dot_dimension_numbers<[1], [0], [0], [1], [0, 0, 1, 1], [], []>} : vector<256x128xf32>, vector<128x128xf32>, vector<256x128xf32> -> vector<256x128xf32>
    %162 = vector.broadcast %160 : vector<1x128xf32> to vector<256x128xf32>
    %163 = arith.addf %161, %162 : vector<256x128xf32>
    %cst_126 = arith.constant 0.000000e+00 : f32
    %164 = vector.broadcast %cst_126 : f32 to vector<256x128xf32>
    %165 = arith.maximumf %163, %164 : vector<256x128xf32>
    %c3_127 = arith.constant 3 : index
    %c1_128 = arith.constant 1 : index
    %c0_129 = arith.constant 0 : index
    %c0_130 = arith.constant 0 : index
    %166 = vector.load %arg2[%c3_127, %c1_128, %c0_129, %c0_130] : memref<6x3x128x128xf32, #tpu.memory_space<vmem>>, vector<1x1x128x128xf32>
    %167 = vector.shape_cast %166 : vector<1x1x128x128xf32> to vector<128x128xf32>
    %c3_131 = arith.constant 3 : index
    %c1_132 = arith.constant 1 : index
    %c0_133 = arith.constant 0 : index
    %c0_134 = arith.constant 0 : index
    %168 = vector.load %arg3[%c3_131, %c1_132, %c0_133, %c0_134] : memref<6x3x1x128xf32, #tpu.memory_space<vmem>>, vector<1x1x1x128xf32>
    %169 = vector.shape_cast %168 : vector<1x1x1x128xf32> to vector<1x128xf32>
    %cst_135 = arith.constant dense<0.000000e+00> : vector<256x128xf32>
    %170 = tpu.matmul %165, %167, %cst_135 {dimension_numbers = #tpu.dot_dimension_numbers<[1], [0], [0], [1], [0, 0, 1, 1], [], []>} : vector<256x128xf32>, vector<128x128xf32>, vector<256x128xf32> -> vector<256x128xf32>
    %171 = vector.broadcast %169 : vector<1x128xf32> to vector<256x128xf32>
    %172 = arith.addf %170, %171 : vector<256x128xf32>
    %cst_136 = arith.constant 0.000000e+00 : f32
    %173 = vector.broadcast %cst_136 : f32 to vector<256x128xf32>
    %174 = arith.maximumf %172, %173 : vector<256x128xf32>
    %c3_137 = arith.constant 3 : index
    %c2_138 = arith.constant 2 : index
    %c0_139 = arith.constant 0 : index
    %c0_140 = arith.constant 0 : index
    %175 = vector.load %arg2[%c3_137, %c2_138, %c0_139, %c0_140] : memref<6x3x128x128xf32, #tpu.memory_space<vmem>>, vector<1x1x128x128xf32>
    %176 = vector.shape_cast %175 : vector<1x1x128x128xf32> to vector<128x128xf32>
    %c3_141 = arith.constant 3 : index
    %c2_142 = arith.constant 2 : index
    %c0_143 = arith.constant 0 : index
    %c0_144 = arith.constant 0 : index
    %177 = vector.load %arg3[%c3_141, %c2_142, %c0_143, %c0_144] : memref<6x3x1x128xf32, #tpu.memory_space<vmem>>, vector<1x1x1x128xf32>
    %178 = vector.shape_cast %177 : vector<1x1x1x128xf32> to vector<1x128xf32>
    %cst_145 = arith.constant dense<0.000000e+00> : vector<256x128xf32>
    %179 = tpu.matmul %174, %176, %cst_145 {dimension_numbers = #tpu.dot_dimension_numbers<[1], [0], [0], [1], [0, 0, 1, 1], [], []>} : vector<256x128xf32>, vector<128x128xf32>, vector<256x128xf32> -> vector<256x128xf32>
    %180 = vector.broadcast %178 : vector<1x128xf32> to vector<256x128xf32>
    %181 = arith.addf %179, %180 : vector<256x128xf32>
    %182 = arith.addf %181, %156 : vector<256x128xf32>
    %cst_146 = arith.constant dense<0.000000e+00> : vector<256xf32>
    %183 = vector.multi_reduction <add>, %182, %cst_146 [1] : vector<256x128xf32> to vector<256xf32>
    %184 = vector.shape_cast %183 : vector<256xf32> to vector<256x1xf32>
    %cst_147 = arith.constant 1.280000e+02 : f32
    %185 = vector.broadcast %cst_147 : f32 to vector<256x1xf32>
    %186 = arith.divf %184, %185 : vector<256x1xf32>
    %187 = arith.mulf %182, %182 : vector<256x128xf32>
    %cst_148 = arith.constant dense<0.000000e+00> : vector<256xf32>
    %188 = vector.multi_reduction <add>, %187, %cst_148 [1] : vector<256x128xf32> to vector<256xf32>
    %189 = vector.shape_cast %188 : vector<256xf32> to vector<256x1xf32>
    %cst_149 = arith.constant 1.280000e+02 : f32
    %190 = vector.broadcast %cst_149 : f32 to vector<256x1xf32>
    %191 = arith.divf %189, %190 : vector<256x1xf32>
    %192 = arith.mulf %186, %186 : vector<256x1xf32>
    %193 = arith.subf %191, %192 : vector<256x1xf32>
    %194 = vector.broadcast %186 : vector<256x1xf32> to vector<256x128xf32>
    %195 = arith.subf %182, %194 : vector<256x128xf32>
    %cst_150 = arith.constant 9.99999974E-6 : f32
    %196 = vector.broadcast %cst_150 : f32 to vector<256x1xf32>
    %197 = arith.addf %193, %196 : vector<256x1xf32>
    %198 = math.rsqrt %197 : vector<256x1xf32>
    %199 = vector.broadcast %198 : vector<256x1xf32> to vector<256x128xf32>
    %200 = arith.mulf %195, %199 : vector<256x128xf32>
    %c3_151 = arith.constant 3 : index
    %c0_152 = arith.constant 0 : index
    %c0_153 = arith.constant 0 : index
    %201 = vector.load %arg4[%c3_151, %c0_152, %c0_153] : memref<5x1x128xf32, #tpu.memory_space<vmem>>, vector<1x1x128xf32>
    %202 = vector.shape_cast %201 : vector<1x1x128xf32> to vector<1x128xf32>
    %203 = vector.broadcast %202 : vector<1x128xf32> to vector<256x128xf32>
    %204 = arith.mulf %200, %203 : vector<256x128xf32>
    %c3_154 = arith.constant 3 : index
    %c0_155 = arith.constant 0 : index
    %c0_156 = arith.constant 0 : index
    %205 = vector.load %arg5[%c3_154, %c0_155, %c0_156] : memref<5x1x128xf32, #tpu.memory_space<vmem>>, vector<1x1x128xf32>
    %206 = vector.shape_cast %205 : vector<1x1x128xf32> to vector<1x128xf32>
    %207 = vector.broadcast %206 : vector<1x128xf32> to vector<256x128xf32>
    %208 = arith.addf %204, %207 : vector<256x128xf32>
    %c4 = arith.constant 4 : index
    %c0_157 = arith.constant 0 : index
    %c0_158 = arith.constant 0 : index
    %c0_159 = arith.constant 0 : index
    %209 = vector.load %arg2[%c4, %c0_157, %c0_158, %c0_159] : memref<6x3x128x128xf32, #tpu.memory_space<vmem>>, vector<1x1x128x128xf32>
    %210 = vector.shape_cast %209 : vector<1x1x128x128xf32> to vector<128x128xf32>
    %c4_160 = arith.constant 4 : index
    %c0_161 = arith.constant 0 : index
    %c0_162 = arith.constant 0 : index
    %c0_163 = arith.constant 0 : index
    %211 = vector.load %arg3[%c4_160, %c0_161, %c0_162, %c0_163] : memref<6x3x1x128xf32, #tpu.memory_space<vmem>>, vector<1x1x1x128xf32>
    %212 = vector.shape_cast %211 : vector<1x1x1x128xf32> to vector<1x128xf32>
    %cst_164 = arith.constant dense<0.000000e+00> : vector<256x128xf32>
    %213 = tpu.matmul %208, %210, %cst_164 {dimension_numbers = #tpu.dot_dimension_numbers<[1], [0], [0], [1], [0, 0, 1, 1], [], []>} : vector<256x128xf32>, vector<128x128xf32>, vector<256x128xf32> -> vector<256x128xf32>
    %214 = vector.broadcast %212 : vector<1x128xf32> to vector<256x128xf32>
    %215 = arith.addf %213, %214 : vector<256x128xf32>
    %cst_165 = arith.constant 0.000000e+00 : f32
    %216 = vector.broadcast %cst_165 : f32 to vector<256x128xf32>
    %217 = arith.maximumf %215, %216 : vector<256x128xf32>
    %c4_166 = arith.constant 4 : index
    %c1_167 = arith.constant 1 : index
    %c0_168 = arith.constant 0 : index
    %c0_169 = arith.constant 0 : index
    %218 = vector.load %arg2[%c4_166, %c1_167, %c0_168, %c0_169] : memref<6x3x128x128xf32, #tpu.memory_space<vmem>>, vector<1x1x128x128xf32>
    %219 = vector.shape_cast %218 : vector<1x1x128x128xf32> to vector<128x128xf32>
    %c4_170 = arith.constant 4 : index
    %c1_171 = arith.constant 1 : index
    %c0_172 = arith.constant 0 : index
    %c0_173 = arith.constant 0 : index
    %220 = vector.load %arg3[%c4_170, %c1_171, %c0_172, %c0_173] : memref<6x3x1x128xf32, #tpu.memory_space<vmem>>, vector<1x1x1x128xf32>
    %221 = vector.shape_cast %220 : vector<1x1x1x128xf32> to vector<1x128xf32>
    %cst_174 = arith.constant dense<0.000000e+00> : vector<256x128xf32>
    %222 = tpu.matmul %217, %219, %cst_174 {dimension_numbers = #tpu.dot_dimension_numbers<[1], [0], [0], [1], [0, 0, 1, 1], [], []>} : vector<256x128xf32>, vector<128x128xf32>, vector<256x128xf32> -> vector<256x128xf32>
    %223 = vector.broadcast %221 : vector<1x128xf32> to vector<256x128xf32>
    %224 = arith.addf %222, %223 : vector<256x128xf32>
    %cst_175 = arith.constant 0.000000e+00 : f32
    %225 = vector.broadcast %cst_175 : f32 to vector<256x128xf32>
    %226 = arith.maximumf %224, %225 : vector<256x128xf32>
    %c4_176 = arith.constant 4 : index
    %c2_177 = arith.constant 2 : index
    %c0_178 = arith.constant 0 : index
    %c0_179 = arith.constant 0 : index
    %227 = vector.load %arg2[%c4_176, %c2_177, %c0_178, %c0_179] : memref<6x3x128x128xf32, #tpu.memory_space<vmem>>, vector<1x1x128x128xf32>
    %228 = vector.shape_cast %227 : vector<1x1x128x128xf32> to vector<128x128xf32>
    %c4_180 = arith.constant 4 : index
    %c2_181 = arith.constant 2 : index
    %c0_182 = arith.constant 0 : index
    %c0_183 = arith.constant 0 : index
    %229 = vector.load %arg3[%c4_180, %c2_181, %c0_182, %c0_183] : memref<6x3x1x128xf32, #tpu.memory_space<vmem>>, vector<1x1x1x128xf32>
    %230 = vector.shape_cast %229 : vector<1x1x1x128xf32> to vector<1x128xf32>
    %cst_184 = arith.constant dense<0.000000e+00> : vector<256x128xf32>
    %231 = tpu.matmul %226, %228, %cst_184 {dimension_numbers = #tpu.dot_dimension_numbers<[1], [0], [0], [1], [0, 0, 1, 1], [], []>} : vector<256x128xf32>, vector<128x128xf32>, vector<256x128xf32> -> vector<256x128xf32>
    %232 = vector.broadcast %230 : vector<1x128xf32> to vector<256x128xf32>
    %233 = arith.addf %231, %232 : vector<256x128xf32>
    %234 = arith.addf %233, %208 : vector<256x128xf32>
    %cst_185 = arith.constant dense<0.000000e+00> : vector<256xf32>
    %235 = vector.multi_reduction <add>, %234, %cst_185 [1] : vector<256x128xf32> to vector<256xf32>
    %236 = vector.shape_cast %235 : vector<256xf32> to vector<256x1xf32>
    %cst_186 = arith.constant 1.280000e+02 : f32
    %237 = vector.broadcast %cst_186 : f32 to vector<256x1xf32>
    %238 = arith.divf %236, %237 : vector<256x1xf32>
    %239 = arith.mulf %234, %234 : vector<256x128xf32>
    %cst_187 = arith.constant dense<0.000000e+00> : vector<256xf32>
    %240 = vector.multi_reduction <add>, %239, %cst_187 [1] : vector<256x128xf32> to vector<256xf32>
    %241 = vector.shape_cast %240 : vector<256xf32> to vector<256x1xf32>
    %cst_188 = arith.constant 1.280000e+02 : f32
    %242 = vector.broadcast %cst_188 : f32 to vector<256x1xf32>
    %243 = arith.divf %241, %242 : vector<256x1xf32>
    %244 = arith.mulf %238, %238 : vector<256x1xf32>
    %245 = arith.subf %243, %244 : vector<256x1xf32>
    %246 = vector.broadcast %238 : vector<256x1xf32> to vector<256x128xf32>
    %247 = arith.subf %234, %246 : vector<256x128xf32>
    %cst_189 = arith.constant 9.99999974E-6 : f32
    %248 = vector.broadcast %cst_189 : f32 to vector<256x1xf32>
    %249 = arith.addf %245, %248 : vector<256x1xf32>
    %250 = math.rsqrt %249 : vector<256x1xf32>
    %251 = vector.broadcast %250 : vector<256x1xf32> to vector<256x128xf32>
    %252 = arith.mulf %247, %251 : vector<256x128xf32>
    %c4_190 = arith.constant 4 : index
    %c0_191 = arith.constant 0 : index
    %c0_192 = arith.constant 0 : index
    %253 = vector.load %arg4[%c4_190, %c0_191, %c0_192] : memref<5x1x128xf32, #tpu.memory_space<vmem>>, vector<1x1x128xf32>
    %254 = vector.shape_cast %253 : vector<1x1x128xf32> to vector<1x128xf32>
    %255 = vector.broadcast %254 : vector<1x128xf32> to vector<256x128xf32>
    %256 = arith.mulf %252, %255 : vector<256x128xf32>
    %c4_193 = arith.constant 4 : index
    %c0_194 = arith.constant 0 : index
    %c0_195 = arith.constant 0 : index
    %257 = vector.load %arg5[%c4_193, %c0_194, %c0_195] : memref<5x1x128xf32, #tpu.memory_space<vmem>>, vector<1x1x128xf32>
    %258 = vector.shape_cast %257 : vector<1x1x128xf32> to vector<1x128xf32>
    %259 = vector.broadcast %258 : vector<1x128xf32> to vector<256x128xf32>
    %260 = arith.addf %256, %259 : vector<256x128xf32>
    %c5 = arith.constant 5 : index
    %c0_196 = arith.constant 0 : index
    %c0_197 = arith.constant 0 : index
    %c0_198 = arith.constant 0 : index
    %261 = vector.load %arg2[%c5, %c0_196, %c0_197, %c0_198] : memref<6x3x128x128xf32, #tpu.memory_space<vmem>>, vector<1x1x128x128xf32>
    %262 = vector.shape_cast %261 : vector<1x1x128x128xf32> to vector<128x128xf32>
    %c5_199 = arith.constant 5 : index
    %c0_200 = arith.constant 0 : index
    %c0_201 = arith.constant 0 : index
    %c0_202 = arith.constant 0 : index
    %263 = vector.load %arg3[%c5_199, %c0_200, %c0_201, %c0_202] : memref<6x3x1x128xf32, #tpu.memory_space<vmem>>, vector<1x1x1x128xf32>
    %264 = vector.shape_cast %263 : vector<1x1x1x128xf32> to vector<1x128xf32>
    %cst_203 = arith.constant dense<0.000000e+00> : vector<256x128xf32>
    %265 = tpu.matmul %260, %262, %cst_203 {dimension_numbers = #tpu.dot_dimension_numbers<[1], [0], [0], [1], [0, 0, 1, 1], [], []>} : vector<256x128xf32>, vector<128x128xf32>, vector<256x128xf32> -> vector<256x128xf32>
    %266 = vector.broadcast %264 : vector<1x128xf32> to vector<256x128xf32>
    %267 = arith.addf %265, %266 : vector<256x128xf32>
    %cst_204 = arith.constant 0.000000e+00 : f32
    %268 = vector.broadcast %cst_204 : f32 to vector<256x128xf32>
    %269 = arith.maximumf %267, %268 : vector<256x128xf32>
    %c5_205 = arith.constant 5 : index
    %c1_206 = arith.constant 1 : index
    %c0_207 = arith.constant 0 : index
    %c0_208 = arith.constant 0 : index
    %270 = vector.load %arg2[%c5_205, %c1_206, %c0_207, %c0_208] : memref<6x3x128x128xf32, #tpu.memory_space<vmem>>, vector<1x1x128x128xf32>
    %271 = vector.shape_cast %270 : vector<1x1x128x128xf32> to vector<128x128xf32>
    %c5_209 = arith.constant 5 : index
    %c1_210 = arith.constant 1 : index
    %c0_211 = arith.constant 0 : index
    %c0_212 = arith.constant 0 : index
    %272 = vector.load %arg3[%c5_209, %c1_210, %c0_211, %c0_212] : memref<6x3x1x128xf32, #tpu.memory_space<vmem>>, vector<1x1x1x128xf32>
    %273 = vector.shape_cast %272 : vector<1x1x1x128xf32> to vector<1x128xf32>
    %cst_213 = arith.constant dense<0.000000e+00> : vector<256x128xf32>
    %274 = tpu.matmul %269, %271, %cst_213 {dimension_numbers = #tpu.dot_dimension_numbers<[1], [0], [0], [1], [0, 0, 1, 1], [], []>} : vector<256x128xf32>, vector<128x128xf32>, vector<256x128xf32> -> vector<256x128xf32>
    %275 = vector.broadcast %273 : vector<1x128xf32> to vector<256x128xf32>
    %276 = arith.addf %274, %275 : vector<256x128xf32>
    %cst_214 = arith.constant 0.000000e+00 : f32
    %277 = vector.broadcast %cst_214 : f32 to vector<256x128xf32>
    %278 = arith.maximumf %276, %277 : vector<256x128xf32>
    %c5_215 = arith.constant 5 : index
    %c2_216 = arith.constant 2 : index
    %c0_217 = arith.constant 0 : index
    %c0_218 = arith.constant 0 : index
    %279 = vector.load %arg2[%c5_215, %c2_216, %c0_217, %c0_218] : memref<6x3x128x128xf32, #tpu.memory_space<vmem>>, vector<1x1x128x128xf32>
    %280 = vector.shape_cast %279 : vector<1x1x128x128xf32> to vector<128x128xf32>
    %c5_219 = arith.constant 5 : index
    %c2_220 = arith.constant 2 : index
    %c0_221 = arith.constant 0 : index
    %c0_222 = arith.constant 0 : index
    %281 = vector.load %arg3[%c5_219, %c2_220, %c0_221, %c0_222] : memref<6x3x1x128xf32, #tpu.memory_space<vmem>>, vector<1x1x1x128xf32>
    %282 = vector.shape_cast %281 : vector<1x1x1x128xf32> to vector<1x128xf32>
    %cst_223 = arith.constant dense<0.000000e+00> : vector<256x128xf32>
    %283 = tpu.matmul %278, %280, %cst_223 {dimension_numbers = #tpu.dot_dimension_numbers<[1], [0], [0], [1], [0, 0, 1, 1], [], []>} : vector<256x128xf32>, vector<128x128xf32>, vector<256x128xf32> -> vector<256x128xf32>
    %284 = vector.broadcast %282 : vector<1x128xf32> to vector<256x128xf32>
    %285 = arith.addf %283, %284 : vector<256x128xf32>
    %286 = arith.addf %285, %260 : vector<256x128xf32>
    %c0_224 = arith.constant 0 : index
    %c0_225 = arith.constant 0 : index
    %287 = vector.load %arg6[%c0_224, %c0_225] : memref<256x128xf32, #tpu.memory_space<vmem>>, vector<256x128xf32>
    tpu.vector_store %arg6[%c0_224, %c0_225], %286 {strides = array<i32>} : memref<256x128xf32, #tpu.memory_space<vmem>>, vector<256x128xf32>,
    return
  }
  func.func @transform_0(%arg0: i32) -> (i32, i32) {
    %c0_i32 = arith.constant 0 : i32
    %c0_i32_0 = arith.constant 0 : i32
    return %arg0, %c0_i32 : i32, i32
  }
  func.func @transform_1(%arg0: i32) -> (i32, i32, i32, i32) {
    %c0_i32 = arith.constant 0 : i32
    %c0_i32_0 = arith.constant 0 : i32
    %c0_i32_1 = arith.constant 0 : i32
    %c0_i32_2 = arith.constant 0 : i32
    %c0_i32_3 = arith.constant 0 : i32
    return %c0_i32, %c0_i32_0, %c0_i32_1, %c0_i32_2 : i32, i32, i32, i32
  }
  func.func @transform_2(%arg0: i32) -> (i32, i32, i32, i32) {
    %c0_i32 = arith.constant 0 : i32
    %c0_i32_0 = arith.constant 0 : i32
    %c0_i32_1 = arith.constant 0 : i32
    %c0_i32_2 = arith.constant 0 : i32
    %c0_i32_3 = arith.constant 0 : i32
    return %c0_i32, %c0_i32_0, %c0_i32_1, %c0_i32_2 : i32, i32, i32, i32
  }
  func.func @transform_3(%arg0: i32) -> (i32, i32, i32) {
    %c0_i32 = arith.constant 0 : i32
    %c0_i32_0 = arith.constant 0 : i32
    %c0_i32_1 = arith.constant 0 : i32
    %c0_i32_2 = arith.constant 0 : i32
    return %c0_i32, %c0_i32_0, %c0_i32_1 : i32, i32, i32
  }
  func.func @transform_4(%arg0: i32) -> (i32, i32, i32) {
    %c0_i32 = arith.constant 0 : i32
    %c0_i32_0 = arith.constant 0 : i32
    %c0_i32_1 = arith.constant 0 : i32
    %c0_i32_2 = arith.constant 0 : i32
    return %c0_i32, %c0_i32_0, %c0_i32_1 : i32, i32, i32
  }
  func.func @transform_5(%arg0: i32) -> (i32, i32) {
    %c0_i32 = arith.constant 0 : i32
    %c0_i32_0 = arith.constant 0 : i32
    return %arg0, %c0_i32 : i32, i32
  }
}

</mosaic_0001>

<bundles_post_ra>
// kernel: bignet_forward.1
= control target key start
LH: loop header
LB: loop body
LE: loop exit
PB: predicated region body
PF: predicated region fallthrough
CT: control target
= control target key end

     0   :  { %10 = vsyncpa [#allocation3], 0  ;;  %s12916_s0 = inlined_call_operand.hbm [shape: f32[512,128], index: 0, kind: input, shape index: {}]   ;;  %s12917_s1 = inlined_call_operand.hbm [shape: f32[6,3,128,128], index: 1, kind: input, shape index: {}]   ;;  %s12918_s2 = inlined_call_operand.hbm [shape: f32[6,3,1,128], index: 2, kind: input, shape index: {}]   ;;  %s12919_s3 = inlined_call_operand.hbm [shape: f32[5,1,128], index: 3, kind: input, shape index: {}]   ;;  %s12920_s4 = inlined_call_operand.hbm [shape: f32[5,1,128], index: 4, kind: input, shape index: {}]   ;;  %s12921_s5 = inlined_call_operand.hbm [shape: f32[512,128], index: 5, kind: output, shape index: {}]  }
   0x1   :  { %12 = vsyncpa [#allocation3 + $0x1], 0 }
   0x2   :  { %13 = vsyncpa [#allocation6], 0 }
   0x3   :  { %14 = vsyncpa [#allocation9], 0 }
   0x4   :  { %15 = vsyncpa [#allocation4], 0 }
   0x5   :  { %17 = vsyncpa [#allocation4 + $0x1], 0  ;;  %s8203_s18 = smov 0   ;;  %s8205_s19 = smov 0  }
   0x6   :  { %s8207_s20 = smov 0   ;;  %s8209_s21 = smov 0  }
   0x7 LB: > { %s8224_s22 = sadd.s32 4294967295, %s8160_s21   ;;  %s7403_s23 = sadd.s32 4294967294, %s8160_s21   ;;  %s8160_s21 = sphi %s8209_s21, %s12948_s21   ;;  %s8156_s20 = sphi %s8207_s20, %s12947_s20   ;;  %s8152_s19 = sphi %s8205_s19, %s12946_s19   ;;  %s8148_s18 = sphi %s8203_s18, %s12945_s18  }
   0x8   : > { %p43_p0 = scmp.ne.s32.totalorder %s8152_s19, %s8148_s18  ;;  %p44_p1 = scmp.eq.s32.totalorder %s8224_s22, 0 }
   0x9   : > { %p151_p2 = scmp.eq.s32.totalorder %s8224_s22, 1  ;;  %p157_p3 = scmp.eq.s32.totalorder %s7403_s23, 1 }
   0xa   : > { %p8233_p4 = por %p44_p1, %p43_p0  ;;  %p7404_p5 = scmp.ge.s32.totalorder %s8160_s21, 1 }
   0xb   : > { %p8238_p6 = por %p157_p3, %p43_p0  ;;  %p164_p7 = scmp.lt.s32.totalorder %s8160_s21, 3 }
   0xc   : > { %s175_s28 = sshll.u32 %s12917_s1, 4  ;;  %s8162_s30 = smov [#allocation5]   ;;  %s176_s28 = int_to_ptr.hbm [resolvable:$true] %s175_s28 }
   0xd   : > { %p8246_p8 = pnand %p7404_p5, %p164_p7  ;;  %s177_s6 = sshll.u32 %s8162_s30, 4  ;;  %s178_s6 = int_to_ptr.vmem [resolvable:$true] %s177_s6 }
   0xe   : > { %s203_s10 = sshll.u32 %s12919_s3, 4  ;;  %s12922_s11 = smov 128   ;;  %s204_s10 = int_to_ptr.hbm [resolvable:$true] %s203_s10 }
   0xf   : > { %p7479_p9 = pneg %p8246_p8  ;;  %s8164_s12 = smov 8  }
  0x10   : > { %s8165_s13 = smov [#allocation8]   ;;  %s189_s17 = sshll.u32 %s12918_s2, 4  ;;  %s190_s17 = int_to_ptr.hbm [resolvable:$true] %s189_s17 }
  0x11   : > { %p8254_p10 = pnand %p7479_p9, %p44_p1  ;;  %s205_s14 = sshll.u32 %s8165_s13, 4  ;;  %s206_s14 = int_to_ptr.vmem [resolvable:$true] %s205_s14 }
  0x12   : > { %s8166_s23 = smov 16   ;;  %s8167_s26 = smov 1  }
  0x13   : > { %7482 = dma.hbm_to_vmem [thread:$0]  (!%p8254_p10), %s176_s28, 36864, %s178_s6, [#allocation6], %s12922_s11, %s12922_s11, %s8164_s12  }
  0x14   : > { %7488 = dma.hbm_to_vmem [thread:$0]  (!%p8254_p10), %s204_s10, 80, %s206_s14, [#allocation9], %s8166_s23, %s8166_s23, %s8167_s26  }
  0x15   : > { %s217_s30 = sshll.u32 %s12920_s4, 4  ;;  %s8168_s6 = smov [#allocation7]   ;;  %s218_s30 = int_to_ptr.hbm [resolvable:$true] %s217_s30 }
  0x16   : > { %s191_s8 = sshll.u32 %s8168_s6, 4  ;;  %s8169_s9 = smov [#allocation10]   ;;  %s192_s8 = int_to_ptr.vmem [resolvable:$true] %s191_s8 }
  0x17   : > { %7485 = dma.hbm_to_vmem [thread:$0]  (!%p8254_p10), %s190_s17, 288, %s192_s8, [#allocation6], %s8166_s23, %s8166_s23, %s8167_s26  }
  0x18   : > { %s219_s13 = sshll.u32 %s8169_s9, 4  ;;  %s8280_s10 = sadd.s32 1, %s8160_s21   ;;  %s220_s13 = int_to_ptr.vmem [resolvable:$true] %s219_s13 }
  0x19   : > { %7491 = dma.hbm_to_vmem [thread:$0]  (!%p8254_p10), %s218_s30, 80, %s220_s13, [#allocation9], %s8166_s23, %s8166_s23, %s8167_s26  }
  0x1a   : > { %s30_s14 = sadd.s32 1, %s8156_s20  ;;  %s27_s15 = ssub.s32 %s8160_s21, %s8280_s10 }
  0x1b   : > { %p37_p12 = scmp.ne.s32.totalorder %s8156_s20, %s8152_s19  ;;  %p28_p13 = scmp.eq.s32.totalorder %s27_s15, 0 }
  0x1c   : > { %p38_p0 = scmp.eq.s32.totalorder %s8160_s21, 0  ;;  %p7504_p5 = scmp.lt.s32.totalorder %s8160_s21, 2 }
  0x1d   : > { %p8290_p3 = por %p151_p2, %p37_p12  ;;  %s233_s27 = sand.u32 1, %s8156_s20  }
  0x1e   : > { %s8296_s17 = scalar_select %p28_p13, %s8156_s20, %s30_s14  }
  0x1f   : > { %p39_p7 = por %p38_p0, %p37_p12  ;;  %s7410_s7 = sshll.u32 %s233_s27, 8 }
  0x20   : > { %s7425_s23 = sshll.u32 %s8160_s21, 8  ;;  %s237_s6 = scalar_lea.vmem [#allocation2], %s7410_s7 }
  0x21   : > { %s242_s30 = scalar_lea.hbm %s12916_s0, %s7425_s23  ;;  %s245_s8 = sshll.u32 %s237_s6, 4  ;;  %s246_s8 = int_to_ptr.vmem [resolvable:$true] %s245_s8 }
  0x22   : > { %s243_s9 = sshll.u32 %s242_s30, 4  ;;  %p8303_p2 = pnand %p7504_p5, %p39_p7  ;;  %s244_s9 = int_to_ptr.hbm [resolvable:$true] %s243_s9 }
  0x23   : > { %s234_s14 = scalar_lea.sflag [#allocation3], %s233_s27  ;;  %s8056_s15 = sshra.s32 %s244_s9, 4  ;;  %s8057_s15 = int_to_ptr.hbm [resolvable:$true] %s8056_s15 }
  0x24   : > { %s8058_s11 = scalar_lea.hbm %s8057_s15, 256  ;;  %p8060_p10 = pneg %p8303_p2 }
  0x25   : > { %p8059_p9 = scmp.ne.s32.totalorder %s8057_s15, %s8058_s11  ;;  %s8063_s26 = scalar_lea.hbm %s12916_s0, 512 }
  0x26   : > { %p8064_p0 = scmp.lt.s32.totalorder %s8057_s15, %s12916_s0  ;;  %p8065_p5 = scmp.lt.s32.totalorder %s8063_s26, %s8058_s11 }
  0x27   : > { %p8061_p12 = pnand %p8060_p10, %p8059_p9 }
  0x28   : > { %p8066_p7 = por %p8065_p5, %p8064_p0 }
  0x29   : > { %p8062_p13 = pneg %p8061_p12 }
  0x2b   : > { %p8067_p11 = pnand %p8066_p7, %p8062_p13 }
  0x2d   : > { %8070 = shalt.err (!%p8067_p11)
}
  0x2e   : > { %s12929_s27 = smov 128   ;;  %257 = sbr.rel (%p8246_p8) target bundleno = 3476 (0xd94), region = 40 }
  0x2f   : > { %7495 = dma.hbm_to_vmem [thread:$0]  (!%p8303_p2), %s244_s9, 4096, %s246_s8, %s234_s14, %s12929_s27, %s12929_s27, %s8164_s12  }
  0x30   : > { %s8323_s6 = sand.u32 (!%p8246_p8), 1, %s8152_s19  }
  0x31   : > { %s7414_s11 = sshll.u32 (!%p8246_p8), %s8323_s6, 8  ;;  %s260_s15 = scalar_lea.sflag (!%p8246_p8), [#allocation3], %s8323_s6 }
  0x32   : > { %s8329_s23 = scalar_lea.vmem (!%p8246_p8), [#allocation2], %s7414_s11 }
  0x33   : > { %8131 = dma.done.wait (%p8233_p4), %s260_s15, 4096  }
  0x34   : > { %8133 = vsyncadd (%p8233_p4), %s260_s15, 4294963200 }
  0x35   : > { %8135 = dma.done.wait (%p44_p1), [#allocation6], 37152  }
  0x36   : > { %8137 = vsyncadd (%p44_p1), [#allocation6], 4294930144 }
  0x37   : > { %8139 = dma.done.wait (%p44_p1), [#allocation9], 160  }
  0x38   : > { %8141 = vsyncadd (%p44_p1), [#allocation9], 4294967136  ;;  %v360_v0 = vld [vmem:[#allocation5 + $0x78] sm:$0xff]  ;;  %v359_v1 = vld [vmem:[#allocation5 + $0x70] sm:$0xff]  ;;  %s12770_s24 = scalar_lea.vmem [#allocation11], %s7414_s11  ;;  %s7426_s29 = sshll.u32 %s8224_s22, 8 }
  0x39   : > { %365 = vmatpush.msra.mxu0 %v360_v0  ;;  %7427 = vmatpush.msra.mxu2 %v360_v0  ;;  %v358_v2 = vld [vmem:[#allocation5 + $0x68] sm:$0xff]  ;;  %v357_v3 = vld [vmem:[#allocation5 + $0x60] sm:$0xff]  ;;  %v356_v4 = vld [vmem:[#allocation5 + $0x58] sm:$0xff]  ;;  %s7288_s9 = scalar_lea.hbm %s12921_s5, %s7426_s29  ;;  %s7289_s13 = sshll.u32 %s12770_s24, 4  ;;  %s7290_s13 = int_to_ptr.vmem [resolvable:$true] %s7289_s13 }
  0x3a   : > { %v355_v5 = vld [vmem:[#allocation5 + $0x50] sm:$0xff]  ;;  %v354_v6 = vld [vmem:[#allocation5 + $0x48] sm:$0xff]  ;;  %v353_v7 = vld [vmem:[#allocation5 + $0x40] sm:$0xff]  ;;  %s7291_s14 = sshll.u32 %s7288_s9, 4  ;;  %s7277_s7 = scalar_lea.sflag [#allocation4], %s8323_s6  ;;  %s7292_s14 = int_to_ptr.hbm [resolvable:$true] %s7291_s14 }
  0x3b   : > { %366 = vmatpush.msra.mxu0 %v359_v1  ;;  %7428 = vmatpush.msra.mxu2 %v359_v1  ;;  %v352_v8 = vld [vmem:[#allocation5 + $0x38] sm:$0xff]  ;;  %v351_v9 = vld [vmem:[#allocation5 + $0x30] sm:$0xff]  ;;  %v350_v10 = vld [vmem:[#allocation5 + $0x28] sm:$0xff]  ;;  %s8100_s22 = sshra.s32 %s7292_s14, 4  ;;  %s8106_s27 = scalar_lea.hbm %s12921_s5, 512  ;;  %s8101_s22 = int_to_ptr.hbm [resolvable:$true] %s8100_s22 }
  0x3c   : > { %v349_v11 = vld [vmem:[#allocation5 + $0x20] sm:$0xff]  ;;  %v348_v12 = vld [vmem:[#allocation5 + $0x18] sm:$0xff]  ;;  %v347_v13 = vld [vmem:[#allocation5 + $0x10] sm:$0xff]  ;;  %s8102_s26 = scalar_lea.hbm %s8101_s22, 256  ;;  %p8107_p11 = scmp.lt.s32.totalorder %s8101_s22, %s12921_s5 }
  0x3d   : > { %367 = vmatpush.msra.mxu0 %v358_v2  ;;  %7429 = vmatpush.msra.mxu2 %v358_v2  ;;  %v346_v14 = vld [vmem:[#allocation5 + $0x8] sm:$0xff]  ;;  %v345_v15 = vld [vmem:[#allocation5] sm:$0xff]  ;;  %v8352_v18 = vld [vmem:[%s8329_s23 + $0x10] sm:$0xff]  ;;  %p8103_p1 = scmp.ne.s32.totalorder %s8101_s22, %s8102_s26  ;;  %p8108_p2 = scmp.lt.s32.totalorder %s8106_s27, %s8102_s26 }
  0x3e   : > { %v8344_v16 = vld [vmem:[%s8329_s23] sm:$0xff]  ;;  %v8348_v17 = vld [vmem:[%s8329_s23 + $0x8] sm:$0xff]  ;;  %v8356_v19 = vld [vmem:[%s8329_s23 + $0x18] sm:$0xff] }
  0x3f   : > { %368 = vmatpush.msra.mxu0 %v357_v3  ;;  %7430 = vmatpush.msra.mxu2 %v357_v3  ;;  %v8360_v20 = vld [vmem:[%s8329_s23 + $0x20] sm:$0xff]  ;;  %v8364_v21 = vld [vmem:[%s8329_s23 + $0x28] sm:$0xff]  ;;  %v8368_v22 = vld [vmem:[%s8329_s23 + $0x30] sm:$0xff]  ;;  %p8104_p4 = pnand %p8103_p1, %p8290_p3  ;;  %p8109_p9 = por %p8108_p2, %p8107_p11 }
  0x40   : > { %v8372_v23 = vld [vmem:[%s8329_s23 + $0x38] sm:$0xff]  ;;  %v8376_v24 = vld [vmem:[%s8329_s23 + $0x40] sm:$0xff]  ;;  %v525_v26 = vld [vmem:[#allocation5 + $0xf0] sm:$0xff] }
  0x41   : > { %369 = vmatpush.msra.mxu0 %v356_v4  ;;  %7431 = vmatpush.msra.mxu2 %v356_v4  ;;  %v526_v25 = vld [vmem:[#allocation5 + $0xf8] sm:$0xff]  ;;  %v524_v27 = vld [vmem:[#allocation5 + $0xe8] sm:$0xff]  ;;  %v523_v29 = vld [vmem:[#allocation5 + $0xe0] sm:$0xff]  ;;  %p8105_p8 = pneg %p8104_p4 }
  0x42   : > { %532 = vmatpush.msra.mxu1 %v526_v25  ;;  %7443 = vmatpush.msra.mxu3 %v526_v25  ;;  %v8380_v28 = vld [vmem:[%s8329_s23 + $0x48] sm:$0xff]  ;;  %v522_v30 = vld [vmem:[#allocation5 + $0xd8] sm:$0xff]  ;;  %v521_v31 = vld [vmem:[#allocation5 + $0xd0] sm:$0xff] }
  0x43   : > { %370 = vmatpush.msra.mxu0 %v355_v5  ;;  %7432 = vmatpush.msra.mxu2 %v355_v5  ;;  %v520_v32 = vld [vmem:[#allocation5 + $0xc8] sm:$0xff]  ;;  %v8384_v33 = vld [vmem:[%s8329_s23 + $0x50] sm:$0xff]  ;;  %v519_v34 = vld [vmem:[#allocation5 + $0xc0] sm:$0xff]  ;;  %p8110_p10 = pnand %p8109_p9, %p8105_p8 }
  0x44   : > { %533 = vmatpush.msra.mxu1 %v525_v26  ;;  %7444 = vmatpush.msra.mxu3 %v525_v26  ;;  %v518_v35 = vld [vmem:[#allocation5 + $0xb8] sm:$0xff]  ;;  %v8388_v36 = vld [vmem:[%s8329_s23 + $0x80] sm:$0xff]  ;;  %v517_v37 = vld [vmem:[#allocation5 + $0xb0] sm:$0xff] }
  0x45   : > { %371 = vmatpush.msra.mxu0 %v354_v6  ;;  %7433 = vmatpush.msra.mxu2 %v354_v6  ;;  %v516_v38 = vld [vmem:[#allocation5 + $0xa8] sm:$0xff]  ;;  %v8392_v39 = vld [vmem:[%s8329_s23 + $0x58] sm:$0xff]  ;;  %v515_v40 = vld [vmem:[#allocation5 + $0xa0] sm:$0xff] }
  0x46   : > { %534 = vmatpush.msra.mxu1 %v524_v27  ;;  %7445 = vmatpush.msra.mxu3 %v524_v27  ;;  %v514_v41 = vld [vmem:[#allocation5 + $0x98] sm:$0xff]  ;;  %v8396_v42 = vld [vmem:[%s8329_s23 + $0x88] sm:$0xff]  ;;  %v513_v43 = vld [vmem:[#allocation5 + $0x90] sm:$0xff] }
  0x47   : > { %372 = vmatpush.msra.mxu0 %v353_v7  ;;  %7434 = vmatpush.msra.mxu2 %v353_v7  ;;  %v8400_v44 = vld [vmem:[%s8329_s23 + $0x60] sm:$0xff]  ;;  %v512_v45 = vld [vmem:[#allocation5 + $0x88] sm:$0xff]  ;;  %v8404_v47 = vld [vmem:[%s8329_s23 + $0x90] sm:$0xff] }
  0x48   : > { %535 = vmatpush.msra.mxu1 %v523_v29  ;;  %7446 = vmatpush.msra.mxu3 %v523_v29  ;;  %v511_v46 = vld [vmem:[#allocation5 + $0x80] sm:$0xff]  ;;  %v693_v48 = vld [vmem:[#allocation5 + $0x178] sm:$0xff]  ;;  %v8408_v49 = vld [vmem:[%s8329_s23 + $0x68] sm:$0xff] }
  0x49   : > { %373 = vmatpush.msra.mxu0 %v352_v8  ;;  %7435 = vmatpush.msra.mxu2 %v352_v8  ;;  %v332_v50 = vld [vmem:[%s8329_s23 + $0x98] sm:$0xff]  ;;  %v692_v51 = vld [vmem:[#allocation5 + $0x170] sm:$0xff]  ;;  %v333_v53 = vld [vmem:[%s8329_s23 + $0xa0] sm:$0xff] }
  0x4a   : > { %536 = vmatpush.msra.mxu1 %v522_v30  ;;  %7447 = vmatpush.msra.mxu3 %v522_v30  ;;  %v8413_v52 = vld [vmem:[%s8329_s23 + $0x70] sm:$0xff]  ;;  %v691_v54 = vld [vmem:[#allocation5 + $0x168] sm:$0xff]  ;;  %v8418_v55 = vld [vmem:[%s8329_s23 + $0x78] sm:$0xff] }
  0x4b   : > { %374 = vmatpush.msra.mxu0 %v351_v9  ;;  %7436 = vmatpush.msra.mxu2 %v351_v9  ;;  %v8421_v56 = vld [vmem:[#allocation7] ss:$0 sm:$0xff]  ;;  %v334_v57 = vld [vmem:[%s8329_s23 + $0xa8] sm:$0xff]  ;;  %v335_v62 = vld [vmem:[%s8329_s23 + $0xb0] sm:$0xff] }
  0x4c   : > { %537 = vmatpush.msra.mxu1 %v521_v31  ;;  %7448 = vmatpush.msra.mxu3 %v521_v31  ;;  %v690_v58 = vld [vmem:[#allocation5 + $0x160] sm:$0xff]  ;;  %v689_v63 = vld [vmem:[#allocation5 + $0x158] sm:$0xff]  ;;  %v688_v4 = vld [vmem:[#allocation5 + $0x150] sm:$0xff] }
  0x4d   : > { %375 = vmatpush.msra.mxu0 %v350_v10  ;;  %7437 = vmatpush.msra.mxu2 %v350_v10  ;;  %v336_v3 = vld [vmem:[%s8329_s23 + $0xb8] sm:$0xff]  ;;  %v337_v8 = vld [vmem:[%s8329_s23 + $0xc0] sm:$0xff]  ;;  %v687_v9 = vld [vmem:[#allocation5 + $0x148] sm:$0xff] }
  0x4e   : > { %538 = vmatpush.msra.mxu1 %v520_v32  ;;  %7449 = vmatpush.msra.mxu3 %v520_v32  ;;  %v339_v27 = vld [vmem:[%s8329_s23 + $0xd0] sm:$0xff]  ;;  %v685_v29 = vld [vmem:[#allocation5 + $0x138] sm:$0xff] }
  0x4f   : > { %376 = vmatpush.msra.mxu0 %v349_v11  ;;  %7438 = vmatpush.msra.mxu2 %v349_v11 }
  0x50   : > { %539 = vmatpush.msra.mxu1 %v519_v34  ;;  %7450 = vmatpush.msra.mxu3 %v519_v34  ;;  %v340_v34 = vld [vmem:[%s8329_s23 + $0xd8] sm:$0xff] }
  0x51   : > { %377 = vmatpush.msra.mxu0 %v348_v12  ;;  %7439 = vmatpush.msra.mxu2 %v348_v12 }
  0x52   : > { %540 = vmatpush.msra.mxu1 %v518_v35  ;;  %7451 = vmatpush.msra.mxu3 %v518_v35  ;;  %v684_v35 = vld [vmem:[#allocation5 + $0x130] sm:$0xff] }
  0x53   : > { %378 = vmatpush.msra.mxu0 %v347_v13  ;;  %7440 = vmatpush.msra.mxu2 %v347_v13  ;;  %v338_v13 = vld [vmem:[%s8329_s23 + $0xc8] sm:$0xff] }
  0x54   : > { %541 = vmatpush.msra.mxu1 %v517_v37  ;;  %7452 = vmatpush.msra.mxu3 %v517_v37 }
  0x55   : > { %379 = vmatpush.msra.mxu0 %v346_v14  ;;  %7441 = vmatpush.msra.mxu2 %v346_v14  ;;  %v686_v14 = vld [vmem:[#allocation5 + $0x140] sm:$0xff] }
  0x56   : > { %542 = vmatpush.msra.mxu1 %v516_v38  ;;  %7453 = vmatpush.msra.mxu3 %v516_v38 }
  0x57   : > { %380 = vmatpush.msra.mxu0 %v345_v15  ;;  %7442 = vmatpush.msra.mxu2 %v345_v15 }
  0x58   : > { %381 = vmatmul.f32.vlgmr.msra.gmra.mxu0 %v8344_v16  ;;  %429 = vmatmul.f32.vlgmr.msra.gmra.mxu2 %v8388_v36 }
  0x59   : > { %543 = vmatpush.msra.mxu1 %v515_v40  ;;  %7454 = vmatpush.msra.mxu3 %v515_v40 }
  0x5a   : > { %699 = vmatpush.msrb.mxu2 %v693_v48 }
  0x5b   : > { %544 = vmatpush.msra.mxu1 %v514_v41  ;;  %7455 = vmatpush.msra.mxu3 %v514_v41  ;;  %v341_v41 = vld [vmem:[%s8329_s23 + $0xe0] sm:$0xff] }
  0x5c   : > { %700 = vmatpush.msrb.mxu2 %v692_v51  ;;  %v682_v51 = vld [vmem:[#allocation5 + $0x120] sm:$0xff] }
  0x5d   : > { %545 = vmatpush.msra.mxu1 %v513_v43  ;;  %7456 = vmatpush.msra.mxu3 %v513_v43  ;;  %v683_v43 = vld [vmem:[#allocation5 + $0x128] sm:$0xff] }
  0x5e   : > { %701 = vmatpush.msrb.mxu2 %v691_v54 }
  0x5f   : > { %546 = vmatpush.msra.mxu1 %v512_v45  ;;  %7457 = vmatpush.msra.mxu3 %v512_v45 }
  0x60   : > { %384 = vmatmul.f32.gmra.mxu0 %v8348_v17  ;;  %432 = vmatmul.f32.gmra.mxu2 %v8396_v42 }
  0x61   : > { %547 = vmatpush.msra.mxu1 %v511_v46  ;;  %7458 = vmatpush.msra.mxu3 %v511_v46 }
  0x62   : > { %702 = vmatpush.msrb.mxu2 %v690_v58  ;;  %v343_v58 = vld [vmem:[%s8329_s23 + $0xf0] sm:$0xff] }
  0x64   : > { %703 = vmatpush.msrb.mxu2 %v689_v63  ;;  %v344_v63 = vld [vmem:[%s8329_s23 + $0xf8] sm:$0xff] }
  0x66   : > { %704 = vmatpush.msrb.mxu2 %v688_v4  ;;  %v679_v4 = vld [vmem:[#allocation5 + $0x108] sm:$0xff] }
  0x68   : > { %387 = vmatmul.f32.gmra.mxu0 %v8352_v18  ;;  %435 = vmatmul.f32.gmra.mxu2 %v8404_v47 }
  0x69   : > { %705 = vmatpush.msrb.mxu2 %v687_v9 }
  0x6b   : > { %706 = vmatpush.msrb.mxu2 %v686_v14 }
  0x6d   : > { %707 = vmatpush.msrb.mxu2 %v685_v29 }
  0x6f   : > { %708 = vmatpush.msrb.mxu2 %v684_v35 }
  0x70   : > { %390 = vmatmul.f32.gmra.mxu0 %v8356_v19  ;;  %438 = vmatmul.f32.gmra.mxu2 %v332_v50  ;;  %v342_v50 = vld [vmem:[%s8329_s23 + $0xe8] sm:$0xff] }
  0x71   : > { %709 = vmatpush.msrb.mxu2 %v683_v43 }
  0x73   : > { %710 = vmatpush.msrb.mxu2 %v682_v51 }
  0x78   : > { %393 = vmatmul.f32.gmra.mxu0 %v8360_v20  ;;  %441 = vmatmul.f32.gmra.mxu2 %v333_v53 }
  0x80   : > { %396 = vmatmul.f32.gmra.mxu0 %v8364_v21  ;;  %444 = vmatmul.f32.gmra.mxu2 %v334_v57 }
  0x88   : > { %399 = vmatmul.f32.gmra.mxu0 %v8368_v22  ;;  %447 = vmatmul.f32.gmra.mxu2 %v335_v62 }
  0x90   : > { %402 = vmatmul.f32.gmra.mxu0 %v8372_v23  ;;  %450 = vmatmul.f32.gmra.mxu2 %v336_v3 }
  0x98   : > { %405 = vmatmul.f32.gmra.mxu0 %v8376_v24  ;;  %453 = vmatmul.f32.gmra.mxu2 %v337_v8 }
  0xa0   : > { %408 = vmatmul.f32.gmra.mxu0 %v8380_v28  ;;  %456 = vmatmul.f32.gmra.mxu2 %v338_v13 }
  0xa8   : > { %411 = vmatmul.f32.gmra.mxu0 %v8384_v33  ;;  %459 = vmatmul.f32.gmra.mxu2 %v339_v27 }
  0xb0   : > { %414 = vmatmul.f32.gmra.mxu0 %v8392_v39  ;;  %462 = vmatmul.f32.gmra.mxu2 %v340_v34 }
  0xb8   : > { %417 = vmatmul.f32.gmra.mxu0 %v8400_v44  ;;  %465 = vmatmul.f32.gmra.mxu2 %v341_v41 }
  0xc0   : > { %420 = vmatmul.f32.gmra.mxu0 %v8408_v49  ;;  %468 = vmatmul.f32.gmra.mxu2 %v342_v50 }
  0xc8   : > { %423 = vmatmul.f32.gmra.mxu0 %v8413_v52  ;;  %471 = vmatmul.f32.gmra.mxu2 %v343_v58 }
  0xd0   : > { %426 = vmatmul.f32.gmra.mxu0 %v8418_v55  ;;  %474 = vmatmul.f32.gmra.mxu2 %v344_v63 }
  0xd5   : > { %v382_v59 = vpop.f32.mrf.mxu0 }
  0xd6   : > { %v383_v60 = vadd.f32 %v8421_v56, %v382_v59  ;;  %v681_v59 = vld [vmem:[#allocation5 + $0x118] sm:$0xff] }
  0xd7   : > { %711 = vmatpush.msrb.mxu2 %v681_v59 }
  0xd8   : > { %v478_v61 = vmax.f32 %v383_v60, 0.0 }
  0xda   : > { %548 = vmatmul.f32.vlgmr.msra.gmra.mxu1 %v478_v61 }
  0xdd   : > { %v385_v0 = vpop.f32.mrf.mxu0 }
  0xde   : > { %v386_v1 = vadd.f32 %v8421_v56, %v385_v0  ;;  %v680_v0 = vld [vmem:[#allocation5 + $0x110] sm:$0xff] }
  0xdf   : > { %712 = vmatpush.msrb.mxu2 %v680_v0 }
  0xe0   : > { %v479_v2 = vmax.f32 %v386_v1, 0.0 }
  0xe1   : > { %713 = vmatpush.msrb.mxu2 %v679_v4 }
  0xe2   : > { %551 = vmatmul.f32.gmra.mxu1 %v479_v2 }
  0xe5   : > { %v388_v5 = vpop.f32.mrf.mxu0 }
  0xe6   : > { %v389_v6 = vadd.f32 %v8421_v56, %v388_v5 }
  0xe8   : > { %v480_v7 = vmax.f32 %v389_v6, 0.0 }
  0xea   : > { %554 = vmatmul.f32.gmra.mxu1 %v480_v7  ;;  %v430_v7 = vpop.f32.mrf.mxu2 }
  0xeb   : > { %v431_v8 = vadd.f32 %v8421_v56, %v430_v7 }
  0xed   : > { %v391_v10 = vpop.f32.mrf.mxu0 }
  0xee   : > { %v392_v11 = vadd.f32 %v8421_v56, %v391_v10  ;;  %v494_v10 = vmax.f32 %v431_v8, 0.0 }
  0xf0   : > { %v481_v12 = vmax.f32 %v392_v11, 0.0  ;;  %v678_v11 = vld [vmem:[#allocation5 + $0x100] sm:$0xff]  ;;  %596 = vmatmul.f32.vlgmr.msra.gmra.mxu3 %v494_v10 }
  0xf1   : > { %714 = vmatpush.msrb.mxu2 %v678_v11 }
  0xf2   : > { %557 = vmatmul.f32.gmra.mxu1 %v481_v12  ;;  %v433_v14 = vpop.f32.mrf.mxu2 }
  0xf5   : > { %v394_v15 = vpop.f32.mrf.mxu0 }
  0xf6   : > { %v395_v25 = vadd.f32 %v8421_v56, %v394_v15  ;;  %v434_v15 = vadd.f32 %v8421_v56, %v433_v14 }
  0xf8   : > { %v482_v26 = vmax.f32 %v395_v25, 0.0 }
  0xfa   : > { %560 = vmatmul.f32.gmra.mxu1 %v482_v26  ;;  %v495_v26 = vmax.f32 %v434_v15, 0.0 }
  0xfc   : > { %599 = vmatmul.f32.gmra.mxu3 %v495_v26 }
  0xfd   : > { %v397_v30 = vpop.f32.mrf.mxu0 }
  0xfe   : > { %v398_v31 = vadd.f32 %v8421_v56, %v397_v30  ;;  %v436_v30 = vpop.f32.mrf.mxu2 }
 0x100   : > { %v483_v32 = vmax.f32 %v398_v31, 0.0  ;;  %v437_v31 = vadd.f32 %v8421_v56, %v436_v30 }
 0x102   : > { %563 = vmatmul.f32.gmra.mxu1 %v483_v32  ;;  %v496_v34 = vmax.f32 %v437_v31, 0.0 }
 0x104   : > { %602 = vmatmul.f32.gmra.mxu3 %v496_v34 }
 0x105   : > { %v400_v37 = vpop.f32.mrf.mxu0 }
 0x106   : > { %v401_v38 = vadd.f32 %v8421_v56, %v400_v37 }
 0x108   : > { %v484_v40 = vmax.f32 %v401_v38, 0.0  ;;  %v439_v38 = vpop.f32.mrf.mxu2 }
 0x10a   : > { %566 = vmatmul.f32.gmra.mxu1 %v484_v40  ;;  %v440_v40 = vadd.f32 %v8421_v56, %v439_v38 }
 0x10c   : > { %v497_v43 = vmax.f32 %v440_v40, 0.0 }
 0x10d   : > { %v403_v45 = vpop.f32.mrf.mxu0 }
 0x10e   : > { %v404_v46 = vadd.f32 %v8421_v56, %v403_v45  ;;  %605 = vmatmul.f32.gmra.mxu3 %v497_v43 }
 0x110   : > { %v485_v48 = vmax.f32 %v404_v46, 0.0 }
 0x112   : > { %569 = vmatmul.f32.gmra.mxu1 %v485_v48  ;;  %v442_v48 = vpop.f32.mrf.mxu2 }
 0x113   : > { %v443_v50 = vadd.f32 %v8421_v56, %v442_v48 }
 0x115   : > { %v406_v53 = vpop.f32.mrf.mxu0 }
 0x116   : > { %v407_v54 = vadd.f32 %v8421_v56, %v406_v53  ;;  %v498_v53 = vmax.f32 %v443_v50, 0.0 }
 0x118   : > { %v486_v57 = vmax.f32 %v407_v54, 0.0  ;;  %v8455_v54 = vld [vmem:[#allocation7 + $0x1] ss:$0 sm:$0xff]  ;;  %608 = vmatmul.f32.gmra.mxu3 %v498_v53 }
 0x11a   : > { %572 = vmatmul.f32.gmra.mxu1 %v486_v57  ;;  %v445_v57 = vpop.f32.mrf.mxu2 }
 0x11b   : > { %v446_v59 = vadd.f32 %v8421_v56, %v445_v57 }
 0x11d   : > { %v409_v60 = vpop.f32.mrf.mxu0 }
 0x11e   : > { %v410_v61 = vadd.f32 %v8421_v56, %v409_v60 }
 0x120   : > { %v487_v62 = vmax.f32 %v410_v61, 0.0  ;;  %v499_v61 = vmax.f32 %v446_v59, 0.0 }
 0x122   : > { %575 = vmatmul.f32.gmra.mxu1 %v487_v62  ;;  %611 = vmatmul.f32.gmra.mxu3 %v499_v61  ;;  %v448_v63 = vpop.f32.mrf.mxu2 }
 0x125   : > { %v412_v1 = vpop.f32.mrf.mxu0 }
 0x126   : > { %v413_v2 = vadd.f32 %v8421_v56, %v412_v1  ;;  %v449_v1 = vadd.f32 %v8421_v56, %v448_v63 }
 0x128   : > { %v488_v3 = vmax.f32 %v413_v2, 0.0 }
 0x12a   : > { %578 = vmatmul.f32.gmra.mxu1 %v488_v3  ;;  %v500_v3 = vmax.f32 %v449_v1, 0.0 }
 0x12c   : > { %614 = vmatmul.f32.gmra.mxu3 %v500_v3 }
 0x12d   : > { %v415_v5 = vpop.f32.mrf.mxu0 }
 0x12e   : > { %v416_v6 = vadd.f32 %v8421_v56, %v415_v5  ;;  %v451_v5 = vpop.f32.mrf.mxu2 }
 0x12f   : > { %v452_v7 = vadd.f32 %v8421_v56, %v451_v5 }
 0x130   : > { %v489_v9 = vmax.f32 %v416_v6, 0.0 }
 0x132   : > { %581 = vmatmul.f32.gmra.mxu1 %v489_v9  ;;  %v501_v9 = vmax.f32 %v452_v7, 0.0 }
 0x134   : > { %617 = vmatmul.f32.gmra.mxu3 %v501_v9 }
 0x135   : > { %v418_v12 = vpop.f32.mrf.mxu0 }
 0x136   : > { %v419_v13 = vadd.f32 %v8421_v56, %v418_v12  ;;  %v454_v11 = vpop.f32.mrf.mxu2 }
 0x138   : > { %v490_v25 = vmax.f32 %v419_v13, 0.0  ;;  %v455_v13 = vadd.f32 %v8421_v56, %v454_v11 }
 0x13a   : > { %584 = vmatmul.f32.gmra.mxu1 %v490_v25  ;;  %v502_v15 = vmax.f32 %v455_v13, 0.0 }
 0x13c   : > { %620 = vmatmul.f32.gmra.mxu3 %v502_v15 }
 0x13d   : > { %v421_v27 = vpop.f32.mrf.mxu0 }
 0x13e   : > { %v422_v29 = vadd.f32 %v8421_v56, %v421_v27  ;;  %v457_v26 = vpop.f32.mrf.mxu2 }
 0x140   : > { %v491_v32 = vmax.f32 %v422_v29, 0.0  ;;  %v458_v29 = vadd.f32 %v8421_v56, %v457_v26 }
 0x142   : > { %587 = vmatmul.f32.gmra.mxu1 %v491_v32  ;;  %v503_v32 = vmax.f32 %v458_v29, 0.0 }
 0x144   : > { %623 = vmatmul.f32.gmra.mxu3 %v503_v32 }
 0x145   : > { %v424_v35 = vpop.f32.mrf.mxu0 }
 0x146   : > { %v425_v37 = vadd.f32 %v8421_v56, %v424_v35  ;;  %v460_v34 = vpop.f32.mrf.mxu2 }
 0x148   : > { %v492_v41 = vmax.f32 %v425_v37, 0.0  ;;  %v461_v37 = vadd.f32 %v8421_v56, %v460_v34 }
 0x14a   : > { %590 = vmatmul.f32.gmra.mxu1 %v492_v41  ;;  %v504_v41 = vmax.f32 %v461_v37, 0.0 }
 0x14c   : > { %626 = vmatmul.f32.gmra.mxu3 %v504_v41 }
 0x14d   : > { %v427_v45 = vpop.f32.mrf.mxu0 }
 0x14e   : > { %v428_v46 = vadd.f32 %v8421_v56, %v427_v45  ;;  %v463_v43 = vpop.f32.mrf.mxu2 }
 0x150   : > { %v493_v51 = vmax.f32 %v428_v46, 0.0  ;;  %v464_v46 = vadd.f32 %v8421_v56, %v463_v43 }
 0x152   : > { %593 = vmatmul.f32.gmra.mxu1 %v493_v51  ;;  %v505_v51 = vmax.f32 %v464_v46, 0.0 }
 0x154   : > { %629 = vmatmul.f32.gmra.mxu3 %v505_v51 }
 0x156   : > { %v466_v53 = vpop.f32.mrf.mxu2 }
 0x157   : > { %v549_v58 = vpop.f32.mrf.mxu1 }
 0x158   : > { %v550_v60 = vadd.f32 %v8455_v54, %v549_v58  ;;  %v467_v58 = vadd.f32 %v8421_v56, %v466_v53 }
 0x15a   : > { %v645_v62 = vmax.f32 %v550_v60, 0.0  ;;  %v506_v61 = vmax.f32 %v467_v58, 0.0 }
 0x15c   : > { %715 = vmatmul.f32.vlgmr.msrb.gmra.mxu2 %v645_v62  ;;  %632 = vmatmul.f32.gmra.mxu3 %v506_v61 }
 0x15e   : > { %v469_v62 = vpop.f32.mrf.mxu2 }
 0x15f   : > { %v552_v0 = vpop.f32.mrf.mxu1 }
 0x160   : > { %v553_v2 = vadd.f32 %v8455_v54, %v552_v0  ;;  %v470_v0 = vadd.f32 %v8421_v56, %v469_v62 }
 0x162   : > { %v646_v4 = vmax.f32 %v553_v2, 0.0  ;;  %v507_v3 = vmax.f32 %v470_v0, 0.0 }
 0x164   : > { %718 = vmatmul.f32.gmra.mxu2 %v646_v4  ;;  %635 = vmatmul.f32.gmra.mxu3 %v507_v3 }
 0x166   : > { %v472_v4 = vpop.f32.mrf.mxu2 }
 0x167   : > { %v555_v6 = vpop.f32.mrf.mxu1 }
 0x168   : > { %v556_v8 = vadd.f32 %v8455_v54, %v555_v6  ;;  %v473_v6 = vadd.f32 %v8421_v56, %v472_v4 }
 0x16a   : > { %v647_v10 = vmax.f32 %v556_v8, 0.0  ;;  %v508_v9 = vmax.f32 %v473_v6, 0.0 }
 0x16c   : > { %721 = vmatmul.f32.gmra.mxu2 %v647_v10  ;;  %638 = vmatmul.f32.gmra.mxu3 %v508_v9  ;;  %v1641_v9 = vld [vmem:[#allocation5 + $0x1e8] sm:$0xff] }
 0x16e   : > { %v475_v10 = vpop.f32.mrf.mxu2 }
 0x16f   : > { %v558_v12 = vpop.f32.mrf.mxu1 }
 0x170   : > { %v559_v14 = vadd.f32 %v8455_v54, %v558_v12  ;;  %v476_v12 = vadd.f32 %v8421_v56, %v475_v10 }
 0x172   : > { %v648_v25 = vmax.f32 %v559_v14, 0.0  ;;  %v509_v15 = vmax.f32 %v476_v12, 0.0 }
 0x174   : > { %724 = vmatmul.f32.gmra.mxu2 %v648_v25  ;;  %641 = vmatmul.f32.gmra.mxu3 %v509_v15 }
 0x177   : > { %v561_v27 = vpop.f32.mrf.mxu1 }
 0x178   : > { %v562_v30 = vadd.f32 %v8455_v54, %v561_v27 }
 0x17a   : > { %v649_v31 = vmax.f32 %v562_v30, 0.0  ;;  %v597_v30 = vpop.f32.mrf.mxu3 }
 0x17b   : > { %v598_v51 = vadd.f32 %v8455_v54, %v597_v30 }
 0x17c   : > { %727 = vmatmul.f32.gmra.mxu2 %v649_v31 }
 0x17d   : > { %v661_v53 = vmax.f32 %v598_v51, 0.0 }
 0x17f   : > { %v564_v35 = vpop.f32.mrf.mxu1 }
 0x180   : > { %v565_v38 = vadd.f32 %v8455_v54, %v564_v35 }
 0x182   : > { %v650_v40 = vmax.f32 %v565_v38, 0.0  ;;  %v600_v35 = vpop.f32.mrf.mxu3 }
 0x183   : > { %v601_v58 = vadd.f32 %v8455_v54, %v600_v35  ;;  %v1639_v35 = vld [vmem:[#allocation5 + $0x1d8] sm:$0xff] }
 0x184   : > { %730 = vmatmul.f32.gmra.mxu2 %v650_v40 }
 0x185   : > { %v662_v62 = vmax.f32 %v601_v58, 0.0 }
 0x187   : > { %v567_v45 = vpop.f32.mrf.mxu1 }
 0x188   : > { %v568_v48 = vadd.f32 %v8455_v54, %v567_v45 }
 0x18a   : > { %v651_v50 = vmax.f32 %v568_v48, 0.0  ;;  %v603_v40 = vpop.f32.mrf.mxu3 }
 0x18c   : > { %733 = vmatmul.f32.gmra.mxu2 %v651_v50 }
 0x18f   : > { %v570_v57 = vpop.f32.mrf.mxu1 }
 0x190   : > { %v571_v59 = vadd.f32 %v8455_v54, %v570_v57 }
 0x192   : > { %v652_v60 = vmax.f32 %v571_v59, 0.0  ;;  %v606_v48 = vpop.f32.mrf.mxu3  ;;  %v8486_v59 = vld [vmem:[#allocation7 + $0x2] ss:$0 sm:$0xff] }
 0x194   : > { %736 = vmatmul.f32.gmra.mxu2 %v652_v60  ;;  %v1643_v60 = vld [vmem:[#allocation5 + $0x1f8] sm:$0xff] }
 0x195   : > { %1649 = vmatpush.msrb.mxu3 %v1643_v60 }
 0x197   : > { %v573_v63 = vpop.f32.mrf.mxu1 }
 0x198   : > { %v574_v1 = vadd.f32 %v8455_v54, %v573_v63 }
 0x19a   : > { %v653_v2 = vmax.f32 %v574_v1, 0.0  ;;  %v604_v1 = vadd.f32 %v8455_v54, %v603_v40 }
 0x19b   : > { %v609_v57 = vpop.f32.mrf.mxu3 }
 0x19c   : > { %739 = vmatmul.f32.gmra.mxu2 %v653_v2  ;;  %v1642_v2 = vld [vmem:[#allocation5 + $0x1f0] sm:$0xff]  ;;  %v610_v15 = vadd.f32 %v8455_v54, %v609_v57  ;;  %v1637_v57 = vld [vmem:[#allocation5 + $0x1c8] sm:$0xff] }
 0x19d   : > { %1650 = vmatpush.msrb.mxu3 %v1642_v2  ;;  %v1636_v2 = vld [vmem:[#allocation5 + $0x1c0] sm:$0xff] }
 0x19f   : > { %v576_v5 = vpop.f32.mrf.mxu1  ;;  %1651 = vmatpush.msrb.mxu3 %v1641_v9  ;;  %v1635_v9 = vld [vmem:[#allocation5 + $0x1b8] sm:$0xff] }
 0x1a0   : > { %v577_v7 = vadd.f32 %v8455_v54, %v576_v5  ;;  %v663_v5 = vmax.f32 %v604_v1, 0.0 }
 0x1a2   : > { %v654_v8 = vmax.f32 %v577_v7, 0.0 }
 0x1a4   : > { %742 = vmatmul.f32.gmra.mxu2 %v654_v8 }
 0x1a5   : > { %v612_v3 = vpop.f32.mrf.mxu3 }
 0x1a7   : > { %v579_v11 = vpop.f32.mrf.mxu1 }
 0x1a8   : > { %v580_v13 = vadd.f32 %v8455_v54, %v579_v11 }
 0x1aa   : > { %v655_v14 = vmax.f32 %v580_v13, 0.0 }
 0x1ac   : > { %745 = vmatmul.f32.gmra.mxu2 %v655_v14 }
 0x1af   : > { %v582_v25 = vpop.f32.mrf.mxu1  ;;  %v615_v11 = vpop.f32.mrf.mxu3 }
 0x1b0   : > { %v583_v26 = vadd.f32 %v8455_v54, %v582_v25  ;;  %v1640_v25 = vld [vmem:[#allocation5 + $0x1e0] sm:$0xff] }
 0x1b1   : > { %1652 = vmatpush.msrb.mxu3 %v1640_v25  ;;  %v1634_v25 = vld [vmem:[#allocation5 + $0x1b0] sm:$0xff] }
 0x1b2   : > { %v656_v27 = vmax.f32 %v583_v26, 0.0 }
 0x1b3   : > { %1653 = vmatpush.msrb.mxu3 %v1639_v35 }
 0x1b4   : > { %748 = vmatmul.f32.gmra.mxu2 %v656_v27  ;;  %v665_v27 = vmax.f32 %v610_v15, 0.0 }
 0x1b7   : > { %v585_v29 = vpop.f32.mrf.mxu1  ;;  %v618_v30 = vpop.f32.mrf.mxu3 }
 0x1b8   : > { %v586_v31 = vadd.f32 %v8455_v54, %v585_v29 }
 0x1ba   : > { %v657_v32 = vmax.f32 %v586_v31, 0.0 }
 0x1bc   : > { %751 = vmatmul.f32.gmra.mxu2 %v657_v32 }
 0x1bf   : > { %v588_v34 = vpop.f32.mrf.mxu1  ;;  %v621_v40 = vpop.f32.mrf.mxu3 }
 0x1c0   : > { %v589_v56 = vadd.f32 %v8455_v54, %v588_v34  ;;  %v613_v34 = vadd.f32 %v8455_v54, %v612_v3  ;;  %v622_v1 = vadd.f32 %v8455_v54, %v621_v40 }
 0x1c2   : > { %v658_v37 = vmax.f32 %v589_v56, 0.0 }
 0x1c4   : > { %754 = vmatmul.f32.gmra.mxu2 %v658_v37  ;;  %v666_v37 = vmax.f32 %v613_v34, 0.0  ;;  %v1633_v34 = vld [vmem:[#allocation5 + $0x1a8] sm:$0xff] }
 0x1c7   : > { %v591_v38 = vpop.f32.mrf.mxu1  ;;  %v624_v58 = vpop.f32.mrf.mxu3 }
 0x1c8   : > { %v592_v41 = vadd.f32 %v8455_v54, %v591_v38 }
 0x1ca   : > { %v659_v43 = vmax.f32 %v592_v41, 0.0 }
 0x1cc   : > { %757 = vmatmul.f32.gmra.mxu2 %v659_v43  ;;  %v616_v43 = vadd.f32 %v8455_v54, %v615_v11 }
 0x1cf   : > { %v594_v45 = vpop.f32.mrf.mxu1 }
 0x1d0   : > { %v595_v46 = vadd.f32 %v8455_v54, %v594_v45  ;;  %v1638_v45 = vld [vmem:[#allocation5 + $0x1d0] sm:$0xff] }
 0x1d1   : > { %1654 = vmatpush.msrb.mxu3 %v1638_v45 }
 0x1d2   : > { %v660_v50 = vmax.f32 %v595_v46, 0.0 }
 0x1d3   : > { %1655 = vmatpush.msrb.mxu3 %v1637_v57 }
 0x1d4   : > { %760 = vmatmul.f32.gmra.mxu2 %v660_v50 }
 0x1d5   : > { %1656 = vmatpush.msrb.mxu3 %v1636_v2 }
 0x1d7   : > { %1657 = vmatpush.msrb.mxu3 %v1635_v9 }
 0x1d9   : > { %1658 = vmatpush.msrb.mxu3 %v1634_v25  ;;  %v1630_v25 = vld [vmem:[#allocation5 + $0x190] sm:$0xff] }
 0x1db   : > { %1659 = vmatpush.msrb.mxu3 %v1633_v34 }
 0x1dc   : > { %763 = vmatmul.f32.gmra.mxu2 %v661_v53  ;;  %v619_v53 = vadd.f32 %v8455_v54, %v618_v30 }
 0x1df   : > { %v716_v61 = vpop.f32.mrf.mxu2 }
 0x1e0   : > { %v717_v63 = vadd.f32 %v8486_v59, %v716_v61  ;;  %v668_v61 = vmax.f32 %v619_v53, 0.0  ;;  %v1631_v53 = vld [vmem:[#allocation5 + $0x198] sm:$0xff] }
 0x1e2   : > { %v8490_v0 = vadd.f32 %v717_v63, %v8344_v16  ;;  %v607_v16 = vadd.f32 %v8455_v54, %v606_v48  ;;  %v667_v48 = vmax.f32 %v616_v43, 0.0 }
 0x1e4   : > { %766 = vmatmul.f32.gmra.mxu2 %v662_v62  ;;  %844 = vadd.xlane.f32.xlu0 %v8490_v0  ;;  %v947_v8 = vmul.f32 %v8490_v0, %v8490_v0  ;;  %v664_v12 = vmax.f32 %v607_v16, 0.0  ;;  %v625_v16 = vadd.f32 %v8455_v54, %v624_v58 }
 0x1e6   : > { %v670_v11 = vmax.f32 %v625_v16, 0.0 }
 0x1e7   : > { %v719_v4 = vpop.f32.mrf.mxu2 }
 0x1e8   : > { %v720_v6 = vadd.f32 %v8486_v59, %v719_v4  ;;  %v627_v4 = vpop.f32.mrf.mxu3 }
 0x1e9   : > { %v628_v15 = vadd.f32 %v8455_v54, %v627_v4 }
 0x1ea   : > { %v8496_v7 = vadd.f32 %v720_v6, %v8348_v17 }
 0x1ec   : > { %769 = vmatmul.f32.gmra.mxu2 %v663_v5  ;;  %846 = vadd.xlane.f32.xlu1 %v8496_v7  ;;  %v948_v17 = vmul.f32 %v8496_v7, %v8496_v7  ;;  %v669_v5 = vmax.f32 %v622_v1, 0.0 }
 0x1ed   : > { %979 = vadd.xlane.f32.xlu0 %v947_v8 }
 0x1ef   : > { %v722_v10 = vpop.f32.mrf.mxu2 }
 0x1f0   : > { %v723_v13 = vadd.f32 %v8486_v59, %v722_v10 }
 0x1f2   : > { %v8504_v14 = vadd.f32 %v723_v13, %v8352_v18  ;;  %v630_v13 = vpop.f32.mrf.mxu3 }
 0x1f4   : > { %772 = vmatmul.f32.gmra.mxu2 %v664_v12  ;;  %848 = vadd.xlane.f32.xlu2 %v8504_v14  ;;  %v949_v18 = vmul.f32 %v8504_v14, %v8504_v14 }
 0x1f5   : > { %981 = vadd.xlane.f32.xlu1 %v948_v17 }
 0x1f7   : > { %v725_v26 = vpop.f32.mrf.mxu2 }
 0x1f8   : > { %v726_v29 = vadd.f32 %v8486_v59, %v725_v26 }
 0x1fa   : > { %v8512_v31 = vadd.f32 %v726_v29, %v8356_v19 }
 0x1fc   : > { %775 = vmatmul.f32.gmra.mxu2 %v665_v27  ;;  %983 = vadd.xlane.f32.xlu2 %v949_v18  ;;  %v950_v32 = vmul.f32 %v8512_v31, %v8512_v31  ;;  %v671_v27 = vmax.f32 %v628_v15, 0.0 }
 0x1fd   : > { %850 = vadd.xlane.f32.xlu0 %v8512_v31 }
 0x1fe   : > { %985 = vadd.xlane.f32.xlu1 %v950_v32  ;;  %v631_v32 = vadd.f32 %v8455_v54, %v630_v13 }
 0x1ff   : > { %v728_v56 = vpop.f32.mrf.mxu2 }
 0x200   : > { %v729_v19 = vadd.f32 %v8486_v59, %v728_v56  ;;  %v672_v56 = vmax.f32 %v631_v32, 0.0 }
 0x202   : > { %v8522_v38 = vadd.f32 %v729_v19, %v8360_v20 }
 0x204   : > { %778 = vmatmul.f32.gmra.mxu2 %v666_v37  ;;  %852 = vadd.xlane.f32.xlu2 %v8522_v38  ;;  %v951_v41 = vmul.f32 %v8522_v38, %v8522_v38 }
 0x206   : > { %987 = vadd.xlane.f32.xlu0 %v951_v41  ;;  %v1632_v41 = vld [vmem:[#allocation5 + $0x1a0] sm:$0xff] }
 0x207   : > { %v731_v46 = vpop.f32.mrf.mxu2  ;;  %1660 = vmatpush.msrb.mxu3 %v1632_v41 }
 0x208   : > { %v732_v50 = vadd.f32 %v8486_v59, %v731_v46 }
 0x209   : > { %1661 = vmatpush.msrb.mxu3 %v1631_v53 }
 0x20a   : > { %v8530_v51 = vadd.f32 %v732_v50, %v8364_v21 }
 0x20b   : > { %1662 = vmatpush.msrb.mxu3 %v1630_v25 }
 0x20c   : > { %781 = vmatmul.f32.gmra.mxu2 %v667_v48  ;;  %854 = vadd.xlane.f32.xlu1 %v8530_v51  ;;  %v952_v20 = vmul.f32 %v8530_v51, %v8530_v51 }
 0x20e   : > { %989 = vadd.xlane.f32.xlu2 %v952_v20 }
 0x20f   : > { %v734_v60 = vpop.f32.mrf.mxu2 }
 0x210   : > { %v735_v62 = vadd.f32 %v8486_v59, %v734_v60 }
 0x212   : > { %v8538_v63 = vadd.f32 %v735_v62, %v8368_v22  ;;  %v8170_v62 = vmov 128.0  }
 0x213   : > { %7581 = vrcp.f32 %v8170_v62 }
 0x214   : > { %784 = vmatmul.f32.gmra.mxu2 %v668_v61  ;;  %856 = vadd.xlane.f32.xlu0 %v8538_v63  ;;  %v953_v21 = vmul.f32 %v8538_v63, %v8538_v63 }
 0x216   : > { %991 = vadd.xlane.f32.xlu1 %v953_v21 }
 0x217   : > { %v737_v3 = vpop.f32.mrf.mxu2 }
 0x218   : > { %v738_v6 = vadd.f32 %v8486_v59, %v737_v3 }
 0x219   : > { %v7582_v2 = vpop.eup %7581 }
 0x21a   : > { %v8546_v8 = vadd.f32 %v738_v6, %v8372_v23  ;;  %vm913_vm0 = vweird.f32 %v7582_v2 }
 0x21c   : > { %787 = vmatmul.f32.gmra.mxu2 %v669_v5  ;;  %858 = vadd.xlane.f32.xlu2 %v8546_v8  ;;  %v954_v22 = vmul.f32 %v8546_v8, %v8546_v8 }
 0x21e   : > { %993 = vadd.xlane.f32.xlu0 %v954_v22 }
 0x21f   : > { %v740_v10 = vpop.f32.mrf.mxu2 }
 0x220   : > { %v741_v12 = vadd.f32 %v8486_v59, %v740_v10 }
 0x222   : > { %v8554_v17 = vadd.f32 %v741_v12, %v8376_v24  ;;  %v633_v24 = vpop.f32.mrf.mxu3 }
 0x223   : > { %v634_v40 = vadd.f32 %v8455_v54, %v633_v24 }
 0x224   : > { %790 = vmatmul.f32.gmra.mxu2 %v670_v11  ;;  %860 = vadd.xlane.f32.xlu1 %v8554_v17  ;;  %v955_v23 = vmul.f32 %v8554_v17, %v8554_v17 }
 0x225   : > { %v673_v46 = vmax.f32 %v634_v40, 0.0 }
 0x226   : > { %995 = vadd.xlane.f32.xlu2 %v955_v23 }
 0x227   : > { %v743_v26 = vpop.f32.mrf.mxu2 }
 0x228   : > { %v744_v29 = vadd.f32 %v8486_v59, %v743_v26 }
 0x22a   : > { %v8562_v30 = vadd.f32 %v744_v29, %v8380_v28  ;;  %v636_v43 = vpop.f32.mrf.mxu3 }
 0x22b   : > { %v637_v20 = vadd.f32 %v8455_v54, %v636_v43 }
 0x22c   : > { %793 = vmatmul.f32.gmra.mxu2 %v671_v27  ;;  %862 = vadd.xlane.f32.xlu0 %v8562_v30  ;;  %v956_v18 = vmul.f32 %v8562_v30, %v8562_v30 }
 0x22d   : > { %v674_v60 = vmax.f32 %v637_v20, 0.0 }
 0x22e   : > { %997 = vadd.xlane.f32.xlu1 %v956_v18  ;;  %v1629_v18 = vld [vmem:[#allocation5 + $0x188] sm:$0xff] }
 0x22f   : > { %v746_v35 = vpop.f32.mrf.mxu2  ;;  %1663 = vmatpush.msrb.mxu3 %v1629_v18 }
 0x230   : > { %v747_v37 = vadd.f32 %v8486_v59, %v746_v35  ;;  %v1628_v35 = vld [vmem:[#allocation5 + $0x180] sm:$0xff] }
 0x231   : > { %1664 = vmatpush.msrb.mxu3 %v1628_v35 }
 0x232   : > { %v8570_v19 = vadd.f32 %v747_v37, %v8384_v33  ;;  %v639_v58 = vpop.f32.mrf.mxu3 }
 0x233   : > { %v640_v1 = vadd.f32 %v8455_v54, %v639_v58 }
 0x234   : > { %796 = vmatmul.f32.gmra.mxu2 %v672_v56  ;;  %864 = vadd.xlane.f32.xlu2 %v8570_v19  ;;  %v957_v28 = vmul.f32 %v8570_v19, %v8570_v19 }
 0x235   : > { %v675_v4 = vmax.f32 %v640_v1, 0.0 }
 0x236   : > { %999 = vadd.xlane.f32.xlu0 %v957_v28 }
 0x237   : > { %v749_v45 = vpop.f32.mrf.mxu2 }
 0x238   : > { %v750_v48 = vadd.f32 %v8486_v59, %v749_v45 }
 0x23a   : > { %v8578_v50 = vadd.f32 %v750_v48, %v8392_v39  ;;  %v642_v6 = vpop.f32.mrf.mxu3 }
 0x23b   : > { %v643_v9 = vadd.f32 %v8455_v54, %v642_v6 }
 0x23c   : > { %799 = vmatmul.f32.gmra.mxu2 %v673_v46  ;;  %866 = vadd.xlane.f32.xlu1 %v8578_v50  ;;  %v958_v33 = vmul.f32 %v8578_v50, %v8578_v50 }
 0x23d   : > { %v676_v12 = vmax.f32 %v643_v9, 0.0 }
 0x23e   : > { %1001 = vadd.xlane.f32.xlu2 %v958_v33 }
 0x23f   : > { %v752_v57 = vpop.f32.mrf.mxu2 }
 0x240   : > { %v753_v61 = vadd.f32 %v8486_v59, %v752_v57 }
 0x242   : > { %v8586_v39 = vadd.f32 %v753_v61, %v8400_v44  ;;  %v909_v44 = vmul.f32 128.0, %v7582_v2 }
 0x244   : > { %802 = vmatmul.f32.gmra.mxu2 %v674_v60  ;;  %868 = vadd.xlane.f32.xlu0 %v8586_v39  ;;  %v959_v21 = vmul.f32 %v8586_v39, %v8586_v39  ;;  %v910_v10 = vsub.f32 1.0, %v909_v44 }
 0x246   : > { %1003 = vadd.xlane.f32.xlu1 %v959_v21 }
 0x247   : > { %v755_v3 = vpop.f32.mrf.mxu2 }
 0x248   : > { %v756_v5 = vadd.f32 %v8486_v59, %v755_v3 }
 0x24a   : > { %v8594_v22 = vadd.f32 %v756_v5, %v8408_v49  ;;  %v911_v49 = vmul.f32 %v7582_v2, %v910_v10 }
 0x24c   : > { %805 = vmatmul.f32.gmra.mxu2 %v675_v4  ;;  %870 = vadd.xlane.f32.xlu2 %v8594_v22  ;;  %v960_v16 = vmul.f32 %v8594_v22, %v8594_v22  ;;  %v912_v54 = vadd.f32 %v7582_v2, %v911_v49 }
 0x24e   : > { %1005 = vadd.xlane.f32.xlu0 %v960_v16 }
 0x24f   : > { %v758_v11 = vpop.f32.mrf.mxu2 }
 0x250   : > { %v759_v13 = vadd.f32 %v8486_v59, %v758_v11 }
 0x252   : > { %v8602_v23 = vadd.f32 %v759_v13, %v8413_v52  ;;  %v8611_v52 = vsel %vm913_vm0, %v7582_v2, %v912_v54 }
 0x254   : > { %808 = vmatmul.f32.gmra.mxu2 %v676_v12  ;;  %872 = vadd.xlane.f32.xlu1 %v8602_v23  ;;  %v961_v15 = vmul.f32 %v8602_v23, %v8602_v23 }
 0x256   : > { %1007 = vadd.xlane.f32.xlu2 %v961_v15 }
 0x257   : > { %v761_v26 = vpop.f32.mrf.mxu2  ;;  %v845_v27 = vpop.xlane.xlu0 %844 }
 0x258   : > { %v762_v29 = vadd.f32 %v8486_v59, %v761_v26  ;;  %v8617_v34 = vmul.f32 %v8611_v52, %v845_v27 }
 0x25a   : > { %v8609_v24 = vadd.f32 %v762_v29, %v8418_v55  ;;  %v1075_v40 = vmul.f32 %v8617_v34, %v8617_v34 }
 0x25c   : > { %874 = vadd.xlane.f32.xlu0 %v8609_v24  ;;  %v962_v32 = vmul.f32 %v8609_v24, %v8609_v24 }
 0x25e   : > { %1009 = vadd.xlane.f32.xlu1 %v962_v32 }
 0x25f   : > { %v764_v56 = vpop.f32.mrf.mxu2  ;;  %v847_v37 = vpop.xlane.xlu1 %846 }
 0x260   : > { %v765_v55 = vadd.f32 %v8486_v59, %v764_v56  ;;  %v980_v28 = vpop.xlane.xlu0 %979  ;;  %v8630_v48 = vmul.f32 %v8611_v52, %v847_v37  ;;  %v1810_v56 = vld [vmem:[#allocation5 + $0x278] sm:$0xff]  ;;  %v1139_v37 = vsub.f32 %v8490_v0, %v8617_v34 }
 0x261   : > { %v1043_v41 = vmul.f32 %v980_v28, %v8611_v52  ;;  %1816 = vmatpush.msrb.mxu0 %v1810_v56  ;;  %v8679_v34 = vld [vmem:[#allocation10] ss:$0 sm:$0xff]  ;;  %v7904_v56 = vld [vmem:[%s8329_s23 + $0xa0] sm:$0xff] }
 0x262   : > { %v8624_v43 = vadd.f32 %v765_v55, %v8388_v36  ;;  %v1076_v36 = vmul.f32 %v8630_v48, %v8630_v48 }
 0x263   : > { %v1107_v45 = vsub.f32 %v1043_v41, %v1075_v40  ;;  %v8672_v41 = vld [vmem:[#allocation8] ss:$0 sm:$0xff] }
 0x264   : > { %876 = vadd.xlane.f32.xlu2 %v8624_v43  ;;  %v963_v46 = vmul.f32 %v8624_v43, %v8624_v43 }
 0x265   : > { %v1171_v33 = vadd.f32 1e-05, %v1107_v45 }
 0x266   : > { %1011 = vadd.xlane.f32.xlu0 %v963_v46 }
 0x267   : > { %7583 = vrsqrt.f32 %v1171_v33  ;;  %v767_v20 = vpop.f32.mrf.mxu2  ;;  %v849_v53 = vpop.xlane.xlu2 %848  ;;  %vm1209_vm2 = vweird.f32 %v1171_v33 }
 0x268   : > { %v768_v57 = vadd.f32 %v8486_v59, %v767_v20  ;;  %v982_v58 = vpop.xlane.xlu1 %981  ;;  %v8640_v21 = vmul.f32 %v8611_v52, %v849_v53 }
 0x269   : > { %v1044_v60 = vmul.f32 %v982_v58, %v8611_v52  ;;  %v7903_v58 = vld [vmem:[%s8329_s23 + $0x98] sm:$0xff] }
 0x26a   : > { %v8637_v61 = vadd.f32 %v768_v57, %v8396_v42  ;;  %v1077_v44 = vmul.f32 %v8640_v21, %v8640_v21 }
 0x26b   : > { %v1108_v62 = vsub.f32 %v1044_v60, %v1076_v36 }
 0x26c   : > { %878 = vadd.xlane.f32.xlu1 %v8637_v61  ;;  %v964_v1 = vmul.f32 %v8637_v61, %v8637_v61 }
 0x26d   : > { %v7584_v2 = vpop.eup %7583  ;;  %v8645_v3 = vadd.f32 1e-05, %v1108_v62 }
 0x26e   : > { %v1204_v4 = vmul.f32 %v7584_v2, %v1171_v33  ;;  %1013 = vadd.xlane.f32.xlu2 %v964_v1  ;;  %vm1210_vm1 = vweird.f32 %v7584_v2 }
 0x26f   : > { %7585 = vrsqrt.f32 %v8645_v3  ;;  %v770_v5 = vpop.f32.mrf.mxu2  ;;  %v984_v6 = vpop.xlane.xlu2 %983  ;;  %vm1211_vm3 = vmor %vm1209_vm2, %vm1210_vm1  ;;  %vm1219_vm5 = vweird.f32 %v8645_v3 }
 0x270   : > { %v1205_v42 = vmul.f32 %v7584_v2, %v1204_v4  ;;  %v771_v16 = vadd.f32 %v8486_v59, %v770_v5  ;;  %v1045_v9 = vmul.f32 %v984_v6, %v8611_v52  ;;  %v851_v10 = vpop.xlane.xlu0 %850 }
 0x271   : > { %v8653_v11 = vmul.f32 %v8611_v52, %v851_v10  ;;  %v986_v12 = vpop.xlane.xlu1 %985 }
 0x272   : > { %v1206_v13 = vmul.f32 0.5, %v1205_v42  ;;  %v8656_v49 = vadd.f32 %v771_v16, %v8404_v47  ;;  %v1109_v15 = vsub.f32 %v1045_v9, %v1077_v44  ;;  %v1046_v25 = vmul.f32 %v986_v12, %v8611_v52  ;;  %v1809_v9 = vld [vmem:[#allocation5 + $0x270] sm:$0xff] }
 0x273   : > { %v1078_v54 = vmul.f32 %v8653_v11, %v8653_v11  ;;  %v1140_v12 = vsub.f32 %v8496_v7, %v8630_v48  ;;  %1817 = vmatpush.msrb.mxu0 %v1809_v9 }
 0x274   : > { %v1207_v26 = vsub.f32 1.5, %v1206_v13  ;;  %v8661_v27 = vadd.f32 1e-05, %v1109_v15  ;;  %880 = vadd.xlane.f32.xlu0 %v8656_v49  ;;  %v965_v29 = vmul.f32 %v8656_v49, %v8656_v49 }
 0x275   : > { %v7586_v18 = vpop.eup %7585  ;;  %v1110_v32 = vsub.f32 %v1046_v25, %v1078_v54 }
 0x276   : > { %v1214_v47 = vmul.f32 %v7586_v18, %v8645_v3  ;;  %7587 = vrsqrt.f32 %v8661_v27  ;;  %1015 = vadd.xlane.f32.xlu1 %v965_v29  ;;  %v1208_v35 = vmul.f32 %v7584_v2, %v1207_v26  ;;  %vm1220_vm4 = vweird.f32 %v7586_v18 }
 0x277   : > { %v8670_v55 = vadd.f32 1e-05, %v1110_v32  ;;  %v773_v28 = vpop.f32.mrf.mxu2  ;;  %v853_v40 = vpop.xlane.xlu2 %852  ;;  %vm1221_vm6 = vmor %vm1219_vm5, %vm1220_vm4  ;;  %vm1229_vm8 = vweird.f32 %v8661_v27 }
 0x278   : > { %v1215_v45 = vmul.f32 %v7586_v18, %v1214_v47  ;;  %v774_v46 = vadd.f32 %v8486_v59, %v773_v28  ;;  %v8676_v33 = vmul.f32 %v8611_v52, %v853_v40  ;;  %v1212_v20 = vsel %vm1211_vm3, %v7584_v2, %v1208_v35 }
 0x279   : > { %7589 = vrsqrt.f32 %v8670_v55  ;;  %v988_v53 = vpop.xlane.xlu0 %987  ;;  %v1523_v0 = vmul.f32 %v1212_v20, %v1139_v37  ;;  %vm1239_vm10 = vweird.f32 %v8670_v55 }
 0x27a   : > { %v1216_v57 = vmul.f32 0.5, %v1215_v45  ;;  %v8682_v36 = vadd.f32 %v7903_v58, %v774_v46  ;;  %v1079_v60 = vmul.f32 %v8676_v33, %v8676_v33  ;;  %v1047_v62 = vmul.f32 %v988_v53, %v8611_v52 }
 0x27b   : > { %v1559_v1 = vmul.f32 %v8672_v41, %v1523_v0  ;;  %v1141_v58 = vsub.f32 %v8504_v14, %v8640_v21 }
 0x27c   : > { %v7588_v4 = vpop.eup %7587  ;;  %v1217_v5 = vsub.f32 1.5, %v1216_v57  ;;  %882 = vadd.xlane.f32.xlu2 %v8682_v36  ;;  %v966_v2 = vmul.f32 %v8682_v36, %v8682_v36  ;;  %v1111_v42 = vsub.f32 %v1047_v62, %v1079_v60  ;;  %v1808_v62 = vld [vmem:[#allocation5 + $0x268] sm:$0xff] }
 0x27d   : > { %v1224_v6 = vmul.f32 %v7588_v4, %v8661_v27  ;;  %v8693_v44 = vadd.f32 %v8679_v34, %v1559_v1  ;;  %vm1230_vm7 = vweird.f32 %v7588_v4  ;;  %1818 = vmatpush.msrb.mxu0 %v1808_v62  ;;  %v7906_v62 = vld [vmem:[%s8329_s23 + $0xb0] sm:$0xff] }
 0x27e   : > { %1017 = vadd.xlane.f32.xlu0 %v966_v2  ;;  %v1218_v16 = vmul.f32 %v7586_v18, %v1217_v5  ;;  %v8700_v15 = vadd.f32 1e-05, %v1111_v42  ;;  %vm1231_vm9 = vmor %vm1229_vm8, %vm1230_vm7 }
 0x27f   : > { %v8696_v10 = vpop.eup %7589  ;;  %v1225_v13 = vmul.f32 %v7588_v4, %v1224_v6  ;;  %1665 = vmatmul.f32.vlgmr.msrb.gmra.mxu3 %v8693_v44  ;;  %v776_v25 = vpop.f32.mrf.mxu2 }
 0x280   : > { %v855_v54 = vpop.xlane.xlu1 %854  ;;  %v1234_v3 = vmul.f32 %v8696_v10, %v8670_v55  ;;  %v777_v26 = vadd.f32 %v8486_v59, %v776_v25  ;;  %v1222_v7 = vsel %vm1221_vm6, %v7586_v18, %v1218_v16  ;;  %7591 = vrsqrt.f32 %v8700_v15 }
 0x281   : > { %v8708_v29 = vmul.f32 %v8611_v52, %v855_v54  ;;  %v1226_v48 = vmul.f32 0.5, %v1225_v13  ;;  %v990_v32 = vpop.xlane.xlu2 %989  ;;  %v1524_v47 = vmul.f32 %v1222_v7, %v1140_v12  ;;  %vm1240_vm11 = vweird.f32 %v8696_v10 }
 0x282   : > { %v1235_v35 = vmul.f32 %v8696_v10, %v1234_v3  ;;  %v8713_v37 = vadd.f32 %v7904_v56, %v777_v26  ;;  %v1048_v45 = vmul.f32 %v990_v32, %v8611_v52  ;;  %vm1241_vm12 = vmor %vm1239_vm10, %vm1240_vm11  ;;  %v1142_v3 = vsub.f32 %v8512_v31, %v8653_v11  ;;  %v1807_v31 = vld [vmem:[#allocation5 + $0x260] sm:$0xff] }
 0x283   : > { %v1080_v28 = vmul.f32 %v8708_v29, %v8708_v29  ;;  %v1227_v40 = vsub.f32 1.5, %v1226_v48  ;;  %v1560_v46 = vmul.f32 %v8672_v41, %v1524_v47  ;;  %vm1249_vm13 = vweird.f32 %v8700_v15  ;;  %1819 = vmatpush.msrb.mxu0 %v1807_v31 }
 0x284   : > { %v1236_v18 = vmul.f32 0.5, %v1235_v35  ;;  %884 = vadd.xlane.f32.xlu1 %v8713_v37  ;;  %v967_v20 = vmul.f32 %v8713_v37, %v8713_v37 }
 0x285   : > { %v1112_v53 = vsub.f32 %v1048_v45, %v1080_v28  ;;  %v8724_v0 = vadd.f32 %v8679_v34, %v1560_v46  ;;  %v1228_v57 = vmul.f32 %v7588_v4, %v1227_v40 }
 0x286   : > { %v1237_v60 = vsub.f32 1.5, %v1236_v18  ;;  %1019 = vadd.xlane.f32.xlu2 %v967_v20  ;;  %v8728_v1 = vpop.eup %7591 }
 0x287   : > { %v8731_v5 = vadd.f32 1e-05, %v1112_v53  ;;  %1668 = vmatmul.f32.gmra.mxu3 %v8724_v0  ;;  %v779_v27 = vpop.f32.mrf.mxu2  ;;  %v857_v2 = vpop.xlane.xlu0 %856  ;;  %v1232_v6 = vsel %vm1231_vm9, %v7588_v4, %v1228_v57  ;;  %v1244_v14 = vmul.f32 %v8728_v1, %v8700_v15  ;;  %v7905_v4 = vld [vmem:[%s8329_s23 + $0xa8] sm:$0xff]  ;;  %vm1250_vm14 = vweird.f32 %v8728_v1 }
 0x288   : > { %v780_v21 = vadd.f32 %v8486_v59, %v779_v27  ;;  %v8739_v42 = vmul.f32 %v8611_v52, %v857_v2  ;;  %v1525_v16 = vmul.f32 %v1232_v6, %v1141_v58  ;;  %v1238_v12 = vmul.f32 %v8696_v10, %v1237_v60  ;;  %vm1251_vm15 = vmor %vm1249_vm13, %vm1250_vm14 }
 0x289   : > { %7593 = vrsqrt.f32 %v8731_v5  ;;  %v992_v9 = vpop.xlane.xlu1 %991  ;;  %v1245_v13 = vmul.f32 %v8728_v1, %v1244_v14  ;;  %v1143_v6 = vsub.f32 %v8522_v38, %v8676_v33  ;;  %vm1259_vm0 = vweird.f32 %v8731_v5 }
 0x28a   : > { %v8745_v25 = vadd.f32 %v7905_v4, %v780_v21  ;;  %v1081_v54 = vmul.f32 %v8739_v42, %v8739_v42  ;;  %v1049_v26 = vmul.f32 %v992_v9, %v8611_v52  ;;  %v1561_v7 = vmul.f32 %v8672_v41, %v1525_v16 }
 0x28b   : > { %v1242_v48 = vsel %vm1241_vm12, %v8696_v10, %v1238_v12  ;;  %v1246_v32 = vmul.f32 0.5, %v1245_v13 }
 0x28c   : > { %886 = vadd.xlane.f32.xlu0 %v8745_v25  ;;  %v968_v47 = vmul.f32 %v8745_v25, %v8745_v25  ;;  %v1113_v35 = vsub.f32 %v1049_v26, %v1081_v54  ;;  %v8760_v56 = vadd.f32 %v8679_v34, %v1561_v7  ;;  %v1526_v55 = vmul.f32 %v1242_v48, %v1142_v3  ;;  %v1806_v54 = vld [vmem:[#allocation5 + $0x258] sm:$0xff] }
 0x28d   : > { %v1247_v28 = vsub.f32 1.5, %v1246_v32  ;;  %1820 = vmatpush.msrb.mxu0 %v1806_v54  ;;  %v7908_v54 = vld [vmem:[%s8329_s23 + $0xc0] sm:$0xff] }
 0x28e   : > { %1021 = vadd.xlane.f32.xlu1 %v968_v47  ;;  %v8763_v40 = vadd.f32 1e-05, %v1113_v35  ;;  %v1562_v57 = vmul.f32 %v8672_v41, %v1526_v55 }
 0x28f   : > { %v7594_v11 = vpop.eup %7593  ;;  %1671 = vmatmul.f32.gmra.mxu3 %v8760_v56  ;;  %v782_v10 = vpop.f32.mrf.mxu2  ;;  %v1248_v58 = vmul.f32 %v8728_v1, %v1247_v28  ;;  %v7907_v28 = vld [vmem:[%s8329_s23 + $0xb8] sm:$0xff] }
 0x290   : > { %v859_v45 = vpop.xlane.xlu2 %858  ;;  %v1254_v46 = vmul.f32 %v7594_v11, %v8731_v5  ;;  %v783_v18 = vadd.f32 %v8486_v59, %v782_v10  ;;  %7595 = vrsqrt.f32 %v8763_v40  ;;  %v8790_v13 = vadd.f32 %v8679_v34, %v1562_v57  ;;  %v1805_v5 = vld [vmem:[#allocation5 + $0x250] sm:$0xff] }
 0x291   : > { %v8770_v20 = vmul.f32 %v8611_v52, %v859_v45  ;;  %v994_v53 = vpop.xlane.xlu0 %993  ;;  %v1252_v21 = vsel %vm1251_vm15, %v8728_v1, %v1248_v58  ;;  %vm1260_vm1 = vweird.f32 %v7594_v11  ;;  %v1144_v45 = vsub.f32 %v8530_v51, %v8708_v29  ;;  %1821 = vmatpush.msrb.mxu0 %v1805_v5 }
 0x292   : > { %v1255_v60 = vmul.f32 %v7594_v11, %v1254_v46  ;;  %v8776_v27 = vadd.f32 %v7906_v62, %v783_v18  ;;  %v1050_v14 = vmul.f32 %v994_v53, %v8611_v52  ;;  %v1527_v4 = vmul.f32 %v1252_v21, %v1143_v6  ;;  %vm1261_vm2 = vmor %vm1259_vm0, %vm1260_vm1 }
 0x293   : > { %v1082_v2 = vmul.f32 %v8770_v20, %v8770_v20  ;;  %vm1269_vm3 = vweird.f32 %v8763_v40 }
 0x294   : > { %v1256_v16 = vmul.f32 0.5, %v1255_v60  ;;  %888 = vadd.xlane.f32.xlu2 %v8776_v27  ;;  %v969_v9 = vmul.f32 %v8776_v27, %v8776_v27  ;;  %v1563_v47 = vmul.f32 %v8672_v41, %v1527_v4 }
 0x295   : > { %v1114_v12 = vsub.f32 %v1050_v14, %v1082_v2 }
 0x296   : > { %v1257_v15 = vsub.f32 1.5, %v1256_v16  ;;  %1023 = vadd.xlane.f32.xlu0 %v969_v9  ;;  %v7596_v3 = vpop.eup %7595  ;;  %v8817_v60 = vadd.f32 %v8679_v34, %v1563_v47 }
 0x297   : > { %v8793_v38 = vadd.f32 1e-05, %v1114_v12  ;;  %1674 = vmatmul.f32.gmra.mxu3 %v8790_v13  ;;  %v785_v33 = vpop.f32.mrf.mxu2  ;;  %v861_v1 = vpop.xlane.xlu1 %860  ;;  %v1264_v26 = vmul.f32 %v7596_v3, %v8763_v40  ;;  %vm1270_vm4 = vweird.f32 %v7596_v3  ;;  %v1804_v40 = vld [vmem:[#allocation5 + $0x248] sm:$0xff] }
 0x298   : > { %v786_v7 = vadd.f32 %v8486_v59, %v785_v33  ;;  %v8799_v48 = vmul.f32 %v8611_v52, %v861_v1  ;;  %v1258_v35 = vmul.f32 %v7594_v11, %v1257_v15  ;;  %vm1271_vm5 = vmor %vm1269_vm3, %vm1270_vm4  ;;  %1822 = vmatpush.msrb.mxu0 %v1804_v40 }
 0x299   : > { %7597 = vrsqrt.f32 %v8793_v38  ;;  %v996_v32 = vpop.xlane.xlu2 %995  ;;  %v1265_v55 = vmul.f32 %v7596_v3, %v1264_v26  ;;  %v1145_v26 = vsub.f32 %v8538_v63, %v8739_v42  ;;  %vm1279_vm6 = vweird.f32 %v8793_v38 }
 0x29a   : > { %v8804_v31 = vadd.f32 %v7907_v28, %v786_v7  ;;  %v1083_v10 = vmul.f32 %v8799_v48, %v8799_v48  ;;  %v1051_v46 = vmul.f32 %v996_v32, %v8611_v52  ;;  %v1262_v18 = vsel %vm1261_vm2, %v7594_v11, %v1258_v35 }
 0x29b   : > { %v1266_v53 = vmul.f32 0.5, %v1265_v55  ;;  %v1528_v62 = vmul.f32 %v1262_v18, %v1144_v45 }
 0x29c   : > { %890 = vadd.xlane.f32.xlu1 %v8804_v31  ;;  %v970_v57 = vmul.f32 %v8804_v31, %v8804_v31  ;;  %v1115_v58 = vsub.f32 %v1051_v46, %v1083_v10 }
 0x29d   : > { %v1267_v2 = vsub.f32 1.5, %v1266_v53  ;;  %v1564_v12 = vmul.f32 %v8672_v41, %v1528_v62 }
 0x29e   : > { %1025 = vadd.xlane.f32.xlu2 %v970_v57  ;;  %v8820_v51 = vadd.f32 1e-05, %v1115_v58 }
 0x29f   : > { %v7598_v6 = vpop.eup %7597  ;;  %1677 = vmatmul.f32.gmra.mxu3 %v8817_v60  ;;  %v788_v29 = vpop.f32.mrf.mxu2  ;;  %v1268_v4 = vmul.f32 %v7596_v3, %v1267_v2  ;;  %v8844_v28 = vadd.f32 %v8679_v34, %v1564_v12 }
 0x2a0   : > { %v863_v11 = vpop.xlane.xlu0 %862  ;;  %v1274_v14 = vmul.f32 %v7598_v6, %v8793_v38  ;;  %v789_v21 = vadd.f32 %v8486_v59, %v788_v29  ;;  %7599 = vrsqrt.f32 %v8820_v51  ;;  %vm1280_vm7 = vweird.f32 %v7598_v6  ;;  %v7909_v29 = vld [vmem:[%s8329_s23 + $0xc8] sm:$0xff]  ;;  %v1803_v38 = vld [vmem:[#allocation5 + $0x240] sm:$0xff] }
 0x2a1   : > { %v8826_v16 = vmul.f32 %v8611_v52, %v863_v11  ;;  %v998_v9 = vpop.xlane.xlu1 %997  ;;  %v1272_v32 = vsel %vm1271_vm5, %v7596_v3, %v1268_v4  ;;  %vm1281_vm8 = vmor %vm1279_vm6, %vm1280_vm7  ;;  %vm1289_vm9 = vweird.f32 %v8820_v51  ;;  %1823 = vmatpush.msrb.mxu0 %v1803_v38 }
 0x2a2   : > { %v1275_v15 = vmul.f32 %v7598_v6, %v1274_v14  ;;  %v8831_v33 = vadd.f32 %v7908_v54, %v789_v21  ;;  %v1052_v7 = vmul.f32 %v998_v9, %v8611_v52  ;;  %v1529_v10 = vmul.f32 %v1272_v32, %v1145_v26 }
 0x2a3   : > { %v1084_v1 = vmul.f32 %v8826_v16, %v8826_v16  ;;  %v1146_v21 = vsub.f32 %v8546_v8, %v8770_v20 }
 0x2a4   : > { %v1276_v47 = vmul.f32 0.5, %v1275_v15  ;;  %892 = vadd.xlane.f32.xlu0 %v8831_v33  ;;  %v971_v35 = vmul.f32 %v8831_v33, %v8831_v33  ;;  %v1565_v62 = vmul.f32 %v8672_v41, %v1529_v10 }
 0x2a5   : > { %v1116_v55 = vsub.f32 %v1052_v7, %v1084_v1 }
 0x2a6   : > { %v1277_v45 = vsub.f32 1.5, %v1276_v47  ;;  %1027 = vadd.xlane.f32.xlu1 %v971_v35  ;;  %v7600_v46 = vpop.eup %7599  ;;  %v8871_v1 = vadd.f32 %v8679_v34, %v1565_v62 }
 0x2a7   : > { %v8847_v63 = vadd.f32 1e-05, %v1116_v55  ;;  %1680 = vmatmul.f32.gmra.mxu3 %v8844_v28  ;;  %v791_v42 = vpop.f32.mrf.mxu2  ;;  %v865_v3 = vpop.xlane.xlu2 %864  ;;  %v1284_v18 = vmul.f32 %v7600_v46, %v8820_v51  ;;  %vm1290_vm10 = vweird.f32 %v7600_v46 }
 0x2a8   : > { %v792_v53 = vadd.f32 %v8486_v59, %v791_v42  ;;  %v8853_v57 = vmul.f32 %v8611_v52, %v865_v3  ;;  %v1278_v2 = vmul.f32 %v7598_v6, %v1277_v45  ;;  %vm1291_vm11 = vmor %vm1289_vm9, %vm1290_vm10  ;;  %v7910_v42 = vld [vmem:[%s8329_s23 + $0xd0] sm:$0xff] }
 0x2a9   : > { %7601 = vrsqrt.f32 %v8847_v63  ;;  %v1000_v58 = vpop.xlane.xlu0 %999  ;;  %v1285_v5 = vmul.f32 %v7600_v46, %v1284_v18  ;;  %vm1299_vm12 = vweird.f32 %v8847_v63 }
 0x2aa   : > { %v8858_v11 = vadd.f32 %v7909_v29, %v792_v53  ;;  %v1085_v14 = vmul.f32 %v8853_v57, %v8853_v57  ;;  %v1053_v9 = vmul.f32 %v1000_v58, %v8611_v52  ;;  %v1282_v12 = vsel %vm1281_vm8, %v7598_v6, %v1278_v2 }
 0x2ab   : > { %v1286_v4 = vmul.f32 0.5, %v1285_v5  ;;  %v1530_v26 = vmul.f32 %v1282_v12, %v1146_v21 }
 0x2ac   : > { %894 = vadd.xlane.f32.xlu2 %v8858_v11  ;;  %v972_v15 = vmul.f32 %v8858_v11, %v8858_v11  ;;  %v1117_v54 = vsub.f32 %v1053_v9, %v1085_v14  ;;  %v1802_v9 = vld [vmem:[#allocation5 + $0x238] sm:$0xff] }
 0x2ad   : > { %v1287_v7 = vsub.f32 1.5, %v1286_v4  ;;  %v1566_v51 = vmul.f32 %v8672_v41, %v1530_v26  ;;  %1824 = vmatpush.msrb.mxu0 %v1802_v9 }
 0x2ae   : > { %1029 = vadd.xlane.f32.xlu0 %v972_v15  ;;  %v8874_v8 = vadd.f32 1e-05, %v1117_v54  ;;  %v8903_v15 = vld [vmem:[#allocation7 + $0x2] ss:$0 sm:$0xff] }
 0x2af   : > { %v7602_v32 = vpop.eup %7601  ;;  %1683 = vmatmul.f32.gmra.mxu3 %v8871_v1  ;;  %v794_v20 = vpop.f32.mrf.mxu2  ;;  %v1288_v45 = vmul.f32 %v7600_v46, %v1287_v7  ;;  %v8896_v29 = vadd.f32 %v8679_v34, %v1566_v51  ;;  %v1148_v51 = vsub.f32 %v8562_v30, %v8826_v16 }
 0x2b0   : > { %v867_v6 = vpop.xlane.xlu1 %866  ;;  %v1294_v47 = vmul.f32 %v7602_v32, %v8847_v63  ;;  %v795_v35 = vadd.f32 %v8486_v59, %v794_v20  ;;  %7603 = vrsqrt.f32 %v8874_v8  ;;  %v1147_v59 = vsub.f32 %v8554_v17, %v8799_v48 }
 0x2b1   : > { %v8880_v55 = vmul.f32 %v8611_v52, %v867_v6  ;;  %v1002_v10 = vpop.xlane.xlu2 %1001  ;;  %v1292_v58 = vsel %vm1291_vm11, %v7600_v46, %v1288_v45  ;;  %vm1300_vm13 = vweird.f32 %v7602_v32  ;;  %vm1309_vm15 = vweird.f32 %v8874_v8 }
 0x2b2   : > { %v1295_v40 = vmul.f32 %v7602_v32, %v1294_v47  ;;  %v8885_v3 = vadd.f32 %v7910_v42, %v795_v35  ;;  %v1054_v53 = vmul.f32 %v1002_v10, %v8611_v52  ;;  %v1531_v14 = vmul.f32 %v1292_v58, %v1147_v59  ;;  %vm1301_vm14 = vmor %vm1299_vm12, %vm1300_vm13  ;;  %v7912_v47 = vld [vmem:[%s8329_s23 + $0xd8] sm:$0xff] }
 0x2b3   : > { %v1086_v18 = vmul.f32 %v8880_v55, %v8880_v55 }
 0x2b4   : > { %v1296_v62 = vmul.f32 0.5, %v1295_v40  ;;  %896 = vadd.xlane.f32.xlu1 %v8885_v3  ;;  %v973_v2 = vmul.f32 %v8885_v3, %v8885_v3  ;;  %v1567_v38 = vmul.f32 %v8672_v41, %v1531_v14 }
 0x2b5   : > { %v1118_v5 = vsub.f32 %v1054_v53, %v1086_v18 }
 0x2b6   : > { %v1297_v21 = vsub.f32 1.5, %v1296_v62  ;;  %1031 = vadd.xlane.f32.xlu2 %v973_v2  ;;  %v7604_v12 = vpop.eup %7603  ;;  %v8925_v59 = vadd.f32 %v8679_v34, %v1567_v38  ;;  %v1801_v62 = vld [vmem:[#allocation5 + $0x230] sm:$0xff]  ;;  %v1149_v38 = vsub.f32 %v8570_v19, %v8853_v57 }
 0x2b7   : > { %v8899_v17 = vadd.f32 1e-05, %v1118_v5  ;;  %1686 = vmatmul.f32.gmra.mxu3 %v8896_v29  ;;  %v797_v48 = vpop.f32.mrf.mxu2  ;;  %v869_v46 = vpop.xlane.xlu0 %868  ;;  %v1304_v4 = vmul.f32 %v7604_v12, %v8874_v8  ;;  %vm1310_vm0 = vweird.f32 %v7604_v12  ;;  %1825 = vmatpush.msrb.mxu0 %v1801_v62 }
 0x2b8   : > { %v798_v54 = vadd.f32 %v8903_v15, %v797_v48  ;;  %v8907_v26 = vmul.f32 %v8611_v52, %v869_v46  ;;  %v1298_v20 = vmul.f32 %v7602_v32, %v1297_v21  ;;  %vm1311_vm1 = vmor %vm1309_vm15, %vm1310_vm0 }
 0x2b9   : > { %7605 = vrsqrt.f32 %v8899_v17  ;;  %v1004_v7 = vpop.xlane.xlu1 %1003  ;;  %v1305_v6 = vmul.f32 %v7604_v12, %v1304_v4  ;;  %v7913_v4 = vld [vmem:[%s8329_s23 + $0xe0] sm:$0xff]  ;;  %vm1319_vm2 = vweird.f32 %v8899_v17 }
 0x2ba   : > { %v8914_v35 = vadd.f32 %v7912_v47, %v798_v54  ;;  %v1087_v10 = vmul.f32 %v8907_v26, %v8907_v26  ;;  %v1055_v45 = vmul.f32 %v1004_v7, %v8611_v52  ;;  %v1302_v40 = vsel %vm1301_vm14, %v7602_v32, %v1298_v20 }
 0x2bb   : > { %v1306_v42 = vmul.f32 0.5, %v1305_v6  ;;  %v1532_v53 = vmul.f32 %v1302_v40, %v1148_v51 }
 0x2bc   : > { %898 = vadd.xlane.f32.xlu0 %v8914_v35  ;;  %v974_v63 = vmul.f32 %v8914_v35, %v8914_v35  ;;  %v1119_v18 = vsub.f32 %v1055_v45, %v1087_v10 }
 0x2bd   : > { %v1307_v58 = vsub.f32 1.5, %v1306_v42  ;;  %v1568_v8 = vmul.f32 %v8672_v41, %v1532_v53 }
 0x2be   : > { %1033 = vadd.xlane.f32.xlu1 %v974_v63  ;;  %v8928_v30 = vadd.f32 1e-05, %v1119_v18  ;;  %v1800_v63 = vld [vmem:[#allocation5 + $0x228] sm:$0xff] }
 0x2bf   : > { %v7606_v2 = vpop.eup %7605  ;;  %1689 = vmatmul.f32.gmra.mxu3 %v8925_v59  ;;  %v800_v16 = vpop.f32.mrf.mxu2  ;;  %v1308_v48 = vmul.f32 %v7604_v12, %v1307_v58  ;;  %v8950_v45 = vadd.f32 %v8679_v34, %v1568_v8  ;;  %1826 = vmatpush.msrb.mxu0 %v1800_v63 }
 0x2c0   : > { %v871_v32 = vpop.xlane.xlu2 %870  ;;  %v1314_v5 = vmul.f32 %v7606_v2, %v8899_v17  ;;  %v801_v14 = vadd.f32 %v8903_v15, %v800_v16  ;;  %7607 = vrsqrt.f32 %v8928_v30  ;;  %vm1320_vm3 = vweird.f32 %v7606_v2 }
 0x2c1   : > { %v8934_v21 = vmul.f32 %v8611_v52, %v871_v32  ;;  %v1006_v9 = vpop.xlane.xlu0 %1005  ;;  %v1312_v6 = vsel %vm1311_vm1, %v7604_v12, %v1308_v48  ;;  %vm1321_vm4 = vmor %vm1319_vm2, %vm1320_vm3  ;;  %v1150_v48 = vsub.f32 %v8578_v50, %v8880_v55  ;;  %vm1329_vm5 = vweird.f32 %v8928_v30 }
 0x2c2   : > { %v1315_v46 = vmul.f32 %v7606_v2, %v1314_v5  ;;  %v8939_v54 = vadd.f32 %v7913_v4, %v801_v14  ;;  %v1056_v20 = vmul.f32 %v1006_v9, %v8611_v52  ;;  %v1533_v40 = vmul.f32 %v1312_v6, %v1149_v38  ;;  %v7914_v14 = vld [vmem:[%s8329_s23 + $0xe8] sm:$0xff] }
 0x2c3   : > { %v1088_v7 = vmul.f32 %v8934_v21, %v8934_v21 }
 0x2c4   : > { %v1316_v47 = vmul.f32 0.5, %v1315_v46  ;;  %900 = vadd.xlane.f32.xlu2 %v8939_v54  ;;  %v975_v10 = vmul.f32 %v8939_v54, %v8939_v54  ;;  %v1569_v17 = vmul.f32 %v8672_v41, %v1533_v40 }
 0x2c5   : > { %v1120_v51 = vsub.f32 %v1056_v20, %v1088_v7 }
 0x2c6   : > { %v1317_v42 = vsub.f32 1.5, %v1316_v47  ;;  %1035 = vadd.xlane.f32.xlu0 %v975_v10  ;;  %v7608_v18 = vpop.eup %7607  ;;  %v8975_v6 = vadd.f32 %v8679_v34, %v1569_v17 }
 0x2c7   : > { %v8953_v19 = vadd.f32 1e-05, %v1120_v51  ;;  %1692 = vmatmul.f32.gmra.mxu3 %v8950_v45  ;;  %v803_v57 = vpop.f32.mrf.mxu2  ;;  %v873_v12 = vpop.xlane.xlu1 %872  ;;  %v1324_v53 = vmul.f32 %v7608_v18, %v8928_v30  ;;  %v1799_v51 = vld [vmem:[#allocation5 + $0x220] sm:$0xff]  ;;  %vm1330_vm6 = vweird.f32 %v7608_v18 }
 0x2c8   : > { %v804_v58 = vadd.f32 %v8903_v15, %v803_v57  ;;  %v8959_v62 = vmul.f32 %v8611_v52, %v873_v12  ;;  %v1318_v32 = vmul.f32 %v7606_v2, %v1317_v42  ;;  %1827 = vmatpush.msrb.mxu0 %v1799_v51  ;;  %vm1331_vm7 = vmor %vm1329_vm5, %vm1330_vm6 }
 0x2c9   : > { %7609 = vrsqrt.f32 %v8953_v19  ;;  %v1008_v16 = vpop.xlane.xlu2 %1007  ;;  %v1325_v5 = vmul.f32 %v7608_v18, %v1324_v53  ;;  %vm1339_vm8 = vweird.f32 %v8953_v19 }
 0x2ca   : > { %v8964_v9 = vadd.f32 %v7914_v14, %v804_v58  ;;  %v1089_v8 = vmul.f32 %v8959_v62, %v8959_v62  ;;  %v1057_v46 = vmul.f32 %v1008_v16, %v8611_v52  ;;  %v1322_v4 = vsel %vm1321_vm4, %v7606_v2, %v1318_v32  ;;  %v7915_v16 = vld [vmem:[%s8329_s23 + $0xf0] sm:$0xff] }
 0x2cb   : > { %v1326_v7 = vmul.f32 0.5, %v1325_v5  ;;  %v1534_v47 = vmul.f32 %v1322_v4, %v1150_v48  ;;  %v1151_v5 = vsub.f32 %v8586_v39, %v8907_v26 }
 0x2cc   : > { %902 = vadd.xlane.f32.xlu1 %v8964_v9  ;;  %v976_v38 = vmul.f32 %v8964_v9, %v8964_v9  ;;  %v1121_v20 = vsub.f32 %v1057_v46, %v1089_v8 }
 0x2cd   : > { %v1327_v10 = vsub.f32 1.5, %v1326_v7  ;;  %v1570_v30 = vmul.f32 %v8672_v41, %v1534_v47 }
 0x2ce   : > { %1037 = vadd.xlane.f32.xlu2 %v976_v38  ;;  %v8978_v50 = vadd.f32 1e-05, %v1121_v20  ;;  %v1798_v20 = vld [vmem:[#allocation5 + $0x218] sm:$0xff] }
 0x2cf   : > { %v7610_v40 = vpop.eup %7609  ;;  %1695 = vmatmul.f32.gmra.mxu3 %v8975_v6  ;;  %v806_v55 = vpop.f32.mrf.mxu2  ;;  %v1328_v53 = vmul.f32 %v7608_v18, %v1327_v10  ;;  %v9000_v7 = vadd.f32 %v8679_v34, %v1570_v30  ;;  %1828 = vmatpush.msrb.mxu0 %v1798_v20  ;;  %v7916_v30 = vld [vmem:[%s8329_s23 + $0xf8] sm:$0xff] }
 0x2d0   : > { %v875_v2 = vpop.xlane.xlu0 %874  ;;  %v1334_v42 = vmul.f32 %v7610_v40, %v8953_v19  ;;  %v807_v63 = vadd.f32 %v8903_v15, %v806_v55  ;;  %7611 = vrsqrt.f32 %v8978_v50  ;;  %vm1340_vm9 = vweird.f32 %v7610_v40 }
 0x2d1   : > { %v8984_v57 = vmul.f32 %v8611_v52, %v875_v2  ;;  %v1010_v12 = vpop.xlane.xlu1 %1009  ;;  %v1332_v8 = vsel %vm1331_vm7, %v7608_v18, %v1328_v53  ;;  %vm1341_vm10 = vmor %vm1339_vm8, %vm1340_vm9  ;;  %vm1349_vm11 = vweird.f32 %v8978_v50 }
 0x2d2   : > { %v1335_v58 = vmul.f32 %v7610_v40, %v1334_v42  ;;  %v8989_v17 = vadd.f32 %v7915_v16, %v807_v63  ;;  %v1058_v14 = vmul.f32 %v1010_v12, %v8611_v52  ;;  %v1535_v38 = vmul.f32 %v1332_v8, %v1151_v5 }
 0x2d3   : > { %v1090_v32 = vmul.f32 %v8984_v57, %v8984_v57 }
 0x2d4   : > { %v1336_v48 = vmul.f32 0.5, %v1335_v58  ;;  %904 = vadd.xlane.f32.xlu0 %v8989_v17  ;;  %v977_v46 = vmul.f32 %v8989_v17, %v8989_v17  ;;  %v1571_v63 = vmul.f32 %v8672_v41, %v1535_v38  ;;  %v1797_v38 = vld [vmem:[#allocation5 + $0x210] sm:$0xff] }
 0x2d5   : > { %v1122_v4 = vsub.f32 %v1058_v14, %v1090_v32  ;;  %1829 = vmatpush.msrb.mxu0 %v1797_v38 }
 0x2d6   : > { %v1337_v47 = vsub.f32 1.5, %v1336_v48  ;;  %1039 = vadd.xlane.f32.xlu1 %v977_v46  ;;  %v7612_v10 = vpop.eup %7611  ;;  %v9025_v48 = vadd.f32 %v8679_v34, %v1571_v63  ;;  %v1153_v63 = vsub.f32 %v8602_v23, %v8959_v62  ;;  %v1795_v23 = vld [vmem:[#allocation5 + $0x200] sm:$0xff] }
 0x2d7   : > { %v9003_v39 = vadd.f32 1e-05, %v1122_v4  ;;  %1698 = vmatmul.f32.gmra.mxu3 %v9000_v7  ;;  %v809_v26 = vpop.f32.mrf.mxu2  ;;  %v877_v18 = vpop.xlane.xlu2 %876  ;;  %v1344_v51 = vmul.f32 %v7612_v10, %v8978_v50  ;;  %vm1350_vm12 = vweird.f32 %v7612_v10 }
 0x2d8   : > { %v810_v55 = vadd.f32 %v8903_v15, %v809_v26  ;;  %v9009_v2 = vmul.f32 %v8611_v52, %v877_v18  ;;  %v1338_v19 = vmul.f32 %v7610_v40, %v1337_v47  ;;  %v1152_v15 = vsub.f32 %v8594_v22, %v8934_v21  ;;  %vm1351_vm13 = vmor %vm1349_vm11, %vm1350_vm12 }
 0x2d9   : > { %7613 = vrsqrt.f32 %v9003_v39  ;;  %v1012_v42 = vpop.xlane.xlu0 %1011  ;;  %v1345_v12 = vmul.f32 %v7612_v10, %v1344_v51  ;;  %vm1359_vm14 = vweird.f32 %v9003_v39 }
 0x2da   : > { %v9014_v53 = vadd.f32 %v7916_v30, %v810_v55  ;;  %v1091_v58 = vmul.f32 %v9009_v2, %v9009_v2  ;;  %v1059_v16 = vmul.f32 %v1012_v42, %v8611_v52  ;;  %v1342_v32 = vsel %vm1341_vm10, %v7610_v40, %v1338_v19 }
 0x2db   : > { %v1346_v5 = vmul.f32 0.5, %v1345_v12  ;;  %v1536_v46 = vmul.f32 %v1342_v32, %v1152_v15 }
 0x2dc   : > { %906 = vadd.xlane.f32.xlu2 %v9014_v53  ;;  %v978_v14 = vmul.f32 %v9014_v53, %v9014_v53  ;;  %v1123_v8 = vsub.f32 %v1059_v16, %v1091_v58  ;;  %v1796_v16 = vld [vmem:[#allocation5 + $0x208] sm:$0xff] }
 0x2dd   : > { %v1347_v4 = vsub.f32 1.5, %v1346_v5  ;;  %v1572_v18 = vmul.f32 %v8672_v41, %v1536_v46  ;;  %1830 = vmatpush.msrb.mxu0 %v1796_v16 }
 0x2de   : > { %1041 = vadd.xlane.f32.xlu0 %v978_v14  ;;  %v1187_v22 = vadd.f32 1e-05, %v1123_v8 }
 0x2df   : > { %v7614_v20 = vpop.eup %7613  ;;  %1701 = vmatmul.f32.gmra.mxu3 %v9025_v48  ;;  %v879_v21 = vpop.xlane.xlu1 %878  ;;  %v1348_v51 = vmul.f32 %v7612_v10, %v1347_v4  ;;  %v9040_v58 = vadd.f32 %v8679_v34, %v1572_v18  ;;  %1831 = vmatpush.msrb.mxu0 %v1795_v23  ;;  %v1155_v23 = vsub.f32 %v8624_v43, %v9009_v2 }
 0x2e0   : > { %v1354_v40 = vmul.f32 %v7614_v20, %v9003_v39  ;;  %v9031_v47 = vmul.f32 %v8611_v52, %v879_v21  ;;  %7615 = vrsqrt.f32 %v1187_v22  ;;  %vm1360_vm15 = vweird.f32 %v7614_v20 }
 0x2e1   : > { %v1014_v26 = vpop.xlane.xlu2 %1013  ;;  %v1352_v19 = vsel %vm1351_vm13, %v7612_v10, %v1348_v51  ;;  %vm1361_vm0 = vmor %vm1359_vm14, %vm1360_vm15  ;;  %v1154_v39 = vsub.f32 %v8609_v24, %v8984_v57  ;;  %vm1369_vm1 = vweird.f32 %v1187_v22 }
 0x2e2   : > { %v1355_v55 = vmul.f32 %v7614_v20, %v1354_v40  ;;  %v1092_v50 = vmul.f32 %v9031_v47, %v9031_v47  ;;  %v1060_v42 = vmul.f32 %v1014_v26, %v8611_v52  ;;  %v1537_v15 = vmul.f32 %v1352_v19, %v1153_v63 }
 0x2e4   : > { %v1356_v12 = vmul.f32 0.5, %v1355_v55  ;;  %v1124_v30 = vsub.f32 %v1060_v42, %v1092_v50  ;;  %v1573_v4 = vmul.f32 %v8672_v41, %v1537_v15 }
 0x2e6   : > { %v1357_v32 = vsub.f32 1.5, %v1356_v12  ;;  %v1188_v5 = vadd.f32 1e-05, %v1124_v30  ;;  %v7616_v14 = vpop.eup %7615  ;;  %v9054_v50 = vadd.f32 %v8679_v34, %v1573_v4 }
 0x2e7   : > { %1704 = vmatmul.f32.gmra.mxu3 %v9040_v58  ;;  %v881_v8 = vpop.xlane.xlu0 %880  ;;  %v1364_v46 = vmul.f32 %v7616_v14, %v1187_v22  ;;  %vm1370_vm2 = vweird.f32 %v7616_v14 }
 0x2e8   : > { %7617 = vrsqrt.f32 %v1188_v5  ;;  %v9045_v62 = vmul.f32 %v8611_v52, %v881_v8  ;;  %v1358_v38 = vmul.f32 %v7614_v20, %v1357_v32  ;;  %vm1371_vm3 = vmor %vm1369_vm1, %vm1370_vm2  ;;  %vm1379_vm4 = vweird.f32 %v1188_v5 }
 0x2e9   : > { %v1016_v10 = vpop.xlane.xlu1 %1015  ;;  %v1365_v21 = vmul.f32 %v7616_v14, %v1364_v46 }
 0x2ea   : > { %v1061_v40 = vmul.f32 %v1016_v10, %v8611_v52  ;;  %v1093_v26 = vmul.f32 %v9045_v62, %v9045_v62  ;;  %v1362_v18 = vsel %vm1361_vm0, %v7614_v20, %v1358_v38 }
 0x2eb   : > { %v1366_v51 = vmul.f32 0.5, %v1365_v21  ;;  %v1538_v42 = vmul.f32 %v1362_v18, %v1154_v39  ;;  %v1977_v39 = vld [vmem:[#allocation5 + $0x2f8] sm:$0xff] }
 0x2ec   : > { %v1125_v55 = vsub.f32 %v1061_v40, %v1093_v26  ;;  %1983 = vmatpush.msrb.mxu1 %v1977_v39 }
 0x2ed   : > { %v1367_v19 = vsub.f32 1.5, %v1366_v51  ;;  %v1574_v32 = vmul.f32 %v8672_v41, %v1538_v42 }
 0x2ee   : > { %v7618_v63 = vpop.eup %7617  ;;  %v1189_v30 = vadd.f32 1e-05, %v1125_v55 }
 0x2ef   : > { %v1374_v12 = vmul.f32 %v7618_v63, %v1188_v5  ;;  %1707 = vmatmul.f32.gmra.mxu3 %v9054_v50  ;;  %v883_v15 = vpop.xlane.xlu2 %882  ;;  %v1368_v57 = vmul.f32 %v7616_v14, %v1367_v19  ;;  %v9067_v21 = vadd.f32 %v8679_v34, %v1574_v32  ;;  %vm1380_vm5 = vweird.f32 %v7618_v63 }
 0x2f0   : > { %v9058_v24 = vmul.f32 %v8611_v52, %v883_v15  ;;  %7619 = vrsqrt.f32 %v1189_v30  ;;  %vm1381_vm6 = vmor %vm1379_vm4, %vm1380_vm5  ;;  %v1156_v15 = vsub.f32 %v8637_v61, %v9031_v47  ;;  %vm1389_vm7 = vweird.f32 %v1189_v30  ;;  %v9089_v47 = vld [vmem:[#allocation7 + $0x3] ss:$0 sm:$0xff] }
 0x2f1   : > { %v1375_v20 = vmul.f32 %v7618_v63, %v1374_v12  ;;  %v1018_v16 = vpop.xlane.xlu0 %1017  ;;  %v1372_v46 = vsel %vm1371_vm3, %v7616_v14, %v1368_v57 }
 0x2f2   : > { %v1094_v8 = vmul.f32 %v9058_v24, %v9058_v24  ;;  %v1062_v22 = vmul.f32 %v1018_v16, %v8611_v52  ;;  %v1539_v40 = vmul.f32 %v1372_v46, %v1155_v23 }
 0x2f3   : > { %v1376_v10 = vmul.f32 0.5, %v1375_v20 }
 0x2f4   : > { %v1126_v4 = vsub.f32 %v1062_v22, %v1094_v8  ;;  %v1575_v42 = vmul.f32 %v8672_v41, %v1539_v40  ;;  %v1976_v41 = vld [vmem:[#allocation5 + $0x2f0] sm:$0xff] }
 0x2f5   : > { %v1377_v38 = vsub.f32 1.5, %v1376_v10  ;;  %1984 = vmatpush.msrb.mxu1 %v1976_v41  ;;  %v9099_v40 = vld [vmem:[#allocation8] ss:$0 sm:$0xff] }
 0x2f6   : > { %v9069_v26 = vadd.f32 1e-05, %v1126_v4  ;;  %v7620_v18 = vpop.eup %7619  ;;  %v9083_v32 = vadd.f32 %v8679_v34, %v1575_v42  ;;  %v1157_v42 = vsub.f32 %v8656_v49, %v9045_v62 }
 0x2f7   : > { %1710 = vmatmul.f32.gmra.mxu3 %v9067_v21  ;;  %v885_v14 = vpop.xlane.xlu1 %884  ;;  %v1378_v51 = vmul.f32 %v7618_v63, %v1377_v38  ;;  %v1384_v55 = vmul.f32 %v7620_v18, %v1189_v30  ;;  %vm1390_vm8 = vweird.f32 %v7620_v18 }
 0x2f8   : > { %7621 = vrsqrt.f32 %v9069_v26  ;;  %v9074_v43 = vmul.f32 %v8611_v52, %v885_v14  ;;  %vm9094_vm9 = vmor %vm1389_vm7, %vm1390_vm8  ;;  %vm1399_vm10 = vweird.f32 %v9069_v26 }
 0x2f9   : > { %v1020_v2 = vpop.xlane.xlu2 %1019  ;;  %v1385_v5 = vmul.f32 %v7620_v18, %v1384_v55  ;;  %v1382_v12 = vsel %vm1381_vm6, %v7618_v63, %v1378_v51 }
 0x2fa   : > { %v1063_v19 = vmul.f32 %v1020_v2, %v8611_v52  ;;  %v1095_v57 = vmul.f32 %v9074_v43, %v9074_v43  ;;  %v1540_v8 = vmul.f32 %v1382_v12, %v1156_v15 }
 0x2fb   : > { %v1386_v20 = vmul.f32 0.5, %v1385_v5 }
 0x2fc   : > { %v1127_v16 = vsub.f32 %v1063_v19, %v1095_v57  ;;  %v1576_v39 = vmul.f32 %v9099_v40, %v1540_v8 }
 0x2fd   : > { %v1387_v46 = vsub.f32 1.5, %v1386_v20  ;;  %v9110_v20 = vld [vmem:[#allocation10] ss:$0 sm:$0xff] }
 0x2fe   : > { %v7622_v22 = vpop.eup %7621  ;;  %v9086_v63 = vadd.f32 1e-05, %v1127_v16  ;;  %v9113_v16 = vadd.f32 %v9110_v20, %v1576_v39 }
 0x2ff   : > { %v1394_v23 = vmul.f32 %v7622_v22, %v9069_v26  ;;  %1713 = vmatmul.f32.gmra.mxu3 %v9083_v32  ;;  %v887_v61 = vpop.xlane.xlu0 %886  ;;  %v1388_v34 = vmul.f32 %v7620_v18, %v1387_v46  ;;  %v1975_v46 = vld [vmem:[#allocation5 + $0x2e8] sm:$0xff]  ;;  %vm1400_vm11 = vweird.f32 %v7622_v22 }
 0x300   : > { %v9092_v10 = vmul.f32 %v8611_v52, %v887_v61  ;;  %7623 = vrsqrt.f32 %v9086_v63  ;;  %1985 = vmatpush.msrb.mxu1 %v1975_v46  ;;  %vm1401_vm12 = vmor %vm1399_vm10, %vm1400_vm11  ;;  %vm1409_vm13 = vweird.f32 %v9086_v63 }
 0x301   : > { %v1395_v30 = vmul.f32 %v7622_v22, %v1394_v23  ;;  %v1022_v38 = vpop.xlane.xlu1 %1021  ;;  %v1392_v2 = vsel %vm9094_vm9, %v7620_v18, %v1388_v34 }
 0x302   : > { %v1096_v14 = vmul.f32 %v9092_v10, %v9092_v10  ;;  %v1064_v51 = vmul.f32 %v1022_v38, %v8611_v52  ;;  %v1666_v55 = vpop.f32.mrf.mxu3  ;;  %v1541_v8 = vmul.f32 %v1392_v2, %v1157_v42 }
 0x303   : > { %v1396_v5 = vmul.f32 0.5, %v1395_v30  ;;  %v1667_v19 = vadd.f32 %v9089_v47, %v1666_v55 }
 0x304   : > { %v1128_v12 = vsub.f32 %v1064_v51, %v1096_v14  ;;  %v1577_v26 = vmul.f32 %v9099_v40, %v1541_v8  ;;  %v1158_v14 = vsub.f32 %v8682_v36, %v9058_v24 }
 0x305   : > { %v1397_v15 = vsub.f32 1.5, %v1396_v5  ;;  %v1762_v57 = vmax.f32 %v1667_v19, 0.0 }
 0x306   : > { %v9116_v18 = vadd.f32 1e-05, %v1128_v12  ;;  %v7624_v49 = vpop.eup %7623  ;;  %v9132_v5 = vadd.f32 %v9110_v20, %v1577_v26 }
 0x307   : > { %1716 = vmatmul.f32.gmra.mxu3 %v9113_v16  ;;  %1832 = vmatmul.f32.vlgmr.msrb.gmra.mxu0 %v1762_v57  ;;  %v889_v62 = vpop.xlane.xlu2 %888  ;;  %v1398_v41 = vmul.f32 %v7622_v22, %v1397_v15  ;;  %v1404_v23 = vmul.f32 %v7624_v49, %v9086_v63  ;;  %vm1410_vm14 = vweird.f32 %v7624_v49 }
 0x308   : > { %7625 = vrsqrt.f32 %v9116_v18  ;;  %v9122_v61 = vmul.f32 %v8611_v52, %v889_v62  ;;  %vm9142_vm15 = vmor %vm1409_vm13, %vm1410_vm14  ;;  %vm1419_vm0 = vweird.f32 %v9116_v18 }
 0x309   : > { %v1024_v34 = vpop.xlane.xlu0 %1023  ;;  %v1405_v4 = vmul.f32 %v7624_v49, %v1404_v23  ;;  %v1402_v39 = vsel %vm1401_vm12, %v7622_v22, %v1398_v41  ;;  %v1974_v22 = vld [vmem:[#allocation5 + $0x2e0] sm:$0xff] }
 0x30a   : > { %v1669_v30 = vpop.f32.mrf.mxu3  ;;  %v1065_v38 = vmul.f32 %v1024_v34, %v8611_v52  ;;  %v1097_v51 = vmul.f32 %v9122_v61, %v9122_v61  ;;  %v1542_v12 = vmul.f32 %v1402_v39, %v1158_v14  ;;  %1986 = vmatpush.msrb.mxu1 %v1974_v22  ;;  %v1159_v39 = vsub.f32 %v8713_v37, %v9074_v43 }
 0x30b   : > { %v1670_v55 = vadd.f32 %v9089_v47, %v1669_v30  ;;  %v1406_v2 = vmul.f32 0.5, %v1405_v4 }
 0x30c   : > { %v1129_v42 = vsub.f32 %v1065_v38, %v1097_v51  ;;  %v1578_v34 = vmul.f32 %v9099_v40, %v1542_v12 }
 0x30d   : > { %v1763_v19 = vmax.f32 %v1670_v55, 0.0  ;;  %v1407_v57 = vsub.f32 1.5, %v1406_v2 }
 0x30e   : > { %v7626_v15 = vpop.eup %7625  ;;  %v9136_v24 = vadd.f32 1e-05, %v1129_v42  ;;  %v9157_v42 = vadd.f32 %v9110_v20, %v1578_v34 }
 0x30f   : > { %v1414_v36 = vmul.f32 %v7626_v15, %v9116_v18  ;;  %1719 = vmatmul.f32.gmra.mxu3 %v9132_v5  ;;  %1835 = vmatmul.f32.gmra.mxu0 %v1763_v19  ;;  %v891_v8 = vpop.xlane.xlu1 %890  ;;  %v1408_v62 = vmul.f32 %v7624_v49, %v1407_v57  ;;  %v1973_v57 = vld [vmem:[#allocation5 + $0x2d8] sm:$0xff]  ;;  %vm1420_vm1 = vweird.f32 %v7626_v15 }
 0x310   : > { %v9140_v46 = vmul.f32 %v8611_v52, %v891_v8  ;;  %7627 = vrsqrt.f32 %v9136_v24  ;;  %1987 = vmatpush.msrb.mxu1 %v1973_v57  ;;  %vm1421_vm2 = vmor %vm1419_vm0, %vm1420_vm1  ;;  %vm1429_vm3 = vweird.f32 %v9136_v24 }
 0x311   : > { %v1415_v63 = vmul.f32 %v7626_v15, %v1414_v36  ;;  %v1026_v23 = vpop.xlane.xlu2 %1025  ;;  %v1412_v38 = vsel %vm9142_vm15, %v7624_v49, %v1408_v62 }
 0x312   : > { %v1098_v26 = vmul.f32 %v9140_v46, %v9140_v46  ;;  %v1066_v4 = vmul.f32 %v1026_v23, %v8611_v52  ;;  %v1672_v30 = vpop.f32.mrf.mxu3  ;;  %v1543_v12 = vmul.f32 %v1412_v38, %v1159_v39 }
 0x313   : > { %v1416_v14 = vmul.f32 0.5, %v1415_v63  ;;  %v1673_v51 = vadd.f32 %v9089_v47, %v1672_v30 }
 0x314   : > { %v1130_v55 = vsub.f32 %v1066_v4, %v1098_v26  ;;  %v1579_v18 = vmul.f32 %v9099_v40, %v1543_v12  ;;  %v1160_v26 = vsub.f32 %v8745_v25, %v9092_v10 }
 0x315   : > { %v1417_v2 = vsub.f32 1.5, %v1416_v14  ;;  %v1764_v19 = vmax.f32 %v1673_v51, 0.0 }
 0x316   : > { %v9160_v22 = vadd.f32 1e-05, %v1130_v55  ;;  %v7628_v49 = vpop.eup %7627  ;;  %v9176_v14 = vadd.f32 %v9110_v20, %v1579_v18 }
 0x317   : > { %1722 = vmatmul.f32.gmra.mxu3 %v9157_v42  ;;  %1838 = vmatmul.f32.gmra.mxu0 %v1764_v19  ;;  %v893_v37 = vpop.xlane.xlu0 %892  ;;  %v1418_v43 = vmul.f32 %v7626_v15, %v1417_v2  ;;  %v1424_v36 = vmul.f32 %v7628_v49, %v9136_v24  ;;  %vm1430_vm4 = vweird.f32 %v7628_v49 }
 0x318   : > { %7629 = vrsqrt.f32 %v9160_v22  ;;  %v9166_v8 = vmul.f32 %v8611_v52, %v893_v37  ;;  %vm9186_vm5 = vmor %vm1429_vm3, %vm1430_vm4  ;;  %vm1439_vm6 = vweird.f32 %v9160_v22 }
 0x319   : > { %v1028_v62 = vpop.xlane.xlu1 %1027  ;;  %v1425_v41 = vmul.f32 %v7628_v49, %v1424_v36  ;;  %v1422_v34 = vsel %vm1421_vm2, %v7626_v15, %v1418_v43  ;;  %v1972_v15 = vld [vmem:[#allocation5 + $0x2d0] sm:$0xff] }
 0x31a   : > { %v1067_v63 = vmul.f32 %v1028_v62, %v8611_v52  ;;  %v1675_v23 = vpop.f32.mrf.mxu3  ;;  %v1099_v4 = vmul.f32 %v9166_v8, %v9166_v8  ;;  %v1544_v55 = vmul.f32 %v1422_v34, %v1160_v26  ;;  %1988 = vmatpush.msrb.mxu1 %v1972_v15  ;;  %v1161_v34 = vsub.f32 %v8776_v27, %v9122_v61 }
 0x31b   : > { %v1676_v30 = vadd.f32 %v9089_v47, %v1675_v23  ;;  %v1426_v38 = vmul.f32 0.5, %v1425_v41 }
 0x31c   : > { %v1131_v39 = vsub.f32 %v1067_v63, %v1099_v4  ;;  %v1580_v62 = vmul.f32 %v9099_v40, %v1544_v55 }
 0x31d   : > { %v1765_v51 = vmax.f32 %v1676_v30, 0.0  ;;  %v1427_v19 = vsub.f32 1.5, %v1426_v38 }
 0x31e   : > { %v7630_v2 = vpop.eup %7629  ;;  %v9180_v10 = vadd.f32 1e-05, %v1131_v39  ;;  %v9201_v39 = vadd.f32 %v9110_v20, %v1580_v62 }
 0x31f   : > { %v1434_v25 = vmul.f32 %v7630_v2, %v9160_v22  ;;  %1725 = vmatmul.f32.gmra.mxu3 %v9176_v14  ;;  %1841 = vmatmul.f32.gmra.mxu0 %v1765_v51  ;;  %v895_v12 = vpop.xlane.xlu2 %894  ;;  %v1428_v37 = vmul.f32 %v7628_v49, %v1427_v19  ;;  %v1971_v19 = vld [vmem:[#allocation5 + $0x2c8] sm:$0xff]  ;;  %vm1440_vm7 = vweird.f32 %v7630_v2 }
 0x320   : > { %v9184_v57 = vmul.f32 %v8611_v52, %v895_v12  ;;  %7631 = vrsqrt.f32 %v9180_v10  ;;  %1989 = vmatpush.msrb.mxu1 %v1971_v19  ;;  %vm1441_vm8 = vmor %vm1439_vm6, %vm1440_vm7  ;;  %vm1449_vm9 = vweird.f32 %v9180_v10 }
 0x321   : > { %v1435_v24 = vmul.f32 %v7630_v2, %v1434_v25  ;;  %v1030_v36 = vpop.xlane.xlu0 %1029  ;;  %v1432_v23 = vsel %vm9186_vm5, %v7628_v49, %v1428_v37 }
 0x322   : > { %v1100_v18 = vmul.f32 %v9184_v57, %v9184_v57  ;;  %v1678_v41 = vpop.f32.mrf.mxu3  ;;  %v1068_v63 = vmul.f32 %v1030_v36, %v8611_v52  ;;  %v1545_v55 = vmul.f32 %v1432_v23, %v1161_v34 }
 0x323   : > { %v1436_v26 = vmul.f32 0.5, %v1435_v24  ;;  %v1679_v4 = vadd.f32 %v9089_v47, %v1678_v41 }
 0x324   : > { %v1132_v30 = vsub.f32 %v1068_v63, %v1100_v18  ;;  %v1581_v22 = vmul.f32 %v9099_v40, %v1545_v55  ;;  %v1162_v18 = vsub.f32 %v8804_v31, %v9140_v46 }
 0x325   : > { %v1437_v38 = vsub.f32 1.5, %v1436_v26  ;;  %v1766_v51 = vmax.f32 %v1679_v4, 0.0 }
 0x326   : > { %v9204_v15 = vadd.f32 1e-05, %v1132_v30  ;;  %v7632_v49 = vpop.eup %7631  ;;  %v9220_v26 = vadd.f32 %v9110_v20, %v1581_v22 }
 0x327   : > { %1728 = vmatmul.f32.gmra.mxu3 %v9201_v39  ;;  %1844 = vmatmul.f32.gmra.mxu0 %v1766_v51  ;;  %v897_v27 = vpop.xlane.xlu1 %896  ;;  %v1438_v61 = vmul.f32 %v7630_v2, %v1437_v38  ;;  %v1444_v25 = vmul.f32 %v7632_v49, %v9180_v10  ;;  %vm1450_vm10 = vweird.f32 %v7632_v49 }
 0x328   : > { %7633 = vrsqrt.f32 %v9204_v15  ;;  %v9210_v12 = vmul.f32 %v8611_v52, %v897_v27  ;;  %vm9230_vm11 = vmor %vm1449_vm9, %vm1450_vm10  ;;  %vm1459_vm12 = vweird.f32 %v9204_v15 }
 0x329   : > { %v1032_v37 = vpop.xlane.xlu2 %1031  ;;  %v1445_v43 = vmul.f32 %v7632_v49, %v1444_v25  ;;  %v1442_v62 = vsel %vm1441_vm8, %v7630_v2, %v1438_v61  ;;  %v1970_v2 = vld [vmem:[#allocation5 + $0x2c0] sm:$0xff] }
 0x32a   : > { %v1069_v24 = vmul.f32 %v1032_v37, %v8611_v52  ;;  %v1681_v36 = vpop.f32.mrf.mxu3  ;;  %v1101_v41 = vmul.f32 %v9210_v12, %v9210_v12  ;;  %v1546_v30 = vmul.f32 %v1442_v62, %v1162_v18  ;;  %1990 = vmatpush.msrb.mxu1 %v1970_v2  ;;  %v1163_v62 = vsub.f32 %v8831_v33, %v9166_v8 }
 0x32b   : > { %v1682_v63 = vadd.f32 %v9089_v47, %v1681_v36  ;;  %v1446_v23 = vmul.f32 0.5, %v1445_v43 }
 0x32c   : > { %v1133_v34 = vsub.f32 %v1069_v24, %v1101_v41  ;;  %v1582_v37 = vmul.f32 %v9099_v40, %v1546_v30 }
 0x32d   : > { %v1767_v4 = vmax.f32 %v1682_v63, 0.0  ;;  %v1447_v51 = vsub.f32 1.5, %v1446_v23 }
 0x32e   : > { %v7634_v38 = vpop.eup %7633  ;;  %v9224_v46 = vadd.f32 1e-05, %v1133_v34  ;;  %v9245_v34 = vadd.f32 %v9110_v20, %v1582_v37 }
 0x32f   : > { %v1454_v31 = vmul.f32 %v7634_v38, %v9204_v15  ;;  %1731 = vmatmul.f32.gmra.mxu3 %v9220_v26  ;;  %1847 = vmatmul.f32.gmra.mxu0 %v1767_v4  ;;  %v899_v55 = vpop.xlane.xlu0 %898  ;;  %v1448_v27 = vmul.f32 %v7632_v49, %v1447_v51  ;;  %v1969_v51 = vld [vmem:[#allocation5 + $0x2b8] sm:$0xff]  ;;  %vm1460_vm13 = vweird.f32 %v7634_v38 }
 0x330   : > { %v9228_v19 = vmul.f32 %v8611_v52, %v899_v55  ;;  %7635 = vrsqrt.f32 %v9224_v46  ;;  %1991 = vmatpush.msrb.mxu1 %v1969_v51  ;;  %vm1461_vm14 = vmor %vm1459_vm12, %vm1460_vm13  ;;  %vm1469_vm15 = vweird.f32 %v9224_v46 }
 0x331   : > { %v1455_v10 = vmul.f32 %v7634_v38, %v1454_v31  ;;  %v1034_v25 = vpop.xlane.xlu1 %1033  ;;  %v1452_v36 = vsel %vm9230_vm11, %v7632_v49, %v1448_v27 }
 0x332   : > { %v1102_v22 = vmul.f32 %v9228_v19, %v9228_v19  ;;  %v1070_v43 = vmul.f32 %v1034_v25, %v8611_v52  ;;  %v1684_v24 = vpop.f32.mrf.mxu3  ;;  %v1547_v30 = vmul.f32 %v1452_v36, %v1163_v62 }
 0x333   : > { %v1456_v18 = vmul.f32 0.5, %v1455_v10  ;;  %v1685_v41 = vadd.f32 %v9089_v47, %v1684_v24 }
 0x334   : > { %v1134_v63 = vsub.f32 %v1070_v43, %v1102_v22  ;;  %v1583_v15 = vmul.f32 %v9099_v40, %v1547_v30  ;;  %v1164_v22 = vsub.f32 %v8858_v11, %v9184_v57 }
 0x335   : > { %v1457_v23 = vsub.f32 1.5, %v1456_v18  ;;  %v1768_v4 = vmax.f32 %v1685_v41, 0.0 }
 0x336   : > { %v9248_v2 = vadd.f32 1e-05, %v1134_v63  ;;  %v7636_v49 = vpop.eup %7635  ;;  %v9264_v18 = vadd.f32 %v9110_v20, %v1583_v15 }
 0x337   : > { %1734 = vmatmul.f32.gmra.mxu3 %v9245_v34  ;;  %1850 = vmatmul.f32.gmra.mxu0 %v1768_v4  ;;  %v901_v33 = vpop.xlane.xlu2 %900  ;;  %v1458_v8 = vmul.f32 %v7634_v38, %v1457_v23  ;;  %v1464_v31 = vmul.f32 %v7636_v49, %v9224_v46  ;;  %vm1470_vm0 = vweird.f32 %v7636_v49 }
 0x338   : > { %7637 = vrsqrt.f32 %v9248_v2  ;;  %v9254_v55 = vmul.f32 %v8611_v52, %v901_v33  ;;  %vm9274_vm1 = vmor %vm1469_vm15, %vm1470_vm0  ;;  %vm1479_vm2 = vweird.f32 %v9248_v2 }
 0x339   : > { %v1036_v27 = vpop.xlane.xlu0 %1035  ;;  %v1465_v61 = vmul.f32 %v7636_v49, %v1464_v31  ;;  %v1462_v37 = vsel %vm1461_vm14, %v7634_v38, %v1458_v8  ;;  %v1968_v38 = vld [vmem:[#allocation5 + $0x2b0] sm:$0xff] }
 0x33a   : > { %v1687_v10 = vpop.f32.mrf.mxu3  ;;  %v1071_v25 = vmul.f32 %v1036_v27, %v8611_v52  ;;  %v1103_v43 = vmul.f32 %v9254_v55, %v9254_v55  ;;  %v1548_v63 = vmul.f32 %v1462_v37, %v1164_v22  ;;  %1992 = vmatpush.msrb.mxu1 %v1968_v38  ;;  %v1165_v37 = vsub.f32 %v8885_v3, %v9210_v12  ;;  %v1966_v38 = vld [vmem:[#allocation5 + $0x2a0] sm:$0xff] }
 0x33b   : > { %v1688_v24 = vadd.f32 %v9089_v47, %v1687_v10  ;;  %v1466_v36 = vmul.f32 0.5, %v1465_v61 }
 0x33c   : > { %v1135_v62 = vsub.f32 %v1071_v25, %v1103_v43  ;;  %v1584_v27 = vmul.f32 %v9099_v40, %v1548_v63 }
 0x33d   : > { %v1769_v41 = vmax.f32 %v1688_v24, 0.0  ;;  %v1467_v4 = vsub.f32 1.5, %v1466_v36 }
 0x33e   : > { %v7638_v23 = vpop.eup %7637  ;;  %v9268_v57 = vadd.f32 1e-05, %v1135_v62 }
 0x33f   : > { %v1474_v11 = vmul.f32 %v7638_v23, %v9248_v2  ;;  %1737 = vmatmul.f32.gmra.mxu3 %v9264_v18  ;;  %1853 = vmatmul.f32.gmra.mxu0 %v1769_v41  ;;  %v903_v30 = vpop.xlane.xlu1 %902  ;;  %v1468_v33 = vmul.f32 %v7636_v49, %v1467_v4  ;;  %v9289_v41 = vadd.f32 %v9110_v20, %v1584_v27  ;;  %v1967_v4 = vld [vmem:[#allocation5 + $0x2a8] sm:$0xff]  ;;  %vm1480_vm3 = vweird.f32 %v7638_v23 }
 0x340   : > { %v9272_v51 = vmul.f32 %v8611_v52, %v903_v30  ;;  %7639 = vrsqrt.f32 %v9268_v57  ;;  %1993 = vmatpush.msrb.mxu1 %v1967_v4  ;;  %v1965_v30 = vld [vmem:[#allocation5 + $0x298] sm:$0xff]  ;;  %vm9297_vm4 = vmor %vm1479_vm2, %vm1480_vm3  ;;  %vm1489_vm5 = vweird.f32 %v9268_v57 }
 0x341   : > { %v1475_v46 = vmul.f32 %v7638_v23, %v1474_v11  ;;  %v1038_v31 = vpop.xlane.xlu2 %1037  ;;  %v1472_v25 = vsel %vm9274_vm1, %v7636_v49, %v1468_v33 }
 0x342   : > { %v1104_v15 = vmul.f32 %v9272_v51, %v9272_v51  ;;  %v1072_v61 = vmul.f32 %v1038_v31, %v8611_v52  ;;  %v1690_v10 = vpop.f32.mrf.mxu3  ;;  %v1549_v63 = vmul.f32 %v1472_v25, %v1165_v37  ;;  %1994 = vmatpush.msrb.mxu1 %v1966_v38  ;;  %v1166_v25 = vsub.f32 %v8914_v35, %v9228_v19 }
 0x343   : > { %v1476_v22 = vmul.f32 0.5, %v1475_v46  ;;  %v1691_v43 = vadd.f32 %v9089_v47, %v1690_v10 }
 0x344   : > { %v1136_v24 = vsub.f32 %v1072_v61, %v1104_v15  ;;  %v1585_v31 = vmul.f32 %v9099_v40, %v1549_v63  ;;  %1995 = vmatpush.msrb.mxu1 %v1965_v30 }
 0x345   : > { %v1477_v36 = vsub.f32 1.5, %v1476_v22  ;;  %v1770_v62 = vmax.f32 %v1691_v43, 0.0 }
 0x346   : > { %v9292_v11 = vadd.f32 1e-05, %v1136_v24  ;;  %v7640_v49 = vpop.eup %7639 }
 0x347   : > { %1740 = vmatmul.f32.gmra.mxu3 %v9289_v41  ;;  %1856 = vmatmul.f32.gmra.mxu0 %v1770_v62  ;;  %v905_v3 = vpop.xlane.xlu0 %904  ;;  %v1478_v12 = vmul.f32 %v7638_v23, %v1477_v36  ;;  %v1484_v33 = vmul.f32 %v7640_v49, %v9268_v57  ;;  %v9314_v62 = vadd.f32 %v9110_v20, %v1585_v31  ;;  %vm1490_vm6 = vweird.f32 %v7640_v49 }
 0x348   : > { %7641 = vrsqrt.f32 %v9292_v11  ;;  %v9302_v2 = vmul.f32 %v8611_v52, %v905_v3  ;;  %v1964_v3 = vld [vmem:[#allocation5 + $0x290] sm:$0xff]  ;;  %vm9322_vm7 = vmor %vm1489_vm5, %vm1490_vm6  ;;  %vm1499_vm8 = vweird.f32 %v9292_v11 }
 0x349   : > { %v1040_v46 = vpop.xlane.xlu1 %1039  ;;  %v1485_v27 = vmul.f32 %v7640_v49, %v1484_v33  ;;  %v1482_v10 = vsel %vm9297_vm4, %v7638_v23, %v1478_v12  ;;  %1996 = vmatpush.msrb.mxu1 %v1964_v3 }
 0x34a   : > { %v1073_v15 = vmul.f32 %v1040_v46, %v8611_v52  ;;  %v1693_v61 = vpop.f32.mrf.mxu3  ;;  %v1105_v37 = vmul.f32 %v9302_v2, %v9302_v2  ;;  %v1550_v63 = vmul.f32 %v1482_v10, %v1166_v25  ;;  %v1167_v10 = vsub.f32 %v8939_v54, %v9254_v55  ;;  %v1963_v54 = vld [vmem:[#allocation5 + $0x288] sm:$0xff] }
 0x34b   : > { %v1694_v22 = vadd.f32 %v9089_v47, %v1693_v61  ;;  %v1486_v43 = vmul.f32 0.5, %v1485_v27  ;;  %1997 = vmatpush.msrb.mxu1 %v1963_v54 }
 0x34c   : > { %v1137_v24 = vsub.f32 %v1073_v15, %v1105_v37  ;;  %v1586_v46 = vmul.f32 %v9099_v40, %v1550_v63 }
 0x34d   : > { %v1771_v36 = vmax.f32 %v1694_v22, 0.0  ;;  %v1487_v38 = vsub.f32 1.5, %v1486_v43 }
 0x34e   : > { %v7642_v4 = vpop.eup %7641  ;;  %v1201_v35 = vadd.f32 1e-05, %v1137_v24 }
 0x34f   : > { %v1494_v23 = vmul.f32 %v7642_v4, %v9292_v11  ;;  %1743 = vmatmul.f32.gmra.mxu3 %v9314_v62  ;;  %1859 = vmatmul.f32.gmra.mxu0 %v1771_v36  ;;  %v907_v19 = vpop.xlane.xlu2 %906  ;;  %v1488_v30 = vmul.f32 %v7640_v49, %v1487_v38  ;;  %v9336_v36 = vadd.f32 %v9110_v20, %v1586_v46  ;;  %vm1500_vm9 = vweird.f32 %v7642_v4 }
 0x350   : > { %v9320_v12 = vmul.f32 %v8611_v52, %v907_v19  ;;  %7643 = vrsqrt.f32 %v1201_v35  ;;  %vm1501_vm10 = vmor %vm1499_vm8, %vm1500_vm9  ;;  %v1168_v11 = vsub.f32 %v8964_v9, %v9272_v51  ;;  %vm1509_vm11 = vweird.f32 %v1201_v35 }
 0x351   : > { %v1495_v8 = vmul.f32 %v7642_v4, %v1494_v23  ;;  %v1042_v57 = vpop.xlane.xlu0 %1041  ;;  %v1492_v61 = vsel %vm9322_vm7, %v7640_v49, %v1488_v30 }
 0x352   : > { %v1106_v31 = vmul.f32 %v9320_v12, %v9320_v12  ;;  %v1696_v27 = vpop.f32.mrf.mxu3  ;;  %v1074_v15 = vmul.f32 %v1042_v57, %v8611_v52  ;;  %v1551_v63 = vmul.f32 %v1492_v61, %v1167_v10 }
 0x353   : > { %v1496_v25 = vmul.f32 0.5, %v1495_v8  ;;  %v1697_v37 = vadd.f32 %v9089_v47, %v1696_v27 }
 0x354   : > { %v1138_v22 = vsub.f32 %v1074_v15, %v1106_v31  ;;  %v1587_v19 = vmul.f32 %v9099_v40, %v1551_v63 }
 0x355   : > { %v1497_v43 = vsub.f32 1.5, %v1496_v25  ;;  %v1772_v24 = vmax.f32 %v1697_v37, 0.0 }
 0x356   : > { %v1202_v38 = vadd.f32 1e-05, %v1138_v22  ;;  %v7644_v23 = vpop.eup %7643  ;;  %v9345_v31 = vadd.f32 %v9110_v20, %v1587_v19 }
 0x357   : > { %1746 = vmatmul.f32.gmra.mxu3 %v9336_v36  ;;  %1862 = vmatmul.f32.gmra.mxu0 %v1772_v24  ;;  %v1498_v49 = vmul.f32 %v7642_v4, %v1497_v43  ;;  %v1504_v55 = vmul.f32 %v7644_v23, %v1201_v35  ;;  %vm1510_vm12 = vweird.f32 %v7644_v23  ;;  %v1169_v43 = vsub.f32 %v8989_v17, %v9302_v2 }
 0x358   : > { %7645 = vrsqrt.f32 %v1202_v38  ;;  %vm1511_vm13 = vmor %vm1509_vm11, %vm1510_vm12  ;;  %vm1519_vm14 = vweird.f32 %v1202_v38  ;;  %v1170_v2 = vsub.f32 %v9014_v53, %v9320_v12 }
 0x359   : > { %v1505_v3 = vmul.f32 %v7644_v23, %v1504_v55  ;;  %v1502_v33 = vsel %vm1501_vm10, %v7642_v4, %v1498_v49  ;;  %v1962_v4 = vld [vmem:[#allocation5 + $0x280] sm:$0xff] }
 0x35a   : > { %v1699_v30 = vpop.f32.mrf.mxu3  ;;  %v1552_v27 = vmul.f32 %v1502_v33, %v1168_v11  ;;  %1998 = vmatpush.msrb.mxu1 %v1962_v4  ;;  %v9371_v4 = vld [vmem:[#allocation7 + $0x4] ss:$0 sm:$0xff] }
 0x35b   : > { %v1700_v8 = vadd.f32 %v9089_v47, %v1699_v30  ;;  %v1506_v57 = vmul.f32 0.5, %v1505_v3 }
 0x35c   : > { %v1588_v51 = vmul.f32 %v9099_v40, %v1552_v27 }
 0x35d   : > { %v1773_v46 = vmax.f32 %v1700_v8, 0.0  ;;  %v1507_v61 = vsub.f32 1.5, %v1506_v57 }
 0x35e   : > { %v7646_v15 = vpop.eup %7645  ;;  %v9353_v54 = vadd.f32 %v9110_v20, %v1588_v51 }
 0x35f   : > { %v1514_v10 = vmul.f32 %v7646_v15, %v1202_v38  ;;  %1749 = vmatmul.f32.gmra.mxu3 %v9345_v31  ;;  %1865 = vmatmul.f32.gmra.mxu0 %v1773_v46  ;;  %v1508_v25 = vmul.f32 %v7644_v23, %v1507_v61  ;;  %vm1520_vm15 = vweird.f32 %v7646_v15 }
 0x360   : > { %vm1521_vm0 = vmor %vm1519_vm14, %vm1520_vm15 }
 0x361   : > { %v1515_v9 = vmul.f32 %v7646_v15, %v1514_v10  ;;  %v1512_v22 = vsel %vm1511_vm13, %v7644_v23, %v1508_v25  ;;  %v2922_v10 = vld [vmem:[#allocation5 + $0x378] sm:$0xff] }
 0x362   : > { %v1702_v37 = vpop.f32.mrf.mxu3  ;;  %v1553_v55 = vmul.f32 %v1512_v22, %v1169_v43  ;;  %2928 = vmatpush.msra.mxu2 %v2922_v10 }
 0x363   : > { %v1516_v24 = vmul.f32 0.5, %v1515_v9  ;;  %v1703_v35 = vadd.f32 %v9089_v47, %v1702_v37 }
 0x364   : > { %v1589_v23 = vmul.f32 %v9099_v40, %v1553_v55  ;;  %v2921_v55 = vld [vmem:[#allocation5 + $0x370] sm:$0xff] }
 0x365   : > { %v1517_v63 = vsub.f32 1.5, %v1516_v24  ;;  %v1774_v49 = vmax.f32 %v1703_v35, 0.0  ;;  %2929 = vmatpush.msra.mxu2 %v2921_v55 }
 0x366   : > { %v9361_v11 = vadd.f32 %v9110_v20, %v1589_v23 }
 0x367   : > { %1752 = vmatmul.f32.gmra.mxu3 %v9353_v54  ;;  %1868 = vmatmul.f32.gmra.mxu0 %v1774_v49  ;;  %v1518_v19 = vmul.f32 %v7646_v15, %v1517_v63 }
 0x369   : > { %v1522_v17 = vsel %vm1521_vm0, %v7646_v15, %v1518_v19 }
 0x36a   : > { %v1705_v3 = vpop.f32.mrf.mxu3  ;;  %v1554_v38 = vmul.f32 %v1522_v17, %v1170_v2 }
 0x36b   : > { %v1706_v30 = vadd.f32 %v9089_v47, %v1705_v3 }
 0x36c   : > { %v1590_v8 = vmul.f32 %v9099_v40, %v1554_v38 }
 0x36d   : > { %v1775_v33 = vmax.f32 %v1706_v30, 0.0 }
 0x36e   : > { %v9367_v15 = vadd.f32 %v9110_v20, %v1590_v8 }
 0x36f   : > { %1755 = vmatmul.f32.gmra.mxu3 %v9361_v11  ;;  %1871 = vmatmul.f32.gmra.mxu0 %v1775_v33 }
 0x372   : > { %v1708_v57 = vpop.f32.mrf.mxu3 }
 0x373   : > { %v1709_v46 = vadd.f32 %v9089_v47, %v1708_v57 }
 0x375   : > { %v1776_v27 = vmax.f32 %v1709_v46, 0.0 }
 0x377   : > { %1758 = vmatmul.f32.gmra.mxu3 %v9367_v15  ;;  %1874 = vmatmul.f32.gmra.mxu0 %v1776_v27 }
 0x37a   : > { %v1711_v53 = vpop.f32.mrf.mxu3 }
 0x37b   : > { %v1712_v12 = vadd.f32 %v9089_v47, %v1711_v53  ;;  %v2920_v53 = vld [vmem:[#allocation5 + $0x368] sm:$0xff] }
 0x37c   : > { %2930 = vmatpush.msra.mxu2 %v2920_v53 }
 0x37d   : > { %v1777_v61 = vmax.f32 %v1712_v12, 0.0 }
 0x37f   : > { %1877 = vmatmul.f32.gmra.mxu0 %v1777_v61 }
 0x382   : > { %v1714_v40 = vpop.f32.mrf.mxu3 }
 0x383   : > { %v1715_v25 = vadd.f32 %v9089_v47, %v1714_v40 }
 0x384   : > { %v1833_v9 = vpop.f32.mrf.mxu0 }
 0x385   : > { %v1778_v51 = vmax.f32 %v1715_v25, 0.0  ;;  %v1834_v20 = vadd.f32 %v9371_v4, %v1833_v9 }
 0x387   : > { %v1929_v37 = vmax.f32 %v1834_v20, 0.0  ;;  %1880 = vmatmul.f32.gmra.mxu0 %v1778_v51 }
 0x389   : > { %1999 = vmatmul.f32.vlgmr.msrb.gmra.mxu1 %v1929_v37 }
 0x38a   : > { %v1717_v22 = vpop.f32.mrf.mxu3 }
 0x38b   : > { %v1718_v43 = vadd.f32 %v9089_v47, %v1717_v22 }
 0x38c   : > { %v1836_v24 = vpop.f32.mrf.mxu0 }
 0x38d   : > { %v1779_v35 = vmax.f32 %v1718_v43, 0.0  ;;  %v1837_v63 = vadd.f32 %v9371_v4, %v1836_v24 }
 0x38f   : > { %1883 = vmatmul.f32.gmra.mxu0 %v1779_v35  ;;  %v1930_v49 = vmax.f32 %v1837_v63, 0.0  ;;  %v2919_v35 = vld [vmem:[#allocation5 + $0x360] sm:$0xff] }
 0x390   : > { %2931 = vmatpush.msra.mxu2 %v2919_v35 }
 0x391   : > { %2002 = vmatmul.f32.gmra.mxu1 %v1930_v49 }
 0x392   : > { %v1720_v19 = vpop.f32.mrf.mxu3 }
 0x393   : > { %v1721_v23 = vadd.f32 %v9089_v47, %v1720_v19 }
 0x394   : > { %v1839_v3 = vpop.f32.mrf.mxu0 }
 0x395   : > { %v1780_v17 = vmax.f32 %v1721_v23, 0.0  ;;  %v1840_v2 = vadd.f32 %v9371_v4, %v1839_v3 }
 0x397   : > { %1886 = vmatmul.f32.gmra.mxu0 %v1780_v17  ;;  %v1931_v30 = vmax.f32 %v1840_v2, 0.0 }
 0x399   : > { %2005 = vmatmul.f32.gmra.mxu1 %v1931_v30 }
 0x39a   : > { %v1723_v33 = vpop.f32.mrf.mxu3 }
 0x39b   : > { %v1724_v38 = vadd.f32 %v9089_v47, %v1723_v33 }
 0x39c   : > { %v1842_v8 = vpop.f32.mrf.mxu0 }
 0x39d   : > { %v1781_v57 = vmax.f32 %v1724_v38, 0.0  ;;  %v1843_v46 = vadd.f32 %v9371_v4, %v1842_v8 }
 0x39f   : > { %1889 = vmatmul.f32.gmra.mxu0 %v1781_v57  ;;  %v1932_v27 = vmax.f32 %v1843_v46, 0.0  ;;  %v2918_v57 = vld [vmem:[#allocation5 + $0x358] sm:$0xff] }
 0x3a0   : > { %2932 = vmatpush.msra.mxu2 %v2918_v57 }
 0x3a1   : > { %2008 = vmatmul.f32.gmra.mxu1 %v1932_v27 }
 0x3a2   : > { %v1726_v12 = vpop.f32.mrf.mxu3 }
 0x3a3   : > { %v1727_v61 = vadd.f32 %v9089_v47, %v1726_v12 }
 0x3a4   : > { %v1845_v10 = vpop.f32.mrf.mxu0 }
 0x3a5   : > { %v1782_v40 = vmax.f32 %v1727_v61, 0.0  ;;  %v1846_v25 = vadd.f32 %v9371_v4, %v1845_v10 }
 0x3a7   : > { %1892 = vmatmul.f32.gmra.mxu0 %v1782_v40  ;;  %v1933_v9 = vmax.f32 %v1846_v25, 0.0 }
 0x3a9   : > { %2011 = vmatmul.f32.gmra.mxu1 %v1933_v9 }
 0x3aa   : > { %v1729_v51 = vpop.f32.mrf.mxu3 }
 0x3ab   : > { %v1730_v20 = vadd.f32 %v9089_v47, %v1729_v51 }
 0x3ac   : > { %v1848_v37 = vpop.f32.mrf.mxu0 }
 0x3ad   : > { %v1783_v22 = vmax.f32 %v1730_v20, 0.0  ;;  %v1849_v43 = vadd.f32 %v9371_v4, %v1848_v37 }
 0x3af   : > { %1895 = vmatmul.f32.gmra.mxu0 %v1783_v22  ;;  %v1934_v24 = vmax.f32 %v1849_v43, 0.0  ;;  %v2917_v22 = vld [vmem:[#allocation5 + $0x350] sm:$0xff] }
 0x3b0   : > { %2933 = vmatpush.msra.mxu2 %v2917_v22 }
 0x3b1   : > { %2014 = vmatmul.f32.gmra.mxu1 %v1934_v24 }
 0x3b2   : > { %v1732_v63 = vpop.f32.mrf.mxu3 }
 0x3b3   : > { %v1733_v49 = vadd.f32 %v9089_v47, %v1732_v63 }
 0x3b4   : > { %v1851_v55 = vpop.f32.mrf.mxu0 }
 0x3b5   : > { %v1784_v19 = vmax.f32 %v1733_v49, 0.0  ;;  %v1852_v23 = vadd.f32 %v9371_v4, %v1851_v55 }
 0x3b7   : > { %1898 = vmatmul.f32.gmra.mxu0 %v1784_v19  ;;  %v1935_v3 = vmax.f32 %v1852_v23, 0.0 }
 0x3b9   : > { %2017 = vmatmul.f32.gmra.mxu1 %v1935_v3 }
 0x3ba   : > { %v1735_v17 = vpop.f32.mrf.mxu3 }
 0x3bb   : > { %v1736_v2 = vadd.f32 %v9089_v47, %v1735_v17 }
 0x3bc   : > { %v1854_v30 = vpop.f32.mrf.mxu0 }
 0x3bd   : > { %v1785_v33 = vmax.f32 %v1736_v2, 0.0  ;;  %v1855_v38 = vadd.f32 %v9371_v4, %v1854_v30 }
 0x3bf   : > { %1901 = vmatmul.f32.gmra.mxu0 %v1785_v33  ;;  %v1936_v8 = vmax.f32 %v1855_v38, 0.0  ;;  %v2916_v33 = vld [vmem:[#allocation5 + $0x348] sm:$0xff] }
 0x3c0   : > { %2934 = vmatpush.msra.mxu2 %v2916_v33 }
 0x3c1   : > { %2020 = vmatmul.f32.gmra.mxu1 %v1936_v8 }
 0x3c2   : > { %v1738_v46 = vpop.f32.mrf.mxu3 }
 0x3c3   : > { %v1739_v27 = vadd.f32 %v9089_v47, %v1738_v46 }
 0x3c4   : > { %v1857_v53 = vpop.f32.mrf.mxu0 }
 0x3c5   : > { %v1786_v12 = vmax.f32 %v1739_v27, 0.0  ;;  %v1858_v61 = vadd.f32 %v9371_v4, %v1857_v53 }
 0x3c7   : > { %v1937_v10 = vmax.f32 %v1858_v61, 0.0  ;;  %1904 = vmatmul.f32.gmra.mxu0 %v1786_v12 }
 0x3c9   : > { %2023 = vmatmul.f32.gmra.mxu1 %v1937_v10 }
 0x3ca   : > { %v1741_v40 = vpop.f32.mrf.mxu3 }
 0x3cb   : > { %v1742_v25 = vadd.f32 %v9089_v47, %v1741_v40 }
 0x3cc   : > { %v1860_v9 = vpop.f32.mrf.mxu0 }
 0x3cd   : > { %v1787_v51 = vmax.f32 %v1742_v25, 0.0  ;;  %v1861_v20 = vadd.f32 %v9371_v4, %v1860_v9 }
 0x3cf   : > { %v1938_v37 = vmax.f32 %v1861_v20, 0.0  ;;  %1907 = vmatmul.f32.gmra.mxu0 %v1787_v51  ;;  %v2915_v51 = vld [vmem:[#allocation5 + $0x340] sm:$0xff] }
 0x3d0   : > { %2935 = vmatpush.msra.mxu2 %v2915_v51 }
 0x3d1   : > { %2026 = vmatmul.f32.gmra.mxu1 %v1938_v37  ;;  %v7919_v37 = vld [vmem:[#allocation7 + $0x3] ss:$0 sm:$0xff] }
 0x3d2   : > { %v1744_v43 = vpop.f32.mrf.mxu3 }
 0x3d3   : > { %v1745_v24 = vadd.f32 %v9089_v47, %v1744_v43 }
 0x3d4   : > { %v1863_v35 = vpop.f32.mrf.mxu0 }
 0x3d5   : > { %v1788_v63 = vmax.f32 %v1745_v24, 0.0  ;;  %v1864_v49 = vadd.f32 %v9371_v4, %v1863_v35 }
 0x3d7   : > { %v1939_v55 = vmax.f32 %v1864_v49, 0.0  ;;  %1910 = vmatmul.f32.gmra.mxu0 %v1788_v63 }
 0x3d9   : > { %2029 = vmatmul.f32.gmra.mxu1 %v1939_v55 }
 0x3da   : > { %v1747_v19 = vpop.f32.mrf.mxu3 }
 0x3db   : > { %v1748_v23 = vadd.f32 %v9089_v47, %v1747_v19 }
 0x3dc   : > { %v1866_v3 = vpop.f32.mrf.mxu0 }
 0x3dd   : > { %v1789_v17 = vmax.f32 %v1748_v23, 0.0  ;;  %v1867_v2 = vadd.f32 %v9371_v4, %v1866_v3 }
 0x3df   : > { %v1940_v30 = vmax.f32 %v1867_v2, 0.0  ;;  %1913 = vmatmul.f32.gmra.mxu0 %v1789_v17  ;;  %v2914_v17 = vld [vmem:[#allocation5 + $0x338] sm:$0xff]  ;;  %v9403_v2 = vld [vmem:[#allocation7 + $0x5] ss:$0 sm:$0xff] }
 0x3e0   : > { %2936 = vmatpush.msra.mxu2 %v2914_v17 }
 0x3e1   : > { %2032 = vmatmul.f32.gmra.mxu1 %v1940_v30 }
 0x3e2   : > { %v1750_v38 = vpop.f32.mrf.mxu3 }
 0x3e3   : > { %v1751_v8 = vadd.f32 %v9089_v47, %v1750_v38 }
 0x3e4   : > { %v1869_v57 = vpop.f32.mrf.mxu0 }
 0x3e5   : > { %v1790_v46 = vmax.f32 %v1751_v8, 0.0  ;;  %v1870_v27 = vadd.f32 %v9371_v4, %v1869_v57 }
 0x3e7   : > { %v1941_v53 = vmax.f32 %v1870_v27, 0.0  ;;  %1916 = vmatmul.f32.gmra.mxu0 %v1790_v46  ;;  %v3089_v27 = vld [vmem:[#allocation5 + $0x3f8] sm:$0xff] }
 0x3e8   : > { %3095 = vmatpush.msra.mxu3 %v3089_v27 }
 0x3e9   : > { %2035 = vmatmul.f32.gmra.mxu1 %v1941_v53 }
 0x3ea   : > { %v1753_v12 = vpop.f32.mrf.mxu3 }
 0x3eb   : > { %v1754_v61 = vadd.f32 %v9089_v47, %v1753_v12 }
 0x3ec   : > { %v1872_v10 = vpop.f32.mrf.mxu0 }
 0x3ed   : > { %v1791_v40 = vmax.f32 %v1754_v61, 0.0  ;;  %v1873_v25 = vadd.f32 %v9371_v4, %v1872_v10 }
 0x3ef   : > { %v1942_v9 = vmax.f32 %v1873_v25, 0.0  ;;  %1919 = vmatmul.f32.gmra.mxu0 %v1791_v40 }
 0x3f1   : > { %2038 = vmatmul.f32.gmra.mxu1 %v1942_v9 }
 0x3f2   : > { %v1756_v20 = vpop.f32.mrf.mxu3 }
 0x3f3   : > { %v1757_v22 = vadd.f32 %v7919_v37, %v1756_v20 }
 0x3f4   : > { %v1875_v43 = vpop.f32.mrf.mxu0 }
 0x3f5   : > { %v1792_v24 = vmax.f32 %v1757_v22, 0.0  ;;  %v1876_v35 = vadd.f32 %v9371_v4, %v1875_v43 }
 0x3f7   : > { %v1943_v63 = vmax.f32 %v1876_v35, 0.0  ;;  %1922 = vmatmul.f32.gmra.mxu0 %v1792_v24 }
 0x3f9   : > { %2041 = vmatmul.f32.gmra.mxu1 %v1943_v63 }
 0x3fa   : > { %v1759_v47 = vpop.f32.mrf.mxu3 }
 0x3fb   : > { %v1760_v49 = vadd.f32 %v7919_v37, %v1759_v47 }
 0x3fc   : > { %v1878_v55 = vpop.f32.mrf.mxu0 }
 0x3fd   : > { %v1793_v19 = vmax.f32 %v1760_v49, 0.0  ;;  %v1879_v23 = vadd.f32 %v9371_v4, %v1878_v55 }
 0x3ff   : > { %v1944_v3 = vmax.f32 %v1879_v23, 0.0  ;;  %1925 = vmatmul.f32.gmra.mxu0 %v1793_v19 }
 0x401   : > { %2044 = vmatmul.f32.gmra.mxu1 %v1944_v3 }
 0x404   : > { %v1881_v30 = vpop.f32.mrf.mxu0 }
 0x405   : > { %v1882_v33 = vadd.f32 %v9371_v4, %v1881_v30 }
 0x406   : > { %v2000_v38 = vpop.f32.mrf.mxu1 }
 0x407   : > { %v1945_v8 = vmax.f32 %v1882_v33, 0.0  ;;  %v2001_v57 = vadd.f32 %v9403_v2, %v2000_v38 }
 0x409   : > { %v9408_v46 = vadd.f32 %v2001_v57, %v8693_v44  ;;  %2047 = vmatmul.f32.gmra.mxu1 %v1945_v8  ;;  %v2913_v44 = vld [vmem:[#allocation5 + $0x330] sm:$0xff] }
 0x40a   : > { %2937 = vmatpush.msra.mxu2 %v2913_v44 }
 0x40b   : > { %2128 = vadd.xlane.f32.xlu1 %v9408_v46  ;;  %v2224_v53 = vmul.f32 %v9408_v46, %v9408_v46 }
 0x40c   : > { %v1884_v12 = vpop.f32.mrf.mxu0 }
 0x40d   : > { %v1885_v61 = vadd.f32 %v9371_v4, %v1884_v12  ;;  %2256 = vadd.xlane.f32.xlu2 %v2224_v53 }
 0x40e   : > { %v2003_v10 = vpop.f32.mrf.mxu1 }
 0x40f   : > { %v1946_v40 = vmax.f32 %v1885_v61, 0.0  ;;  %v2004_v25 = vadd.f32 %v9403_v2, %v2003_v10 }
 0x411   : > { %v9416_v9 = vadd.f32 %v2004_v25, %v8724_v0  ;;  %2050 = vmatmul.f32.gmra.mxu1 %v1946_v40  ;;  %v3088_v0 = vld [vmem:[#allocation5 + $0x3f0] sm:$0xff] }
 0x412   : > { %3096 = vmatpush.msra.mxu3 %v3088_v0 }
 0x413   : > { %2130 = vadd.xlane.f32.xlu0 %v9416_v9  ;;  %v2225_v51 = vmul.f32 %v9416_v9, %v9416_v9 }
 0x414   : > { %v1887_v20 = vpop.f32.mrf.mxu0 }
 0x415   : > { %v1888_v37 = vadd.f32 %v9371_v4, %v1887_v20  ;;  %2258 = vadd.xlane.f32.xlu1 %v2225_v51 }
 0x416   : > { %v2006_v22 = vpop.f32.mrf.mxu1 }
 0x417   : > { %v1947_v43 = vmax.f32 %v1888_v37, 0.0  ;;  %v2007_v24 = vadd.f32 %v9403_v2, %v2006_v22 }
 0x419   : > { %v9424_v35 = vadd.f32 %v2007_v24, %v8760_v56  ;;  %2053 = vmatmul.f32.gmra.mxu1 %v1947_v43  ;;  %v2912_v56 = vld [vmem:[#allocation5 + $0x328] sm:$0xff] }
 0x41a   : > { %2938 = vmatpush.msra.mxu2 %v2912_v56 }
 0x41b   : > { %2132 = vadd.xlane.f32.xlu2 %v9424_v35  ;;  %v2226_v63 = vmul.f32 %v9424_v35, %v9424_v35 }
 0x41c   : > { %v1890_v47 = vpop.f32.mrf.mxu0 }
 0x41d   : > { %v1891_v49 = vadd.f32 %v9371_v4, %v1890_v47  ;;  %2260 = vadd.xlane.f32.xlu0 %v2226_v63 }
 0x41e   : > { %v2009_v55 = vpop.f32.mrf.mxu1 }
 0x41f   : > { %v1948_v19 = vmax.f32 %v1891_v49, 0.0  ;;  %v2010_v23 = vadd.f32 %v9403_v2, %v2009_v55 }
 0x421   : > { %v9432_v3 = vadd.f32 %v2010_v23, %v8790_v13  ;;  %2056 = vmatmul.f32.gmra.mxu1 %v1948_v19  ;;  %v3087_v13 = vld [vmem:[#allocation5 + $0x3e8] sm:$0xff] }
 0x422   : > { %3097 = vmatpush.msra.mxu3 %v3087_v13 }
 0x423   : > { %2134 = vadd.xlane.f32.xlu1 %v9432_v3  ;;  %v2227_v17 = vmul.f32 %v9432_v3, %v9432_v3 }
 0x424   : > { %v1893_v30 = vpop.f32.mrf.mxu0 }
 0x425   : > { %v1894_v33 = vadd.f32 %v9371_v4, %v1893_v30  ;;  %2262 = vadd.xlane.f32.xlu2 %v2227_v17 }
 0x426   : > { %v2012_v38 = vpop.f32.mrf.mxu1 }
 0x427   : > { %v1949_v8 = vmax.f32 %v1894_v33, 0.0  ;;  %v2013_v57 = vadd.f32 %v9403_v2, %v2012_v38 }
 0x429   : > { %v9440_v27 = vadd.f32 %v2013_v57, %v8817_v60  ;;  %2059 = vmatmul.f32.gmra.mxu1 %v1949_v8  ;;  %v2911_v60 = vld [vmem:[#allocation5 + $0x320] sm:$0xff] }
 0x42a   : > { %2939 = vmatpush.msra.mxu2 %v2911_v60 }
 0x42b   : > { %2136 = vadd.xlane.f32.xlu0 %v9440_v27  ;;  %v2228_v53 = vmul.f32 %v9440_v27, %v9440_v27 }
 0x42c   : > { %v1896_v12 = vpop.f32.mrf.mxu0 }
 0x42d   : > { %v1897_v61 = vadd.f32 %v9371_v4, %v1896_v12  ;;  %2264 = vadd.xlane.f32.xlu1 %v2228_v53 }
 0x42e   : > { %v2015_v10 = vpop.f32.mrf.mxu1 }
 0x42f   : > { %v1950_v40 = vmax.f32 %v1897_v61, 0.0  ;;  %v2016_v25 = vadd.f32 %v9403_v2, %v2015_v10 }
 0x431   : > { %v9448_v44 = vadd.f32 %v2016_v25, %v8844_v28  ;;  %2062 = vmatmul.f32.gmra.mxu1 %v1950_v40  ;;  %v3086_v28 = vld [vmem:[#allocation5 + $0x3e0] sm:$0xff] }
 0x432   : > { %3098 = vmatpush.msra.mxu3 %v3086_v28 }
 0x433   : > { %2138 = vadd.xlane.f32.xlu2 %v9448_v44  ;;  %v2229_v51 = vmul.f32 %v9448_v44, %v9448_v44 }
 0x434   : > { %v1899_v20 = vpop.f32.mrf.mxu0 }
 0x435   : > { %v1900_v37 = vadd.f32 %v9371_v4, %v1899_v20  ;;  %2266 = vadd.xlane.f32.xlu0 %v2229_v51 }
 0x436   : > { %v2018_v22 = vpop.f32.mrf.mxu1 }
 0x437   : > { %v1951_v43 = vmax.f32 %v1900_v37, 0.0  ;;  %v2019_v24 = vadd.f32 %v9403_v2, %v2018_v22 }
 0x439   : > { %v9456_v0 = vadd.f32 %v2019_v24, %v8871_v1  ;;  %2065 = vmatmul.f32.gmra.mxu1 %v1951_v43  ;;  %v2910_v1 = vld [vmem:[#allocation5 + $0x318] sm:$0xff] }
 0x43a   : > { %2940 = vmatpush.msra.mxu2 %v2910_v1 }
 0x43b   : > { %2140 = vadd.xlane.f32.xlu1 %v9456_v0  ;;  %v2230_v63 = vmul.f32 %v9456_v0, %v9456_v0 }
 0x43c   : > { %v1902_v47 = vpop.f32.mrf.mxu0 }
 0x43d   : > { %v1903_v49 = vadd.f32 %v9371_v4, %v1902_v47  ;;  %2268 = vadd.xlane.f32.xlu2 %v2230_v63 }
 0x43e   : > { %v2021_v55 = vpop.f32.mrf.mxu1 }
 0x43f   : > { %v1952_v19 = vmax.f32 %v1903_v49, 0.0  ;;  %v2022_v23 = vadd.f32 %v9403_v2, %v2021_v55 }
 0x441   : > { %v9464_v56 = vadd.f32 %v2022_v23, %v8896_v29  ;;  %2068 = vmatmul.f32.gmra.mxu1 %v1952_v19  ;;  %v3085_v29 = vld [vmem:[#allocation5 + $0x3d8] sm:$0xff] }
 0x442   : > { %3099 = vmatpush.msra.mxu3 %v3085_v29 }
 0x443   : > { %2142 = vadd.xlane.f32.xlu0 %v9464_v56  ;;  %v2231_v17 = vmul.f32 %v9464_v56, %v9464_v56 }
 0x444   : > { %v1905_v30 = vpop.f32.mrf.mxu0 }
 0x445   : > { %v1906_v33 = vadd.f32 %v9371_v4, %v1905_v30  ;;  %2270 = vadd.xlane.f32.xlu1 %v2231_v17 }
 0x446   : > { %v2024_v38 = vpop.f32.mrf.mxu1 }
 0x447   : > { %v1953_v8 = vmax.f32 %v1906_v33, 0.0  ;;  %v2025_v57 = vadd.f32 %v9403_v2, %v2024_v38 }
 0x449   : > { %v9472_v13 = vadd.f32 %v2025_v57, %v8925_v59  ;;  %2071 = vmatmul.f32.gmra.mxu1 %v1953_v8  ;;  %v2909_v59 = vld [vmem:[#allocation5 + $0x310] sm:$0xff] }
 0x44a   : > { %2941 = vmatpush.msra.mxu2 %v2909_v59 }
 0x44b   : > { %2144 = vadd.xlane.f32.xlu2 %v9472_v13  ;;  %v2232_v53 = vmul.f32 %v9472_v13, %v9472_v13 }
 0x44c   : > { %v1908_v12 = vpop.f32.mrf.mxu0 }
 0x44d   : > { %v1909_v61 = vadd.f32 %v9371_v4, %v1908_v12  ;;  %2272 = vadd.xlane.f32.xlu0 %v2232_v53 }
 0x44e   : > { %v2027_v10 = vpop.f32.mrf.mxu1 }
 0x44f   : > { %v1954_v40 = vmax.f32 %v1909_v61, 0.0  ;;  %v2028_v25 = vadd.f32 %v9403_v2, %v2027_v10 }
 0x451   : > { %v9480_v60 = vadd.f32 %v2028_v25, %v8950_v45  ;;  %2074 = vmatmul.f32.gmra.mxu1 %v1954_v40  ;;  %v3084_v45 = vld [vmem:[#allocation5 + $0x3d0] sm:$0xff] }
 0x452   : > { %3100 = vmatpush.msra.mxu3 %v3084_v45 }
 0x453   : > { %2146 = vadd.xlane.f32.xlu1 %v9480_v60  ;;  %v2233_v51 = vmul.f32 %v9480_v60, %v9480_v60 }
 0x454   : > { %v1911_v20 = vpop.f32.mrf.mxu0 }
 0x455   : > { %v1912_v37 = vadd.f32 %v9371_v4, %v1911_v20  ;;  %2274 = vadd.xlane.f32.xlu2 %v2233_v51 }
 0x456   : > { %v2030_v22 = vpop.f32.mrf.mxu1 }
 0x457   : > { %v1955_v43 = vmax.f32 %v1912_v37, 0.0  ;;  %v2031_v24 = vadd.f32 %v9403_v2, %v2030_v22 }
 0x459   : > { %v9488_v28 = vadd.f32 %v2031_v24, %v8975_v6  ;;  %2077 = vmatmul.f32.gmra.mxu1 %v1955_v43  ;;  %v2908_v6 = vld [vmem:[#allocation5 + $0x308] sm:$0xff] }
 0x45a   : > { %2942 = vmatpush.msra.mxu2 %v2908_v6 }
 0x45b   : > { %2148 = vadd.xlane.f32.xlu0 %v9488_v28  ;;  %v2234_v63 = vmul.f32 %v9488_v28, %v9488_v28 }
 0x45c   : > { %v1914_v47 = vpop.f32.mrf.mxu0 }
 0x45d   : > { %v1915_v49 = vadd.f32 %v9371_v4, %v1914_v47  ;;  %2276 = vadd.xlane.f32.xlu1 %v2234_v63  ;;  %v2907_v63 = vld [vmem:[#allocation5 + $0x300] sm:$0xff] }
 0x45e   : > { %v2033_v55 = vpop.f32.mrf.mxu1  ;;  %2943 = vmatpush.msra.mxu2 %v2907_v63 }
 0x45f   : > { %v1956_v19 = vmax.f32 %v1915_v49, 0.0  ;;  %v2034_v23 = vadd.f32 %v9403_v2, %v2033_v55 }
 0x461   : > { %v9496_v1 = vadd.f32 %v2034_v23, %v9000_v7  ;;  %2080 = vmatmul.f32.gmra.mxu1 %v1956_v19 }
 0x463   : > { %2150 = vadd.xlane.f32.xlu2 %v9496_v1  ;;  %v2235_v17 = vmul.f32 %v9496_v1, %v9496_v1 }
 0x464   : > { %v1917_v30 = vpop.f32.mrf.mxu0 }
 0x465   : > { %v1918_v33 = vadd.f32 %v9371_v4, %v1917_v30  ;;  %2278 = vadd.xlane.f32.xlu0 %v2235_v17 }
 0x466   : > { %v2036_v38 = vpop.f32.mrf.mxu1 }
 0x467   : > { %v1957_v8 = vmax.f32 %v1918_v33, 0.0  ;;  %v2037_v57 = vadd.f32 %v9403_v2, %v2036_v38 }
 0x469   : > { %v9504_v29 = vadd.f32 %v2037_v57, %v9025_v48  ;;  %2083 = vmatmul.f32.gmra.mxu1 %v1957_v8  ;;  %v3082_v8 = vld [vmem:[#allocation5 + $0x3c0] sm:$0xff] }
 0x46b   : > { %2152 = vadd.xlane.f32.xlu1 %v9504_v29  ;;  %v2236_v7 = vmul.f32 %v9504_v29, %v9504_v29 }
 0x46c   : > { %v1920_v53 = vpop.f32.mrf.mxu0 }
 0x46d   : > { %v1921_v12 = vadd.f32 %v9371_v4, %v1920_v53  ;;  %2280 = vadd.xlane.f32.xlu2 %v2236_v7 }
 0x46e   : > { %v2039_v61 = vpop.f32.mrf.mxu1 }
 0x46f   : > { %v1958_v10 = vmax.f32 %v1921_v12, 0.0  ;;  %v2040_v40 = vadd.f32 %v9403_v2, %v2039_v61 }
 0x471   : > { %v9512_v25 = vadd.f32 %v2040_v40, %v9040_v58  ;;  %2086 = vmatmul.f32.gmra.mxu1 %v1958_v10  ;;  %v3083_v58 = vld [vmem:[#allocation5 + $0x3c8] sm:$0xff] }
 0x472   : > { %3101 = vmatpush.msra.mxu3 %v3083_v58 }
 0x473   : > { %2154 = vadd.xlane.f32.xlu0 %v9512_v25  ;;  %v2237_v48 = vmul.f32 %v9512_v25, %v9512_v25 }
 0x474   : > { %v1923_v59 = vpop.f32.mrf.mxu0  ;;  %3102 = vmatpush.msra.mxu3 %v3082_v8 }
 0x475   : > { %v1924_v51 = vadd.f32 %v9371_v4, %v1923_v59  ;;  %2282 = vadd.xlane.f32.xlu1 %v2237_v48 }
 0x476   : > { %v2042_v20 = vpop.f32.mrf.mxu1 }
 0x477   : > { %v1959_v37 = vmax.f32 %v1924_v51, 0.0  ;;  %v2043_v22 = vadd.f32 %v9403_v2, %v2042_v20 }
 0x479   : > { %v9520_v43 = vadd.f32 %v2043_v22, %v9054_v50  ;;  %2089 = vmatmul.f32.gmra.mxu1 %v1959_v37 }
 0x47b   : > { %2156 = vadd.xlane.f32.xlu2 %v9520_v43  ;;  %v2238_v24 = vmul.f32 %v9520_v43, %v9520_v43 }
 0x47c   : > { %v1926_v45 = vpop.f32.mrf.mxu0 }
 0x47d   : > { %v1927_v47 = vadd.f32 %v9371_v4, %v1926_v45  ;;  %2284 = vadd.xlane.f32.xlu0 %v2238_v24 }
 0x47e   : > { %v2129_v49 = vpop.xlane.xlu1 %2128  ;;  %v2045_v55 = vpop.f32.mrf.mxu1 }
 0x47f   : > { %v1960_v19 = vmax.f32 %v1927_v47, 0.0  ;;  %v9527_v50 = vmul.f32 %v2129_v49, %v8611_v52  ;;  %v2046_v23 = vadd.f32 %v9403_v2, %v2045_v55 }
 0x480   : > { %v2257_v6 = vpop.xlane.xlu2 %2256 }
 0x481   : > { %v2352_v17 = vmul.f32 %v9527_v50, %v9527_v50  ;;  %v9533_v30 = vadd.f32 %v2046_v23, %v9067_v21  ;;  %v2320_v33 = vmul.f32 %v2257_v6, %v8611_v52  ;;  %2092 = vmatmul.f32.gmra.mxu1 %v1960_v19 }
 0x483   : > { %v2384_v4 = vsub.f32 %v2320_v33, %v2352_v17  ;;  %2158 = vadd.xlane.f32.xlu1 %v9533_v30  ;;  %v2239_v38 = vmul.f32 %v9533_v30, %v9533_v30 }
 0x485   : > { %v2448_v57 = vadd.f32 1e-05, %v2384_v4  ;;  %2286 = vadd.xlane.f32.xlu2 %v2239_v38  ;;  %v3081_v4 = vld [vmem:[#allocation5 + $0x3b8] sm:$0xff] }
 0x486   : > { %v2048_v7 = vpop.f32.mrf.mxu1  ;;  %v2131_v53 = vpop.xlane.xlu0 %2130  ;;  %3103 = vmatpush.msra.mxu3 %v3081_v4 }
 0x487   : > { %7647 = vrsqrt.f32 %v2448_v57  ;;  %v2049_v12 = vadd.f32 %v9403_v2, %v2048_v7  ;;  %v9541_v21 = vmul.f32 %v2131_v53, %v8611_v52  ;;  %vm2486_vm2 = vweird.f32 %v2448_v57 }
 0x488   : > { %v2259_v61 = vpop.xlane.xlu1 %2258 }
 0x489   : > { %v9544_v10 = vadd.f32 %v2049_v12, %v9083_v32  ;;  %v2353_v40 = vmul.f32 %v9541_v21, %v9541_v21  ;;  %v2321_v48 = vmul.f32 %v2259_v61, %v8611_v52  ;;  %v2416_v61 = vsub.f32 %v9408_v46, %v9527_v50  ;;  %v9581_v46 = vld [vmem:[#allocation10 + $0x1] ss:$0 sm:$0xff] }
 0x48b   : > { %v2385_v59 = vsub.f32 %v2321_v48, %v2353_v40  ;;  %2160 = vadd.xlane.f32.xlu0 %v9544_v10  ;;  %v2240_v51 = vmul.f32 %v9544_v10, %v9544_v10 }
 0x48d   : > { %v7648_v20 = vpop.eup %7647  ;;  %v2449_v37 = vadd.f32 1e-05, %v2385_v59  ;;  %2288 = vadd.xlane.f32.xlu1 %v2240_v51  ;;  %v9574_v59 = vld [vmem:[#allocation8 + $0x1] ss:$0 sm:$0xff] }
 0x48e   : > { %v2481_v22 = vmul.f32 %v7648_v20, %v2448_v57  ;;  %v2133_v58 = vpop.xlane.xlu2 %2132  ;;  %v2051_v24 = vpop.f32.mrf.mxu1  ;;  %vm2487_vm1 = vweird.f32 %v7648_v20 }
 0x48f   : > { %7649 = vrsqrt.f32 %v2449_v37  ;;  %v9553_v32 = vmul.f32 %v2133_v58, %v8611_v52  ;;  %v2052_v45 = vadd.f32 %v9403_v2, %v2051_v24  ;;  %vm2488_vm3 = vmor %vm2486_vm2, %vm2487_vm1  ;;  %vm2496_vm5 = vweird.f32 %v2449_v37 }
 0x490   : > { %v2482_v63 = vmul.f32 %v7648_v20, %v2481_v22  ;;  %v2261_v47 = vpop.xlane.xlu0 %2260 }
 0x491   : > { %v2354_v49 = vmul.f32 %v9553_v32, %v9553_v32  ;;  %v9559_v55 = vadd.f32 %v2052_v45, %v9113_v16  ;;  %v2322_v19 = vmul.f32 %v2261_v47, %v8611_v52 }
 0x492   : > { %v2483_v23 = vmul.f32 0.5, %v2482_v63 }
 0x493   : > { %v2386_v6 = vsub.f32 %v2322_v19, %v2354_v49  ;;  %2162 = vadd.xlane.f32.xlu2 %v9559_v55  ;;  %v2241_v17 = vmul.f32 %v9559_v55, %v9559_v55 }
 0x494   : > { %v2484_v33 = vsub.f32 1.5, %v2483_v23 }
 0x495   : > { %v7650_v38 = vpop.eup %7649  ;;  %v9565_v8 = vadd.f32 1e-05, %v2386_v6  ;;  %2290 = vadd.xlane.f32.xlu0 %v2241_v17  ;;  %v3256_v6 = vld [vmem:[#allocation5 + $0x478] sm:$0xff] }
 0x496   : > { %v2485_v7 = vmul.f32 %v7648_v20, %v2484_v33  ;;  %v2491_v16 = vmul.f32 %v7650_v38, %v2449_v37  ;;  %v2135_v53 = vpop.xlane.xlu1 %2134  ;;  %v2054_v12 = vpop.f32.mrf.mxu1  ;;  %vm2497_vm4 = vweird.f32 %v7650_v38  ;;  %3262 = vmatpush.msra.mxu0 %v3256_v6 }
 0x497   : > { %7651 = vrsqrt.f32 %v9565_v8  ;;  %v9571_v40 = vmul.f32 %v2135_v53, %v8611_v52  ;;  %v2055_v48 = vadd.f32 %v9403_v2, %v2054_v12  ;;  %vm2498_vm6 = vmor %vm2496_vm5, %vm2497_vm4  ;;  %vm2506_vm8 = vweird.f32 %v9565_v8 }
 0x498   : > { %v2489_v51 = vsel %vm2488_vm3, %v7648_v20, %v2485_v7  ;;  %v2492_v22 = vmul.f32 %v7650_v38, %v2491_v16  ;;  %v2263_v58 = vpop.xlane.xlu2 %2262 }
 0x499   : > { %v2800_v57 = vmul.f32 %v2489_v51, %v2416_v61  ;;  %v2355_v24 = vmul.f32 %v9571_v40, %v9571_v40  ;;  %v9579_v45 = vadd.f32 %v2055_v48, %v9132_v5  ;;  %v2323_v63 = vmul.f32 %v2263_v58, %v8611_v52 }
 0x49a   : > { %v2493_v50 = vmul.f32 0.5, %v2492_v22  ;;  %v2417_v61 = vsub.f32 %v9416_v9, %v9541_v21 }
 0x49b   : > { %2164 = vadd.xlane.f32.xlu1 %v9579_v45  ;;  %v2242_v47 = vmul.f32 %v9579_v45, %v9579_v45  ;;  %v2837_v20 = vmul.f32 %v9574_v59, %v2800_v57  ;;  %v2387_v19 = vsub.f32 %v2323_v63, %v2355_v24 }
 0x49c   : > { %v2494_v49 = vsub.f32 1.5, %v2493_v50 }
 0x49d   : > { %v7652_v23 = vpop.eup %7651  ;;  %2292 = vadd.xlane.f32.xlu2 %v2242_v47  ;;  %v9589_v5 = vadd.f32 %v9581_v46, %v2837_v20  ;;  %v9592_v33 = vadd.f32 1e-05, %v2387_v19  ;;  %v3080_v47 = vld [vmem:[#allocation5 + $0x3b0] sm:$0xff] }
 0x49e   : > { %v2501_v17 = vmul.f32 %v7652_v23, %v9565_v8  ;;  %v2057_v4 = vpop.f32.mrf.mxu1  ;;  %v2137_v7 = vpop.xlane.xlu0 %2136  ;;  %v2495_v16 = vmul.f32 %v7650_v38, %v2494_v49  ;;  %vm2507_vm7 = vweird.f32 %v7652_v23  ;;  %3104 = vmatpush.msra.mxu3 %v3080_v47 }
 0x49f   : > { %v2058_v53 = vadd.f32 %v9403_v2, %v2057_v4  ;;  %v9596_v12 = vmul.f32 %v2137_v7, %v8611_v52  ;;  %2944 = vmatmul.f32.vlgmr.msra.gmra.mxu2 %v9589_v5  ;;  %7653 = vrsqrt.f32 %v9592_v33  ;;  %v2418_v4 = vsub.f32 %v9424_v35, %v9553_v32  ;;  %vm2508_vm9 = vmor %vm2506_vm8, %vm2507_vm7 }
 0x4a0   : > { %v2502_v37 = vmul.f32 %v7652_v23, %v2501_v17  ;;  %v2265_v48 = vpop.xlane.xlu1 %2264  ;;  %v2499_v51 = vsel %vm2498_vm6, %v7650_v38, %v2495_v16  ;;  %vm2516_vm11 = vweird.f32 %v9592_v33 }
 0x4a1   : > { %v9603_v22 = vadd.f32 %v2058_v53, %v9157_v42  ;;  %v2356_v58 = vmul.f32 %v9596_v12, %v9596_v12  ;;  %v2324_v57 = vmul.f32 %v2265_v48, %v8611_v52  ;;  %v2801_v50 = vmul.f32 %v2499_v51, %v2417_v61 }
 0x4a2   : > { %v2503_v24 = vmul.f32 0.5, %v2502_v37 }
 0x4a3   : > { %v2388_v63 = vsub.f32 %v2324_v57, %v2356_v58  ;;  %2166 = vadd.xlane.f32.xlu0 %v9603_v22  ;;  %v2243_v9 = vmul.f32 %v9603_v22, %v9603_v22  ;;  %v2838_v38 = vmul.f32 %v9574_v59, %v2801_v50 }
 0x4a4   : > { %v2504_v21 = vsub.f32 1.5, %v2503_v24 }
 0x4a5   : > { %v9612_v42 = vadd.f32 1e-05, %v2388_v63  ;;  %2294 = vadd.xlane.f32.xlu1 %v2243_v9  ;;  %v7654_v20 = vpop.eup %7653  ;;  %v9616_v6 = vadd.f32 %v9581_v46, %v2838_v38 }
 0x4a6   : > { %v2139_v49 = vpop.xlane.xlu2 %2138  ;;  %v2060_v19 = vpop.f32.mrf.mxu1  ;;  %v2505_v17 = vmul.f32 %v7652_v23, %v2504_v21  ;;  %v2511_v7 = vmul.f32 %v7654_v20, %v9592_v33  ;;  %v3255_v21 = vld [vmem:[#allocation5 + $0x470] sm:$0xff]  ;;  %vm2517_vm10 = vweird.f32 %v7654_v20 }
 0x4a7   : > { %7655 = vrsqrt.f32 %v9612_v42  ;;  %v9623_v16 = vmul.f32 %v2139_v49, %v8611_v52  ;;  %v2061_v53 = vadd.f32 %v9403_v2, %v2060_v19  ;;  %2947 = vmatmul.f32.gmra.mxu2 %v9616_v6  ;;  %3263 = vmatpush.msra.mxu0 %v3255_v21  ;;  %vm2518_vm12 = vmor %vm2516_vm11, %vm2517_vm10  ;;  %vm2526_vm14 = vweird.f32 %v9612_v42 }
 0x4a8   : > { %v2267_v8 = vpop.xlane.xlu0 %2266  ;;  %v2509_v61 = vsel %vm2508_vm9, %v7652_v23, %v2505_v17  ;;  %v2512_v37 = vmul.f32 %v7654_v20, %v2511_v7 }
 0x4a9   : > { %v2325_v48 = vmul.f32 %v2267_v8, %v8611_v52  ;;  %v2802_v51 = vmul.f32 %v2509_v61, %v2418_v4  ;;  %v2357_v35 = vmul.f32 %v9623_v16, %v9623_v16  ;;  %v9631_v32 = vadd.f32 %v2061_v53, %v9176_v14 }
 0x4aa   : > { %v2513_v58 = vmul.f32 0.5, %v2512_v37  ;;  %v2419_v8 = vsub.f32 %v9432_v3, %v9571_v40  ;;  %v3079_v40 = vld [vmem:[#allocation5 + $0x3a8] sm:$0xff] }
 0x4ab   : > { %v2839_v57 = vmul.f32 %v9574_v59, %v2802_v51  ;;  %v2389_v24 = vsub.f32 %v2325_v48, %v2357_v35  ;;  %2168 = vadd.xlane.f32.xlu2 %v9631_v32  ;;  %v2244_v50 = vmul.f32 %v9631_v32, %v9631_v32  ;;  %3105 = vmatpush.msra.mxu3 %v3079_v40 }
 0x4ac   : > { %v2514_v63 = vsub.f32 1.5, %v2513_v58 }
 0x4ad   : > { %v7656_v23 = vpop.eup %7655  ;;  %v9638_v9 = vadd.f32 %v9581_v46, %v2839_v57  ;;  %v9641_v14 = vadd.f32 1e-05, %v2389_v24  ;;  %2296 = vadd.xlane.f32.xlu0 %v2244_v50 }
 0x4ae   : > { %v2521_v38 = vmul.f32 %v7656_v23, %v9612_v42  ;;  %v2141_v47 = vpop.xlane.xlu1 %2140  ;;  %v2063_v49 = vpop.f32.mrf.mxu1  ;;  %v2515_v4 = vmul.f32 %v7654_v20, %v2514_v63  ;;  %vm2527_vm13 = vweird.f32 %v7656_v23 }
 0x4af   : > { %v9644_v19 = vmul.f32 %v2141_v47, %v8611_v52  ;;  %v2064_v17 = vadd.f32 %v9403_v2, %v2063_v49  ;;  %7657 = vrsqrt.f32 %v9641_v14  ;;  %2950 = vmatmul.f32.gmra.mxu2 %v9638_v9  ;;  %vm2528_vm15 = vmor %vm2526_vm14, %vm2527_vm13  ;;  %vm2536_vm1 = vweird.f32 %v9641_v14 }
 0x4b0   : > { %v2522_v7 = vmul.f32 %v7656_v23, %v2521_v38  ;;  %v2269_v53 = vpop.xlane.xlu2 %2268  ;;  %v2519_v51 = vsel %vm2518_vm12, %v7654_v20, %v2515_v4  ;;  %v2420_v38 = vsub.f32 %v9440_v27, %v9596_v12 }
 0x4b1   : > { %v2358_v61 = vmul.f32 %v9644_v19, %v9644_v19  ;;  %v9656_v37 = vadd.f32 %v2064_v17, %v9201_v39  ;;  %v2326_v48 = vmul.f32 %v2269_v53, %v8611_v52  ;;  %v2803_v57 = vmul.f32 %v2519_v51, %v2419_v8 }
 0x4b2   : > { %v2523_v33 = vmul.f32 0.5, %v2522_v7 }
 0x4b3   : > { %v2390_v35 = vsub.f32 %v2326_v48, %v2358_v61  ;;  %2170 = vadd.xlane.f32.xlu1 %v9656_v37  ;;  %v2245_v58 = vmul.f32 %v9656_v37, %v9656_v37  ;;  %v2840_v39 = vmul.f32 %v9574_v59, %v2803_v57  ;;  %v3254_v57 = vld [vmem:[#allocation5 + $0x468] sm:$0xff] }
 0x4b4   : > { %v2524_v3 = vsub.f32 1.5, %v2523_v33  ;;  %3264 = vmatpush.msra.mxu0 %v3254_v57 }
 0x4b5   : > { %v9662_v24 = vadd.f32 1e-05, %v2390_v35  ;;  %2298 = vadd.xlane.f32.xlu2 %v2245_v58  ;;  %v7658_v50 = vpop.eup %7657  ;;  %v9675_v4 = vadd.f32 %v9581_v46, %v2840_v39 }
 0x4b6   : > { %v2066_v20 = vpop.f32.mrf.mxu1  ;;  %v2143_v63 = vpop.xlane.xlu0 %2142  ;;  %v2525_v21 = vmul.f32 %v7656_v23, %v2524_v3  ;;  %v2531_v47 = vmul.f32 %v7658_v50, %v9641_v14  ;;  %vm2537_vm0 = vweird.f32 %v7658_v50 }
 0x4b7   : > { %7659 = vrsqrt.f32 %v9662_v24  ;;  %v2067_v49 = vadd.f32 %v9403_v2, %v2066_v20  ;;  %v9672_v17 = vmul.f32 %v2143_v63, %v8611_v52  ;;  %2953 = vmatmul.f32.gmra.mxu2 %v9675_v4  ;;  %vm2538_vm2 = vmor %vm2536_vm1, %vm2537_vm0  ;;  %vm2546_vm4 = vweird.f32 %v9662_v24 }
 0x4b8   : > { %v2271_v42 = vpop.xlane.xlu1 %2270  ;;  %v2529_v7 = vsel %vm2528_vm15, %v7656_v23, %v2525_v21  ;;  %v2532_v53 = vmul.f32 %v7658_v50, %v2531_v47 }
 0x4b9   : > { %v2327_v8 = vmul.f32 %v2271_v42, %v8611_v52  ;;  %v2804_v61 = vmul.f32 %v2529_v7, %v2420_v38  ;;  %v9679_v27 = vadd.f32 %v2067_v49, %v9220_v26  ;;  %v2359_v12 = vmul.f32 %v9672_v17, %v9672_v17 }
 0x4ba   : > { %v2533_v48 = vmul.f32 0.5, %v2532_v53  ;;  %v2421_v42 = vsub.f32 %v9448_v44, %v9623_v16 }
 0x4bb   : > { %v2841_v33 = vmul.f32 %v9574_v59, %v2804_v61  ;;  %v2391_v51 = vsub.f32 %v2327_v8, %v2359_v12  ;;  %2172 = vadd.xlane.f32.xlu0 %v9679_v27  ;;  %v2246_v23 = vmul.f32 %v9679_v27, %v9679_v27 }
 0x4bc   : > { %v2534_v58 = vsub.f32 1.5, %v2533_v48 }
 0x4bd   : > { %v7660_v35 = vpop.eup %7659  ;;  %v9689_v3 = vadd.f32 1e-05, %v2391_v51  ;;  %2300 = vadd.xlane.f32.xlu1 %v2246_v23  ;;  %v9692_v20 = vadd.f32 %v9581_v46, %v2841_v33  ;;  %v3078_v33 = vld [vmem:[#allocation5 + $0x3a0] sm:$0xff] }
 0x4be   : > { %v2541_v26 = vmul.f32 %v7660_v35, %v9662_v24  ;;  %v2145_v40 = vpop.xlane.xlu2 %2144  ;;  %v2069_v39 = vpop.f32.mrf.mxu1  ;;  %v2535_v38 = vmul.f32 %v7658_v50, %v2534_v58  ;;  %vm2547_vm3 = vweird.f32 %v7660_v35  ;;  %3106 = vmatpush.msra.mxu3 %v3078_v33 }
 0x4bf   : > { %v9695_v63 = vmul.f32 %v2145_v40, %v8611_v52  ;;  %v2070_v21 = vadd.f32 %v9403_v2, %v2069_v39  ;;  %7661 = vrsqrt.f32 %v9689_v3  ;;  %2956 = vmatmul.f32.gmra.mxu2 %v9692_v20  ;;  %vm2548_vm5 = vmor %vm2546_vm4, %vm2547_vm3  ;;  %vm2556_vm7 = vweird.f32 %v9689_v3 }
 0x4c0   : > { %v2542_v47 = vmul.f32 %v7660_v35, %v2541_v26  ;;  %v2273_v49 = vpop.xlane.xlu0 %2272  ;;  %v2539_v14 = vsel %vm2538_vm2, %v7658_v50, %v2535_v38  ;;  %v2422_v26 = vsub.f32 %v9456_v0, %v9644_v19 }
 0x4c1   : > { %v2360_v7 = vmul.f32 %v9695_v63, %v9695_v63  ;;  %v9706_v53 = vadd.f32 %v2070_v21, %v9245_v34  ;;  %v2328_v8 = vmul.f32 %v2273_v49, %v8611_v52  ;;  %v2805_v16 = vmul.f32 %v2539_v14, %v2421_v42 }
 0x4c2   : > { %v2543_v61 = vmul.f32 0.5, %v2542_v47 }
 0x4c3   : > { %v2392_v12 = vsub.f32 %v2328_v8, %v2360_v7  ;;  %2174 = vadd.xlane.f32.xlu2 %v9706_v53  ;;  %v2247_v44 = vmul.f32 %v9706_v53, %v9706_v53  ;;  %v2842_v34 = vmul.f32 %v9574_v59, %v2805_v16  ;;  %v3253_v16 = vld [vmem:[#allocation5 + $0x460] sm:$0xff] }
 0x4c4   : > { %v2544_v48 = vsub.f32 1.5, %v2543_v61  ;;  %3265 = vmatpush.msra.mxu0 %v3253_v16 }
 0x4c5   : > { %v9713_v51 = vadd.f32 1e-05, %v2392_v12  ;;  %2302 = vadd.xlane.f32.xlu0 %v2247_v44  ;;  %v7662_v23 = vpop.eup %7661  ;;  %v9726_v38 = vadd.f32 %v9581_v46, %v2842_v34 }
 0x4c6   : > { %v2147_v50 = vpop.xlane.xlu1 %2146  ;;  %v2072_v58 = vpop.f32.mrf.mxu1  ;;  %v2545_v57 = vmul.f32 %v7660_v35, %v2544_v48  ;;  %v2551_v40 = vmul.f32 %v7662_v23, %v9689_v3  ;;  %vm2557_vm6 = vweird.f32 %v7662_v23 }
 0x4c7   : > { %7663 = vrsqrt.f32 %v9713_v51  ;;  %v9722_v39 = vmul.f32 %v2147_v50, %v8611_v52  ;;  %v2073_v21 = vadd.f32 %v9403_v2, %v2072_v58  ;;  %2959 = vmatmul.f32.gmra.mxu2 %v9726_v38  ;;  %vm2558_vm8 = vmor %vm2556_vm7, %vm2557_vm6  ;;  %vm2566_vm10 = vweird.f32 %v9713_v51 }
 0x4c8   : > { %v2275_v24 = vpop.xlane.xlu2 %2274  ;;  %v2549_v47 = vsel %vm2548_vm5, %v7660_v35, %v2545_v57  ;;  %v2552_v49 = vmul.f32 %v7662_v23, %v2551_v40 }
 0x4c9   : > { %v2329_v42 = vmul.f32 %v2275_v24, %v8611_v52  ;;  %v2806_v7 = vmul.f32 %v2549_v47, %v2422_v26  ;;  %v2361_v0 = vmul.f32 %v9722_v39, %v9722_v39  ;;  %v9732_v19 = vadd.f32 %v2073_v21, %v9264_v18 }
 0x4ca   : > { %v2553_v8 = vmul.f32 0.5, %v2552_v49  ;;  %v2423_v24 = vsub.f32 %v9464_v56, %v9672_v17 }
 0x4cb   : > { %v2843_v61 = vmul.f32 %v9574_v59, %v2806_v7  ;;  %v2393_v14 = vsub.f32 %v2329_v42, %v2361_v0  ;;  %2176 = vadd.xlane.f32.xlu1 %v9732_v19  ;;  %v2248_v35 = vmul.f32 %v9732_v19, %v9732_v19 }
 0x4cc   : > { %v2554_v44 = vsub.f32 1.5, %v2553_v8 }
 0x4cd   : > { %v7664_v12 = vpop.eup %7663  ;;  %v9740_v33 = vadd.f32 1e-05, %v2393_v14  ;;  %2304 = vadd.xlane.f32.xlu2 %v2248_v35  ;;  %v9743_v50 = vadd.f32 %v9581_v46, %v2843_v61 }
 0x4ce   : > { %v2561_v48 = vmul.f32 %v7664_v12, %v9713_v51  ;;  %v2075_v18 = vpop.f32.mrf.mxu1  ;;  %v2149_v34 = vpop.xlane.xlu0 %2148  ;;  %v2555_v26 = vmul.f32 %v7662_v23, %v2554_v44  ;;  %vm2567_vm9 = vweird.f32 %v7664_v12 }
 0x4cf   : > { %v2076_v58 = vadd.f32 %v9403_v2, %v2075_v18  ;;  %v9747_v57 = vmul.f32 %v2149_v34, %v8611_v52  ;;  %7665 = vrsqrt.f32 %v9740_v33  ;;  %2962 = vmatmul.f32.gmra.mxu2 %v9743_v50  ;;  %vm2568_vm11 = vmor %vm2566_vm10, %vm2567_vm9  ;;  %vm2576_vm13 = vweird.f32 %v9740_v33 }
 0x4d0   : > { %v2562_v40 = vmul.f32 %v7664_v12, %v2561_v48  ;;  %v2277_v21 = vpop.xlane.xlu1 %2276  ;;  %v2559_v3 = vsel %vm2558_vm8, %v7662_v23, %v2555_v26  ;;  %v2424_v48 = vsub.f32 %v9472_v13, %v9695_v63 }
 0x4d1   : > { %v9755_v47 = vadd.f32 %v2076_v58, %v9289_v41  ;;  %v2362_v49 = vmul.f32 %v9747_v57, %v9747_v57  ;;  %v2330_v42 = vmul.f32 %v2277_v21, %v8611_v52  ;;  %v2807_v17 = vmul.f32 %v2559_v3, %v2423_v24  ;;  %v3077_v41 = vld [vmem:[#allocation5 + $0x398] sm:$0xff] }
 0x4d2   : > { %v2563_v7 = vmul.f32 0.5, %v2562_v40  ;;  %3107 = vmatpush.msra.mxu3 %v3077_v41 }
 0x4d3   : > { %v2394_v0 = vsub.f32 %v2330_v42, %v2362_v49  ;;  %2178 = vadd.xlane.f32.xlu0 %v9755_v47  ;;  %v2249_v56 = vmul.f32 %v9755_v47, %v9755_v47  ;;  %v2844_v14 = vmul.f32 %v9574_v59, %v2807_v17 }
 0x4d4   : > { %v2564_v8 = vsub.f32 1.5, %v2563_v7 }
 0x4d5   : > { %v9764_v61 = vadd.f32 1e-05, %v2394_v0  ;;  %2306 = vadd.xlane.f32.xlu1 %v2249_v56  ;;  %v7666_v35 = vpop.eup %7665  ;;  %v9777_v26 = vadd.f32 %v9581_v46, %v2844_v14  ;;  %v3252_v56 = vld [vmem:[#allocation5 + $0x458] sm:$0xff] }
 0x4d6   : > { %v2151_v23 = vpop.xlane.xlu2 %2150  ;;  %v2078_v44 = vpop.f32.mrf.mxu1  ;;  %v2565_v16 = vmul.f32 %v7664_v12, %v2564_v8  ;;  %v2571_v18 = vmul.f32 %v7666_v35, %v9740_v33  ;;  %vm2577_vm12 = vweird.f32 %v7666_v35  ;;  %3266 = vmatpush.msra.mxu0 %v3252_v56 }
 0x4d7   : > { %7667 = vrsqrt.f32 %v9764_v61  ;;  %v9773_v34 = vmul.f32 %v2151_v23, %v8611_v52  ;;  %v2079_v58 = vadd.f32 %v9403_v2, %v2078_v44  ;;  %2965 = vmatmul.f32.gmra.mxu2 %v9777_v26  ;;  %v9799_v44 = vld [vmem:[#allocation7 + $0x5] ss:$0 sm:$0xff]  ;;  %vm2578_vm14 = vmor %vm2576_vm13, %vm2577_vm12  ;;  %vm2586_vm0 = vweird.f32 %v9764_v61 }
 0x4d8   : > { %v2279_v51 = vpop.xlane.xlu0 %2278  ;;  %v2569_v40 = vsel %vm2568_vm11, %v7664_v12, %v2565_v16  ;;  %v2572_v21 = vmul.f32 %v7666_v35, %v2571_v18 }
 0x4d9   : > { %v2331_v24 = vmul.f32 %v2279_v51, %v8611_v52  ;;  %v2808_v49 = vmul.f32 %v2569_v40, %v2424_v48  ;;  %v2363_v13 = vmul.f32 %v9773_v34, %v9773_v34  ;;  %v9783_v63 = vadd.f32 %v2079_v58, %v9314_v62 }
 0x4da   : > { %v2573_v42 = vmul.f32 0.5, %v2572_v21  ;;  %v2425_v51 = vsub.f32 %v9480_v60, %v9722_v39 }
 0x4db   : > { %v2845_v2 = vmul.f32 %v9574_v59, %v2808_v49  ;;  %v2395_v7 = vsub.f32 %v2331_v24, %v2363_v13  ;;  %2180 = vadd.xlane.f32.xlu2 %v9783_v63  ;;  %v2250_v12 = vmul.f32 %v9783_v63, %v9783_v63 }
 0x4dc   : > { %v2574_v0 = vsub.f32 1.5, %v2573_v42 }
 0x4dd   : > { %v7668_v3 = vpop.eup %7667  ;;  %v9791_v8 = vadd.f32 1e-05, %v2395_v7  ;;  %2308 = vadd.xlane.f32.xlu0 %v2250_v12  ;;  %v9794_v14 = vadd.f32 %v9581_v46, %v2845_v2  ;;  %v3076_v2 = vld [vmem:[#allocation5 + $0x390] sm:$0xff] }
 0x4de   : > { %v2581_v17 = vmul.f32 %v7668_v3, %v9764_v61  ;;  %v2153_v62 = vpop.xlane.xlu1 %2152  ;;  %v2081_v41 = vpop.f32.mrf.mxu1  ;;  %v2575_v48 = vmul.f32 %v7666_v35, %v2574_v0  ;;  %vm2587_vm15 = vweird.f32 %v7668_v3  ;;  %3108 = vmatpush.msra.mxu3 %v3076_v2 }
 0x4df   : > { %v9797_v23 = vmul.f32 %v2153_v62, %v8611_v52  ;;  %v2082_v16 = vadd.f32 %v9799_v44, %v2081_v41  ;;  %7669 = vrsqrt.f32 %v9791_v8  ;;  %2968 = vmatmul.f32.gmra.mxu2 %v9794_v14  ;;  %vm2588_vm1 = vmor %vm2586_vm0, %vm2587_vm15  ;;  %vm2596_vm3 = vweird.f32 %v9791_v8 }
 0x4e0   : > { %v2582_v18 = vmul.f32 %v7668_v3, %v2581_v17  ;;  %v2281_v58 = vpop.xlane.xlu2 %2280  ;;  %v2579_v33 = vsel %vm2578_vm14, %v7666_v35, %v2575_v48  ;;  %v2426_v17 = vsub.f32 %v9488_v28, %v9747_v57 }
 0x4e1   : > { %v2364_v40 = vmul.f32 %v9797_v23, %v9797_v23  ;;  %v9810_v21 = vadd.f32 %v2082_v16, %v9336_v36  ;;  %v2332_v24 = vmul.f32 %v2281_v58, %v8611_v52  ;;  %v2809_v39 = vmul.f32 %v2579_v33, %v2425_v51 }
 0x4e2   : > { %v2583_v49 = vmul.f32 0.5, %v2582_v18 }
 0x4e3   : > { %v2396_v13 = vsub.f32 %v2332_v24, %v2364_v40  ;;  %2182 = vadd.xlane.f32.xlu1 %v9810_v21  ;;  %v2251_v60 = vmul.f32 %v9810_v21, %v9810_v21  ;;  %v2846_v36 = vmul.f32 %v9574_v59, %v2809_v39  ;;  %v3251_v39 = vld [vmem:[#allocation5 + $0x450] sm:$0xff] }
 0x4e4   : > { %v2584_v42 = vsub.f32 1.5, %v2583_v49  ;;  %3267 = vmatpush.msra.mxu0 %v3251_v39 }
 0x4e5   : > { %v9817_v7 = vadd.f32 1e-05, %v2396_v13  ;;  %2310 = vadd.xlane.f32.xlu2 %v2251_v60  ;;  %v7670_v12 = vpop.eup %7669  ;;  %v9830_v48 = vadd.f32 %v9581_v46, %v2846_v36 }
 0x4e6   : > { %v2084_v35 = vpop.f32.mrf.mxu1  ;;  %v2155_v0 = vpop.xlane.xlu0 %2154  ;;  %v2585_v56 = vmul.f32 %v7668_v3, %v2584_v42  ;;  %v2591_v62 = vmul.f32 %v7670_v12, %v9791_v8  ;;  %vm2597_vm2 = vweird.f32 %v7670_v12 }
 0x4e7   : > { %7671 = vrsqrt.f32 %v9817_v7  ;;  %v2085_v41 = vadd.f32 %v9799_v44, %v2084_v35  ;;  %v9827_v16 = vmul.f32 %v2155_v0, %v8611_v52  ;;  %2971 = vmatmul.f32.gmra.mxu2 %v9830_v48  ;;  %vm2598_vm4 = vmor %vm2596_vm3, %vm2597_vm2  ;;  %vm2606_vm6 = vweird.f32 %v9817_v7 }
 0x4e8   : > { %v2283_v61 = vpop.xlane.xlu1 %2282  ;;  %v2589_v18 = vsel %vm2588_vm1, %v7668_v3, %v2585_v56  ;;  %v2592_v58 = vmul.f32 %v7670_v12, %v2591_v62 }
 0x4e9   : > { %v2333_v51 = vmul.f32 %v2283_v61, %v8611_v52  ;;  %v2810_v40 = vmul.f32 %v2589_v18, %v2426_v17  ;;  %v9834_v28 = vadd.f32 %v2085_v41, %v9345_v31  ;;  %v2365_v57 = vmul.f32 %v9827_v16, %v9827_v16 }
 0x4ea   : > { %v2593_v24 = vmul.f32 0.5, %v2592_v58  ;;  %v2427_v61 = vsub.f32 %v9496_v1, %v9773_v34 }
 0x4eb   : > { %v2847_v49 = vmul.f32 %v9574_v59, %v2810_v40  ;;  %v2397_v33 = vsub.f32 %v2333_v51, %v2365_v57  ;;  %2184 = vadd.xlane.f32.xlu0 %v9834_v28  ;;  %v2252_v3 = vmul.f32 %v9834_v28, %v9834_v28 }
 0x4ec   : > { %v2594_v60 = vsub.f32 1.5, %v2593_v24 }
 0x4ed   : > { %v7672_v13 = vpop.eup %7671  ;;  %v9844_v42 = vadd.f32 1e-05, %v2397_v33  ;;  %2312 = vadd.xlane.f32.xlu1 %v2252_v3  ;;  %v9847_v35 = vadd.f32 %v9581_v46, %v2847_v49  ;;  %v3075_v49 = vld [vmem:[#allocation5 + $0x388] sm:$0xff] }
 0x4ee   : > { %v2601_v31 = vmul.f32 %v7672_v13, %v9817_v7  ;;  %v2157_v2 = vpop.xlane.xlu2 %2156  ;;  %v2087_v36 = vpop.f32.mrf.mxu1  ;;  %v2595_v17 = vmul.f32 %v7670_v12, %v2594_v60  ;;  %vm2607_vm5 = vweird.f32 %v7672_v13  ;;  %3109 = vmatpush.msra.mxu3 %v3075_v49 }
 0x4ef   : > { %v9850_v0 = vmul.f32 %v2157_v2, %v8611_v52  ;;  %v2088_v56 = vadd.f32 %v9799_v44, %v2087_v36  ;;  %7673 = vrsqrt.f32 %v9844_v42  ;;  %2974 = vmatmul.f32.gmra.mxu2 %v9847_v35  ;;  %vm2608_vm7 = vmor %vm2606_vm6, %vm2607_vm5  ;;  %vm2616_vm9 = vweird.f32 %v9844_v42 }
 0x4f0   : > { %v2602_v62 = vmul.f32 %v7672_v13, %v2601_v31  ;;  %v2285_v41 = vpop.xlane.xlu0 %2284  ;;  %v2599_v8 = vsel %vm2598_vm4, %v7670_v12, %v2595_v17  ;;  %v2428_v31 = vsub.f32 %v9504_v29, %v9797_v23 }
 0x4f1   : > { %v2366_v18 = vmul.f32 %v9850_v0, %v9850_v0  ;;  %v9861_v58 = vadd.f32 %v2088_v56, %v9353_v54  ;;  %v2334_v51 = vmul.f32 %v2285_v41, %v8611_v52  ;;  %v2811_v34 = vmul.f32 %v2599_v8, %v2427_v61 }
 0x4f2   : > { %v2603_v40 = vmul.f32 0.5, %v2602_v62 }
 0x4f3   : > { %v2398_v57 = vsub.f32 %v2334_v51, %v2366_v18  ;;  %2186 = vadd.xlane.f32.xlu2 %v9861_v58  ;;  %v2253_v1 = vmul.f32 %v9861_v58, %v9861_v58  ;;  %v2848_v54 = vmul.f32 %v9574_v59, %v2811_v34  ;;  %v3250_v34 = vld [vmem:[#allocation5 + $0x448] sm:$0xff] }
 0x4f4   : > { %v2604_v24 = vsub.f32 1.5, %v2603_v40  ;;  %3268 = vmatpush.msra.mxu0 %v3250_v34 }
 0x4f5   : > { %v9868_v33 = vadd.f32 1e-05, %v2398_v57  ;;  %2314 = vadd.xlane.f32.xlu0 %v2253_v1  ;;  %v7674_v3 = vpop.eup %7673  ;;  %v9881_v17 = vadd.f32 %v9581_v46, %v2848_v54 }
 0x4f6   : > { %v2159_v12 = vpop.xlane.xlu1 %2158  ;;  %v2090_v60 = vpop.f32.mrf.mxu1  ;;  %v2605_v39 = vmul.f32 %v7672_v13, %v2604_v24  ;;  %v2611_v2 = vmul.f32 %v7674_v3, %v9844_v42  ;;  %vm2617_vm8 = vweird.f32 %v7674_v3 }
 0x4f7   : > { %7675 = vrsqrt.f32 %v9868_v33  ;;  %v9877_v36 = vmul.f32 %v2159_v12, %v8611_v52  ;;  %v2091_v56 = vadd.f32 %v9799_v44, %v2090_v60  ;;  %2977 = vmatmul.f32.gmra.mxu2 %v9881_v17  ;;  %vm2618_vm10 = vmor %vm2616_vm9, %vm2617_vm8  ;;  %vm2626_vm12 = vweird.f32 %v9868_v33 }
 0x4f8   : > { %v2287_v7 = vpop.xlane.xlu2 %2286  ;;  %v2609_v62 = vsel %vm2608_vm7, %v7672_v13, %v2605_v39  ;;  %v2612_v41 = vmul.f32 %v7674_v3, %v2611_v2 }
 0x4f9   : > { %v2335_v61 = vmul.f32 %v2287_v7, %v8611_v52  ;;  %v2812_v18 = vmul.f32 %v2609_v62, %v2428_v31  ;;  %v2367_v29 = vmul.f32 %v9877_v36, %v9877_v36  ;;  %v9887_v23 = vadd.f32 %v2091_v56, %v9361_v11 }
 0x4fa   : > { %v2613_v51 = vmul.f32 0.5, %v2612_v41  ;;  %v2429_v7 = vsub.f32 %v9512_v25, %v9827_v16 }
 0x4fb   : > { %v2849_v40 = vmul.f32 %v9574_v59, %v2812_v18  ;;  %v2399_v8 = vsub.f32 %v2335_v61, %v2367_v29  ;;  %2188 = vadd.xlane.f32.xlu1 %v9887_v23  ;;  %v2254_v13 = vmul.f32 %v9887_v23, %v9887_v23 }
 0x4fc   : > { %v2614_v1 = vsub.f32 1.5, %v2613_v51 }
 0x4fd   : > { %v7676_v57 = vpop.eup %7675  ;;  %v9895_v49 = vadd.f32 1e-05, %v2399_v8  ;;  %2316 = vadd.xlane.f32.xlu2 %v2254_v13  ;;  %v9898_v12 = vadd.f32 %v9581_v46, %v2849_v40 }
 0x4fe   : > { %v2621_v24 = vmul.f32 %v7676_v57, %v9868_v33  ;;  %v2093_v11 = vpop.f32.mrf.mxu1  ;;  %v2161_v54 = vpop.xlane.xlu0 %2160  ;;  %v2615_v31 = vmul.f32 %v7674_v3, %v2614_v1  ;;  %vm2627_vm11 = vweird.f32 %v7676_v57  ;;  %v2430_v1 = vsub.f32 %v9520_v43, %v9850_v0 }
 0x4ff   : > { %v2094_v60 = vadd.f32 %v9799_v44, %v2093_v11  ;;  %v9902_v39 = vmul.f32 %v2161_v54, %v8611_v52  ;;  %7677 = vrsqrt.f32 %v9895_v49  ;;  %2980 = vmatmul.f32.gmra.mxu2 %v9898_v12  ;;  %vm2628_vm13 = vmor %vm2626_vm12, %vm2627_vm11  ;;  %vm2636_vm15 = vweird.f32 %v9895_v49 }
 0x500   : > { %v2622_v2 = vmul.f32 %v7676_v57, %v2621_v24  ;;  %v2289_v56 = vpop.xlane.xlu1 %2288  ;;  %v2619_v42 = vsel %vm2618_vm10, %v7674_v3, %v2615_v31 }
 0x501   : > { %v9910_v62 = vadd.f32 %v2094_v60, %v9367_v15  ;;  %v2368_v44 = vmul.f32 %v9902_v39, %v9902_v39  ;;  %v2336_v41 = vmul.f32 %v2289_v56, %v8611_v52  ;;  %v2813_v16 = vmul.f32 %v2619_v42, %v2429_v7  ;;  %v3074_v15 = vld [vmem:[#allocation5 + $0x380] sm:$0xff] }
 0x502   : > { %v2623_v61 = vmul.f32 0.5, %v2622_v2  ;;  %3110 = vmatpush.msra.mxu3 %v3074_v15  ;;  %v2431_v15 = vsub.f32 %v9533_v30, %v9877_v36 }
 0x503   : > { %v2400_v18 = vsub.f32 %v2336_v41, %v2368_v44  ;;  %2190 = vadd.xlane.f32.xlu0 %v9910_v62  ;;  %v2255_v25 = vmul.f32 %v9910_v62, %v9910_v62  ;;  %v2850_v40 = vmul.f32 %v9574_v59, %v2813_v16 }
 0x504   : > { %v2624_v29 = vsub.f32 1.5, %v2623_v61  ;;  %v3249_v61 = vld [vmem:[#allocation5 + $0x440] sm:$0xff] }
 0x505   : > { %v2464_v51 = vadd.f32 1e-05, %v2400_v18  ;;  %2318 = vadd.xlane.f32.xlu1 %v2255_v25  ;;  %v7678_v8 = vpop.eup %7677  ;;  %v9928_v11 = vadd.f32 %v9581_v46, %v2850_v40  ;;  %3269 = vmatpush.msra.mxu0 %v3249_v61 }
 0x506   : > { %v2163_v13 = vpop.xlane.xlu2 %2162  ;;  %v2625_v3 = vmul.f32 %v7676_v57, %v2624_v29  ;;  %v2631_v34 = vmul.f32 %v7678_v8, %v9895_v49  ;;  %vm2637_vm14 = vweird.f32 %v7678_v8 }
 0x507   : > { %7679 = vrsqrt.f32 %v2464_v51  ;;  %v9925_v24 = vmul.f32 %v2163_v13, %v8611_v52  ;;  %2983 = vmatmul.f32.gmra.mxu2 %v9928_v11  ;;  %vm2638_vm0 = vmor %vm2636_vm15, %vm2637_vm14  ;;  %vm2646_vm2 = vweird.f32 %v2464_v51 }
 0x508   : > { %v2291_v54 = vpop.xlane.xlu0 %2290  ;;  %v2629_v60 = vsel %vm2628_vm13, %v7676_v57, %v2625_v3  ;;  %v2632_v31 = vmul.f32 %v7678_v8, %v2631_v34 }
 0x509   : > { %v2337_v33 = vmul.f32 %v2291_v54, %v8611_v52  ;;  %v2814_v2 = vmul.f32 %v2629_v60, %v2430_v1  ;;  %v2369_v56 = vmul.f32 %v9925_v24, %v9925_v24 }
 0x50a   : > { %v2633_v43 = vmul.f32 0.5, %v2632_v31 }
 0x50b   : > { %v2851_v0 = vmul.f32 %v9574_v59, %v2814_v2  ;;  %v2401_v7 = vsub.f32 %v2337_v33, %v2369_v56 }
 0x50c   : > { %v2634_v41 = vsub.f32 1.5, %v2633_v43 }
 0x50d   : > { %v7680_v44 = vpop.eup %7679  ;;  %v2465_v18 = vadd.f32 1e-05, %v2401_v7  ;;  %v9936_v25 = vadd.f32 %v9581_v46, %v2851_v0 }
 0x50e   : > { %v2641_v42 = vmul.f32 %v7680_v44, %v2464_v51  ;;  %v2165_v57 = vpop.xlane.xlu1 %2164  ;;  %v2635_v29 = vmul.f32 %v7678_v8, %v2634_v41  ;;  %vm2647_vm1 = vweird.f32 %v7680_v44 }
 0x50f   : > { %v9940_v16 = vmul.f32 %v2165_v57, %v8611_v52  ;;  %7681 = vrsqrt.f32 %v2465_v18  ;;  %2986 = vmatmul.f32.gmra.mxu2 %v9936_v25  ;;  %vm2648_vm3 = vmor %vm2646_vm2, %vm2647_vm1  ;;  %vm2656_vm5 = vweird.f32 %v2465_v18 }
 0x510   : > { %v2642_v40 = vmul.f32 %v7680_v44, %v2641_v42  ;;  %v2293_v13 = vpop.xlane.xlu2 %2292  ;;  %v2639_v34 = vsel %vm2638_vm0, %v7678_v8, %v2635_v29  ;;  %v2432_v8 = vsub.f32 %v9544_v10, %v9902_v39 }
 0x511   : > { %v2370_v3 = vmul.f32 %v9940_v16, %v9940_v16  ;;  %v2338_v1 = vmul.f32 %v2293_v13, %v8611_v52  ;;  %v2815_v49 = vmul.f32 %v2639_v34, %v2431_v15 }
 0x512   : > { %v2643_v54 = vmul.f32 0.5, %v2642_v40  ;;  %v3248_v40 = vld [vmem:[#allocation5 + $0x438] sm:$0xff] }
 0x513   : > { %v2402_v60 = vsub.f32 %v2338_v1, %v2370_v3  ;;  %v2852_v33 = vmul.f32 %v9574_v59, %v2815_v49  ;;  %3270 = vmatpush.msra.mxu0 %v3248_v40  ;;  %v9967_v49 = vld [vmem:[#allocation7 + $0x6] ss:$0 sm:$0xff] }
 0x514   : > { %v2644_v31 = vsub.f32 1.5, %v2643_v54 }
 0x515   : > { %v2466_v30 = vadd.f32 1e-05, %v2402_v60  ;;  %v7682_v36 = vpop.eup %7681  ;;  %v9950_v56 = vadd.f32 %v9581_v46, %v2852_v33  ;;  %v2433_v33 = vsub.f32 %v9559_v55, %v9925_v24 }
 0x516   : > { %v2167_v2 = vpop.xlane.xlu0 %2166  ;;  %v2645_v43 = vmul.f32 %v7680_v44, %v2644_v31  ;;  %v2651_v0 = vmul.f32 %v7682_v36, %v2465_v18  ;;  %vm2657_vm4 = vweird.f32 %v7682_v36 }
 0x517   : > { %7683 = vrsqrt.f32 %v2466_v30  ;;  %v9955_v7 = vmul.f32 %v2167_v2, %v8611_v52  ;;  %2989 = vmatmul.f32.gmra.mxu2 %v9950_v56  ;;  %vm2658_vm6 = vmor %vm2656_vm5, %vm2657_vm4  ;;  %vm2666_vm8 = vweird.f32 %v2466_v30 }
 0x518   : > { %v2295_v41 = vpop.xlane.xlu1 %2294  ;;  %v2649_v61 = vsel %vm2648_vm3, %v7680_v44, %v2645_v43  ;;  %v2652_v42 = vmul.f32 %v7682_v36, %v2651_v0 }
 0x519   : > { %v2339_v57 = vmul.f32 %v2295_v41, %v8611_v52  ;;  %v2816_v51 = vmul.f32 %v2649_v61, %v2432_v8  ;;  %v2371_v29 = vmul.f32 %v9955_v7, %v9955_v7 }
 0x51a   : > { %v2653_v15 = vmul.f32 0.5, %v2652_v42 }
 0x51b   : > { %v2853_v10 = vmul.f32 %v9574_v59, %v2816_v51  ;;  %v2403_v39 = vsub.f32 %v2339_v57, %v2371_v29  ;;  %v9980_v29 = vld [vmem:[#allocation8 + $0x1] ss:$0 sm:$0xff] }
 0x51c   : > { %v2654_v3 = vsub.f32 1.5, %v2653_v15 }
 0x51d   : > { %v7684_v13 = vpop.eup %7683  ;;  %v9962_v44 = vadd.f32 1e-05, %v2403_v39  ;;  %v9965_v34 = vadd.f32 %v9581_v46, %v2853_v10 }
 0x51e   : > { %v2661_v1 = vmul.f32 %v7684_v13, %v2466_v30  ;;  %v2169_v54 = vpop.xlane.xlu2 %2168  ;;  %v2655_v60 = vmul.f32 %v7682_v36, %v2654_v3  ;;  %vm2667_vm7 = vweird.f32 %v7684_v13  ;;  %v9989_v3 = vld [vmem:[#allocation10 + $0x1] ss:$0 sm:$0xff] }
 0x51f   : > { %7685 = vrsqrt.f32 %v9962_v44  ;;  %v9971_v59 = vmul.f32 %v2169_v54, %v8611_v52  ;;  %2992 = vmatmul.f32.gmra.mxu2 %v9965_v34  ;;  %vm2668_vm9 = vmor %vm2666_vm8, %vm2667_vm7  ;;  %v2434_v54 = vsub.f32 %v9579_v45, %v9940_v16  ;;  %v3247_v16 = vld [vmem:[#allocation5 + $0x430] sm:$0xff]  ;;  %vm2676_vm11 = vweird.f32 %v9962_v44 }
 0x520   : > { %v2662_v31 = vmul.f32 %v7684_v13, %v2661_v1  ;;  %v2297_v2 = vpop.xlane.xlu0 %2296  ;;  %v2659_v43 = vsel %vm2658_vm6, %v7682_v36, %v2655_v60  ;;  %3271 = vmatpush.msra.mxu0 %v3247_v16 }
 0x521   : > { %v2372_v46 = vmul.f32 %v9971_v59, %v9971_v59  ;;  %v2340_v18 = vmul.f32 %v2297_v2, %v8611_v52  ;;  %v2817_v61 = vmul.f32 %v2659_v43, %v2433_v33 }
 0x522   : > { %v2663_v8 = vmul.f32 0.5, %v2662_v31  ;;  %v2945_v0 = vpop.f32.mrf.mxu2 }
 0x523   : > { %v2946_v41 = vadd.f32 %v9967_v49, %v2945_v0  ;;  %v2404_v57 = vsub.f32 %v2340_v18, %v2372_v46  ;;  %v2854_v55 = vmul.f32 %v9980_v29, %v2817_v61 }
 0x524   : > { %v2664_v42 = vsub.f32 1.5, %v2663_v8 }
 0x525   : > { %v3041_v51 = vmax.f32 %v2946_v41, 0.0  ;;  %v7686_v24 = vpop.eup %7685  ;;  %v9983_v36 = vadd.f32 1e-05, %v2404_v57  ;;  %v9992_v1 = vadd.f32 %v9989_v3, %v2854_v55 }
 0x526   : > { %v2171_v15 = vpop.xlane.xlu1 %2170  ;;  %v2665_v10 = vmul.f32 %v7684_v13, %v2664_v42  ;;  %v2671_v39 = vmul.f32 %v7686_v24, %v9962_v44  ;;  %vm2677_vm10 = vweird.f32 %v7686_v24 }
 0x527   : > { %v9987_v40 = vmul.f32 %v2171_v15, %v8611_v52  ;;  %3111 = vmatmul.f32.vlgmr.msra.gmra.mxu3 %v3041_v51  ;;  %7687 = vrsqrt.f32 %v9983_v36  ;;  %2995 = vmatmul.f32.gmra.mxu2 %v9992_v1  ;;  %vm2678_vm12 = vmor %vm2676_vm11, %vm2677_vm10  ;;  %vm2686_vm14 = vweird.f32 %v9983_v36 }
 0x528   : > { %v2299_v30 = vpop.xlane.xlu2 %2298  ;;  %v2669_v60 = vsel %vm2668_vm9, %v7684_v13, %v2665_v10  ;;  %v2672_v31 = vmul.f32 %v7686_v24, %v2671_v39  ;;  %v2435_v39 = vsub.f32 %v9603_v22, %v9955_v7 }
 0x529   : > { %v2373_v33 = vmul.f32 %v9987_v40, %v9987_v40  ;;  %v2341_v2 = vmul.f32 %v2299_v30, %v8611_v52  ;;  %v2818_v43 = vmul.f32 %v2669_v60, %v2434_v54 }
 0x52a   : > { %v2673_v8 = vmul.f32 0.5, %v2672_v31  ;;  %v2948_v18 = vpop.f32.mrf.mxu2 }
 0x52b   : > { %v2405_v46 = vsub.f32 %v2341_v2, %v2373_v33  ;;  %v2949_v0 = vadd.f32 %v9967_v49, %v2948_v18  ;;  %v2855_v45 = vmul.f32 %v9980_v29, %v2818_v43 }
 0x52c   : > { %v2674_v41 = vsub.f32 1.5, %v2673_v8 }
 0x52d   : > { %v10003_v61 = vadd.f32 1e-05, %v2405_v46  ;;  %v7688_v13 = vpop.eup %7687  ;;  %v3042_v42 = vmax.f32 %v2949_v0, 0.0  ;;  %v10006_v57 = vadd.f32 %v9989_v3, %v2855_v45 }
 0x52e   : > { %v2681_v51 = vmul.f32 %v7688_v13, %v9983_v36  ;;  %v2173_v55 = vpop.xlane.xlu0 %2172  ;;  %v2675_v10 = vmul.f32 %v7686_v24, %v2674_v41  ;;  %vm2687_vm13 = vweird.f32 %v7688_v13 }
 0x52f   : > { %7689 = vrsqrt.f32 %v10003_v61  ;;  %v10012_v15 = vmul.f32 %v2173_v55, %v8611_v52  ;;  %3114 = vmatmul.f32.gmra.mxu3 %v3042_v42  ;;  %2998 = vmatmul.f32.gmra.mxu2 %v10006_v57  ;;  %v2436_v55 = vsub.f32 %v9631_v32, %v9971_v59  ;;  %vm2688_vm15 = vmor %vm2686_vm14, %vm2687_vm13  ;;  %v3246_v59 = vld [vmem:[#allocation5 + $0x428] sm:$0xff]  ;;  %vm2696_vm1 = vweird.f32 %v10003_v61 }
 0x530   : > { %v2682_v54 = vmul.f32 %v7688_v13, %v2681_v51  ;;  %v2301_v30 = vpop.xlane.xlu1 %2300  ;;  %v2679_v33 = vsel %vm2678_vm12, %v7686_v24, %v2675_v10  ;;  %3272 = vmatpush.msra.mxu0 %v3246_v59 }
 0x531   : > { %v2374_v60 = vmul.f32 %v10012_v15, %v10012_v15  ;;  %v2342_v31 = vmul.f32 %v2301_v30, %v8611_v52  ;;  %v2819_v43 = vmul.f32 %v2679_v33, %v2435_v39 }
 0x532   : > { %v2683_v44 = vmul.f32 0.5, %v2682_v54  ;;  %v2951_v2 = vpop.f32.mrf.mxu2 }
 0x533   : > { %v2406_v8 = vsub.f32 %v2342_v31, %v2374_v60  ;;  %v2952_v46 = vadd.f32 %v9967_v49, %v2951_v2  ;;  %v2856_v22 = vmul.f32 %v9980_v29, %v2819_v43 }
 0x534   : > { %v2684_v0 = vsub.f32 1.5, %v2683_v44 }
 0x535   : > { %v7690_v18 = vpop.eup %7689  ;;  %v10023_v45 = vadd.f32 1e-05, %v2406_v8  ;;  %v3043_v16 = vmax.f32 %v2952_v46, 0.0  ;;  %v10030_v42 = vadd.f32 %v9989_v3, %v2856_v22  ;;  %v2437_v22 = vsub.f32 %v9656_v37, %v9987_v40 }
 0x536   : > { %v2691_v7 = vmul.f32 %v7690_v18, %v10003_v61  ;;  %v2175_v41 = vpop.xlane.xlu2 %2174  ;;  %v2685_v51 = vmul.f32 %v7688_v13, %v2684_v0  ;;  %vm2697_vm0 = vweird.f32 %v7690_v18 }
 0x537   : > { %v10027_v24 = vmul.f32 %v2175_v41, %v8611_v52  ;;  %7691 = vrsqrt.f32 %v10023_v45  ;;  %3117 = vmatmul.f32.gmra.mxu3 %v3043_v16  ;;  %3001 = vmatmul.f32.gmra.mxu2 %v10030_v42  ;;  %vm2698_vm2 = vmor %vm2696_vm1, %vm2697_vm0  ;;  %vm2706_vm4 = vweird.f32 %v10023_v45 }
 0x538   : > { %v2692_v10 = vmul.f32 %v7690_v18, %v2691_v7  ;;  %v2303_v39 = vpop.xlane.xlu0 %2302  ;;  %v2689_v30 = vsel %vm2688_vm15, %v7688_v13, %v2685_v51 }
 0x539   : > { %v2375_v54 = vmul.f32 %v10027_v24, %v10027_v24  ;;  %v2343_v36 = vmul.f32 %v2303_v39, %v8611_v52  ;;  %v2820_v31 = vmul.f32 %v2689_v30, %v2436_v55 }
 0x53a   : > { %v2693_v60 = vmul.f32 0.5, %v2692_v10  ;;  %v2954_v43 = vpop.f32.mrf.mxu2 }
 0x53b   : > { %v2407_v33 = vsub.f32 %v2343_v36, %v2375_v54  ;;  %v2857_v32 = vmul.f32 %v9980_v29, %v2820_v31  ;;  %v2955_v46 = vadd.f32 %v9967_v49, %v2954_v43 }
 0x53c   : > { %v2694_v44 = vsub.f32 1.5, %v2693_v60 }
 0x53d   : > { %v10040_v2 = vadd.f32 1e-05, %v2407_v33  ;;  %v7692_v8 = vpop.eup %7691  ;;  %v10045_v13 = vadd.f32 %v9989_v3, %v2857_v32  ;;  %v3044_v41 = vmax.f32 %v2955_v46, 0.0 }
 0x53e   : > { %v2695_v0 = vmul.f32 %v7690_v18, %v2694_v44  ;;  %v2701_v7 = vmul.f32 %v7692_v8, %v10023_v45  ;;  %v2177_v16 = vpop.xlane.xlu1 %2176  ;;  %vm2707_vm3 = vweird.f32 %v7692_v8 }
 0x53f   : > { %7693 = vrsqrt.f32 %v10040_v2  ;;  %v10052_v51 = vmul.f32 %v2177_v16, %v8611_v52  ;;  %3004 = vmatmul.f32.gmra.mxu2 %v10045_v13  ;;  %3120 = vmatmul.f32.gmra.mxu3 %v3044_v41  ;;  %vm2708_vm5 = vmor %vm2706_vm4, %vm2707_vm3  ;;  %vm2716_vm7 = vweird.f32 %v10040_v2 }
 0x540   : > { %v2699_v61 = vsel %vm2698_vm2, %v7690_v18, %v2695_v0  ;;  %v2702_v55 = vmul.f32 %v7692_v8, %v2701_v7  ;;  %v2305_v10 = vpop.xlane.xlu2 %2304 }
 0x541   : > { %v2821_v39 = vmul.f32 %v2699_v61, %v2437_v22  ;;  %v2376_v54 = vmul.f32 %v10052_v51, %v10052_v51  ;;  %v2344_v37 = vmul.f32 %v2305_v10, %v8611_v52  ;;  %v2438_v22 = vsub.f32 %v9679_v27, %v10012_v15  ;;  %v3245_v15 = vld [vmem:[#allocation5 + $0x420] sm:$0xff] }
 0x542   : > { %v2703_v40 = vmul.f32 0.5, %v2702_v55  ;;  %v2957_v33 = vpop.f32.mrf.mxu2  ;;  %3273 = vmatpush.msra.mxu0 %v3245_v15 }
 0x543   : > { %v2858_v36 = vmul.f32 %v9980_v29, %v2821_v39  ;;  %v2408_v30 = vsub.f32 %v2344_v37, %v2376_v54  ;;  %v2958_v32 = vadd.f32 %v9967_v49, %v2957_v33 }
 0x544   : > { %v2704_v31 = vsub.f32 1.5, %v2703_v40 }
 0x545   : > { %v7694_v60 = vpop.eup %7693  ;;  %v10060_v44 = vadd.f32 1e-05, %v2408_v30  ;;  %v10064_v43 = vadd.f32 %v9989_v3, %v2858_v36  ;;  %v3045_v16 = vmax.f32 %v2958_v32, 0.0 }
 0x546   : > { %v2711_v18 = vmul.f32 %v7694_v60, %v10040_v2  ;;  %v2179_v59 = vpop.xlane.xlu0 %2178  ;;  %v2705_v0 = vmul.f32 %v7692_v8, %v2704_v31  ;;  %vm2717_vm6 = vweird.f32 %v7694_v60 }
 0x547   : > { %v10068_v46 = vmul.f32 %v2179_v59, %v8611_v52  ;;  %7695 = vrsqrt.f32 %v10060_v44  ;;  %3007 = vmatmul.f32.gmra.mxu2 %v10064_v43  ;;  %3123 = vmatmul.f32.gmra.mxu3 %v3045_v16  ;;  %vm2718_vm8 = vmor %vm2716_vm7, %vm2717_vm6  ;;  %vm2726_vm10 = vweird.f32 %v10060_v44 }
 0x548   : > { %v2712_v7 = vmul.f32 %v7694_v60, %v2711_v18  ;;  %v2307_v41 = vpop.xlane.xlu1 %2306  ;;  %v2709_v10 = vsel %vm2708_vm5, %v7692_v8, %v2705_v0  ;;  %v2439_v18 = vsub.f32 %v9706_v53, %v10027_v24 }
 0x549   : > { %v2377_v61 = vmul.f32 %v10068_v46, %v10068_v46  ;;  %v2345_v55 = vmul.f32 %v2307_v41, %v8611_v52  ;;  %v2822_v39 = vmul.f32 %v2709_v10, %v2438_v22 }
 0x54a   : > { %v2713_v45 = vmul.f32 0.5, %v2712_v7  ;;  %v2960_v36 = vpop.f32.mrf.mxu2 }
 0x54b   : > { %v2409_v54 = vsub.f32 %v2345_v55, %v2377_v61  ;;  %v2859_v27 = vmul.f32 %v9980_v29, %v2822_v39  ;;  %v2961_v8 = vadd.f32 %v9967_v49, %v2960_v36 }
 0x54c   : > { %v2714_v37 = vsub.f32 1.5, %v2713_v45 }
 0x54d   : > { %v10078_v40 = vadd.f32 1e-05, %v2409_v54  ;;  %v7696_v30 = vpop.eup %7695  ;;  %v10083_v31 = vadd.f32 %v9989_v3, %v2859_v27  ;;  %v3046_v0 = vmax.f32 %v2961_v8, 0.0 }
 0x54e   : > { %v2715_v33 = vmul.f32 %v7694_v60, %v2714_v37  ;;  %v2721_v32 = vmul.f32 %v7696_v30, %v10060_v44  ;;  %v2181_v59 = vpop.xlane.xlu2 %2180  ;;  %vm2727_vm9 = vweird.f32 %v7696_v30 }
 0x54f   : > { %7697 = vrsqrt.f32 %v10078_v40  ;;  %v10090_v22 = vmul.f32 %v2181_v59, %v8611_v52  ;;  %3010 = vmatmul.f32.gmra.mxu2 %v10083_v31  ;;  %3126 = vmatmul.f32.gmra.mxu3 %v3046_v0  ;;  %vm2728_vm11 = vmor %vm2726_vm10, %vm2727_vm9  ;;  %vm2736_vm13 = vweird.f32 %v10078_v40 }
 0x550   : > { %v2719_v2 = vsel %vm2718_vm8, %v7694_v60, %v2715_v33  ;;  %v2722_v7 = vmul.f32 %v7696_v30, %v2721_v32  ;;  %v2309_v16 = vpop.xlane.xlu0 %2308 }
 0x551   : > { %v2823_v41 = vmul.f32 %v2719_v2, %v2439_v18  ;;  %v2378_v61 = vmul.f32 %v10090_v22, %v10090_v22  ;;  %v2346_v53 = vmul.f32 %v2309_v16, %v8611_v52  ;;  %v2440_v18 = vsub.f32 %v9732_v19, %v10052_v51  ;;  %v3244_v51 = vld [vmem:[#allocation5 + $0x418] sm:$0xff] }
 0x552   : > { %v2723_v24 = vmul.f32 0.5, %v2722_v7  ;;  %v2963_v54 = vpop.f32.mrf.mxu2  ;;  %3274 = vmatpush.msra.mxu0 %v3244_v51 }
 0x553   : > { %v2860_v55 = vmul.f32 %v9980_v29, %v2823_v41  ;;  %v2410_v10 = vsub.f32 %v2346_v53, %v2378_v61  ;;  %v2964_v27 = vadd.f32 %v9967_v49, %v2963_v54 }
 0x554   : > { %v2724_v39 = vsub.f32 1.5, %v2723_v24 }
 0x555   : > { %v7698_v45 = vpop.eup %7697  ;;  %v10098_v37 = vadd.f32 1e-05, %v2410_v10  ;;  %v10102_v36 = vadd.f32 %v9989_v3, %v2860_v55  ;;  %v3047_v59 = vmax.f32 %v2964_v27, 0.0 }
 0x556   : > { %v2731_v60 = vmul.f32 %v7698_v45, %v10078_v40  ;;  %v2183_v15 = vpop.xlane.xlu1 %2182  ;;  %v2725_v33 = vmul.f32 %v7696_v30, %v2724_v39  ;;  %vm2737_vm12 = vweird.f32 %v7698_v45 }
 0x557   : > { %v10106_v8 = vmul.f32 %v2183_v15, %v8611_v52  ;;  %7699 = vrsqrt.f32 %v10098_v37  ;;  %3013 = vmatmul.f32.gmra.mxu2 %v10102_v36  ;;  %3129 = vmatmul.f32.gmra.mxu3 %v3047_v59  ;;  %vm2738_vm14 = vmor %vm2736_vm13, %vm2737_vm12  ;;  %vm2746_vm0 = vweird.f32 %v10098_v37 }
 0x558   : > { %v2732_v32 = vmul.f32 %v7698_v45, %v2731_v60  ;;  %v2311_v0 = vpop.xlane.xlu2 %2310  ;;  %v2729_v16 = vsel %vm2728_vm11, %v7696_v30, %v2725_v33  ;;  %v2441_v60 = vsub.f32 %v9755_v47, %v10068_v46 }
 0x559   : > { %v2379_v2 = vmul.f32 %v10106_v8, %v10106_v8  ;;  %v2347_v7 = vmul.f32 %v2311_v0, %v8611_v52  ;;  %v2824_v41 = vmul.f32 %v2729_v16, %v2440_v18 }
 0x55a   : > { %v2733_v44 = vmul.f32 0.5, %v2732_v32  ;;  %v2966_v55 = vpop.f32.mrf.mxu2 }
 0x55b   : > { %v2411_v61 = vsub.f32 %v2347_v7, %v2379_v2  ;;  %v2861_v19 = vmul.f32 %v9980_v29, %v2824_v41  ;;  %v2967_v30 = vadd.f32 %v9967_v49, %v2966_v55 }
 0x55c   : > { %v2734_v53 = vsub.f32 1.5, %v2733_v44 }
 0x55d   : > { %v10116_v24 = vadd.f32 1e-05, %v2411_v61  ;;  %v7700_v10 = vpop.eup %7699  ;;  %v10121_v39 = vadd.f32 %v9989_v3, %v2861_v19  ;;  %v3048_v33 = vmax.f32 %v2967_v30, 0.0 }
 0x55e   : > { %v2735_v54 = vmul.f32 %v7698_v45, %v2734_v53  ;;  %v2741_v27 = vmul.f32 %v7700_v10, %v10098_v37  ;;  %v2185_v15 = vpop.xlane.xlu0 %2184  ;;  %vm2747_vm15 = vweird.f32 %v7700_v10 }
 0x55f   : > { %7701 = vrsqrt.f32 %v10116_v24  ;;  %v10128_v18 = vmul.f32 %v2185_v15, %v8611_v52  ;;  %3016 = vmatmul.f32.gmra.mxu2 %v10121_v39  ;;  %3132 = vmatmul.f32.gmra.mxu3 %v3048_v33  ;;  %vm2748_vm1 = vmor %vm2746_vm0, %vm2747_vm15  ;;  %vm2756_vm3 = vweird.f32 %v10116_v24 }
 0x560   : > { %v2739_v40 = vsel %vm2738_vm14, %v7698_v45, %v2735_v54  ;;  %v2742_v32 = vmul.f32 %v7700_v10, %v2741_v27  ;;  %v2313_v59 = vpop.xlane.xlu1 %2312 }
 0x561   : > { %v2825_v0 = vmul.f32 %v2739_v40, %v2441_v60  ;;  %v2380_v2 = vmul.f32 %v10128_v18, %v10128_v18  ;;  %v2348_v47 = vmul.f32 %v2313_v59, %v8611_v52  ;;  %v2442_v60 = vsub.f32 %v9783_v63, %v10090_v22  ;;  %v3243_v22 = vld [vmem:[#allocation5 + $0x410] sm:$0xff] }
 0x562   : > { %v2743_v46 = vmul.f32 0.5, %v2742_v32  ;;  %v2969_v61 = vpop.f32.mrf.mxu2  ;;  %3275 = vmatpush.msra.mxu0 %v3243_v22 }
 0x563   : > { %v2862_v7 = vmul.f32 %v9980_v29, %v2825_v0  ;;  %v2412_v16 = vsub.f32 %v2348_v47, %v2380_v2  ;;  %v2970_v19 = vadd.f32 %v9967_v49, %v2969_v61 }
 0x564   : > { %v2744_v41 = vsub.f32 1.5, %v2743_v46 }
 0x565   : > { %v7702_v44 = vpop.eup %7701  ;;  %v10136_v53 = vadd.f32 1e-05, %v2412_v16  ;;  %v10140_v55 = vadd.f32 %v9989_v3, %v2862_v7  ;;  %v3049_v15 = vmax.f32 %v2970_v19, 0.0 }
 0x566   : > { %v2751_v45 = vmul.f32 %v7702_v44, %v10116_v24  ;;  %v2187_v51 = vpop.xlane.xlu2 %2186  ;;  %v2745_v54 = vmul.f32 %v7700_v10, %v2744_v41  ;;  %vm2757_vm2 = vweird.f32 %v7702_v44 }
 0x567   : > { %v10144_v30 = vmul.f32 %v2187_v51, %v8611_v52  ;;  %7703 = vrsqrt.f32 %v10136_v53  ;;  %3019 = vmatmul.f32.gmra.mxu2 %v10140_v55  ;;  %3135 = vmatmul.f32.gmra.mxu3 %v3049_v15  ;;  %vm2758_vm4 = vmor %vm2756_vm3, %vm2757_vm2  ;;  %vm2766_vm6 = vweird.f32 %v10136_v53 }
 0x568   : > { %v2752_v27 = vmul.f32 %v7702_v44, %v2751_v45  ;;  %v2315_v33 = vpop.xlane.xlu0 %2314  ;;  %v2749_v59 = vsel %vm2748_vm1, %v7700_v10, %v2745_v54  ;;  %v2443_v45 = vsub.f32 %v9810_v21, %v10106_v8  ;;  %v3242_v8 = vld [vmem:[#allocation5 + $0x408] sm:$0xff] }
 0x569   : > { %v2381_v40 = vmul.f32 %v10144_v30, %v10144_v30  ;;  %v2349_v32 = vmul.f32 %v2315_v33, %v8611_v52  ;;  %v2826_v0 = vmul.f32 %v2749_v59, %v2442_v60  ;;  %3276 = vmatpush.msra.mxu0 %v3242_v8 }
 0x56a   : > { %v2753_v37 = vmul.f32 0.5, %v2752_v27  ;;  %v2972_v7 = vpop.f32.mrf.mxu2 }
 0x56b   : > { %v2413_v2 = vsub.f32 %v2349_v32, %v2381_v40  ;;  %v2863_v63 = vmul.f32 %v9980_v29, %v2826_v0  ;;  %v2973_v10 = vadd.f32 %v9967_v49, %v2972_v7 }
 0x56c   : > { %v2754_v47 = vsub.f32 1.5, %v2753_v37 }
 0x56d   : > { %v10154_v46 = vadd.f32 1e-05, %v2413_v2  ;;  %v7704_v16 = vpop.eup %7703  ;;  %v10159_v41 = vadd.f32 %v9989_v3, %v2863_v63  ;;  %v3050_v54 = vmax.f32 %v2973_v10, 0.0 }
 0x56e   : > { %v2755_v61 = vmul.f32 %v7702_v44, %v2754_v47  ;;  %v2761_v19 = vmul.f32 %v7704_v16, %v10136_v53  ;;  %v2189_v51 = vpop.xlane.xlu1 %2188  ;;  %vm2767_vm5 = vweird.f32 %v7704_v16 }
 0x56f   : > { %7705 = vrsqrt.f32 %v10154_v46  ;;  %v10166_v60 = vmul.f32 %v2189_v51, %v8611_v52  ;;  %3022 = vmatmul.f32.gmra.mxu2 %v10159_v41  ;;  %3138 = vmatmul.f32.gmra.mxu3 %v3050_v54  ;;  %vm2768_vm7 = vmor %vm2766_vm6, %vm2767_vm5  ;;  %vm2776_vm9 = vweird.f32 %v10154_v46 }
 0x570   : > { %v2759_v24 = vsel %vm2758_vm4, %v7702_v44, %v2755_v61  ;;  %v2762_v27 = vmul.f32 %v7704_v16, %v2761_v19  ;;  %v2317_v15 = vpop.xlane.xlu2 %2316  ;;  %v2444_v19 = vsub.f32 %v9834_v28, %v10128_v18 }
 0x571   : > { %v2827_v33 = vmul.f32 %v2759_v24, %v2443_v45  ;;  %v2382_v40 = vmul.f32 %v10166_v60, %v10166_v60  ;;  %v2350_v21 = vmul.f32 %v2317_v15, %v8611_v52 }
 0x572   : > { %v2763_v32 = vmul.f32 0.5, %v2762_v27  ;;  %v2975_v44 = vpop.f32.mrf.mxu2 }
 0x573   : > { %v2864_v59 = vmul.f32 %v9980_v29, %v2827_v33  ;;  %v2414_v37 = vsub.f32 %v2350_v21, %v2382_v40  ;;  %v2976_v22 = vadd.f32 %v9967_v49, %v2975_v44  ;;  %v2445_v44 = vsub.f32 %v9861_v58, %v10144_v30 }
 0x574   : > { %v2764_v2 = vsub.f32 1.5, %v2763_v32 }
 0x575   : > { %v7706_v0 = vpop.eup %7705  ;;  %v2478_v63 = vadd.f32 1e-05, %v2414_v37  ;;  %v10176_v10 = vadd.f32 %v9989_v3, %v2864_v59  ;;  %v3051_v54 = vmax.f32 %v2976_v22, 0.0 }
 0x576   : > { %v2771_v47 = vmul.f32 %v7706_v0, %v10154_v46  ;;  %v2191_v7 = vpop.xlane.xlu0 %2190  ;;  %v2765_v45 = vmul.f32 %v7704_v16, %v2764_v2  ;;  %vm2777_vm8 = vweird.f32 %v7706_v0  ;;  %v3241_v46 = vld [vmem:[#allocation5 + $0x400] sm:$0xff] }
 0x577   : > { %v10180_v61 = vmul.f32 %v2191_v7, %v8611_v52  ;;  %7707 = vrsqrt.f32 %v2478_v63  ;;  %3025 = vmatmul.f32.gmra.mxu2 %v10176_v10  ;;  %3141 = vmatmul.f32.gmra.mxu3 %v3051_v54  ;;  %vm2778_vm10 = vmor %vm2776_vm9, %vm2777_vm8  ;;  %vm2786_vm12 = vweird.f32 %v2478_v63 }
 0x578   : > { %v2772_v51 = vmul.f32 %v7706_v0, %v2771_v47  ;;  %v2319_v24 = vpop.xlane.xlu1 %2318  ;;  %v2769_v33 = vsel %vm2768_vm7, %v7704_v16, %v2765_v45  ;;  %3277 = vmatpush.msra.mxu0 %v3241_v46 }
 0x579   : > { %v2383_v27 = vmul.f32 %v10180_v61, %v10180_v61  ;;  %v2351_v15 = vmul.f32 %v2319_v24, %v8611_v52  ;;  %v2828_v53 = vmul.f32 %v2769_v33, %v2444_v19 }
 0x57a   : > { %v2773_v40 = vmul.f32 0.5, %v2772_v51  ;;  %v2978_v32 = vpop.f32.mrf.mxu2 }
 0x57b   : > { %v2415_v21 = vsub.f32 %v2351_v15, %v2383_v27  ;;  %v2865_v28 = vmul.f32 %v9980_v29, %v2828_v53  ;;  %v2979_v37 = vadd.f32 %v9967_v49, %v2978_v32 }
 0x57c   : > { %v2774_v8 = vsub.f32 1.5, %v2773_v40  ;;  %v2446_v40 = vsub.f32 %v9887_v23, %v10166_v60  ;;  %v2447_v60 = vsub.f32 %v9910_v62, %v10180_v61 }
 0x57d   : > { %v2479_v18 = vadd.f32 1e-05, %v2415_v21  ;;  %v7708_v59 = vpop.eup %7707  ;;  %v10192_v2 = vadd.f32 %v9989_v3, %v2865_v28  ;;  %v3052_v22 = vmax.f32 %v2979_v37, 0.0 }
 0x57e   : > { %v2775_v16 = vmul.f32 %v7706_v0, %v2774_v8  ;;  %v2781_v47 = vmul.f32 %v7708_v59, %v2478_v63  ;;  %vm2787_vm11 = vweird.f32 %v7708_v59 }
 0x57f   : > { %7709 = vrsqrt.f32 %v2479_v18  ;;  %3028 = vmatmul.f32.gmra.mxu2 %v10192_v2  ;;  %3144 = vmatmul.f32.gmra.mxu3 %v3052_v22  ;;  %vm2788_vm13 = vmor %vm2786_vm12, %vm2787_vm11  ;;  %vm2796_vm15 = vweird.f32 %v2479_v18 }
 0x580   : > { %v2779_v7 = vsel %vm2778_vm10, %v7706_v0, %v2775_v16  ;;  %v2782_v45 = vmul.f32 %v7708_v59, %v2781_v47 }
 0x581   : > { %v2829_v19 = vmul.f32 %v2779_v7, %v2445_v44 }
 0x582   : > { %v2783_v51 = vmul.f32 0.5, %v2782_v45  ;;  %v2981_v15 = vpop.f32.mrf.mxu2 }
 0x583   : > { %v2866_v54 = vmul.f32 %v9980_v29, %v2829_v19  ;;  %v2982_v30 = vadd.f32 %v9967_v49, %v2981_v15  ;;  %v10221_v15 = vld [vmem:[#allocation7 + $0x7] ss:$0 sm:$0xff] }
 0x584   : > { %v2784_v27 = vsub.f32 1.5, %v2783_v51 }
 0x585   : > { %v7710_v24 = vpop.eup %7709  ;;  %v10200_v33 = vadd.f32 %v9989_v3, %v2866_v54  ;;  %v3053_v21 = vmax.f32 %v2982_v30, 0.0 }
 0x586   : > { %v2791_v58 = vmul.f32 %v7710_v24, %v2479_v18  ;;  %v2785_v0 = vmul.f32 %v7708_v59, %v2784_v27  ;;  %vm2797_vm14 = vweird.f32 %v7710_v24 }
 0x587   : > { %3031 = vmatmul.f32.gmra.mxu2 %v10200_v33  ;;  %3147 = vmatmul.f32.gmra.mxu3 %v3053_v21  ;;  %vm2798_vm0 = vmor %vm2796_vm15, %vm2797_vm14 }
 0x588   : > { %v2792_v53 = vmul.f32 %v7710_v24, %v2791_v58  ;;  %v2789_v8 = vsel %vm2788_vm13, %v7708_v59, %v2785_v0  ;;  %v4201_v58 = vld [vmem:[#allocation5 + $0x4f8] sm:$0xff] }
 0x589   : > { %v2830_v32 = vmul.f32 %v2789_v8, %v2446_v40  ;;  %4207 = vmatpush.msra.mxu1 %v4201_v58 }
 0x58a   : > { %v2793_v28 = vmul.f32 0.5, %v2792_v53  ;;  %v2984_v44 = vpop.f32.mrf.mxu2 }
 0x58b   : > { %v2867_v16 = vmul.f32 %v9980_v29, %v2830_v32  ;;  %v2985_v63 = vadd.f32 %v9967_v49, %v2984_v44 }
 0x58c   : > { %v2794_v37 = vsub.f32 1.5, %v2793_v28 }
 0x58d   : > { %v10208_v47 = vadd.f32 %v9989_v3, %v2867_v16  ;;  %v3054_v59 = vmax.f32 %v2985_v63, 0.0  ;;  %v4200_v63 = vld [vmem:[#allocation5 + $0x4f0] sm:$0xff] }
 0x58e   : > { %v2795_v23 = vmul.f32 %v7710_v24, %v2794_v37  ;;  %4208 = vmatpush.msra.mxu1 %v4200_v63 }
 0x58f   : > { %3034 = vmatmul.f32.gmra.mxu2 %v10208_v47  ;;  %3150 = vmatmul.f32.gmra.mxu3 %v3054_v59 }
 0x590   : > { %v2799_v22 = vsel %vm2798_vm0, %v7710_v24, %v2795_v23 }
 0x591   : > { %v2831_v7 = vmul.f32 %v2799_v22, %v2447_v60 }
 0x592   : > { %v2987_v19 = vpop.f32.mrf.mxu2 }
 0x593   : > { %v2868_v45 = vmul.f32 %v9980_v29, %v2831_v7  ;;  %v2988_v18 = vadd.f32 %v9967_v49, %v2987_v19 }
 0x595   : > { %v10216_v46 = vadd.f32 %v9989_v3, %v2868_v45  ;;  %v3055_v51 = vmax.f32 %v2988_v18, 0.0 }
 0x597   : > { %3037 = vmatmul.f32.gmra.mxu2 %v10216_v46  ;;  %3153 = vmatmul.f32.gmra.mxu3 %v3055_v51 }
 0x59a   : > { %v2990_v62 = vpop.f32.mrf.mxu2 }
 0x59b   : > { %v2991_v61 = vadd.f32 %v9967_v49, %v2990_v62 }
 0x59d   : > { %v3056_v54 = vmax.f32 %v2991_v61, 0.0 }
 0x59f   : > { %3156 = vmatmul.f32.gmra.mxu3 %v3056_v54 }
 0x5a2   : > { %v2993_v24 = vpop.f32.mrf.mxu2 }
 0x5a3   : > { %v2994_v27 = vadd.f32 %v9967_v49, %v2993_v24  ;;  %v4199_v24 = vld [vmem:[#allocation5 + $0x4e8] sm:$0xff] }
 0x5a4   : > { %4209 = vmatpush.msra.mxu1 %v4199_v24 }
 0x5a5   : > { %v3057_v29 = vmax.f32 %v2994_v27, 0.0 }
 0x5a7   : > { %3159 = vmatmul.f32.gmra.mxu3 %v3057_v29 }
 0x5aa   : > { %v3112_v3 = vpop.f32.mrf.mxu3  ;;  %v2996_v0 = vpop.f32.mrf.mxu2 }
 0x5ab   : > { %v3113_v30 = vadd.f32 %v10221_v15, %v3112_v3  ;;  %v2997_v53 = vadd.f32 %v9967_v49, %v2996_v0 }
 0x5ad   : > { %v3208_v40 = vmax.f32 %v3113_v30, 0.0  ;;  %v3058_v21 = vmax.f32 %v2997_v53, 0.0 }
 0x5af   : > { %3278 = vmatmul.f32.vlgmr.msra.gmra.mxu0 %v3208_v40  ;;  %3162 = vmatmul.f32.gmra.mxu3 %v3058_v21 }
 0x5b2   : > { %v3115_v8 = vpop.f32.mrf.mxu3  ;;  %v2999_v32 = vpop.f32.mrf.mxu2 }
 0x5b3   : > { %v3116_v28 = vadd.f32 %v10221_v15, %v3115_v8  ;;  %v3000_v37 = vadd.f32 %v9967_v49, %v2999_v32 }
 0x5b5   : > { %v3209_v16 = vmax.f32 %v3116_v28, 0.0  ;;  %v3059_v44 = vmax.f32 %v3000_v37, 0.0  ;;  %v4198_v37 = vld [vmem:[#allocation5 + $0x4e0] sm:$0xff] }
 0x5b6   : > { %4210 = vmatpush.msra.mxu1 %v4198_v37 }
 0x5b7   : > { %3281 = vmatmul.f32.gmra.mxu0 %v3209_v16  ;;  %3165 = vmatmul.f32.gmra.mxu3 %v3059_v44 }
 0x5ba   : > { %v3118_v23 = vpop.f32.mrf.mxu3  ;;  %v3002_v59 = vpop.f32.mrf.mxu2 }
 0x5bb   : > { %v3119_v60 = vadd.f32 %v10221_v15, %v3118_v23  ;;  %v3003_v22 = vadd.f32 %v9967_v49, %v3002_v59 }
 0x5bd   : > { %v3210_v7 = vmax.f32 %v3119_v60, 0.0  ;;  %v3060_v45 = vmax.f32 %v3003_v22, 0.0 }
 0x5bf   : > { %3284 = vmatmul.f32.gmra.mxu0 %v3210_v7  ;;  %3168 = vmatmul.f32.gmra.mxu3 %v3060_v45 }
 0x5c2   : > { %v3005_v19 = vpop.f32.mrf.mxu2  ;;  %v3121_v18 = vpop.f32.mrf.mxu3 }
 0x5c3   : > { %v3006_v51 = vadd.f32 %v9967_v49, %v3005_v19  ;;  %v3122_v62 = vadd.f32 %v10221_v15, %v3121_v18 }
 0x5c5   : > { %v3061_v61 = vmax.f32 %v3006_v51, 0.0  ;;  %v3211_v54 = vmax.f32 %v3122_v62, 0.0  ;;  %v4197_v62 = vld [vmem:[#allocation5 + $0x4d8] sm:$0xff] }
 0x5c6   : > { %4211 = vmatpush.msra.mxu1 %v4197_v62 }
 0x5c7   : > { %3171 = vmatmul.f32.gmra.mxu3 %v3061_v61  ;;  %3287 = vmatmul.f32.gmra.mxu0 %v3211_v54 }
 0x5ca   : > { %v3008_v27 = vpop.f32.mrf.mxu2  ;;  %v3124_v29 = vpop.f32.mrf.mxu3 }
 0x5cb   : > { %v3009_v58 = vadd.f32 %v9967_v49, %v3008_v27  ;;  %v3125_v3 = vadd.f32 %v10221_v15, %v3124_v29 }
 0x5cd   : > { %v3062_v30 = vmax.f32 %v3009_v58, 0.0  ;;  %v3212_v0 = vmax.f32 %v3125_v3, 0.0 }
 0x5cf   : > { %3174 = vmatmul.f32.gmra.mxu3 %v3062_v30  ;;  %3290 = vmatmul.f32.gmra.mxu0 %v3212_v0 }
 0x5d2   : > { %v3011_v40 = vpop.f32.mrf.mxu2  ;;  %v3127_v53 = vpop.f32.mrf.mxu3 }
 0x5d3   : > { %v3012_v21 = vadd.f32 %v9967_v49, %v3011_v40  ;;  %v3128_v8 = vadd.f32 %v10221_v15, %v3127_v53 }
 0x5d5   : > { %v3063_v28 = vmax.f32 %v3012_v21, 0.0  ;;  %v3213_v32 = vmax.f32 %v3128_v8, 0.0  ;;  %v4196_v8 = vld [vmem:[#allocation5 + $0x4d0] sm:$0xff] }
 0x5d6   : > { %4212 = vmatpush.msra.mxu1 %v4196_v8 }
 0x5d7   : > { %3177 = vmatmul.f32.gmra.mxu3 %v3063_v28  ;;  %3293 = vmatmul.f32.gmra.mxu0 %v3213_v32 }
 0x5da   : > { %v3014_v16 = vpop.f32.mrf.mxu2  ;;  %v3130_v44 = vpop.f32.mrf.mxu3 }
 0x5db   : > { %v3015_v63 = vadd.f32 %v9967_v49, %v3014_v16  ;;  %v3131_v23 = vadd.f32 %v10221_v15, %v3130_v44 }
 0x5dd   : > { %v3064_v60 = vmax.f32 %v3015_v63, 0.0  ;;  %v3214_v59 = vmax.f32 %v3131_v23, 0.0 }
 0x5df   : > { %3180 = vmatmul.f32.gmra.mxu3 %v3064_v60  ;;  %3296 = vmatmul.f32.gmra.mxu0 %v3214_v59 }
 0x5e2   : > { %v3017_v22 = vpop.f32.mrf.mxu2  ;;  %v3133_v7 = vpop.f32.mrf.mxu3 }
 0x5e3   : > { %v3018_v45 = vadd.f32 %v9967_v49, %v3017_v22  ;;  %v3134_v19 = vadd.f32 %v10221_v15, %v3133_v7 }
 0x5e5   : > { %v3065_v18 = vmax.f32 %v3018_v45, 0.0  ;;  %v3215_v51 = vmax.f32 %v3134_v19, 0.0  ;;  %v4195_v19 = vld [vmem:[#allocation5 + $0x4c8] sm:$0xff] }
 0x5e6   : > { %4213 = vmatpush.msra.mxu1 %v4195_v19 }
 0x5e7   : > { %3183 = vmatmul.f32.gmra.mxu3 %v3065_v18  ;;  %3299 = vmatmul.f32.gmra.mxu0 %v3215_v51 }
 0x5ea   : > { %v3020_v61 = vpop.f32.mrf.mxu2  ;;  %v3136_v54 = vpop.f32.mrf.mxu3 }
 0x5eb   : > { %v3021_v24 = vadd.f32 %v9967_v49, %v3020_v61  ;;  %v3137_v27 = vadd.f32 %v10221_v15, %v3136_v54 }
 0x5ed   : > { %v3066_v29 = vmax.f32 %v3021_v24, 0.0  ;;  %v3216_v58 = vmax.f32 %v3137_v27, 0.0 }
 0x5ef   : > { %3186 = vmatmul.f32.gmra.mxu3 %v3066_v29  ;;  %3302 = vmatmul.f32.gmra.mxu0 %v3216_v58  ;;  %v7923_v58 = vld [vmem:[#allocation7 + $0x6] ss:$0 sm:$0xff] }
 0x5f2   : > { %v3023_v3 = vpop.f32.mrf.mxu2  ;;  %v3139_v30 = vpop.f32.mrf.mxu3 }
 0x5f3   : > { %v3024_v0 = vadd.f32 %v9967_v49, %v3023_v3  ;;  %v3140_v40 = vadd.f32 %v10221_v15, %v3139_v30 }
 0x5f5   : > { %v3067_v53 = vmax.f32 %v3024_v0, 0.0  ;;  %v3217_v21 = vmax.f32 %v3140_v40, 0.0 }
 0x5f7   : > { %3189 = vmatmul.f32.gmra.mxu3 %v3067_v53  ;;  %3305 = vmatmul.f32.gmra.mxu0 %v3217_v21  ;;  %v4194_v53 = vld [vmem:[#allocation5 + $0x4c0] sm:$0xff] }
 0x5f8   : > { %4214 = vmatpush.msra.mxu1 %v4194_v53 }
 0x5fa   : > { %v3026_v28 = vpop.f32.mrf.mxu2  ;;  %v3142_v32 = vpop.f32.mrf.mxu3 }
 0x5fb   : > { %v3027_v37 = vadd.f32 %v9967_v49, %v3026_v28  ;;  %v3143_v16 = vadd.f32 %v10221_v15, %v3142_v32 }
 0x5fd   : > { %v3068_v44 = vmax.f32 %v3027_v37, 0.0  ;;  %v3218_v63 = vmax.f32 %v3143_v16, 0.0 }
 0x5ff   : > { %3192 = vmatmul.f32.gmra.mxu3 %v3068_v44  ;;  %3308 = vmatmul.f32.gmra.mxu0 %v3218_v63 }
 0x602   : > { %v3029_v23 = vpop.f32.mrf.mxu2  ;;  %v3145_v60 = vpop.f32.mrf.mxu3 }
 0x603   : > { %v3030_v59 = vadd.f32 %v9967_v49, %v3029_v23  ;;  %v3146_v22 = vadd.f32 %v10221_v15, %v3145_v60  ;;  %v10252_v23 = vld [vmem:[#allocation7 + $0x8] ss:$0 sm:$0xff]  ;;  %v4193_v60 = vld [vmem:[#allocation5 + $0x4b8] sm:$0xff] }
 0x604   : > { %4215 = vmatpush.msra.mxu1 %v4193_v60  ;;  %v4366_v60 = vld [vmem:[#allocation5 + $0x568] sm:$0xff] }
 0x605   : > { %v3069_v7 = vmax.f32 %v3030_v59, 0.0  ;;  %v3219_v45 = vmax.f32 %v3146_v22, 0.0  ;;  %v4368_v59 = vld [vmem:[#allocation5 + $0x578] sm:$0xff] }
 0x606   : > { %4374 = vmatpush.msrb.mxu2 %v4368_v59 }
 0x607   : > { %3195 = vmatmul.f32.gmra.mxu3 %v3069_v7  ;;  %3311 = vmatmul.f32.gmra.mxu0 %v3219_v45 }
 0x60a   : > { %v3032_v18 = vpop.f32.mrf.mxu2  ;;  %v3148_v51 = vpop.f32.mrf.mxu3 }
 0x60b   : > { %v3033_v62 = vadd.f32 %v9967_v49, %v3032_v18  ;;  %v3149_v61 = vadd.f32 %v10221_v15, %v3148_v51 }
 0x60d   : > { %v3070_v54 = vmax.f32 %v3033_v62, 0.0  ;;  %v3220_v24 = vmax.f32 %v3149_v61, 0.0 }
 0x60f   : > { %3198 = vmatmul.f32.gmra.mxu3 %v3070_v54  ;;  %3314 = vmatmul.f32.gmra.mxu0 %v3220_v24 }
 0x612   : > { %v3035_v27 = vpop.f32.mrf.mxu2  ;;  %v3151_v29 = vpop.f32.mrf.mxu3 }
 0x613   : > { %v3036_v3 = vadd.f32 %v7923_v58, %v3035_v27  ;;  %v3152_v30 = vadd.f32 %v10221_v15, %v3151_v29 }
 0x615   : > { %v3071_v0 = vmax.f32 %v3036_v3, 0.0  ;;  %v3221_v40 = vmax.f32 %v3152_v30, 0.0  ;;  %v4192_v3 = vld [vmem:[#allocation5 + $0x4b0] sm:$0xff] }
 0x616   : > { %v4367_v30 = vld [vmem:[#allocation5 + $0x570] sm:$0xff]  ;;  %4216 = vmatpush.msra.mxu1 %v4192_v3  ;;  %v4365_v3 = vld [vmem:[#allocation5 + $0x560] sm:$0xff] }
 0x617   : > { %3201 = vmatmul.f32.gmra.mxu3 %v3071_v0  ;;  %3317 = vmatmul.f32.gmra.mxu0 %v3221_v40 }
 0x618   : > { %4375 = vmatpush.msrb.mxu2 %v4367_v30 }
 0x61a   : > { %v3038_v21 = vpop.f32.mrf.mxu2  ;;  %v3154_v49 = vpop.f32.mrf.mxu3  ;;  %4376 = vmatpush.msrb.mxu2 %v4366_v60  ;;  %v4364_v60 = vld [vmem:[#allocation5 + $0x558] sm:$0xff] }
 0x61b   : > { %v3039_v8 = vadd.f32 %v7923_v58, %v3038_v21  ;;  %v3155_v28 = vadd.f32 %v10221_v15, %v3154_v49 }
 0x61c   : > { %4377 = vmatpush.msrb.mxu2 %v4365_v3  ;;  %v4363_v3 = vld [vmem:[#allocation5 + $0x550] sm:$0xff] }
 0x61d   : > { %v3072_v32 = vmax.f32 %v3039_v8, 0.0  ;;  %v3222_v37 = vmax.f32 %v3155_v28, 0.0 }
 0x61e   : > { %4378 = vmatpush.msrb.mxu2 %v4364_v60 }
 0x61f   : > { %3204 = vmatmul.f32.gmra.mxu3 %v3072_v32  ;;  %3320 = vmatmul.f32.gmra.mxu0 %v3222_v37 }
 0x620   : > { %4379 = vmatpush.msrb.mxu2 %v4363_v3 }
 0x622   : > { %v3157_v16 = vpop.f32.mrf.mxu3 }
 0x623   : > { %v3158_v44 = vadd.f32 %v10221_v15, %v3157_v16 }
 0x625   : > { %v3223_v63 = vmax.f32 %v3158_v44, 0.0 }
 0x627   : > { %3323 = vmatmul.f32.gmra.mxu0 %v3223_v63 }
 0x62a   : > { %v3160_v7 = vpop.f32.mrf.mxu3 }
 0x62b   : > { %v3161_v19 = vadd.f32 %v10221_v15, %v3160_v7 }
 0x62c   : > { %v3279_v22 = vpop.f32.mrf.mxu0 }
 0x62d   : > { %v3280_v45 = vadd.f32 %v10252_v23, %v3279_v22  ;;  %v3224_v51 = vmax.f32 %v3161_v19, 0.0 }
 0x62f   : > { %v10257_v18 = vadd.f32 %v3280_v45, %v9589_v5  ;;  %3326 = vmatmul.f32.gmra.mxu0 %v3224_v51 }
 0x631   : > { %3407 = vadd.xlane.f32.xlu2 %v10257_v18  ;;  %v3503_v62 = vmul.f32 %v10257_v18, %v10257_v18 }
 0x632   : > { %v3163_v61 = vpop.f32.mrf.mxu3 }
 0x633   : > { %3535 = vadd.xlane.f32.xlu0 %v3503_v62  ;;  %v3164_v24 = vadd.f32 %v10221_v15, %v3163_v61 }
 0x634   : > { %v3282_v54 = vpop.f32.mrf.mxu0 }
 0x635   : > { %v3283_v27 = vadd.f32 %v10252_v23, %v3282_v54  ;;  %v3225_v29 = vmax.f32 %v3164_v24, 0.0 }
 0x637   : > { %v10265_v58 = vadd.f32 %v3283_v27, %v9616_v6  ;;  %3329 = vmatmul.f32.gmra.mxu0 %v3225_v29 }
 0x639   : > { %3409 = vadd.xlane.f32.xlu1 %v10265_v58  ;;  %v3504_v5 = vmul.f32 %v10265_v58, %v10265_v58 }
 0x63a   : > { %v3166_v0 = vpop.f32.mrf.mxu3 }
 0x63b   : > { %3537 = vadd.xlane.f32.xlu2 %v3504_v5  ;;  %v3167_v53 = vadd.f32 %v10221_v15, %v3166_v0 }
 0x63c   : > { %v3285_v40 = vpop.f32.mrf.mxu0 }
 0x63d   : > { %v3286_v21 = vadd.f32 %v10252_v23, %v3285_v40  ;;  %v3226_v49 = vmax.f32 %v3167_v53, 0.0 }
 0x63f   : > { %v10273_v6 = vadd.f32 %v3286_v21, %v9638_v9  ;;  %3332 = vmatmul.f32.gmra.mxu0 %v3226_v49  ;;  %v4191_v9 = vld [vmem:[#allocation5 + $0x4a8] sm:$0xff] }
 0x640   : > { %4217 = vmatpush.msra.mxu1 %v4191_v9 }
 0x641   : > { %3411 = vadd.xlane.f32.xlu0 %v10273_v6  ;;  %v3505_v8 = vmul.f32 %v10273_v6, %v10273_v6 }
 0x642   : > { %v3169_v28 = vpop.f32.mrf.mxu3 }
 0x643   : > { %3539 = vadd.xlane.f32.xlu1 %v3505_v8  ;;  %v3170_v32 = vadd.f32 %v10221_v15, %v3169_v28 }
 0x644   : > { %v3288_v37 = vpop.f32.mrf.mxu0 }
 0x645   : > { %v3227_v16 = vmax.f32 %v3170_v32, 0.0  ;;  %v3289_v44 = vadd.f32 %v10252_v23, %v3288_v37 }
 0x647   : > { %v10281_v63 = vadd.f32 %v3289_v44, %v9675_v4  ;;  %3335 = vmatmul.f32.gmra.mxu0 %v3227_v16 }
 0x649   : > { %3413 = vadd.xlane.f32.xlu2 %v10281_v63  ;;  %v3506_v59 = vmul.f32 %v10281_v63, %v10281_v63 }
 0x64a   : > { %v3172_v22 = vpop.f32.mrf.mxu3 }
 0x64b   : > { %v3173_v7 = vadd.f32 %v10221_v15, %v3172_v22  ;;  %3541 = vadd.xlane.f32.xlu0 %v3506_v59 }
 0x64c   : > { %v3291_v45 = vpop.f32.mrf.mxu0 }
 0x64d   : > { %v3228_v19 = vmax.f32 %v3173_v7, 0.0  ;;  %v3292_v51 = vadd.f32 %v10252_v23, %v3291_v45 }
 0x64f   : > { %v10289_v4 = vadd.f32 %v3292_v51, %v9692_v20  ;;  %3338 = vmatmul.f32.gmra.mxu0 %v3228_v19  ;;  %v4190_v20 = vld [vmem:[#allocation5 + $0x4a0] sm:$0xff] }
 0x650   : > { %4218 = vmatpush.msra.mxu1 %v4190_v20 }
 0x651   : > { %3415 = vadd.xlane.f32.xlu1 %v10289_v4  ;;  %v3507_v62 = vmul.f32 %v10289_v4, %v10289_v4 }
 0x652   : > { %v3175_v61 = vpop.f32.mrf.mxu3 }
 0x653   : > { %v3176_v54 = vadd.f32 %v10221_v15, %v3175_v61  ;;  %3543 = vadd.xlane.f32.xlu2 %v3507_v62 }
 0x654   : > { %v3294_v24 = vpop.f32.mrf.mxu0 }
 0x655   : > { %v3229_v27 = vmax.f32 %v3176_v54, 0.0  ;;  %v3295_v29 = vadd.f32 %v10252_v23, %v3294_v24 }
 0x657   : > { %v10297_v5 = vadd.f32 %v3295_v29, %v9726_v38  ;;  %3341 = vmatmul.f32.gmra.mxu0 %v3229_v27 }
 0x659   : > { %3417 = vadd.xlane.f32.xlu0 %v10297_v5  ;;  %v3508_v30 = vmul.f32 %v10297_v5, %v10297_v5 }
 0x65a   : > { %v3178_v0 = vpop.f32.mrf.mxu3 }
 0x65b   : > { %v3179_v40 = vadd.f32 %v10221_v15, %v3178_v0  ;;  %3545 = vadd.xlane.f32.xlu1 %v3508_v30 }
 0x65c   : > { %v3297_v53 = vpop.f32.mrf.mxu0 }
 0x65d   : > { %v3230_v21 = vmax.f32 %v3179_v40, 0.0  ;;  %v3298_v49 = vadd.f32 %v10252_v23, %v3297_v53 }
 0x65f   : > { %v10305_v38 = vadd.f32 %v3298_v49, %v9743_v50  ;;  %3344 = vmatmul.f32.gmra.mxu0 %v3230_v21  ;;  %v4189_v50 = vld [vmem:[#allocation5 + $0x498] sm:$0xff] }
 0x660   : > { %4219 = vmatpush.msra.mxu1 %v4189_v50 }
 0x661   : > { %3419 = vadd.xlane.f32.xlu2 %v10305_v38  ;;  %v3509_v8 = vmul.f32 %v10305_v38, %v10305_v38 }
 0x662   : > { %v3181_v28 = vpop.f32.mrf.mxu3 }
 0x663   : > { %v3182_v32 = vadd.f32 %v10221_v15, %v3181_v28  ;;  %3547 = vadd.xlane.f32.xlu0 %v3509_v8 }
 0x664   : > { %v3300_v37 = vpop.f32.mrf.mxu0 }
 0x665   : > { %v3231_v16 = vmax.f32 %v3182_v32, 0.0  ;;  %v3301_v44 = vadd.f32 %v10252_v23, %v3300_v37 }
 0x667   : > { %v10313_v9 = vadd.f32 %v3301_v44, %v9777_v26  ;;  %3347 = vmatmul.f32.gmra.mxu0 %v3231_v16 }
 0x669   : > { %3421 = vadd.xlane.f32.xlu1 %v10313_v9  ;;  %v3510_v59 = vmul.f32 %v10313_v9, %v10313_v9 }
 0x66a   : > { %v3184_v22 = vpop.f32.mrf.mxu3 }
 0x66b   : > { %v3185_v7 = vadd.f32 %v10221_v15, %v3184_v22  ;;  %3549 = vadd.xlane.f32.xlu2 %v3510_v59 }
 0x66c   : > { %v3303_v45 = vpop.f32.mrf.mxu0 }
 0x66d   : > { %v3232_v19 = vmax.f32 %v3185_v7, 0.0  ;;  %v3304_v51 = vadd.f32 %v10252_v23, %v3303_v45 }
 0x66f   : > { %v10321_v26 = vadd.f32 %v3304_v51, %v9794_v14  ;;  %3350 = vmatmul.f32.gmra.mxu0 %v3232_v19  ;;  %v4188_v14 = vld [vmem:[#allocation5 + $0x490] sm:$0xff] }
 0x670   : > { %4220 = vmatpush.msra.mxu1 %v4188_v14 }
 0x671   : > { %3423 = vadd.xlane.f32.xlu0 %v10321_v26  ;;  %v3511_v62 = vmul.f32 %v10321_v26, %v10321_v26 }
 0x672   : > { %v3187_v61 = vpop.f32.mrf.mxu3 }
 0x673   : > { %v3188_v54 = vadd.f32 %v10221_v15, %v3187_v61  ;;  %3551 = vadd.xlane.f32.xlu1 %v3511_v62 }
 0x674   : > { %v3306_v24 = vpop.f32.mrf.mxu0 }
 0x675   : > { %v3233_v27 = vmax.f32 %v3188_v54, 0.0  ;;  %v3307_v29 = vadd.f32 %v10252_v23, %v3306_v24 }
 0x677   : > { %v10329_v20 = vadd.f32 %v3307_v29, %v9830_v48  ;;  %3353 = vmatmul.f32.gmra.mxu0 %v3233_v27 }
 0x679   : > { %3425 = vadd.xlane.f32.xlu2 %v10329_v20  ;;  %v3512_v30 = vmul.f32 %v10329_v20, %v10329_v20 }
 0x67a   : > { %v3190_v0 = vpop.f32.mrf.mxu3 }
 0x67b   : > { %v3191_v40 = vadd.f32 %v10221_v15, %v3190_v0  ;;  %3553 = vadd.xlane.f32.xlu0 %v3512_v30  ;;  %v4362_v0 = vld [vmem:[#allocation5 + $0x548] sm:$0xff] }
 0x67c   : > { %v3309_v53 = vpop.f32.mrf.mxu0  ;;  %4380 = vmatpush.msrb.mxu2 %v4362_v0 }
 0x67d   : > { %v3234_v21 = vmax.f32 %v3191_v40, 0.0  ;;  %v3310_v49 = vadd.f32 %v10252_v23, %v3309_v53 }
 0x67f   : > { %v10337_v48 = vadd.f32 %v3310_v49, %v9847_v35  ;;  %3356 = vmatmul.f32.gmra.mxu0 %v3234_v21  ;;  %v4187_v35 = vld [vmem:[#allocation5 + $0x488] sm:$0xff] }
 0x680   : > { %4221 = vmatpush.msra.mxu1 %v4187_v35 }
 0x681   : > { %3427 = vadd.xlane.f32.xlu1 %v10337_v48  ;;  %v3513_v8 = vmul.f32 %v10337_v48, %v10337_v48 }
 0x682   : > { %v3193_v28 = vpop.f32.mrf.mxu3 }
 0x683   : > { %v3194_v32 = vadd.f32 %v10221_v15, %v3193_v28  ;;  %3555 = vadd.xlane.f32.xlu2 %v3513_v8 }
 0x684   : > { %v3312_v37 = vpop.f32.mrf.mxu0 }
 0x685   : > { %v3235_v16 = vmax.f32 %v3194_v32, 0.0  ;;  %v3313_v44 = vadd.f32 %v10252_v23, %v3312_v37 }
 0x687   : > { %v10345_v50 = vadd.f32 %v3313_v44, %v9881_v17  ;;  %3359 = vmatmul.f32.gmra.mxu0 %v3235_v16 }
 0x689   : > { %3429 = vadd.xlane.f32.xlu0 %v10345_v50  ;;  %v3514_v60 = vmul.f32 %v10345_v50, %v10345_v50 }
 0x68a   : > { %v3196_v59 = vpop.f32.mrf.mxu3 }
 0x68b   : > { %v3197_v22 = vadd.f32 %v10221_v15, %v3196_v59  ;;  %3557 = vadd.xlane.f32.xlu1 %v3514_v60 }
 0x68c   : > { %v3315_v7 = vpop.f32.mrf.mxu0 }
 0x68d   : > { %v3236_v45 = vmax.f32 %v3197_v22, 0.0  ;;  %v3316_v19 = vadd.f32 %v10252_v23, %v3315_v7 }
 0x68f   : > { %v10353_v51 = vadd.f32 %v3316_v19, %v9898_v12  ;;  %3362 = vmatmul.f32.gmra.mxu0 %v3236_v45  ;;  %v4361_v19 = vld [vmem:[#allocation5 + $0x540] sm:$0xff] }
 0x690   : > { %4381 = vmatpush.msrb.mxu2 %v4361_v19 }
 0x691   : > { %3431 = vadd.xlane.f32.xlu2 %v10353_v51  ;;  %v3515_v17 = vmul.f32 %v10353_v51, %v10353_v51 }
 0x692   : > { %v3199_v62 = vpop.f32.mrf.mxu3 }
 0x693   : > { %v3200_v61 = vadd.f32 %v10221_v15, %v3199_v62  ;;  %3559 = vadd.xlane.f32.xlu0 %v3515_v17 }
 0x694   : > { %v3318_v54 = vpop.f32.mrf.mxu0 }
 0x695   : > { %v3237_v24 = vmax.f32 %v3200_v61, 0.0  ;;  %v3319_v27 = vadd.f32 %v10252_v23, %v3318_v54 }
 0x697   : > { %v10361_v29 = vadd.f32 %v3319_v27, %v9928_v11  ;;  %3365 = vmatmul.f32.gmra.mxu0 %v3237_v24  ;;  %v4186_v11 = vld [vmem:[#allocation5 + $0x480] sm:$0xff] }
 0x698   : > { %4222 = vmatpush.msra.mxu1 %v4186_v11 }
 0x699   : > { %3433 = vadd.xlane.f32.xlu1 %v10361_v29  ;;  %v3516_v12 = vmul.f32 %v10361_v29, %v10361_v29 }
 0x69a   : > { %v3202_v14 = vpop.f32.mrf.mxu3 }
 0x69b   : > { %v3203_v3 = vadd.f32 %v10221_v15, %v3202_v14  ;;  %3561 = vadd.xlane.f32.xlu2 %v3516_v12 }
 0x69c   : > { %v3321_v30 = vpop.f32.mrf.mxu0 }
 0x69d   : > { %v3238_v40 = vmax.f32 %v3203_v3, 0.0  ;;  %v3322_v53 = vadd.f32 %v10252_v23, %v3321_v30 }
 0x69f   : > { %v10369_v21 = vadd.f32 %v3322_v53, %v9936_v25  ;;  %3368 = vmatmul.f32.gmra.mxu0 %v3238_v40 }
 0x6a1   : > { %3435 = vadd.xlane.f32.xlu0 %v10369_v21  ;;  %v3517_v49 = vmul.f32 %v10369_v21, %v10369_v21 }
 0x6a2   : > { %v3205_v28 = vpop.f32.mrf.mxu3 }
 0x6a3   : > { %v3206_v37 = vadd.f32 %v10221_v15, %v3205_v28  ;;  %3563 = vadd.xlane.f32.xlu1 %v3517_v49 }
 0x6a4   : > { %v3408_v8 = vpop.xlane.xlu2 %3407  ;;  %v3324_v44 = vpop.f32.mrf.mxu0 }
 0x6a5   : > { %v10375_v32 = vmul.f32 %v3408_v8, %v8611_v52  ;;  %v3239_v60 = vmax.f32 %v3206_v37, 0.0  ;;  %v3325_v59 = vadd.f32 %v10252_v23, %v3324_v44 }
 0x6a6   : > { %v3536_v16 = vpop.xlane.xlu0 %3535 }
 0x6a7   : > { %v3631_v25 = vmul.f32 %v10375_v32, %v10375_v32  ;;  %v3599_v35 = vmul.f32 %v3536_v16, %v8611_v52  ;;  %v10383_v7 = vadd.f32 %v3325_v59, %v9950_v56  ;;  %3371 = vmatmul.f32.gmra.mxu0 %v3239_v60  ;;  %v3695_v19 = vsub.f32 %v10257_v18, %v10375_v32 }
 0x6a9   : > { %v3663_v22 = vsub.f32 %v3599_v35, %v3631_v25  ;;  %3437 = vadd.xlane.f32.xlu2 %v10383_v7  ;;  %v3518_v15 = vmul.f32 %v10383_v7, %v10383_v7 }
 0x6ab   : > { %v3727_v45 = vadd.f32 1e-05, %v3663_v22  ;;  %3565 = vadd.xlane.f32.xlu0 %v3518_v15 }
 0x6ac   : > { %v3410_v17 = vpop.xlane.xlu1 %3409  ;;  %v3327_v61 = vpop.f32.mrf.mxu0 }
 0x6ad   : > { %7711 = vrsqrt.f32 %v3727_v45  ;;  %v10389_v62 = vmul.f32 %v3410_v17, %v8611_v52  ;;  %v3328_v24 = vadd.f32 %v10252_v23, %v3327_v61  ;;  %vm3765_vm2 = vweird.f32 %v3727_v45 }
 0x6ae   : > { %v3538_v54 = vpop.xlane.xlu2 %3537 }
 0x6af   : > { %v3632_v56 = vmul.f32 %v10389_v62, %v10389_v62  ;;  %v3600_v27 = vmul.f32 %v3538_v54, %v8611_v52  ;;  %v10396_v12 = vadd.f32 %v3328_v24, %v9965_v34  ;;  %v10418_v54 = vld [vmem:[#allocation8 + $0x2] ss:$0 sm:$0xff] }
 0x6b1   : > { %v3664_v14 = vsub.f32 %v3600_v27, %v3632_v56  ;;  %3439 = vadd.xlane.f32.xlu1 %v10396_v12  ;;  %v3519_v40 = vmul.f32 %v10396_v12, %v10396_v12 }
 0x6b3   : > { %v7712_v3 = vpop.eup %7711  ;;  %v3728_v0 = vadd.f32 1e-05, %v3664_v14  ;;  %3567 = vadd.xlane.f32.xlu2 %v3519_v40 }
 0x6b4   : > { %v3760_v30 = vmul.f32 %v7712_v3, %v3727_v45  ;;  %v3412_v53 = vpop.xlane.xlu0 %3411  ;;  %v3330_v8 = vpop.f32.mrf.mxu0  ;;  %vm3766_vm1 = vweird.f32 %v7712_v3 }
 0x6b5   : > { %7713 = vrsqrt.f32 %v3728_v0  ;;  %v10402_v49 = vmul.f32 %v3412_v53, %v8611_v52  ;;  %v3331_v37 = vadd.f32 %v10252_v23, %v3330_v8  ;;  %vm3767_vm3 = vmor %vm3765_vm2, %vm3766_vm1  ;;  %vm3775_vm5 = vweird.f32 %v3728_v0 }
 0x6b6   : > { %v3761_v11 = vmul.f32 %v7712_v3, %v3760_v30  ;;  %v3540_v28 = vpop.xlane.xlu1 %3539  ;;  %v10421_v30 = vld [vmem:[#allocation10 + $0x2] ss:$0 sm:$0xff] }
 0x6b7   : > { %v3633_v16 = vmul.f32 %v10402_v49, %v10402_v49  ;;  %v3601_v25 = vmul.f32 %v3540_v28, %v8611_v52  ;;  %v10409_v35 = vadd.f32 %v3331_v37, %v9992_v1  ;;  %v4360_v1 = vld [vmem:[#allocation5 + $0x538] sm:$0xff] }
 0x6b8   : > { %v3762_v34 = vmul.f32 0.5, %v3761_v11  ;;  %4382 = vmatpush.msrb.mxu2 %v4360_v1 }
 0x6b9   : > { %v3665_v60 = vsub.f32 %v3601_v25, %v3633_v16  ;;  %3441 = vadd.xlane.f32.xlu0 %v10409_v35  ;;  %v3520_v15 = vmul.f32 %v10409_v35, %v10409_v35 }
 0x6ba   : > { %v3763_v44 = vsub.f32 1.5, %v3762_v34 }
 0x6bb   : > { %v7714_v59 = vpop.eup %7713  ;;  %v10416_v61 = vadd.f32 1e-05, %v3665_v60  ;;  %3569 = vadd.xlane.f32.xlu1 %v3520_v15 }
 0x6bc   : > { %v3764_v22 = vmul.f32 %v7712_v3, %v3763_v44  ;;  %v3770_v17 = vmul.f32 %v7714_v59, %v3728_v0  ;;  %v3414_v27 = vpop.xlane.xlu2 %3413  ;;  %v3333_v14 = vpop.f32.mrf.mxu0  ;;  %vm3776_vm4 = vweird.f32 %v7714_v59 }
 0x6bd   : > { %7715 = vrsqrt.f32 %v10416_v61  ;;  %v10424_v18 = vmul.f32 %v3414_v27, %v8611_v52  ;;  %v3334_v32 = vadd.f32 %v10252_v23, %v3333_v14  ;;  %vm3777_vm6 = vmor %vm3775_vm5, %vm3776_vm4  ;;  %vm3785_vm8 = vweird.f32 %v10416_v61 }
 0x6be   : > { %v3768_v56 = vsel %vm3767_vm3, %v7712_v3, %v3764_v22  ;;  %v3771_v45 = vmul.f32 %v7714_v59, %v3770_v17  ;;  %v3542_v53 = vpop.xlane.xlu0 %3541 }
 0x6bf   : > { %v4079_v24 = vmul.f32 %v3768_v56, %v3695_v19  ;;  %v3634_v3 = vmul.f32 %v10424_v18, %v10424_v18  ;;  %v10431_v8 = vadd.f32 %v3334_v32, %v10006_v57  ;;  %v3602_v28 = vmul.f32 %v3542_v53, %v8611_v52  ;;  %v4535_v57 = vld [vmem:[#allocation5 + $0x5f8] sm:$0xff] }
 0x6c0   : > { %v3772_v40 = vmul.f32 0.5, %v3771_v45  ;;  %4541 = vmatpush.msrb.mxu3 %v4535_v57  ;;  %v3696_v19 = vsub.f32 %v10265_v58, %v10389_v62 }
 0x6c1   : > { %v4116_v11 = vmul.f32 %v10418_v54, %v4079_v24  ;;  %v3666_v16 = vsub.f32 %v3602_v28, %v3634_v3  ;;  %3443 = vadd.xlane.f32.xlu2 %v10431_v8  ;;  %v3521_v25 = vmul.f32 %v10431_v8, %v10431_v8 }
 0x6c2   : > { %v3773_v34 = vsub.f32 1.5, %v3772_v40 }
 0x6c3   : > { %v10435_v37 = vadd.f32 %v10421_v30, %v4116_v11  ;;  %v7716_v44 = vpop.eup %7715  ;;  %v10442_v15 = vadd.f32 1e-05, %v3666_v16  ;;  %3571 = vadd.xlane.f32.xlu0 %v3521_v25 }
 0x6c4   : > { %v3774_v60 = vmul.f32 %v7714_v59, %v3773_v34  ;;  %v3780_v22 = vmul.f32 %v7716_v44, %v10416_v61  ;;  %v3416_v17 = vpop.xlane.xlu1 %3415  ;;  %v3336_v1 = vpop.f32.mrf.mxu0  ;;  %vm3786_vm7 = vweird.f32 %v7716_v44  ;;  %v4359_v34 = vld [vmem:[#allocation5 + $0x530] sm:$0xff] }
 0x6c5   : > { %4223 = vmatmul.f32.vlgmr.msra.gmra.mxu1 %v10435_v37  ;;  %7717 = vrsqrt.f32 %v10442_v15  ;;  %v10448_v0 = vmul.f32 %v3416_v17, %v8611_v52  ;;  %v3337_v45 = vadd.f32 %v10252_v23, %v3336_v1  ;;  %4383 = vmatpush.msrb.mxu2 %v4359_v34  ;;  %vm3787_vm9 = vmor %vm3785_vm8, %vm3786_vm7  ;;  %v3697_v1 = vsub.f32 %v10273_v6, %v10402_v49 }
 0x6c6   : > { %v3778_v56 = vsel %vm3777_vm6, %v7714_v59, %v3774_v60  ;;  %v3781_v24 = vmul.f32 %v7716_v44, %v3780_v22  ;;  %v3544_v27 = vpop.xlane.xlu2 %3543  ;;  %vm3795_vm11 = vweird.f32 %v10442_v15 }
 0x6c7   : > { %v4080_v14 = vmul.f32 %v3778_v56, %v3696_v19  ;;  %v3635_v40 = vmul.f32 %v10448_v0, %v10448_v0  ;;  %v3603_v53 = vmul.f32 %v3544_v27, %v8611_v52  ;;  %v10455_v58 = vadd.f32 %v3337_v45, %v10030_v42 }
 0x6c8   : > { %v3782_v32 = vmul.f32 0.5, %v3781_v24 }
 0x6c9   : > { %v4117_v62 = vmul.f32 %v10418_v54, %v4080_v14  ;;  %v3667_v11 = vsub.f32 %v3603_v53, %v3635_v40  ;;  %3445 = vadd.xlane.f32.xlu1 %v10455_v58  ;;  %v3522_v3 = vmul.f32 %v10455_v58, %v10455_v58 }
 0x6ca   : > { %v3783_v59 = vsub.f32 1.5, %v3782_v32 }
 0x6cb   : > { %v10462_v28 = vadd.f32 %v10421_v30, %v4117_v62  ;;  %v7718_v16 = vpop.eup %7717  ;;  %v10464_v25 = vadd.f32 1e-05, %v3667_v11  ;;  %3573 = vadd.xlane.f32.xlu2 %v3522_v3 }
 0x6cc   : > { %v3784_v60 = vmul.f32 %v7716_v44, %v3783_v59  ;;  %v3790_v42 = vmul.f32 %v7718_v16, %v10442_v15  ;;  %v3339_v57 = vpop.f32.mrf.mxu0  ;;  %v3418_v22 = vpop.xlane.xlu0 %3417  ;;  %vm3796_vm10 = vweird.f32 %v7718_v16 }
 0x6cd   : > { %4226 = vmatmul.f32.gmra.mxu1 %v10462_v28  ;;  %7719 = vrsqrt.f32 %v10464_v25  ;;  %v3340_v19 = vadd.f32 %v10252_v23, %v3339_v57  ;;  %v10473_v17 = vmul.f32 %v3418_v22, %v8611_v52  ;;  %vm3797_vm12 = vmor %vm3795_vm11, %vm3796_vm10  ;;  %vm3805_vm14 = vweird.f32 %v10464_v25 }
 0x6ce   : > { %v3791_v61 = vmul.f32 %v7718_v16, %v3790_v42  ;;  %v3546_v56 = vpop.xlane.xlu1 %3545  ;;  %v3788_v24 = vsel %vm3787_vm9, %v7716_v44, %v3784_v60  ;;  %v4534_v44 = vld [vmem:[#allocation5 + $0x5f0] sm:$0xff] }
 0x6cf   : > { %v10478_v45 = vadd.f32 %v3340_v19, %v10045_v13  ;;  %v3636_v27 = vmul.f32 %v10473_v17, %v10473_v17  ;;  %v3604_v14 = vmul.f32 %v3546_v56, %v8611_v52  ;;  %v4081_v40 = vmul.f32 %v3788_v24, %v3697_v1  ;;  %4542 = vmatpush.msrb.mxu3 %v4534_v44 }
 0x6d0   : > { %v3792_v32 = vmul.f32 0.5, %v3791_v61  ;;  %v3698_v19 = vsub.f32 %v10281_v63, %v10424_v18 }
 0x6d1   : > { %v3668_v53 = vsub.f32 %v3604_v14, %v3636_v27  ;;  %3447 = vadd.xlane.f32.xlu0 %v10478_v45  ;;  %v3523_v62 = vmul.f32 %v10478_v45, %v10478_v45  ;;  %v4118_v49 = vmul.f32 %v10418_v54, %v4081_v40 }
 0x6d2   : > { %v3793_v6 = vsub.f32 1.5, %v3792_v32 }
 0x6d3   : > { %v7720_v13 = vpop.eup %7719  ;;  %v10487_v59 = vadd.f32 1e-05, %v3668_v53  ;;  %3575 = vadd.xlane.f32.xlu1 %v3523_v62  ;;  %v10492_v60 = vadd.f32 %v10421_v30, %v4118_v49  ;;  %v4358_v53 = vld [vmem:[#allocation5 + $0x528] sm:$0xff] }
 0x6d4   : > { %v3800_v11 = vmul.f32 %v7720_v13, %v10464_v25  ;;  %v3420_v3 = vpop.xlane.xlu2 %3419  ;;  %v3342_v34 = vpop.f32.mrf.mxu0  ;;  %v3794_v42 = vmul.f32 %v7718_v16, %v3793_v6  ;;  %vm3806_vm13 = vweird.f32 %v7720_v13  ;;  %4384 = vmatpush.msrb.mxu2 %v4358_v53 }
 0x6d5   : > { %7721 = vrsqrt.f32 %v10487_v59  ;;  %v10496_v57 = vmul.f32 %v3420_v3, %v8611_v52  ;;  %v3343_v22 = vadd.f32 %v10252_v23, %v3342_v34  ;;  %4229 = vmatmul.f32.gmra.mxu1 %v10492_v60  ;;  %vm3807_vm15 = vmor %vm3805_vm14, %vm3806_vm13  ;;  %vm3815_vm1 = vweird.f32 %v10487_v59 }
 0x6d6   : > { %v3801_v15 = vmul.f32 %v7720_v13, %v3800_v11  ;;  %v3548_v1 = vpop.xlane.xlu0 %3547  ;;  %v3798_v61 = vsel %vm3797_vm12, %v7718_v16, %v3794_v42 }
 0x6d7   : > { %v3637_v56 = vmul.f32 %v10496_v57, %v10496_v57  ;;  %v10505_v24 = vadd.f32 %v3343_v22, %v10064_v43  ;;  %v3605_v27 = vmul.f32 %v3548_v1, %v8611_v52  ;;  %v4082_v32 = vmul.f32 %v3798_v61, %v3698_v19 }
 0x6d8   : > { %v3802_v14 = vmul.f32 0.5, %v3801_v15  ;;  %v3699_v22 = vsub.f32 %v10289_v4, %v10448_v0 }
 0x6d9   : > { %v3669_v40 = vsub.f32 %v3605_v27, %v3637_v56  ;;  %3449 = vadd.xlane.f32.xlu2 %v10505_v24  ;;  %v3524_v63 = vmul.f32 %v10505_v24, %v10505_v24  ;;  %v4119_v16 = vmul.f32 %v10418_v54, %v4082_v32 }
 0x6da   : > { %v3803_v18 = vsub.f32 1.5, %v3802_v14 }
 0x6db   : > { %v7722_v62 = vpop.eup %7721  ;;  %v10512_v6 = vadd.f32 1e-05, %v3669_v40  ;;  %3577 = vadd.xlane.f32.xlu0 %v3524_v63  ;;  %v10517_v11 = vadd.f32 %v10421_v30, %v4119_v16  ;;  %v4533_v40 = vld [vmem:[#allocation5 + $0x5e8] sm:$0xff] }
 0x6dc   : > { %v3810_v43 = vmul.f32 %v7722_v62, %v10487_v59  ;;  %v3422_v49 = vpop.xlane.xlu1 %3421  ;;  %v3345_v44 = vpop.f32.mrf.mxu0  ;;  %v3804_v3 = vmul.f32 %v7720_v13, %v3803_v18  ;;  %vm3816_vm0 = vweird.f32 %v7722_v62  ;;  %4543 = vmatpush.msrb.mxu3 %v4533_v40 }
 0x6dd   : > { %7723 = vrsqrt.f32 %v10512_v6  ;;  %v10521_v34 = vmul.f32 %v3422_v49, %v8611_v52  ;;  %v3346_v42 = vadd.f32 %v10252_v23, %v3345_v44  ;;  %4232 = vmatmul.f32.gmra.mxu1 %v10517_v11  ;;  %vm3817_vm2 = vmor %vm3815_vm1, %vm3816_vm0  ;;  %vm3825_vm4 = vweird.f32 %v10512_v6 }
 0x6de   : > { %v3811_v25 = vmul.f32 %v7722_v62, %v3810_v43  ;;  %v3550_v19 = vpop.xlane.xlu2 %3549  ;;  %v3808_v15 = vsel %vm3807_vm15, %v7720_v13, %v3804_v3 }
 0x6df   : > { %v3638_v1 = vmul.f32 %v10521_v34, %v10521_v34  ;;  %v10530_v61 = vadd.f32 %v3346_v42, %v10083_v31  ;;  %v3606_v56 = vmul.f32 %v3550_v19, %v8611_v52  ;;  %v4083_v14 = vmul.f32 %v3808_v15, %v3699_v22 }
 0x6e0   : > { %v3812_v27 = vmul.f32 0.5, %v3811_v25  ;;  %v3700_v42 = vsub.f32 %v10297_v5, %v10473_v17 }
 0x6e1   : > { %v3670_v32 = vsub.f32 %v3606_v56, %v3638_v1  ;;  %3451 = vadd.xlane.f32.xlu1 %v10530_v61  ;;  %v3525_v4 = vmul.f32 %v10530_v61, %v10530_v61  ;;  %v4120_v13 = vmul.f32 %v10418_v54, %v4083_v14 }
 0x6e2   : > { %v3813_v0 = vsub.f32 1.5, %v3812_v27 }
 0x6e3   : > { %v7724_v63 = vpop.eup %7723  ;;  %v10537_v18 = vadd.f32 1e-05, %v3670_v32  ;;  %3579 = vadd.xlane.f32.xlu2 %v3525_v4  ;;  %v10542_v43 = vadd.f32 %v10421_v30, %v4120_v13  ;;  %v4357_v32 = vld [vmem:[#allocation5 + $0x520] sm:$0xff] }
 0x6e4   : > { %v3820_v31 = vmul.f32 %v7724_v63, %v10512_v6  ;;  %v3348_v16 = vpop.f32.mrf.mxu0  ;;  %v3424_v53 = vpop.xlane.xlu0 %3423  ;;  %v3814_v49 = vmul.f32 %v7722_v62, %v3813_v0  ;;  %vm3826_vm3 = vweird.f32 %v7724_v63  ;;  %4385 = vmatpush.msrb.mxu2 %v4357_v32 }
 0x6e5   : > { %7725 = vrsqrt.f32 %v10537_v18  ;;  %v3349_v44 = vadd.f32 %v10252_v23, %v3348_v16  ;;  %v10547_v3 = vmul.f32 %v3424_v53, %v8611_v52  ;;  %4235 = vmatmul.f32.gmra.mxu1 %v10542_v43  ;;  %vm3827_vm5 = vmor %vm3825_vm4, %vm3826_vm3  ;;  %vm3835_vm7 = vweird.f32 %v10537_v18 }
 0x6e6   : > { %v3821_v59 = vmul.f32 %v7724_v63, %v3820_v31  ;;  %v3552_v22 = vpop.xlane.xlu1 %3551  ;;  %v3818_v25 = vsel %vm3817_vm2, %v7722_v62, %v3814_v49 }
 0x6e7   : > { %v10553_v19 = vadd.f32 %v3349_v44, %v10102_v36  ;;  %v3639_v15 = vmul.f32 %v10547_v3, %v10547_v3  ;;  %v3607_v1 = vmul.f32 %v3552_v22, %v8611_v52  ;;  %v4084_v27 = vmul.f32 %v3818_v25, %v3700_v42 }
 0x6e8   : > { %v3822_v56 = vmul.f32 0.5, %v3821_v59  ;;  %v3701_v44 = vsub.f32 %v10305_v38, %v10496_v57 }
 0x6e9   : > { %v3671_v14 = vsub.f32 %v3607_v1, %v3639_v15  ;;  %3453 = vadd.xlane.f32.xlu0 %v10553_v19  ;;  %v3526_v5 = vmul.f32 %v10553_v19, %v10553_v19  ;;  %v4121_v62 = vmul.f32 %v10418_v54, %v4084_v27 }
 0x6ea   : > { %v3823_v17 = vsub.f32 1.5, %v3822_v56 }
 0x6eb   : > { %v7726_v36 = vpop.eup %7725  ;;  %v10562_v4 = vadd.f32 1e-05, %v3671_v14  ;;  %3581 = vadd.xlane.f32.xlu1 %v3526_v5  ;;  %v10567_v31 = vadd.f32 %v10421_v30, %v4121_v62  ;;  %v4532_v14 = vld [vmem:[#allocation5 + $0x5e0] sm:$0xff] }
 0x6ec   : > { %v3830_v0 = vmul.f32 %v7726_v36, %v10537_v18  ;;  %v3426_v13 = vpop.xlane.xlu2 %3425  ;;  %v3351_v40 = vpop.f32.mrf.mxu0  ;;  %v3824_v16 = vmul.f32 %v7724_v63, %v3823_v17  ;;  %vm3836_vm6 = vweird.f32 %v7726_v36  ;;  %4544 = vmatpush.msrb.mxu3 %v4532_v14 }
 0x6ed   : > { %7727 = vrsqrt.f32 %v10562_v4  ;;  %v10571_v53 = vmul.f32 %v3426_v13, %v8611_v52  ;;  %v3352_v49 = vadd.f32 %v10252_v23, %v3351_v40  ;;  %4238 = vmatmul.f32.gmra.mxu1 %v10567_v31  ;;  %vm3837_vm8 = vmor %vm3835_vm7, %vm3836_vm6  ;;  %vm3845_vm10 = vweird.f32 %v10562_v4 }
 0x6ee   : > { %v3831_v6 = vmul.f32 %v7726_v36, %v3830_v0  ;;  %v3554_v42 = vpop.xlane.xlu0 %3553  ;;  %v3828_v59 = vsel %vm3827_vm5, %v7724_v63, %v3824_v16 }
 0x6ef   : > { %v3640_v22 = vmul.f32 %v10571_v53, %v10571_v53  ;;  %v10580_v25 = vadd.f32 %v3352_v49, %v10121_v39  ;;  %v3608_v15 = vmul.f32 %v3554_v42, %v8611_v52  ;;  %v4085_v56 = vmul.f32 %v3828_v59, %v3701_v44 }
 0x6f0   : > { %v3832_v1 = vmul.f32 0.5, %v3831_v6  ;;  %v3702_v49 = vsub.f32 %v10313_v9, %v10521_v34 }
 0x6f1   : > { %v3672_v27 = vsub.f32 %v3608_v15, %v3640_v22  ;;  %3455 = vadd.xlane.f32.xlu2 %v10580_v25  ;;  %v3527_v38 = vmul.f32 %v10580_v25, %v10580_v25  ;;  %v4122_v63 = vmul.f32 %v10418_v54, %v4085_v56 }
 0x6f2   : > { %v3833_v57 = vsub.f32 1.5, %v3832_v1 }
 0x6f3   : > { %v7728_v5 = vpop.eup %7727  ;;  %v10587_v17 = vadd.f32 1e-05, %v3672_v27  ;;  %3583 = vadd.xlane.f32.xlu0 %v3527_v38  ;;  %v10592_v0 = vadd.f32 %v10421_v30, %v4122_v63  ;;  %v4356_v27 = vld [vmem:[#allocation5 + $0x518] sm:$0xff] }
 0x6f4   : > { %v3840_v39 = vmul.f32 %v7728_v5, %v10562_v4  ;;  %v3428_v62 = vpop.xlane.xlu1 %3427  ;;  %v3354_v32 = vpop.f32.mrf.mxu0  ;;  %v3834_v13 = vmul.f32 %v7726_v36, %v3833_v57  ;;  %vm3846_vm9 = vweird.f32 %v7728_v5  ;;  %4386 = vmatpush.msrb.mxu2 %v4356_v27 }
 0x6f5   : > { %7729 = vrsqrt.f32 %v10587_v17  ;;  %v10596_v40 = vmul.f32 %v3428_v62, %v8611_v52  ;;  %v3355_v16 = vadd.f32 %v10252_v23, %v3354_v32  ;;  %4241 = vmatmul.f32.gmra.mxu1 %v10592_v0  ;;  %vm3847_vm11 = vmor %vm3845_vm10, %vm3846_vm9  ;;  %vm3855_vm13 = vweird.f32 %v10587_v17 }
 0x6f6   : > { %v3841_v18 = vmul.f32 %v7728_v5, %v3840_v39  ;;  %v3556_v44 = vpop.xlane.xlu2 %3555  ;;  %v3838_v6 = vsel %vm3837_vm8, %v7726_v36, %v3834_v13 }
 0x6f7   : > { %v3641_v42 = vmul.f32 %v10596_v40, %v10596_v40  ;;  %v10605_v59 = vadd.f32 %v3355_v16, %v10140_v55  ;;  %v3609_v22 = vmul.f32 %v3556_v44, %v8611_v52  ;;  %v4086_v1 = vmul.f32 %v3838_v6, %v3702_v49 }
 0x6f8   : > { %v3842_v15 = vmul.f32 0.5, %v3841_v18  ;;  %v3703_v16 = vsub.f32 %v10321_v26, %v10547_v3 }
 0x6f9   : > { %v3673_v56 = vsub.f32 %v3609_v22, %v3641_v42  ;;  %3457 = vadd.xlane.f32.xlu1 %v10605_v59  ;;  %v3528_v9 = vmul.f32 %v10605_v59, %v10605_v59  ;;  %v4123_v36 = vmul.f32 %v10418_v54, %v4086_v1  ;;  %v4531_v1 = vld [vmem:[#allocation5 + $0x5d8] sm:$0xff] }
 0x6fa   : > { %v3843_v34 = vsub.f32 1.5, %v3842_v15  ;;  %4545 = vmatpush.msrb.mxu3 %v4531_v1 }
 0x6fb   : > { %v7730_v38 = vpop.eup %7729  ;;  %v10612_v57 = vadd.f32 1e-05, %v3673_v56  ;;  %3585 = vadd.xlane.f32.xlu2 %v3528_v9  ;;  %v10617_v39 = vadd.f32 %v10421_v30, %v4123_v36 }
 0x6fc   : > { %v3850_v55 = vmul.f32 %v7730_v38, %v10587_v17  ;;  %v3357_v63 = vpop.f32.mrf.mxu0  ;;  %v3430_v14 = vpop.xlane.xlu0 %3429  ;;  %v3844_v62 = vmul.f32 %v7728_v5, %v3843_v34  ;;  %vm3856_vm12 = vweird.f32 %v7730_v38  ;;  %v3704_v17 = vsub.f32 %v10329_v20, %v10571_v53 }
 0x6fd   : > { %7731 = vrsqrt.f32 %v10612_v57  ;;  %v3358_v32 = vadd.f32 %v10252_v23, %v3357_v63  ;;  %v10622_v13 = vmul.f32 %v3430_v14, %v8611_v52  ;;  %4244 = vmatmul.f32.gmra.mxu1 %v10617_v39  ;;  %vm3857_vm14 = vmor %vm3855_vm13, %vm3856_vm12  ;;  %v10648_v14 = vld [vmem:[#allocation7 + $0x8] ss:$0 sm:$0xff]  ;;  %vm3865_vm0 = vweird.f32 %v10612_v57 }
 0x6fe   : > { %v3851_v4 = vmul.f32 %v7730_v38, %v3850_v55  ;;  %v3558_v49 = vpop.xlane.xlu1 %3557  ;;  %v3848_v18 = vsel %vm3847_vm11, %v7728_v5, %v3844_v62 }
 0x6ff   : > { %v10628_v44 = vadd.f32 %v3358_v32, %v10159_v41  ;;  %v3642_v6 = vmul.f32 %v10622_v13, %v10622_v13  ;;  %v3610_v42 = vmul.f32 %v3558_v49, %v8611_v52  ;;  %v4087_v22 = vmul.f32 %v3848_v18, %v3703_v16 }
 0x700   : > { %v3852_v23 = vmul.f32 0.5, %v3851_v4 }
 0x701   : > { %v3674_v15 = vsub.f32 %v3610_v42, %v3642_v6  ;;  %3459 = vadd.xlane.f32.xlu0 %v10628_v44  ;;  %v3529_v26 = vmul.f32 %v10628_v44, %v10628_v44  ;;  %v4124_v5 = vmul.f32 %v10418_v54, %v4087_v22 }
 0x702   : > { %v3853_v3 = vsub.f32 1.5, %v3852_v23 }
 0x703   : > { %v7732_v41 = vpop.eup %7731  ;;  %v10637_v56 = vadd.f32 1e-05, %v3674_v15  ;;  %3587 = vadd.xlane.f32.xlu1 %v3529_v26  ;;  %v10642_v27 = vadd.f32 %v10421_v30, %v4124_v5  ;;  %v4355_v15 = vld [vmem:[#allocation5 + $0x510] sm:$0xff] }
 0x704   : > { %v3860_v9 = vmul.f32 %v7732_v41, %v10612_v57  ;;  %v3432_v34 = vpop.xlane.xlu2 %3431  ;;  %v3360_v36 = vpop.f32.mrf.mxu0  ;;  %v3854_v55 = vmul.f32 %v7730_v38, %v3853_v3  ;;  %vm3866_vm15 = vweird.f32 %v7732_v41  ;;  %4387 = vmatpush.msrb.mxu2 %v4355_v15 }
 0x705   : > { %7733 = vrsqrt.f32 %v10637_v56  ;;  %v10646_v63 = vmul.f32 %v3432_v34, %v8611_v52  ;;  %v3361_v62 = vadd.f32 %v10648_v14, %v3360_v36  ;;  %4247 = vmatmul.f32.gmra.mxu1 %v10642_v27  ;;  %vm3867_vm1 = vmor %vm3865_vm0, %vm3866_vm15  ;;  %vm3875_vm3 = vweird.f32 %v10637_v56 }
 0x706   : > { %v3861_v32 = vmul.f32 %v7732_v41, %v3860_v9  ;;  %v3560_v16 = vpop.xlane.xlu0 %3559  ;;  %v3858_v4 = vsel %vm3857_vm14, %v7730_v38, %v3854_v55 }
 0x707   : > { %v3643_v49 = vmul.f32 %v10646_v63, %v10646_v63  ;;  %v10657_v18 = vadd.f32 %v3361_v62, %v10176_v10  ;;  %v3611_v6 = vmul.f32 %v3560_v16, %v8611_v52  ;;  %v4088_v23 = vmul.f32 %v3858_v4, %v3704_v17 }
 0x708   : > { %v3862_v42 = vmul.f32 0.5, %v3861_v32  ;;  %v3705_v62 = vsub.f32 %v10337_v48, %v10596_v40 }
 0x709   : > { %v3675_v22 = vsub.f32 %v3611_v6, %v3643_v49  ;;  %3461 = vadd.xlane.f32.xlu2 %v10657_v18  ;;  %v3530_v20 = vmul.f32 %v10657_v18, %v10657_v18  ;;  %v4125_v38 = vmul.f32 %v10418_v54, %v4088_v23 }
 0x70a   : > { %v3863_v53 = vsub.f32 1.5, %v3862_v42 }
 0x70b   : > { %v7734_v26 = vpop.eup %7733  ;;  %v10664_v3 = vadd.f32 1e-05, %v3675_v22  ;;  %3589 = vadd.xlane.f32.xlu0 %v3530_v20  ;;  %v10669_v9 = vadd.f32 %v10421_v30, %v4125_v38  ;;  %v4530_v22 = vld [vmem:[#allocation5 + $0x5d0] sm:$0xff] }
 0x70c   : > { %v3870_v10 = vmul.f32 %v7734_v26, %v10637_v56  ;;  %v3434_v5 = vpop.xlane.xlu1 %3433  ;;  %v3363_v1 = vpop.f32.mrf.mxu0  ;;  %v3864_v34 = vmul.f32 %v7732_v41, %v3863_v53  ;;  %vm3876_vm2 = vweird.f32 %v7734_v26  ;;  %4546 = vmatpush.msrb.mxu3 %v4530_v22 }
 0x70d   : > { %7735 = vrsqrt.f32 %v10664_v3  ;;  %v10673_v36 = vmul.f32 %v3434_v5, %v8611_v52  ;;  %v3364_v55 = vadd.f32 %v10648_v14, %v3363_v1  ;;  %4250 = vmatmul.f32.gmra.mxu1 %v10669_v9  ;;  %vm3877_vm4 = vmor %vm3875_vm3, %vm3876_vm2  ;;  %vm3885_vm6 = vweird.f32 %v10664_v3 }
 0x70e   : > { %v3871_v57 = vmul.f32 %v7734_v26, %v3870_v10  ;;  %v3562_v17 = vpop.xlane.xlu2 %3561  ;;  %v3868_v32 = vsel %vm3867_vm1, %v7732_v41, %v3864_v34 }
 0x70f   : > { %v3644_v16 = vmul.f32 %v10673_v36, %v10673_v36  ;;  %v10682_v4 = vadd.f32 %v3364_v55, %v10192_v2  ;;  %v3612_v49 = vmul.f32 %v3562_v17, %v8611_v52  ;;  %v4089_v42 = vmul.f32 %v3868_v32, %v3705_v62 }
 0x710   : > { %v3872_v6 = vmul.f32 0.5, %v3871_v57  ;;  %v3706_v55 = vsub.f32 %v10345_v50, %v10622_v13 }
 0x711   : > { %v3676_v23 = vsub.f32 %v3612_v49, %v3644_v16  ;;  %3463 = vadd.xlane.f32.xlu1 %v10682_v4  ;;  %v3531_v48 = vmul.f32 %v10682_v4, %v10682_v4  ;;  %v4126_v41 = vmul.f32 %v10418_v54, %v4089_v42 }
 0x712   : > { %v3873_v40 = vsub.f32 1.5, %v3872_v6 }
 0x713   : > { %v7736_v20 = vpop.eup %7735  ;;  %v10689_v53 = vadd.f32 1e-05, %v3676_v23  ;;  %3591 = vadd.xlane.f32.xlu2 %v3531_v48  ;;  %v10694_v10 = vadd.f32 %v10421_v30, %v4126_v41  ;;  %v4354_v23 = vld [vmem:[#allocation5 + $0x508] sm:$0xff] }
 0x714   : > { %v3880_v2 = vmul.f32 %v7736_v20, %v10664_v3  ;;  %v3366_v38 = vpop.f32.mrf.mxu0  ;;  %v3436_v15 = vpop.xlane.xlu0 %3435  ;;  %v3874_v5 = vmul.f32 %v7734_v26, %v3873_v40  ;;  %vm3886_vm5 = vweird.f32 %v7736_v20  ;;  %4388 = vmatpush.msrb.mxu2 %v4354_v23 }
 0x715   : > { %7737 = vrsqrt.f32 %v10689_v53  ;;  %v3367_v1 = vadd.f32 %v10648_v14, %v3366_v38  ;;  %v10699_v34 = vmul.f32 %v3436_v15, %v8611_v52  ;;  %4253 = vmatmul.f32.gmra.mxu1 %v10694_v10  ;;  %vm3887_vm7 = vmor %vm3885_vm6, %vm3886_vm5  ;;  %vm3895_vm9 = vweird.f32 %v10689_v53 }
 0x716   : > { %v3881_v56 = vmul.f32 %v7736_v20, %v3880_v2  ;;  %v3564_v62 = vpop.xlane.xlu1 %3563  ;;  %v3878_v57 = vsel %vm3877_vm4, %v7734_v26, %v3874_v5 }
 0x717   : > { %v10705_v17 = vadd.f32 %v3367_v1, %v10200_v33  ;;  %v3645_v32 = vmul.f32 %v10699_v34, %v10699_v34  ;;  %v3613_v16 = vmul.f32 %v3564_v62, %v8611_v52  ;;  %v4090_v6 = vmul.f32 %v3878_v57, %v3706_v55 }
 0x718   : > { %v3882_v49 = vmul.f32 0.5, %v3881_v56  ;;  %v3707_v1 = vsub.f32 %v10353_v51, %v10646_v63 }
 0x719   : > { %v3677_v42 = vsub.f32 %v3613_v16, %v3645_v32  ;;  %3465 = vadd.xlane.f32.xlu0 %v10705_v17  ;;  %v3532_v50 = vmul.f32 %v10705_v17, %v10705_v17  ;;  %v4127_v26 = vmul.f32 %v10418_v54, %v4090_v6 }
 0x71a   : > { %v3883_v13 = vsub.f32 1.5, %v3882_v49 }
 0x71b   : > { %v7738_v33 = vpop.eup %7737  ;;  %v10714_v48 = vadd.f32 1e-05, %v3677_v42  ;;  %3593 = vadd.xlane.f32.xlu1 %v3532_v50  ;;  %v10719_v2 = vadd.f32 %v10421_v30, %v4127_v26  ;;  %v4529_v42 = vld [vmem:[#allocation5 + $0x5c8] sm:$0xff] }
 0x71c   : > { %v3890_v40 = vmul.f32 %v7738_v33, %v10689_v53  ;;  %v3438_v41 = vpop.xlane.xlu2 %3437  ;;  %v3369_v22 = vpop.f32.mrf.mxu0  ;;  %v3884_v38 = vmul.f32 %v7736_v20, %v3883_v13  ;;  %vm3896_vm8 = vweird.f32 %v7738_v33  ;;  %4547 = vmatpush.msrb.mxu3 %v4529_v42 }
 0x71d   : > { %7739 = vrsqrt.f32 %v10714_v48  ;;  %v10723_v15 = vmul.f32 %v3438_v41, %v8611_v52  ;;  %v3370_v5 = vadd.f32 %v10648_v14, %v3369_v22  ;;  %4256 = vmatmul.f32.gmra.mxu1 %v10719_v2  ;;  %vm3897_vm10 = vmor %vm3895_vm9, %vm3896_vm8  ;;  %vm3905_vm12 = vweird.f32 %v10714_v48 }
 0x71e   : > { %v3891_v3 = vmul.f32 %v7738_v33, %v3890_v40  ;;  %v3566_v55 = vpop.xlane.xlu0 %3565  ;;  %v3888_v56 = vsel %vm3887_vm7, %v7736_v20, %v3884_v38 }
 0x71f   : > { %v3646_v62 = vmul.f32 %v10723_v15, %v10723_v15  ;;  %v10732_v57 = vadd.f32 %v3370_v5, %v10208_v47  ;;  %v3614_v32 = vmul.f32 %v3566_v55, %v8611_v52  ;;  %v4091_v49 = vmul.f32 %v3888_v56, %v3707_v1  ;;  %v4353_v55 = vld [vmem:[#allocation5 + $0x500] sm:$0xff] }
 0x720   : > { %v3892_v16 = vmul.f32 0.5, %v3891_v3  ;;  %v3708_v5 = vsub.f32 %v10361_v29, %v10673_v36  ;;  %4389 = vmatpush.msrb.mxu2 %v4353_v55 }
 0x721   : > { %v3678_v6 = vsub.f32 %v3614_v32, %v3646_v62  ;;  %3467 = vadd.xlane.f32.xlu2 %v10732_v57  ;;  %v3533_v51 = vmul.f32 %v10732_v57, %v10732_v57  ;;  %v4128_v20 = vmul.f32 %v10418_v54, %v4091_v49 }
 0x722   : > { %v3893_v63 = vsub.f32 1.5, %v3892_v16 }
 0x723   : > { %v7740_v50 = vpop.eup %7739  ;;  %v10739_v13 = vadd.f32 1e-05, %v3678_v6  ;;  %3595 = vadd.xlane.f32.xlu0 %v3533_v51  ;;  %v10744_v40 = vadd.f32 %v10421_v30, %v4128_v20 }
 0x724   : > { %v3900_v47 = vmul.f32 %v7740_v50, %v10714_v48  ;;  %v3440_v26 = vpop.xlane.xlu1 %3439  ;;  %v3372_v23 = vpop.f32.mrf.mxu0  ;;  %v3894_v41 = vmul.f32 %v7738_v33, %v3893_v63  ;;  %vm3906_vm11 = vweird.f32 %v7740_v50 }
 0x725   : > { %7741 = vrsqrt.f32 %v10739_v13  ;;  %v10748_v22 = vmul.f32 %v3440_v26, %v8611_v52  ;;  %v3373_v38 = vadd.f32 %v10648_v14, %v3372_v23  ;;  %4259 = vmatmul.f32.gmra.mxu1 %v10744_v40  ;;  %vm3907_vm13 = vmor %vm3905_vm12, %vm3906_vm11  ;;  %vm3915_vm15 = vweird.f32 %v10739_v13 }
 0x726   : > { %v3901_v53 = vmul.f32 %v7740_v50, %v3900_v47  ;;  %v3568_v1 = vpop.xlane.xlu2 %3567  ;;  %v3898_v3 = vsel %vm3897_vm10, %v7738_v33, %v3894_v41  ;;  %v3709_v47 = vsub.f32 %v10369_v21, %v10699_v34 }
 0x727   : > { %v3647_v56 = vmul.f32 %v10748_v22, %v10748_v22  ;;  %v10757_v62 = vadd.f32 %v3373_v38, %v10216_v46  ;;  %v3615_v32 = vmul.f32 %v3568_v1, %v8611_v52  ;;  %v4092_v14 = vmul.f32 %v3898_v3, %v3708_v5 }
 0x728   : > { %v3902_v16 = vmul.f32 0.5, %v3901_v53 }
 0x729   : > { %v3679_v49 = vsub.f32 %v3615_v32, %v3647_v56  ;;  %3469 = vadd.xlane.f32.xlu1 %v10757_v62  ;;  %v3534_v29 = vmul.f32 %v10757_v62, %v10757_v62  ;;  %v4129_v33 = vmul.f32 %v10418_v54, %v4092_v14 }
 0x72a   : > { %v3903_v36 = vsub.f32 1.5, %v3902_v16  ;;  %v4528_v16 = vld [vmem:[#allocation5 + $0x5c0] sm:$0xff] }
 0x72b   : > { %v7742_v6 = vpop.eup %7741  ;;  %v3743_v51 = vadd.f32 1e-05, %v3679_v49  ;;  %3597 = vadd.xlane.f32.xlu2 %v3534_v29  ;;  %v10767_v20 = vadd.f32 %v10421_v30, %v4129_v33  ;;  %4548 = vmatpush.msrb.mxu3 %v4528_v16  ;;  %v3710_v29 = vsub.f32 %v10383_v7, %v10723_v15 }
 0x72c   : > { %v3910_v46 = vmul.f32 %v7742_v6, %v10739_v13  ;;  %v3442_v63 = vpop.xlane.xlu0 %3441  ;;  %v3904_v42 = vmul.f32 %v7740_v50, %v3903_v36  ;;  %vm3916_vm14 = vweird.f32 %v7742_v6 }
 0x72d   : > { %7743 = vrsqrt.f32 %v3743_v51  ;;  %v10772_v26 = vmul.f32 %v3442_v63, %v8611_v52  ;;  %4262 = vmatmul.f32.gmra.mxu1 %v10767_v20  ;;  %vm3917_vm0 = vmor %vm3915_vm15, %vm3916_vm14  ;;  %vm3925_vm2 = vweird.f32 %v3743_v51 }
 0x72e   : > { %v3911_v23 = vmul.f32 %v7742_v6, %v3910_v46  ;;  %v3570_v41 = vpop.xlane.xlu1 %3569  ;;  %v3908_v48 = vsel %vm3907_vm13, %v7740_v50, %v3904_v42 }
 0x72f   : > { %v3648_v38 = vmul.f32 %v10772_v26, %v10772_v26  ;;  %v3616_v5 = vmul.f32 %v3570_v41, %v8611_v52  ;;  %v4093_v53 = vmul.f32 %v3908_v48, %v3709_v47 }
 0x730   : > { %v3912_v1 = vmul.f32 0.5, %v3911_v23 }
 0x731   : > { %v3680_v3 = vsub.f32 %v3616_v5, %v3648_v38  ;;  %v4130_v21 = vmul.f32 %v10418_v54, %v4093_v53 }
 0x732   : > { %v3913_v34 = vsub.f32 1.5, %v3912_v1  ;;  %v3711_v1 = vsub.f32 %v10396_v12, %v10748_v22 }
 0x733   : > { %v7744_v55 = vpop.eup %7743  ;;  %v3744_v56 = vadd.f32 1e-05, %v3680_v3  ;;  %v10780_v32 = vadd.f32 %v10421_v30, %v4130_v21  ;;  %v10801_v21 = vld [vmem:[#allocation7 + $0x9] ss:$0 sm:$0xff] }
 0x734   : > { %v3920_v50 = vmul.f32 %v7744_v55, %v3743_v51  ;;  %v3444_v14 = vpop.xlane.xlu2 %3443  ;;  %v3914_v49 = vmul.f32 %v7742_v6, %v3913_v34  ;;  %vm3926_vm1 = vweird.f32 %v7744_v55 }
 0x735   : > { %7745 = vrsqrt.f32 %v3744_v56  ;;  %v10786_v36 = vmul.f32 %v3444_v14, %v8611_v52  ;;  %4265 = vmatmul.f32.gmra.mxu1 %v10780_v32  ;;  %vm3927_vm3 = vmor %vm3925_vm2, %vm3926_vm1  ;;  %vm3935_vm5 = vweird.f32 %v3744_v56 }
 0x736   : > { %v3921_v33 = vmul.f32 %v7744_v55, %v3920_v50  ;;  %v3572_v46 = vpop.xlane.xlu0 %3571  ;;  %v3918_v63 = vsel %vm3917_vm0, %v7742_v6, %v3914_v49 }
 0x737   : > { %v3649_v13 = vmul.f32 %v10786_v36, %v10786_v36  ;;  %v3617_v42 = vmul.f32 %v3572_v46, %v8611_v52  ;;  %v4094_v47 = vmul.f32 %v3918_v63, %v3710_v29 }
 0x738   : > { %v3922_v23 = vmul.f32 0.5, %v3921_v33 }
 0x739   : > { %v3681_v41 = vsub.f32 %v3617_v42, %v3649_v13  ;;  %v4131_v7 = vmul.f32 %v10418_v54, %v4094_v47 }
 0x73a   : > { %v3923_v15 = vsub.f32 1.5, %v3922_v23  ;;  %v4527_v23 = vld [vmem:[#allocation5 + $0x5b8] sm:$0xff] }
 0x73b   : > { %v7746_v48 = vpop.eup %7745  ;;  %v10793_v38 = vadd.f32 1e-05, %v3681_v41  ;;  %v10796_v5 = vadd.f32 %v10421_v30, %v4131_v7  ;;  %4549 = vmatpush.msrb.mxu3 %v4527_v23  ;;  %v3713_v23 = vsub.f32 %v10431_v8, %v10786_v36 }
 0x73c   : > { %v3930_v6 = vmul.f32 %v7746_v48, %v3744_v56  ;;  %v3924_v53 = vmul.f32 %v7744_v55, %v3923_v15  ;;  %v3446_v3 = vpop.xlane.xlu1 %3445  ;;  %vm3936_vm4 = vweird.f32 %v7746_v48 }
 0x73d   : > { %7747 = vrsqrt.f32 %v10793_v38  ;;  %v10804_v16 = vmul.f32 %v3446_v3, %v8611_v52  ;;  %4268 = vmatmul.f32.gmra.mxu1 %v10796_v5  ;;  %vm3937_vm6 = vmor %vm3935_vm5, %vm3936_vm4  ;;  %vm3945_vm8 = vweird.f32 %v10793_v38 }
 0x73e   : > { %v3931_v34 = vmul.f32 %v7746_v48, %v3930_v6  ;;  %v3928_v50 = vsel %vm3927_vm3, %v7744_v55, %v3924_v53  ;;  %v3574_v14 = vpop.xlane.xlu2 %3573  ;;  %v3712_v53 = vsub.f32 %v10409_v35, %v10772_v26  ;;  %v10825_v26 = vld [vmem:[#allocation8 + $0x2] ss:$0 sm:$0xff] }
 0x73f   : > { %v4095_v49 = vmul.f32 %v3928_v50, %v3711_v1  ;;  %v3650_v12 = vmul.f32 %v10804_v16, %v10804_v16  ;;  %v3618_v22 = vmul.f32 %v3574_v14, %v8611_v52 }
 0x740   : > { %v3932_v29 = vmul.f32 0.5, %v3931_v34 }
 0x741   : > { %v4132_v46 = vmul.f32 %v10418_v54, %v4095_v49  ;;  %v3682_v13 = vsub.f32 %v3618_v22, %v3650_v12 }
 0x742   : > { %v4224_v51 = vpop.f32.mrf.mxu1  ;;  %v3933_v63 = vsub.f32 1.5, %v3932_v29 }
 0x743   : > { %v4225_v33 = vadd.f32 %v10801_v21, %v4224_v51  ;;  %v7748_v42 = vpop.eup %7747  ;;  %v10813_v55 = vadd.f32 %v10421_v30, %v4132_v46  ;;  %v3746_v7 = vadd.f32 1e-05, %v3682_v13 }
 0x744   : > { %v3940_v41 = vmul.f32 %v7748_v42, %v10793_v38  ;;  %v3448_v15 = vpop.xlane.xlu0 %3447  ;;  %v3934_v6 = vmul.f32 %v7746_v48, %v3933_v63  ;;  %vm3946_vm7 = vweird.f32 %v7748_v42 }
 0x745   : > { %v4320_v47 = vmax.f32 %v4225_v33, 0.0  ;;  %v10819_v54 = vmul.f32 %v3448_v15, %v8611_v52  ;;  %7749 = vrsqrt.f32 %v3746_v7  ;;  %4271 = vmatmul.f32.gmra.mxu1 %v10813_v55  ;;  %vm3947_vm9 = vmor %vm3945_vm8, %vm3946_vm7  ;;  %vm3955_vm11 = vweird.f32 %v3746_v7 }
 0x746   : > { %v3941_v1 = vmul.f32 %v7748_v42, %v3940_v41  ;;  %v3576_v30 = vpop.xlane.xlu1 %3575  ;;  %v3938_v56 = vsel %vm3937_vm6, %v7746_v48, %v3934_v6  ;;  %v10831_v48 = vld [vmem:[#allocation10 + $0x2] ss:$0 sm:$0xff] }
 0x747   : > { %4390 = vmatmul.f32.vlgmr.msrb.gmra.mxu2 %v4320_v47  ;;  %v3651_v3 = vmul.f32 %v10819_v54, %v10819_v54  ;;  %v3619_v34 = vmul.f32 %v3576_v30, %v8611_v52  ;;  %v4096_v50 = vmul.f32 %v3938_v56, %v3712_v53 }
 0x748   : > { %v3942_v14 = vmul.f32 0.5, %v3941_v1 }
 0x749   : > { %v3683_v51 = vsub.f32 %v3619_v34, %v3651_v3  ;;  %v4133_v49 = vmul.f32 %v10825_v26, %v4096_v50 }
 0x74a   : > { %v4227_v35 = vpop.f32.mrf.mxu1  ;;  %v3943_v29 = vsub.f32 1.5, %v3942_v14 }
 0x74b   : > { %v4228_v12 = vadd.f32 %v10801_v21, %v4227_v35  ;;  %v10829_v22 = vadd.f32 1e-05, %v3683_v51  ;;  %v10834_v33 = vadd.f32 %v10831_v48, %v4133_v49  ;;  %v7750_v46 = vpop.eup %7749 }
 0x74c   : > { %v3450_v13 = vpop.xlane.xlu2 %3449  ;;  %v3944_v47 = vmul.f32 %v7748_v42, %v3943_v29  ;;  %v3950_v41 = vmul.f32 %v7750_v46, %v3746_v7  ;;  %vm3956_vm10 = vweird.f32 %v7750_v46 }
 0x74d   : > { %v4321_v63 = vmax.f32 %v4228_v12, 0.0  ;;  %7751 = vrsqrt.f32 %v10829_v22  ;;  %v10841_v15 = vmul.f32 %v3450_v13, %v8611_v52  ;;  %4274 = vmatmul.f32.gmra.mxu1 %v10834_v33  ;;  %v4526_v13 = vld [vmem:[#allocation5 + $0x5b0] sm:$0xff]  ;;  %vm3957_vm12 = vmor %vm3955_vm11, %vm3956_vm10  ;;  %vm3965_vm14 = vweird.f32 %v10829_v22 }
 0x74e   : > { %v3578_v6 = vpop.xlane.xlu0 %3577  ;;  %v3948_v53 = vsel %vm3947_vm9, %v7748_v42, %v3944_v47  ;;  %v3951_v1 = vmul.f32 %v7750_v46, %v3950_v41  ;;  %v3714_v47 = vsub.f32 %v10455_v58, %v10804_v16  ;;  %4550 = vmatpush.msrb.mxu3 %v4526_v13 }
 0x74f   : > { %4393 = vmatmul.f32.gmra.mxu2 %v4321_v63  ;;  %v3620_v38 = vmul.f32 %v3578_v6, %v8611_v52  ;;  %v4097_v30 = vmul.f32 %v3948_v53, %v3713_v23  ;;  %v3652_v56 = vmul.f32 %v10841_v15, %v10841_v15 }
 0x750   : > { %v3952_v8 = vmul.f32 0.5, %v3951_v1 }
 0x751   : > { %v4134_v36 = vmul.f32 %v10825_v26, %v4097_v30  ;;  %v3684_v3 = vsub.f32 %v3620_v38, %v3652_v56 }
 0x752   : > { %v3953_v50 = vsub.f32 1.5, %v3952_v8  ;;  %v4230_v14 = vpop.f32.mrf.mxu1 }
 0x753   : > { %v7752_v34 = vpop.eup %7751  ;;  %v10849_v51 = vadd.f32 %v10831_v48, %v4134_v36  ;;  %v10852_v35 = vadd.f32 1e-05, %v3684_v3  ;;  %v4231_v49 = vadd.f32 %v10801_v21, %v4230_v14 }
 0x754   : > { %v3960_v42 = vmul.f32 %v7752_v34, %v10829_v22  ;;  %v3452_v29 = vpop.xlane.xlu1 %3451  ;;  %v3954_v63 = vmul.f32 %v7750_v46, %v3953_v50  ;;  %vm3966_vm13 = vweird.f32 %v7752_v34 }
 0x755   : > { %v10856_v12 = vmul.f32 %v3452_v29, %v8611_v52  ;;  %7753 = vrsqrt.f32 %v10852_v35  ;;  %v4322_v41 = vmax.f32 %v4231_v49, 0.0  ;;  %4277 = vmatmul.f32.gmra.mxu1 %v10849_v51  ;;  %v3715_v49 = vsub.f32 %v10478_v45, %v10819_v54  ;;  %vm3967_vm15 = vmor %vm3965_vm14, %vm3966_vm13 }
 0x756   : > { %v3961_v23 = vmul.f32 %v7752_v34, %v3960_v42  ;;  %v3580_v6 = vpop.xlane.xlu2 %3579  ;;  %v3958_v1 = vsel %vm3957_vm12, %v7750_v46, %v3954_v63  ;;  %vm3975_vm1 = vweird.f32 %v10852_v35 }
 0x757   : > { %v3653_v7 = vmul.f32 %v10856_v12, %v10856_v12  ;;  %v3621_v53 = vmul.f32 %v3580_v6, %v8611_v52  ;;  %4396 = vmatmul.f32.gmra.mxu2 %v4322_v41  ;;  %v4098_v30 = vmul.f32 %v3958_v1, %v3714_v47 }
 0x758   : > { %v3962_v38 = vmul.f32 0.5, %v3961_v23 }
 0x759   : > { %v3685_v56 = vsub.f32 %v3621_v53, %v3653_v7  ;;  %v4135_v16 = vmul.f32 %v10825_v26, %v4098_v30 }
 0x75a   : > { %v3963_v58 = vsub.f32 1.5, %v3962_v38  ;;  %v4233_v36 = vpop.f32.mrf.mxu1 }
 0x75b   : > { %v10866_v8 = vadd.f32 1e-05, %v3685_v56  ;;  %v7754_v3 = vpop.eup %7753  ;;  %v4234_v50 = vadd.f32 %v10801_v21, %v4233_v36  ;;  %v10871_v42 = vadd.f32 %v10831_v48, %v4135_v16 }
 0x75c   : > { %v3454_v14 = vpop.xlane.xlu0 %3453  ;;  %v3964_v46 = vmul.f32 %v7752_v34, %v3963_v58  ;;  %v3970_v29 = vmul.f32 %v7754_v3, %v10852_v35  ;;  %vm3976_vm0 = vweird.f32 %v7754_v3 }
 0x75d   : > { %7755 = vrsqrt.f32 %v10866_v8  ;;  %v4323_v63 = vmax.f32 %v4234_v50, 0.0  ;;  %v10878_v13 = vmul.f32 %v3454_v14, %v8611_v52  ;;  %4280 = vmatmul.f32.gmra.mxu1 %v10871_v42  ;;  %vm3977_vm2 = vmor %vm3975_vm1, %vm3976_vm0  ;;  %vm3985_vm4 = vweird.f32 %v10866_v8 }
 0x75e   : > { %v3582_v22 = vpop.xlane.xlu1 %3581  ;;  %v3968_v47 = vsel %vm3967_vm15, %v7752_v34, %v3964_v46  ;;  %v3971_v23 = vmul.f32 %v7754_v3, %v3970_v29  ;;  %v4525_v46 = vld [vmem:[#allocation5 + $0x5a8] sm:$0xff] }
 0x75f   : > { %v3622_v41 = vmul.f32 %v3582_v22, %v8611_v52  ;;  %v4099_v6 = vmul.f32 %v3968_v47, %v3715_v49  ;;  %v3654_v45 = vmul.f32 %v10878_v13, %v10878_v13  ;;  %4399 = vmatmul.f32.gmra.mxu2 %v4323_v63  ;;  %v3716_v49 = vsub.f32 %v10505_v24, %v10841_v15 }
 0x760   : > { %v3972_v54 = vmul.f32 0.5, %v3971_v23  ;;  %4551 = vmatpush.msrb.mxu3 %v4525_v46 }
 0x761   : > { %v4136_v7 = vmul.f32 %v10825_v26, %v4099_v6  ;;  %v3686_v53 = vsub.f32 %v3622_v41, %v3654_v45 }
 0x762   : > { %v3973_v38 = vsub.f32 1.5, %v3972_v54  ;;  %v4236_v30 = vpop.f32.mrf.mxu1 }
 0x763   : > { %v7756_v1 = vpop.eup %7755  ;;  %v10886_v56 = vadd.f32 %v10831_v48, %v4136_v7  ;;  %v10889_v58 = vadd.f32 1e-05, %v3686_v53  ;;  %v4237_v16 = vadd.f32 %v10801_v21, %v4236_v30 }
 0x764   : > { %v3980_v34 = vmul.f32 %v7756_v1, %v10866_v8  ;;  %v3456_v36 = vpop.xlane.xlu2 %3455  ;;  %v3974_v14 = vmul.f32 %v7754_v3, %v3973_v38  ;;  %vm3986_vm3 = vweird.f32 %v7756_v1 }
 0x765   : > { %v10894_v50 = vmul.f32 %v3456_v36, %v8611_v52  ;;  %7757 = vrsqrt.f32 %v10889_v58  ;;  %v4324_v63 = vmax.f32 %v4237_v16, 0.0  ;;  %4283 = vmatmul.f32.gmra.mxu1 %v10886_v56  ;;  %v3717_v16 = vsub.f32 %v10530_v61, %v10856_v12  ;;  %vm3987_vm5 = vmor %vm3985_vm4, %vm3986_vm3 }
 0x766   : > { %v3981_v29 = vmul.f32 %v7756_v1, %v3980_v34  ;;  %v3584_v22 = vpop.xlane.xlu0 %3583  ;;  %v3978_v23 = vsel %vm3977_vm2, %v7754_v3, %v3974_v14  ;;  %vm3995_vm7 = vweird.f32 %v10889_v58 }
 0x767   : > { %v3655_v35 = vmul.f32 %v10894_v50, %v10894_v50  ;;  %v3623_v47 = vmul.f32 %v3584_v22, %v8611_v52  ;;  %4402 = vmatmul.f32.gmra.mxu2 %v4324_v63  ;;  %v4100_v6 = vmul.f32 %v3978_v23, %v3716_v49 }
 0x768   : > { %v3982_v41 = vmul.f32 0.5, %v3981_v29 }
 0x769   : > { %v3687_v45 = vsub.f32 %v3623_v47, %v3655_v35  ;;  %v4137_v15 = vmul.f32 %v10825_v26, %v4100_v6 }
 0x76a   : > { %v3983_v24 = vsub.f32 1.5, %v3982_v41  ;;  %v4239_v7 = vpop.f32.mrf.mxu1 }
 0x76b   : > { %v10904_v54 = vadd.f32 1e-05, %v3687_v45  ;;  %v7758_v53 = vpop.eup %7757  ;;  %v4240_v30 = vadd.f32 %v10801_v21, %v4239_v7  ;;  %v10909_v3 = vadd.f32 %v10831_v48, %v4137_v15 }
 0x76c   : > { %v3984_v38 = vmul.f32 %v7756_v1, %v3983_v24  ;;  %v3458_v34 = vpop.xlane.xlu1 %3457  ;;  %v3990_v36 = vmul.f32 %v7758_v53, %v10889_v58  ;;  %vm3996_vm6 = vweird.f32 %v7758_v53 }
 0x76d   : > { %7759 = vrsqrt.f32 %v10904_v54  ;;  %v4325_v14 = vmax.f32 %v4240_v30, 0.0  ;;  %v10916_v46 = vmul.f32 %v3458_v34, %v8611_v52  ;;  %4286 = vmatmul.f32.gmra.mxu1 %v10909_v3  ;;  %v4524_v34 = vld [vmem:[#allocation5 + $0x5a0] sm:$0xff]  ;;  %vm3997_vm8 = vmor %vm3995_vm7, %vm3996_vm6  ;;  %vm4005_vm10 = vweird.f32 %v10904_v54 }
 0x76e   : > { %v3586_v8 = vpop.xlane.xlu2 %3585  ;;  %v3988_v49 = vsel %vm3987_vm5, %v7756_v1, %v3984_v38  ;;  %v3991_v29 = vmul.f32 %v7758_v53, %v3990_v36  ;;  %4552 = vmatpush.msrb.mxu3 %v4524_v34 }
 0x76f   : > { %v3624_v63 = vmul.f32 %v3586_v8, %v8611_v52  ;;  %v4101_v22 = vmul.f32 %v3988_v49, %v3717_v16  ;;  %v3656_v61 = vmul.f32 %v10916_v46, %v10916_v46  ;;  %4405 = vmatmul.f32.gmra.mxu2 %v4325_v14  ;;  %v3718_v16 = vsub.f32 %v10553_v19, %v10878_v13 }
 0x770   : > { %v3992_v12 = vmul.f32 0.5, %v3991_v29 }
 0x771   : > { %v4138_v35 = vmul.f32 %v10825_v26, %v4101_v22  ;;  %v3688_v47 = vsub.f32 %v3624_v63, %v3656_v61 }
 0x772   : > { %v3993_v41 = vsub.f32 1.5, %v3992_v12  ;;  %v4242_v6 = vpop.f32.mrf.mxu1 }
 0x773   : > { %v7760_v23 = vpop.eup %7759  ;;  %v10924_v45 = vadd.f32 %v10831_v48, %v4138_v35  ;;  %v10927_v24 = vadd.f32 1e-05, %v3688_v47  ;;  %v4243_v15 = vadd.f32 %v10801_v21, %v4242_v6 }
 0x774   : > { %v4000_v1 = vmul.f32 %v7760_v23, %v10904_v54  ;;  %v3460_v7 = vpop.xlane.xlu0 %3459  ;;  %v3994_v38 = vmul.f32 %v7758_v53, %v3993_v41  ;;  %vm4006_vm9 = vweird.f32 %v7760_v23 }
 0x775   : > { %v10932_v30 = vmul.f32 %v3460_v7, %v8611_v52  ;;  %7761 = vrsqrt.f32 %v10927_v24  ;;  %v4326_v14 = vmax.f32 %v4243_v15, 0.0  ;;  %4289 = vmatmul.f32.gmra.mxu1 %v10924_v45  ;;  %v3719_v15 = vsub.f32 %v10580_v25, %v10894_v50  ;;  %vm4007_vm11 = vmor %vm4005_vm10, %vm4006_vm9 }
 0x776   : > { %v4001_v36 = vmul.f32 %v7760_v23, %v4000_v1  ;;  %v3588_v8 = vpop.xlane.xlu1 %3587  ;;  %v3998_v29 = vsel %vm3997_vm8, %v7758_v53, %v3994_v38  ;;  %vm4015_vm13 = vweird.f32 %v10927_v24 }
 0x777   : > { %v3657_v49 = vmul.f32 %v10932_v30, %v10932_v30  ;;  %v3625_v58 = vmul.f32 %v3588_v8, %v8611_v52  ;;  %4408 = vmatmul.f32.gmra.mxu2 %v4326_v14  ;;  %v4102_v22 = vmul.f32 %v3998_v29, %v3718_v16 }
 0x778   : > { %v4002_v63 = vmul.f32 0.5, %v4001_v36 }
 0x779   : > { %v3689_v61 = vsub.f32 %v3625_v58, %v3657_v49  ;;  %v4139_v13 = vmul.f32 %v10825_v26, %v4102_v22 }
 0x77a   : > { %v4003_v19 = vsub.f32 1.5, %v4002_v63  ;;  %v4245_v35 = vpop.f32.mrf.mxu1 }
 0x77b   : > { %v10942_v12 = vadd.f32 1e-05, %v3689_v61  ;;  %v7762_v47 = vpop.eup %7761  ;;  %v4246_v6 = vadd.f32 %v10801_v21, %v4245_v35  ;;  %v10947_v53 = vadd.f32 %v10831_v48, %v4139_v13 }
 0x77c   : > { %v4004_v41 = vmul.f32 %v7760_v23, %v4003_v19  ;;  %v3462_v1 = vpop.xlane.xlu2 %3461  ;;  %v4010_v7 = vmul.f32 %v7762_v47, %v10927_v24  ;;  %vm4016_vm12 = vweird.f32 %v7762_v47 }
 0x77d   : > { %7763 = vrsqrt.f32 %v10942_v12  ;;  %v4327_v38 = vmax.f32 %v4246_v6, 0.0  ;;  %v10954_v34 = vmul.f32 %v3462_v1, %v8611_v52  ;;  %4292 = vmatmul.f32.gmra.mxu1 %v10947_v53  ;;  %v4523_v1 = vld [vmem:[#allocation5 + $0x598] sm:$0xff]  ;;  %vm4017_vm14 = vmor %vm4015_vm13, %vm4016_vm12  ;;  %vm4025_vm0 = vweird.f32 %v10942_v12 }
 0x77e   : > { %v3590_v54 = vpop.xlane.xlu0 %3589  ;;  %v4008_v16 = vsel %vm4007_vm11, %v7760_v23, %v4004_v41  ;;  %v4011_v36 = vmul.f32 %v7762_v47, %v4010_v7  ;;  %4553 = vmatpush.msrb.mxu3 %v4523_v1 }
 0x77f   : > { %v3626_v14 = vmul.f32 %v3590_v54, %v8611_v52  ;;  %v4103_v8 = vmul.f32 %v4008_v16, %v3719_v15  ;;  %v3658_v25 = vmul.f32 %v10954_v34, %v10954_v34  ;;  %4411 = vmatmul.f32.gmra.mxu2 %v4327_v38  ;;  %v3720_v15 = vsub.f32 %v10605_v59, %v10916_v46 }
 0x780   : > { %v4012_v50 = vmul.f32 0.5, %v4011_v36 }
 0x781   : > { %v4140_v49 = vmul.f32 %v10825_v26, %v4103_v8  ;;  %v3690_v58 = vsub.f32 %v3626_v14, %v3658_v25 }
 0x782   : > { %v4013_v63 = vsub.f32 1.5, %v4012_v50  ;;  %v4248_v22 = vpop.f32.mrf.mxu1 }
 0x783   : > { %v7764_v29 = vpop.eup %7763  ;;  %v10962_v61 = vadd.f32 %v10831_v48, %v4140_v49  ;;  %v10965_v19 = vadd.f32 1e-05, %v3690_v58  ;;  %v4249_v13 = vadd.f32 %v10801_v21, %v4248_v22 }
 0x784   : > { %v4020_v23 = vmul.f32 %v7764_v29, %v10942_v12  ;;  %v3464_v35 = vpop.xlane.xlu1 %3463  ;;  %v4014_v41 = vmul.f32 %v7762_v47, %v4013_v63  ;;  %vm4026_vm15 = vweird.f32 %v7764_v29 }
 0x785   : > { %v10970_v6 = vmul.f32 %v3464_v35, %v8611_v52  ;;  %7765 = vrsqrt.f32 %v10965_v19  ;;  %v4328_v38 = vmax.f32 %v4249_v13, 0.0  ;;  %4295 = vmatmul.f32.gmra.mxu1 %v10962_v61  ;;  %v3721_v13 = vsub.f32 %v10628_v44, %v10932_v30  ;;  %vm4027_vm1 = vmor %vm4025_vm0, %vm4026_vm15 }
 0x786   : > { %v4021_v7 = vmul.f32 %v7764_v29, %v4020_v23  ;;  %v3592_v54 = vpop.xlane.xlu2 %3591  ;;  %v4018_v36 = vsel %vm4017_vm14, %v7762_v47, %v4014_v41  ;;  %vm4035_vm3 = vweird.f32 %v10965_v19 }
 0x787   : > { %v3659_v16 = vmul.f32 %v10970_v6, %v10970_v6  ;;  %v3627_v24 = vmul.f32 %v3592_v54, %v8611_v52  ;;  %4414 = vmatmul.f32.gmra.mxu2 %v4328_v38  ;;  %v4104_v8 = vmul.f32 %v4018_v36, %v3720_v15 }
 0x788   : > { %v4022_v14 = vmul.f32 0.5, %v4021_v7 }
 0x789   : > { %v3691_v25 = vsub.f32 %v3627_v24, %v3659_v16  ;;  %v4141_v46 = vmul.f32 %v10825_v26, %v4104_v8 }
 0x78a   : > { %v4023_v59 = vsub.f32 1.5, %v4022_v14  ;;  %v4251_v49 = vpop.f32.mrf.mxu1 }
 0x78b   : > { %v10980_v50 = vadd.f32 1e-05, %v3691_v25  ;;  %v7766_v58 = vpop.eup %7765  ;;  %v4252_v22 = vadd.f32 %v10801_v21, %v4251_v49  ;;  %v10985_v47 = vadd.f32 %v10831_v48, %v4141_v46 }
 0x78c   : > { %v4024_v63 = vmul.f32 %v7764_v29, %v4023_v59  ;;  %v3466_v23 = vpop.xlane.xlu0 %3465  ;;  %v4030_v35 = vmul.f32 %v7766_v58, %v10965_v19  ;;  %vm4036_vm2 = vweird.f32 %v7766_v58 }
 0x78d   : > { %7767 = vrsqrt.f32 %v10980_v50  ;;  %v4329_v41 = vmax.f32 %v4252_v22, 0.0  ;;  %v10992_v1 = vmul.f32 %v3466_v23, %v8611_v52  ;;  %4298 = vmatmul.f32.gmra.mxu1 %v10985_v47  ;;  %v4522_v23 = vld [vmem:[#allocation5 + $0x590] sm:$0xff]  ;;  %vm4037_vm4 = vmor %vm4035_vm3, %vm4036_vm2  ;;  %vm4045_vm6 = vweird.f32 %v10980_v50 }
 0x78e   : > { %v3594_v12 = vpop.xlane.xlu1 %3593  ;;  %v4028_v15 = vsel %vm4027_vm1, %v7764_v29, %v4024_v63  ;;  %v4031_v7 = vmul.f32 %v7766_v58, %v4030_v35  ;;  %v3722_v35 = vsub.f32 %v10657_v18, %v10954_v34  ;;  %4554 = vmatpush.msrb.mxu3 %v4522_v23 }
 0x78f   : > { %v3628_v38 = vmul.f32 %v3594_v12, %v8611_v52  ;;  %v4105_v54 = vmul.f32 %v4028_v15, %v3721_v13  ;;  %v3660_v44 = vmul.f32 %v10992_v1, %v10992_v1  ;;  %4417 = vmatmul.f32.gmra.mxu2 %v4329_v41  ;;  %v4521_v13 = vld [vmem:[#allocation5 + $0x588] sm:$0xff] }
 0x790   : > { %v4032_v30 = vmul.f32 0.5, %v4031_v7  ;;  %4555 = vmatpush.msrb.mxu3 %v4521_v13 }
 0x791   : > { %v4142_v16 = vmul.f32 %v10825_v26, %v4105_v54  ;;  %v3692_v24 = vsub.f32 %v3628_v38, %v3660_v44 }
 0x792   : > { %v4033_v14 = vsub.f32 1.5, %v4032_v30  ;;  %v4254_v8 = vpop.f32.mrf.mxu1 }
 0x793   : > { %v7768_v36 = vpop.eup %7767  ;;  %v11000_v25 = vadd.f32 %v10831_v48, %v4142_v16  ;;  %v11003_v59 = vadd.f32 1e-05, %v3692_v24  ;;  %v4255_v46 = vadd.f32 %v10801_v21, %v4254_v8 }
 0x794   : > { %v4040_v29 = vmul.f32 %v7768_v36, %v10980_v50  ;;  %v3468_v49 = vpop.xlane.xlu2 %3467  ;;  %v4034_v63 = vmul.f32 %v7766_v58, %v4033_v14  ;;  %vm4046_vm5 = vweird.f32 %v7768_v36 }
 0x795   : > { %v11008_v22 = vmul.f32 %v3468_v49, %v8611_v52  ;;  %7769 = vrsqrt.f32 %v11003_v59  ;;  %v4330_v12 = vmax.f32 %v4255_v46, 0.0  ;;  %4301 = vmatmul.f32.gmra.mxu1 %v11000_v25  ;;  %v3723_v49 = vsub.f32 %v10682_v4, %v10970_v6  ;;  %vm4047_vm7 = vmor %vm4045_vm6, %vm4046_vm5  ;;  %v4520_v4 = vld [vmem:[#allocation5 + $0x580] sm:$0xff] }
 0x796   : > { %v4041_v41 = vmul.f32 %v7768_v36, %v4040_v29  ;;  %v3596_v15 = vpop.xlane.xlu0 %3595  ;;  %v4038_v38 = vsel %vm4037_vm4, %v7766_v58, %v4034_v63  ;;  %4556 = vmatpush.msrb.mxu3 %v4520_v4  ;;  %vm4055_vm9 = vweird.f32 %v11003_v59 }
 0x797   : > { %v3661_v19 = vmul.f32 %v11008_v22, %v11008_v22  ;;  %v3629_v7 = vmul.f32 %v3596_v15, %v8611_v52  ;;  %4420 = vmatmul.f32.gmra.mxu2 %v4330_v12  ;;  %v4106_v44 = vmul.f32 %v4038_v38, %v3722_v35 }
 0x798   : > { %v4042_v54 = vmul.f32 0.5, %v4041_v41 }
 0x799   : > { %v3693_v18 = vsub.f32 %v3629_v7, %v3661_v19  ;;  %v4143_v30 = vmul.f32 %v10825_v26, %v4106_v44 }
 0x79a   : > { %v4043_v34 = vsub.f32 1.5, %v4042_v54  ;;  %v4257_v24 = vpop.f32.mrf.mxu1 }
 0x79b   : > { %v3757_v16 = vadd.f32 1e-05, %v3693_v18  ;;  %v7770_v14 = vpop.eup %7769  ;;  %v4258_v29 = vadd.f32 %v10801_v21, %v4257_v24  ;;  %v11021_v58 = vadd.f32 %v10831_v48, %v4143_v30 }
 0x79c   : > { %v4044_v8 = vmul.f32 %v7768_v36, %v4043_v34  ;;  %v3470_v46 = vpop.xlane.xlu1 %3469  ;;  %v4050_v63 = vmul.f32 %v7770_v14, %v11003_v59  ;;  %vm4056_vm8 = vweird.f32 %v7770_v14 }
 0x79d   : > { %7771 = vrsqrt.f32 %v3757_v16  ;;  %v4331_v23 = vmax.f32 %v4258_v29, 0.0  ;;  %v11027_v13 = vmul.f32 %v3470_v46, %v8611_v52  ;;  %4304 = vmatmul.f32.gmra.mxu1 %v11021_v58  ;;  %v3724_v29 = vsub.f32 %v10705_v17, %v10992_v1  ;;  %vm4057_vm10 = vmor %vm4055_vm9, %vm4056_vm8 }
 0x79e   : > { %v3598_v50 = vpop.xlane.xlu2 %3597  ;;  %v4048_v35 = vsel %vm4047_vm7, %v7768_v36, %v4044_v8  ;;  %v4051_v41 = vmul.f32 %v7770_v14, %v4050_v63  ;;  %vm4065_vm12 = vweird.f32 %v3757_v16 }
 0x79f   : > { %v3630_v12 = vmul.f32 %v3598_v50, %v8611_v52  ;;  %v4107_v15 = vmul.f32 %v4048_v35, %v3723_v49  ;;  %v3662_v19 = vmul.f32 %v11027_v13, %v11027_v13  ;;  %4423 = vmatmul.f32.gmra.mxu2 %v4331_v23 }
 0x7a0   : > { %v4052_v6 = vmul.f32 0.5, %v4051_v41 }
 0x7a1   : > { %v4144_v7 = vmul.f32 %v10825_v26, %v4107_v15  ;;  %v3694_v38 = vsub.f32 %v3630_v12, %v3662_v19  ;;  %v3725_v19 = vsub.f32 %v10732_v57, %v11008_v22 }
 0x7a2   : > { %v4053_v44 = vsub.f32 1.5, %v4052_v6  ;;  %v4260_v18 = vpop.f32.mrf.mxu1 }
 0x7a3   : > { %v7772_v54 = vpop.eup %7771  ;;  %v11035_v36 = vadd.f32 %v10831_v48, %v4144_v7  ;;  %v3758_v30 = vadd.f32 1e-05, %v3694_v38  ;;  %v4261_v24 = vadd.f32 %v10801_v21, %v4260_v18 }
 0x7a4   : > { %v4060_v34 = vmul.f32 %v7772_v54, %v3757_v16  ;;  %v4054_v8 = vmul.f32 %v7770_v14, %v4053_v44  ;;  %vm4066_vm11 = vweird.f32 %v7772_v54 }
 0x7a5   : > { %7773 = vrsqrt.f32 %v3758_v30  ;;  %v4332_v49 = vmax.f32 %v4261_v24, 0.0  ;;  %4307 = vmatmul.f32.gmra.mxu1 %v11035_v36  ;;  %vm4067_vm13 = vmor %vm4065_vm12, %vm4066_vm11  ;;  %vm4075_vm15 = vweird.f32 %v3758_v30 }
 0x7a6   : > { %v4061_v46 = vmul.f32 %v7772_v54, %v4060_v34  ;;  %v4058_v63 = vsel %vm4057_vm10, %v7770_v14, %v4054_v8  ;;  %v3726_v8 = vsub.f32 %v10757_v62, %v11027_v13 }
 0x7a7   : > { %4426 = vmatmul.f32.gmra.mxu2 %v4332_v49  ;;  %v4108_v50 = vmul.f32 %v4058_v63, %v3724_v29 }
 0x7a8   : > { %v4062_v23 = vmul.f32 0.5, %v4061_v46 }
 0x7a9   : > { %v4145_v41 = vmul.f32 %v10825_v26, %v4108_v50 }
 0x7aa   : > { %v4063_v35 = vsub.f32 1.5, %v4062_v23  ;;  %v4263_v12 = vpop.f32.mrf.mxu1 }
 0x7ab   : > { %v7774_v15 = vpop.eup %7773  ;;  %v4264_v17 = vadd.f32 %v10801_v21, %v4263_v12  ;;  %v11045_v1 = vadd.f32 %v10831_v48, %v4145_v41 }
 0x7ac   : > { %v4064_v59 = vmul.f32 %v7772_v54, %v4063_v35  ;;  %v4070_v14 = vmul.f32 %v7774_v15, %v3758_v30  ;;  %vm4076_vm14 = vweird.f32 %v7774_v15  ;;  %v11065_v30 = vld [vmem:[#allocation7 + $0xa] ss:$0 sm:$0xff] }
 0x7ad   : > { %v4333_v4 = vmax.f32 %v4264_v17, 0.0  ;;  %4310 = vmatmul.f32.gmra.mxu1 %v11045_v1  ;;  %vm4077_vm0 = vmor %vm4075_vm15, %vm4076_vm14 }
 0x7ae   : > { %v4068_v6 = vsel %vm4067_vm13, %v7772_v54, %v4064_v59  ;;  %v4071_v7 = vmul.f32 %v7774_v15, %v4070_v14 }
 0x7af   : > { %v4109_v38 = vmul.f32 %v4068_v6, %v3725_v19  ;;  %4429 = vmatmul.f32.gmra.mxu2 %v4333_v4  ;;  %v5480_v19 = vld [vmem:[#allocation5 + $0x678] sm:$0xff] }
 0x7b0   : > { %v4072_v44 = vmul.f32 0.5, %v4071_v7  ;;  %5486 = vmatpush.msrb.mxu0 %v5480_v19 }
 0x7b1   : > { %v4146_v16 = vmul.f32 %v10825_v26, %v4109_v38 }
 0x7b2   : > { %v4073_v18 = vsub.f32 1.5, %v4072_v44  ;;  %v4266_v34 = vpop.f32.mrf.mxu1 }
 0x7b3   : > { %v11052_v24 = vadd.f32 %v10831_v48, %v4146_v16  ;;  %v4267_v57 = vadd.f32 %v10801_v21, %v4266_v34 }
 0x7b4   : > { %v4074_v22 = vmul.f32 %v7774_v15, %v4073_v18 }
 0x7b5   : > { %v4334_v54 = vmax.f32 %v4267_v57, 0.0  ;;  %4313 = vmatmul.f32.gmra.mxu1 %v11052_v24 }
 0x7b6   : > { %v4078_v29 = vsel %vm4077_vm0, %v7774_v15, %v4074_v22 }
 0x7b7   : > { %4432 = vmatmul.f32.gmra.mxu2 %v4334_v54  ;;  %v4110_v46 = vmul.f32 %v4078_v29, %v3726_v8  ;;  %v5479_v54 = vld [vmem:[#allocation5 + $0x670] sm:$0xff] }
 0x7b8   : > { %5487 = vmatpush.msrb.mxu0 %v5479_v54 }
 0x7b9   : > { %v4147_v49 = vmul.f32 %v10825_v26, %v4110_v46 }
 0x7ba   : > { %v4269_v63 = vpop.f32.mrf.mxu1 }
 0x7bb   : > { %v4270_v23 = vadd.f32 %v10801_v21, %v4269_v63  ;;  %v11061_v50 = vadd.f32 %v10831_v48, %v4147_v49 }
 0x7bd   : > { %v4335_v35 = vmax.f32 %v4270_v23, 0.0  ;;  %4316 = vmatmul.f32.gmra.mxu1 %v11061_v50 }
 0x7bf   : > { %4435 = vmatmul.f32.gmra.mxu2 %v4335_v35 }
 0x7c2   : > { %v4272_v62 = vpop.f32.mrf.mxu1 }
 0x7c3   : > { %v4273_v13 = vadd.f32 %v10801_v21, %v4272_v62 }
 0x7c5   : > { %v4336_v41 = vmax.f32 %v4273_v13, 0.0 }
 0x7c7   : > { %4438 = vmatmul.f32.gmra.mxu2 %v4336_v41 }
 0x7ca   : > { %v4391_v12 = vpop.f32.mrf.mxu2  ;;  %v4275_v15 = vpop.f32.mrf.mxu1 }
 0x7cb   : > { %v4392_v26 = vadd.f32 %v11065_v30, %v4391_v12  ;;  %v4276_v17 = vadd.f32 %v10801_v21, %v4275_v15 }
 0x7cd   : > { %v4487_v59 = vmax.f32 %v4392_v26, 0.0  ;;  %v4337_v48 = vmax.f32 %v4276_v17, 0.0 }
 0x7cf   : > { %4557 = vmatmul.f32.vlgmr.msrb.gmra.mxu3 %v4487_v59  ;;  %4441 = vmatmul.f32.gmra.mxu2 %v4337_v48  ;;  %v5478_v59 = vld [vmem:[#allocation5 + $0x668] sm:$0xff] }
 0x7d0   : > { %5488 = vmatpush.msrb.mxu0 %v5478_v59 }
 0x7d2   : > { %v4394_v14 = vpop.f32.mrf.mxu2  ;;  %v4278_v6 = vpop.f32.mrf.mxu1 }
 0x7d3   : > { %v4395_v4 = vadd.f32 %v11065_v30, %v4394_v14  ;;  %v4279_v7 = vadd.f32 %v10801_v21, %v4278_v6 }
 0x7d5   : > { %v4488_v38 = vmax.f32 %v4395_v4, 0.0  ;;  %v4338_v44 = vmax.f32 %v4279_v7, 0.0 }
 0x7d7   : > { %4560 = vmatmul.f32.gmra.mxu3 %v4488_v38  ;;  %4444 = vmatmul.f32.gmra.mxu2 %v4338_v44 }
 0x7da   : > { %v4281_v16 = vpop.f32.mrf.mxu1  ;;  %v4397_v18 = vpop.f32.mrf.mxu2 }
 0x7db   : > { %v4282_v34 = vadd.f32 %v10801_v21, %v4281_v16  ;;  %v4398_v57 = vadd.f32 %v11065_v30, %v4397_v18 }
 0x7dd   : > { %v4339_v22 = vmax.f32 %v4282_v34, 0.0  ;;  %v4489_v8 = vmax.f32 %v4398_v57, 0.0  ;;  %v5477_v57 = vld [vmem:[#allocation5 + $0x660] sm:$0xff] }
 0x7de   : > { %5489 = vmatpush.msrb.mxu0 %v5477_v57  ;;  %v7927_v57 = vld [vmem:[#allocation7 + $0x9] ss:$0 sm:$0xff] }
 0x7df   : > { %4447 = vmatmul.f32.gmra.mxu2 %v4339_v22  ;;  %4563 = vmatmul.f32.gmra.mxu3 %v4489_v8 }
 0x7e2   : > { %v4284_v29 = vpop.f32.mrf.mxu1  ;;  %v4400_v46 = vpop.f32.mrf.mxu2 }
 0x7e3   : > { %v4285_v49 = vadd.f32 %v10801_v21, %v4284_v29  ;;  %v4401_v63 = vadd.f32 %v11065_v30, %v4400_v46 }
 0x7e5   : > { %v4340_v23 = vmax.f32 %v4285_v49, 0.0  ;;  %v4490_v35 = vmax.f32 %v4401_v63, 0.0 }
 0x7e7   : > { %4450 = vmatmul.f32.gmra.mxu2 %v4340_v23  ;;  %4566 = vmatmul.f32.gmra.mxu3 %v4490_v35 }
 0x7ea   : > { %v4287_v62 = vpop.f32.mrf.mxu1  ;;  %v4403_v13 = vpop.f32.mrf.mxu2 }
 0x7eb   : > { %v4288_v41 = vadd.f32 %v10801_v21, %v4287_v62  ;;  %v4404_v12 = vadd.f32 %v11065_v30, %v4403_v13 }
 0x7ed   : > { %v4341_v26 = vmax.f32 %v4288_v41, 0.0  ;;  %v4491_v15 = vmax.f32 %v4404_v12, 0.0  ;;  %v5476_v12 = vld [vmem:[#allocation5 + $0x658] sm:$0xff] }
 0x7ee   : > { %5490 = vmatpush.msrb.mxu0 %v5476_v12 }
 0x7ef   : > { %4453 = vmatmul.f32.gmra.mxu2 %v4341_v26  ;;  %4569 = vmatmul.f32.gmra.mxu3 %v4491_v15 }
 0x7f2   : > { %v4290_v17 = vpop.f32.mrf.mxu1  ;;  %v4406_v48 = vpop.f32.mrf.mxu2 }
 0x7f3   : > { %v4291_v19 = vadd.f32 %v10801_v21, %v4290_v17  ;;  %v4407_v14 = vadd.f32 %v11065_v30, %v4406_v48 }
 0x7f5   : > { %v4342_v4 = vmax.f32 %v4291_v19, 0.0  ;;  %v4492_v6 = vmax.f32 %v4407_v14, 0.0 }
 0x7f7   : > { %4456 = vmatmul.f32.gmra.mxu2 %v4342_v4  ;;  %4572 = vmatmul.f32.gmra.mxu3 %v4492_v6 }
 0x7fa   : > { %v4293_v7 = vpop.f32.mrf.mxu1  ;;  %v4409_v38 = vpop.f32.mrf.mxu2 }
 0x7fb   : > { %v4294_v44 = vadd.f32 %v10801_v21, %v4293_v7  ;;  %v4410_v16 = vadd.f32 %v11065_v30, %v4409_v38 }
 0x7fd   : > { %v4343_v18 = vmax.f32 %v4294_v44, 0.0  ;;  %v4493_v34 = vmax.f32 %v4410_v16, 0.0  ;;  %v5475_v16 = vld [vmem:[#allocation5 + $0x650] sm:$0xff] }
 0x7fe   : > { %5491 = vmatpush.msrb.mxu0 %v5475_v16 }
 0x7ff   : > { %4459 = vmatmul.f32.gmra.mxu2 %v4343_v18  ;;  %4575 = vmatmul.f32.gmra.mxu3 %v4493_v34 }
 0x802   : > { %v4296_v22 = vpop.f32.mrf.mxu1  ;;  %v4412_v8 = vpop.f32.mrf.mxu2 }
 0x803   : > { %v4297_v54 = vadd.f32 %v10801_v21, %v4296_v22  ;;  %v4413_v29 = vadd.f32 %v11065_v30, %v4412_v8 }
 0x805   : > { %v4344_v46 = vmax.f32 %v4297_v54, 0.0  ;;  %v4494_v49 = vmax.f32 %v4413_v29, 0.0 }
 0x807   : > { %4462 = vmatmul.f32.gmra.mxu2 %v4344_v46  ;;  %4578 = vmatmul.f32.gmra.mxu3 %v4494_v49 }
 0x80a   : > { %v4299_v63 = vpop.f32.mrf.mxu1  ;;  %v4415_v23 = vpop.f32.mrf.mxu2 }
 0x80b   : > { %v4300_v35 = vadd.f32 %v10801_v21, %v4299_v63  ;;  %v4416_v62 = vadd.f32 %v11065_v30, %v4415_v23 }
 0x80d   : > { %v4345_v13 = vmax.f32 %v4300_v35, 0.0  ;;  %v4495_v41 = vmax.f32 %v4416_v62, 0.0  ;;  %v5474_v62 = vld [vmem:[#allocation5 + $0x648] sm:$0xff] }
 0x80e   : > { %5492 = vmatpush.msrb.mxu0 %v5474_v62 }
 0x80f   : > { %4465 = vmatmul.f32.gmra.mxu2 %v4345_v13  ;;  %4581 = vmatmul.f32.gmra.mxu3 %v4495_v41 }
 0x812   : > { %v4302_v26 = vpop.f32.mrf.mxu1  ;;  %v4418_v15 = vpop.f32.mrf.mxu2 }
 0x813   : > { %v4303_v59 = vadd.f32 %v10801_v21, %v4302_v26  ;;  %v4419_v17 = vadd.f32 %v11065_v30, %v4418_v15 }
 0x815   : > { %v4346_v48 = vmax.f32 %v4303_v59, 0.0  ;;  %v4496_v19 = vmax.f32 %v4419_v17, 0.0 }
 0x817   : > { %4468 = vmatmul.f32.gmra.mxu2 %v4346_v48  ;;  %4584 = vmatmul.f32.gmra.mxu3 %v4496_v19 }
 0x81a   : > { %v4305_v14 = vpop.f32.mrf.mxu1  ;;  %v4421_v4 = vpop.f32.mrf.mxu2 }
 0x81b   : > { %v4306_v6 = vadd.f32 %v10801_v21, %v4305_v14  ;;  %v4422_v7 = vadd.f32 %v11065_v30, %v4421_v4 }
 0x81d   : > { %v4347_v38 = vmax.f32 %v4306_v6, 0.0  ;;  %v4497_v44 = vmax.f32 %v4422_v7, 0.0  ;;  %v5473_v7 = vld [vmem:[#allocation5 + $0x640] sm:$0xff] }
 0x81e   : > { %5493 = vmatpush.msrb.mxu0 %v5473_v7 }
 0x81f   : > { %4471 = vmatmul.f32.gmra.mxu2 %v4347_v38  ;;  %4587 = vmatmul.f32.gmra.mxu3 %v4497_v44 }
 0x822   : > { %v4308_v18 = vpop.f32.mrf.mxu1  ;;  %v4424_v34 = vpop.f32.mrf.mxu2 }
 0x823   : > { %v4309_v22 = vadd.f32 %v7927_v57, %v4308_v18  ;;  %v4425_v8 = vadd.f32 %v11065_v30, %v4424_v34 }
 0x825   : > { %v4348_v54 = vmax.f32 %v4309_v22, 0.0  ;;  %v4498_v29 = vmax.f32 %v4425_v8, 0.0  ;;  %v11095_v22 = vld [vmem:[#allocation7 + $0xb] ss:$0 sm:$0xff] }
 0x827   : > { %4474 = vmatmul.f32.gmra.mxu2 %v4348_v54  ;;  %4590 = vmatmul.f32.gmra.mxu3 %v4498_v29  ;;  %v5647_v54 = vld [vmem:[#allocation5 + $0x6f8] sm:$0xff] }
 0x828   : > { %5653 = vmatpush.msrb.mxu1 %v5647_v54 }
 0x82a   : > { %v4311_v46 = vpop.f32.mrf.mxu1  ;;  %v4427_v21 = vpop.f32.mrf.mxu2 }
 0x82b   : > { %v4312_v49 = vadd.f32 %v7927_v57, %v4311_v46  ;;  %v4428_v63 = vadd.f32 %v11065_v30, %v4427_v21 }
 0x82d   : > { %v4349_v23 = vmax.f32 %v4312_v49, 0.0  ;;  %v4499_v35 = vmax.f32 %v4428_v63, 0.0 }
 0x82f   : > { %4477 = vmatmul.f32.gmra.mxu2 %v4349_v23  ;;  %4593 = vmatmul.f32.gmra.mxu3 %v4499_v35 }
 0x832   : > { %v4314_v13 = vpop.f32.mrf.mxu1  ;;  %v4430_v41 = vpop.f32.mrf.mxu2 }
 0x833   : > { %v4315_v12 = vadd.f32 %v7927_v57, %v4314_v13  ;;  %v4431_v26 = vadd.f32 %v11065_v30, %v4430_v41 }
 0x835   : > { %v4350_v15 = vmax.f32 %v4315_v12, 0.0  ;;  %v4500_v59 = vmax.f32 %v4431_v26, 0.0 }
 0x837   : > { %4480 = vmatmul.f32.gmra.mxu2 %v4350_v15  ;;  %4596 = vmatmul.f32.gmra.mxu3 %v4500_v59  ;;  %v5471_v59 = vld [vmem:[#allocation5 + $0x630] sm:$0xff] }
 0x83a   : > { %v4317_v17 = vpop.f32.mrf.mxu1  ;;  %v4433_v48 = vpop.f32.mrf.mxu2 }
 0x83b   : > { %v4318_v19 = vadd.f32 %v7927_v57, %v4317_v17  ;;  %v4434_v14 = vadd.f32 %v11065_v30, %v4433_v48  ;;  %v5472_v57 = vld [vmem:[#allocation5 + $0x638] sm:$0xff]  ;;  %v5646_v17 = vld [vmem:[#allocation5 + $0x6f0] sm:$0xff] }
 0x83c   : > { %5494 = vmatpush.msrb.mxu0 %v5472_v57  ;;  %5654 = vmatpush.msrb.mxu1 %v5646_v17  ;;  %v5470_v57 = vld [vmem:[#allocation5 + $0x628] sm:$0xff] }
 0x83d   : > { %v4351_v4 = vmax.f32 %v4318_v19, 0.0  ;;  %v4501_v6 = vmax.f32 %v4434_v14, 0.0 }
 0x83e   : > { %5495 = vmatpush.msrb.mxu0 %v5471_v59  ;;  %v5469_v59 = vld [vmem:[#allocation5 + $0x620] sm:$0xff] }
 0x83f   : > { %4483 = vmatmul.f32.gmra.mxu2 %v4351_v4  ;;  %4599 = vmatmul.f32.gmra.mxu3 %v4501_v6 }
 0x840   : > { %5496 = vmatpush.msrb.mxu0 %v5470_v57 }
 0x842   : > { %v4436_v38 = vpop.f32.mrf.mxu2  ;;  %5497 = vmatpush.msrb.mxu0 %v5469_v59 }
 0x843   : > { %v4437_v44 = vadd.f32 %v11065_v30, %v4436_v38 }
 0x845   : > { %v4502_v16 = vmax.f32 %v4437_v44, 0.0 }
 0x847   : > { %4602 = vmatmul.f32.gmra.mxu3 %v4502_v16 }
 0x84a   : > { %v4439_v18 = vpop.f32.mrf.mxu2 }
 0x84b   : > { %v4440_v34 = vadd.f32 %v11065_v30, %v4439_v18 }
 0x84d   : > { %v4503_v8 = vmax.f32 %v4440_v34, 0.0 }
 0x84f   : > { %4605 = vmatmul.f32.gmra.mxu3 %v4503_v8 }
 0x852   : > { %v4558_v29 = vpop.f32.mrf.mxu3  ;;  %v4442_v21 = vpop.f32.mrf.mxu2 }
 0x853   : > { %v4559_v46 = vadd.f32 %v11095_v22, %v4558_v29  ;;  %v4443_v63 = vadd.f32 %v11065_v30, %v4442_v21 }
 0x855   : > { %v11099_v49 = vadd.f32 %v4559_v46, %v10435_v37  ;;  %v4504_v35 = vmax.f32 %v4443_v63, 0.0 }
 0x857   : > { %4686 = vadd.xlane.f32.xlu0 %v11099_v49  ;;  %v4782_v23 = vmul.f32 %v11099_v49, %v11099_v49  ;;  %4608 = vmatmul.f32.gmra.mxu3 %v4504_v35 }
 0x859   : > { %4814 = vadd.xlane.f32.xlu1 %v4782_v23 }
 0x85a   : > { %v4561_v62 = vpop.f32.mrf.mxu3  ;;  %v4445_v41 = vpop.f32.mrf.mxu2 }
 0x85b   : > { %v4562_v13 = vadd.f32 %v11095_v22, %v4561_v62  ;;  %v4446_v12 = vadd.f32 %v11065_v30, %v4445_v41 }
 0x85d   : > { %v11108_v26 = vadd.f32 %v4562_v13, %v10462_v28  ;;  %v4505_v37 = vmax.f32 %v4446_v12, 0.0 }
 0x85f   : > { %4688 = vadd.xlane.f32.xlu2 %v11108_v26  ;;  %v4783_v15 = vmul.f32 %v11108_v26, %v11108_v26  ;;  %4611 = vmatmul.f32.gmra.mxu3 %v4505_v37 }
 0x861   : > { %4816 = vadd.xlane.f32.xlu0 %v4783_v15 }
 0x862   : > { %v4448_v48 = vpop.f32.mrf.mxu2  ;;  %v4564_v19 = vpop.f32.mrf.mxu3 }
 0x863   : > { %v4449_v14 = vadd.f32 %v11065_v30, %v4448_v48  ;;  %v4565_v4 = vadd.f32 %v11095_v22, %v4564_v19 }
 0x865   : > { %v4506_v28 = vmax.f32 %v4449_v14, 0.0  ;;  %v11116_v6 = vadd.f32 %v4565_v4, %v10492_v60  ;;  %v5645_v60 = vld [vmem:[#allocation5 + $0x6e8] sm:$0xff] }
 0x866   : > { %5655 = vmatpush.msrb.mxu1 %v5645_v60  ;;  %v5468_v60 = vld [vmem:[#allocation5 + $0x618] sm:$0xff] }
 0x867   : > { %4690 = vadd.xlane.f32.xlu1 %v11116_v6  ;;  %4614 = vmatmul.f32.gmra.mxu3 %v4506_v28  ;;  %v4784_v7 = vmul.f32 %v11116_v6, %v11116_v6 }
 0x868   : > { %5498 = vmatpush.msrb.mxu0 %v5468_v60 }
 0x869   : > { %4818 = vadd.xlane.f32.xlu2 %v4784_v7 }
 0x86a   : > { %v4451_v38 = vpop.f32.mrf.mxu2  ;;  %v4567_v44 = vpop.f32.mrf.mxu3 }
 0x86b   : > { %v4452_v16 = vadd.f32 %v11065_v30, %v4451_v38  ;;  %v4568_v18 = vadd.f32 %v11095_v22, %v4567_v44 }
 0x86d   : > { %v4507_v34 = vmax.f32 %v4452_v16, 0.0  ;;  %v11124_v8 = vadd.f32 %v4568_v18, %v10517_v11 }
 0x86f   : > { %4692 = vadd.xlane.f32.xlu0 %v11124_v8  ;;  %4617 = vmatmul.f32.gmra.mxu3 %v4507_v34  ;;  %v4785_v54 = vmul.f32 %v11124_v8, %v11124_v8 }
 0x871   : > { %4820 = vadd.xlane.f32.xlu1 %v4785_v54 }
 0x872   : > { %v4454_v29 = vpop.f32.mrf.mxu2  ;;  %v4570_v46 = vpop.f32.mrf.mxu3 }
 0x873   : > { %v4455_v21 = vadd.f32 %v11065_v30, %v4454_v29  ;;  %v4571_v63 = vadd.f32 %v11095_v22, %v4570_v46 }
 0x875   : > { %v4508_v23 = vmax.f32 %v4455_v21, 0.0  ;;  %v11132_v11 = vadd.f32 %v4571_v63, %v10542_v43  ;;  %v5644_v43 = vld [vmem:[#allocation5 + $0x6e0] sm:$0xff] }
 0x876   : > { %5656 = vmatpush.msrb.mxu1 %v5644_v43  ;;  %v5467_v43 = vld [vmem:[#allocation5 + $0x610] sm:$0xff] }
 0x877   : > { %4694 = vadd.xlane.f32.xlu2 %v11132_v11  ;;  %4620 = vmatmul.f32.gmra.mxu3 %v4508_v23  ;;  %v4786_v35 = vmul.f32 %v11132_v11, %v11132_v11 }
 0x878   : > { %5499 = vmatpush.msrb.mxu0 %v5467_v43 }
 0x879   : > { %4822 = vadd.xlane.f32.xlu0 %v4786_v35 }
 0x87a   : > { %v4457_v62 = vpop.f32.mrf.mxu2  ;;  %v4573_v13 = vpop.f32.mrf.mxu3 }
 0x87b   : > { %v4458_v41 = vadd.f32 %v11065_v30, %v4457_v62  ;;  %v4574_v12 = vadd.f32 %v11095_v22, %v4573_v13 }
 0x87d   : > { %v4509_v37 = vmax.f32 %v4458_v41, 0.0  ;;  %v11140_v15 = vadd.f32 %v4574_v12, %v10567_v31 }
 0x87f   : > { %4696 = vadd.xlane.f32.xlu1 %v11140_v15  ;;  %4623 = vmatmul.f32.gmra.mxu3 %v4509_v37  ;;  %v4787_v17 = vmul.f32 %v11140_v15, %v11140_v15 }
 0x881   : > { %4824 = vadd.xlane.f32.xlu2 %v4787_v17 }
 0x882   : > { %v4460_v48 = vpop.f32.mrf.mxu2  ;;  %v4576_v19 = vpop.f32.mrf.mxu3 }
 0x883   : > { %v4461_v14 = vadd.f32 %v11065_v30, %v4460_v48  ;;  %v4577_v4 = vadd.f32 %v11095_v22, %v4576_v19 }
 0x885   : > { %v4510_v28 = vmax.f32 %v4461_v14, 0.0  ;;  %v11148_v31 = vadd.f32 %v4577_v4, %v10592_v0  ;;  %v5643_v0 = vld [vmem:[#allocation5 + $0x6d8] sm:$0xff] }
 0x886   : > { %5657 = vmatpush.msrb.mxu1 %v5643_v0  ;;  %v5466_v0 = vld [vmem:[#allocation5 + $0x608] sm:$0xff] }
 0x887   : > { %4698 = vadd.xlane.f32.xlu0 %v11148_v31  ;;  %4626 = vmatmul.f32.gmra.mxu3 %v4510_v28  ;;  %v4788_v7 = vmul.f32 %v11148_v31, %v11148_v31 }
 0x888   : > { %5500 = vmatpush.msrb.mxu0 %v5466_v0 }
 0x889   : > { %4826 = vadd.xlane.f32.xlu1 %v4788_v7 }
 0x88a   : > { %v4463_v38 = vpop.f32.mrf.mxu2  ;;  %v4579_v44 = vpop.f32.mrf.mxu3 }
 0x88b   : > { %v4464_v16 = vadd.f32 %v11065_v30, %v4463_v38  ;;  %v4580_v18 = vadd.f32 %v11095_v22, %v4579_v44 }
 0x88d   : > { %v4511_v34 = vmax.f32 %v4464_v16, 0.0  ;;  %v11156_v57 = vadd.f32 %v4580_v18, %v10617_v39 }
 0x88f   : > { %4700 = vadd.xlane.f32.xlu2 %v11156_v57  ;;  %4629 = vmatmul.f32.gmra.mxu3 %v4511_v34  ;;  %v4789_v54 = vmul.f32 %v11156_v57, %v11156_v57 }
 0x891   : > { %4828 = vadd.xlane.f32.xlu0 %v4789_v54 }
 0x892   : > { %v4466_v29 = vpop.f32.mrf.mxu2  ;;  %v4582_v46 = vpop.f32.mrf.mxu3 }
 0x893   : > { %v4467_v21 = vadd.f32 %v11065_v30, %v4466_v29  ;;  %v4583_v63 = vadd.f32 %v11095_v22, %v4582_v46 }
 0x895   : > { %v4512_v23 = vmax.f32 %v4467_v21, 0.0  ;;  %v11164_v39 = vadd.f32 %v4583_v63, %v10642_v27  ;;  %v5642_v27 = vld [vmem:[#allocation5 + $0x6d0] sm:$0xff] }
 0x896   : > { %5658 = vmatpush.msrb.mxu1 %v5642_v27 }
 0x897   : > { %4702 = vadd.xlane.f32.xlu1 %v11164_v39  ;;  %4632 = vmatmul.f32.gmra.mxu3 %v4512_v23  ;;  %v4790_v35 = vmul.f32 %v11164_v39, %v11164_v39 }
 0x899   : > { %4830 = vadd.xlane.f32.xlu2 %v4790_v35 }
 0x89a   : > { %v4469_v62 = vpop.f32.mrf.mxu2  ;;  %v4585_v13 = vpop.f32.mrf.mxu3 }
 0x89b   : > { %v4470_v41 = vadd.f32 %v11065_v30, %v4469_v62  ;;  %v4586_v12 = vadd.f32 %v11095_v22, %v4585_v13 }
 0x89d   : > { %v4513_v37 = vmax.f32 %v4470_v41, 0.0  ;;  %v11172_v59 = vadd.f32 %v4586_v12, %v10669_v9 }
 0x89f   : > { %4704 = vadd.xlane.f32.xlu0 %v11172_v59  ;;  %4635 = vmatmul.f32.gmra.mxu3 %v4513_v37  ;;  %v4791_v17 = vmul.f32 %v11172_v59, %v11172_v59 }
 0x8a1   : > { %4832 = vadd.xlane.f32.xlu1 %v4791_v17 }
 0x8a2   : > { %v4472_v48 = vpop.f32.mrf.mxu2  ;;  %v4588_v19 = vpop.f32.mrf.mxu3 }
 0x8a3   : > { %v4473_v14 = vadd.f32 %v11065_v30, %v4472_v48  ;;  %v4589_v4 = vadd.f32 %v11095_v22, %v4588_v19  ;;  %v5641_v19 = vld [vmem:[#allocation5 + $0x6c8] sm:$0xff] }
 0x8a4   : > { %5659 = vmatpush.msrb.mxu1 %v5641_v19 }
 0x8a5   : > { %v4514_v28 = vmax.f32 %v4473_v14, 0.0  ;;  %v11180_v9 = vadd.f32 %v4589_v4, %v10694_v10 }
 0x8a7   : > { %4706 = vadd.xlane.f32.xlu2 %v11180_v9  ;;  %4638 = vmatmul.f32.gmra.mxu3 %v4514_v28  ;;  %v4792_v7 = vmul.f32 %v11180_v9, %v11180_v9 }
 0x8a9   : > { %4834 = vadd.xlane.f32.xlu0 %v4792_v7 }
 0x8aa   : > { %v4475_v38 = vpop.f32.mrf.mxu2  ;;  %v4591_v44 = vpop.f32.mrf.mxu3 }
 0x8ab   : > { %v4476_v16 = vadd.f32 %v11065_v30, %v4475_v38  ;;  %v4592_v18 = vadd.f32 %v11095_v22, %v4591_v44  ;;  %v5465_v38 = vld [vmem:[#allocation5 + $0x600] sm:$0xff] }
 0x8ac   : > { %5501 = vmatpush.msrb.mxu0 %v5465_v38 }
 0x8ad   : > { %v4515_v34 = vmax.f32 %v4476_v16, 0.0  ;;  %v11188_v60 = vadd.f32 %v4592_v18, %v10719_v2 }
 0x8af   : > { %4708 = vadd.xlane.f32.xlu1 %v11188_v60  ;;  %4641 = vmatmul.f32.gmra.mxu3 %v4515_v34  ;;  %v4793_v10 = vmul.f32 %v11188_v60, %v11188_v60 }
 0x8b1   : > { %4836 = vadd.xlane.f32.xlu2 %v4793_v10 }
 0x8b2   : > { %v4478_v54 = vpop.f32.mrf.mxu2  ;;  %v4594_v29 = vpop.f32.mrf.mxu3 }
 0x8b3   : > { %v4479_v46 = vadd.f32 %v11065_v30, %v4478_v54  ;;  %v4595_v21 = vadd.f32 %v11095_v22, %v4594_v29 }
 0x8b5   : > { %v4516_v63 = vmax.f32 %v4479_v46, 0.0  ;;  %v11196_v23 = vadd.f32 %v4595_v21, %v10744_v40 }
 0x8b7   : > { %4710 = vadd.xlane.f32.xlu0 %v11196_v23  ;;  %4644 = vmatmul.f32.gmra.mxu3 %v4516_v63  ;;  %v4794_v2 = vmul.f32 %v11196_v23, %v11196_v23 }
 0x8b9   : > { %4838 = vadd.xlane.f32.xlu1 %v4794_v2 }
 0x8ba   : > { %v4481_v35 = vpop.f32.mrf.mxu2  ;;  %v4597_v62 = vpop.f32.mrf.mxu3 }
 0x8bb   : > { %v4482_v13 = vadd.f32 %v11065_v30, %v4481_v35  ;;  %v4598_v41 = vadd.f32 %v11095_v22, %v4597_v62  ;;  %v5640_v62 = vld [vmem:[#allocation5 + $0x6c0] sm:$0xff] }
 0x8bc   : > { %5660 = vmatpush.msrb.mxu1 %v5640_v62 }
 0x8bd   : > { %v4517_v12 = vmax.f32 %v4482_v13, 0.0  ;;  %v11204_v37 = vadd.f32 %v4598_v41, %v10767_v20 }
 0x8bf   : > { %4712 = vadd.xlane.f32.xlu2 %v11204_v37  ;;  %4647 = vmatmul.f32.gmra.mxu3 %v4517_v12  ;;  %v4795_v40 = vmul.f32 %v11204_v37, %v11204_v37 }
 0x8c1   : > { %4840 = vadd.xlane.f32.xlu0 %v4795_v40 }
 0x8c2   : > { %v4484_v43 = vpop.f32.mrf.mxu2  ;;  %v4600_v27 = vpop.f32.mrf.mxu3 }
 0x8c3   : > { %v4485_v17 = vadd.f32 %v11065_v30, %v4484_v43  ;;  %v4601_v48 = vadd.f32 %v11095_v22, %v4600_v27 }
 0x8c5   : > { %v4518_v14 = vmax.f32 %v4485_v17, 0.0  ;;  %v11212_v4 = vadd.f32 %v4601_v48, %v10780_v32 }
 0x8c7   : > { %4714 = vadd.xlane.f32.xlu1 %v11212_v4  ;;  %4650 = vmatmul.f32.gmra.mxu3 %v4518_v14  ;;  %v4796_v20 = vmul.f32 %v11212_v4, %v11212_v4 }
 0x8c9   : > { %4842 = vadd.xlane.f32.xlu2 %v4796_v20 }
 0x8ca   : > { %v4687_v28 = vpop.xlane.xlu0 %4686  ;;  %v4603_v44 = vpop.f32.mrf.mxu3 }
 0x8cb   : > { %v4750_v7 = vmul.f32 %v4687_v28, %v8611_v52  ;;  %v4604_v32 = vadd.f32 %v11095_v22, %v4603_v44 }
 0x8cc   : > { %v4815_v30 = vpop.xlane.xlu1 %4814 }
 0x8cd   : > { %v4910_v16 = vmul.f32 %v4750_v7, %v4750_v7  ;;  %v4878_v18 = vmul.f32 %v4815_v30, %v8611_v52  ;;  %v11221_v0 = vadd.f32 %v4604_v32, %v10796_v5 }
 0x8cf   : > { %v4942_v34 = vsub.f32 %v4878_v18, %v4910_v16  ;;  %4716 = vadd.xlane.f32.xlu0 %v11221_v0  ;;  %v4797_v54 = vmul.f32 %v11221_v0, %v11221_v0 }
 0x8d1   : > { %v5006_v10 = vadd.f32 1e-05, %v4942_v34  ;;  %4844 = vadd.xlane.f32.xlu1 %v4797_v54  ;;  %v4974_v54 = vsub.f32 %v11099_v49, %v4750_v7  ;;  %v5639_v49 = vld [vmem:[#allocation5 + $0x6b8] sm:$0xff] }
 0x8d2   : > { %v4689_v29 = vpop.xlane.xlu2 %4688  ;;  %v4606_v21 = vpop.f32.mrf.mxu3  ;;  %v5814_v7 = vld [vmem:[#allocation5 + $0x778] sm:$0xff]  ;;  %5661 = vmatpush.msrb.mxu1 %v5639_v49 }
 0x8d3   : > { %7775 = vrsqrt.f32 %v5006_v10  ;;  %v11227_v46 = vmul.f32 %v4689_v29, %v8611_v52  ;;  %v4607_v5 = vadd.f32 %v11095_v22, %v4606_v21  ;;  %vm5044_vm2 = vweird.f32 %v5006_v10  ;;  %v11253_v29 = vld [vmem:[#allocation8 + $0x3] ss:$0 sm:$0xff]  ;;  %5820 = vmatpush.msra.mxu2 %v5814_v7 }
 0x8d4   : > { %v4817_v63 = vpop.xlane.xlu0 %4816 }
 0x8d5   : > { %v4911_v2 = vmul.f32 %v11227_v46, %v11227_v46  ;;  %v4879_v35 = vmul.f32 %v4817_v63, %v8611_v52  ;;  %v11234_v13 = vadd.f32 %v4607_v5, %v10813_v55 }
 0x8d7   : > { %v4943_v41 = vsub.f32 %v4879_v35, %v4911_v2  ;;  %4718 = vadd.xlane.f32.xlu2 %v11234_v13  ;;  %v4798_v27 = vmul.f32 %v11234_v13, %v11234_v13 }
 0x8d9   : > { %v7776_v12 = vpop.eup %7775  ;;  %v5007_v43 = vadd.f32 1e-05, %v4943_v41  ;;  %4846 = vadd.xlane.f32.xlu0 %v4798_v27  ;;  %v11257_v41 = vld [vmem:[#allocation10 + $0x3] ss:$0 sm:$0xff] }
 0x8da   : > { %v5039_v40 = vmul.f32 %v7776_v12, %v5006_v10  ;;  %v4691_v48 = vpop.xlane.xlu1 %4690  ;;  %v4609_v19 = vpop.f32.mrf.mxu3  ;;  %vm5045_vm1 = vweird.f32 %v7776_v12 }
 0x8db   : > { %7777 = vrsqrt.f32 %v5007_v43  ;;  %v11240_v20 = vmul.f32 %v4691_v48, %v8611_v52  ;;  %v4610_v55 = vadd.f32 %v11095_v22, %v4609_v19  ;;  %vm5046_vm3 = vmor %vm5044_vm2, %vm5045_vm1  ;;  %vm5054_vm5 = vweird.f32 %v5007_v43 }
 0x8dc   : > { %v5040_v17 = vmul.f32 %v7776_v12, %v5039_v40  ;;  %v4819_v28 = vpop.xlane.xlu2 %4818 }
 0x8dd   : > { %v4912_v30 = vmul.f32 %v11240_v20, %v11240_v20  ;;  %v11246_v44 = vadd.f32 %v4610_v55, %v10834_v33  ;;  %v4880_v16 = vmul.f32 %v4819_v28, %v8611_v52 }
 0x8de   : > { %v5041_v14 = vmul.f32 0.5, %v5040_v17 }
 0x8df   : > { %4720 = vadd.xlane.f32.xlu1 %v11246_v44  ;;  %v4799_v34 = vmul.f32 %v11246_v44, %v11246_v44  ;;  %v4944_v63 = vsub.f32 %v4880_v16, %v4912_v30 }
 0x8e0   : > { %v5042_v38 = vsub.f32 1.5, %v5041_v14 }
 0x8e1   : > { %v7778_v18 = vpop.eup %7777  ;;  %4848 = vadd.xlane.f32.xlu2 %v4799_v34  ;;  %v11255_v35 = vadd.f32 1e-05, %v4944_v63 }
 0x8e2   : > { %v5043_v32 = vmul.f32 %v7776_v12, %v5042_v38  ;;  %v5049_v21 = vmul.f32 %v7778_v18, %v5007_v43  ;;  %v4612_v62 = vpop.f32.mrf.mxu3  ;;  %v4693_v10 = vpop.xlane.xlu0 %4692  ;;  %vm5055_vm4 = vweird.f32 %v7778_v18 }
 0x8e3   : > { %v4613_v40 = vadd.f32 %v11095_v22, %v4612_v62  ;;  %v11261_v27 = vmul.f32 %v4693_v10, %v8611_v52  ;;  %7779 = vrsqrt.f32 %v11255_v35  ;;  %vm5056_vm6 = vmor %vm5054_vm5, %vm5055_vm4  ;;  %vm5064_vm8 = vweird.f32 %v11255_v35 }
 0x8e4   : > { %v5047_v2 = vsel %vm5046_vm3, %v7776_v12, %v5043_v32  ;;  %v5050_v5 = vmul.f32 %v7778_v18, %v5049_v21  ;;  %v4821_v12 = vpop.xlane.xlu1 %4820 }
 0x8e5   : > { %v5358_v33 = vmul.f32 %v5047_v2, %v4974_v54  ;;  %v11266_v19 = vadd.f32 %v4613_v40, %v10849_v51  ;;  %v4913_v14 = vmul.f32 %v11261_v27, %v11261_v27  ;;  %v4881_v55 = vmul.f32 %v4821_v12, %v8611_v52 }
 0x8e6   : > { %v5051_v48 = vmul.f32 0.5, %v5050_v5  ;;  %v4975_v54 = vsub.f32 %v11108_v26, %v11227_v46 }
 0x8e7   : > { %v5395_v17 = vmul.f32 %v11253_v29, %v5358_v33  ;;  %v4945_v30 = vsub.f32 %v4881_v55, %v4913_v14  ;;  %4722 = vadd.xlane.f32.xlu0 %v11266_v19  ;;  %v4800_v16 = vmul.f32 %v11266_v19, %v11266_v19 }
 0x8e8   : > { %v5052_v28 = vsub.f32 1.5, %v5051_v48 }
 0x8e9   : > { %v11272_v38 = vadd.f32 %v11257_v41, %v5395_v17  ;;  %v11278_v51 = vadd.f32 1e-05, %v4945_v30  ;;  %4850 = vadd.xlane.f32.xlu1 %v4800_v16  ;;  %v7780_v34 = vpop.eup %7779 }
 0x8ea   : > { %v5053_v32 = vmul.f32 %v7778_v18, %v5052_v28  ;;  %v4695_v21 = vpop.xlane.xlu2 %4694  ;;  %v4615_v63 = vpop.f32.mrf.mxu3  ;;  %v5059_v33 = vmul.f32 %v7780_v34, %v11255_v35  ;;  %vm5065_vm7 = vweird.f32 %v7780_v34 }
 0x8eb   : > { %5502 = vmatmul.f32.vlgmr.msrb.gmra.mxu0 %v11272_v38  ;;  %7781 = vrsqrt.f32 %v11278_v51  ;;  %v11285_v5 = vmul.f32 %v4695_v21, %v8611_v52  ;;  %v4616_v43 = vadd.f32 %v11095_v22, %v4615_v63  ;;  %v5638_v63 = vld [vmem:[#allocation5 + $0x6b0] sm:$0xff]  ;;  %vm5066_vm9 = vmor %vm5064_vm8, %vm5065_vm7  ;;  %vm5074_vm11 = vweird.f32 %v11278_v51 }
 0x8ec   : > { %v5057_v2 = vsel %vm5056_vm6, %v7778_v18, %v5053_v32  ;;  %v4823_v62 = vpop.xlane.xlu0 %4822  ;;  %v5060_v40 = vmul.f32 %v7780_v34, %v5059_v33  ;;  %5662 = vmatpush.msrb.mxu1 %v5638_v63 }
 0x8ed   : > { %v5359_v10 = vmul.f32 %v5057_v2, %v4975_v54  ;;  %v4882_v49 = vmul.f32 %v4823_v62, %v8611_v52  ;;  %v4914_v26 = vmul.f32 %v11285_v5, %v11285_v5  ;;  %v11292_v46 = vadd.f32 %v4616_v43, %v10871_v42  ;;  %v5813_v2 = vld [vmem:[#allocation5 + $0x770] sm:$0xff] }
 0x8ee   : > { %v5061_v7 = vmul.f32 0.5, %v5060_v40  ;;  %5821 = vmatpush.msra.mxu2 %v5813_v2  ;;  %v4976_v62 = vsub.f32 %v11116_v6, %v11240_v20 }
 0x8ef   : > { %v5396_v18 = vmul.f32 %v11253_v29, %v5359_v10  ;;  %v4946_v17 = vsub.f32 %v4882_v49, %v4914_v26  ;;  %4724 = vadd.xlane.f32.xlu2 %v11292_v46  ;;  %v4801_v48 = vmul.f32 %v11292_v46, %v11292_v46 }
 0x8f0   : > { %v5062_v55 = vsub.f32 1.5, %v5061_v7 }
 0x8f1   : > { %v11299_v12 = vadd.f32 %v11257_v41, %v5396_v18  ;;  %v7782_v14 = vpop.eup %7781  ;;  %v11302_v30 = vadd.f32 1e-05, %v4946_v17  ;;  %4852 = vadd.xlane.f32.xlu0 %v4801_v48 }
 0x8f2   : > { %v5069_v28 = vmul.f32 %v7782_v14, %v11278_v51  ;;  %v4697_v42 = vpop.xlane.xlu1 %4696  ;;  %v4618_v16 = vpop.f32.mrf.mxu3  ;;  %v5063_v32 = vmul.f32 %v7780_v34, %v5062_v55  ;;  %vm5075_vm10 = vweird.f32 %v7782_v14 }
 0x8f3   : > { %5505 = vmatmul.f32.gmra.mxu0 %v11299_v12  ;;  %v11306_v54 = vmul.f32 %v4697_v42, %v8611_v52  ;;  %v4619_v21 = vadd.f32 %v11095_v22, %v4618_v16  ;;  %7783 = vrsqrt.f32 %v11302_v30  ;;  %v4977_v42 = vsub.f32 %v11124_v8, %v11261_v27  ;;  %vm5076_vm12 = vmor %vm5074_vm11, %vm5075_vm10 }
 0x8f4   : > { %v5070_v33 = vmul.f32 %v7782_v14, %v5069_v28  ;;  %v4825_v43 = vpop.xlane.xlu2 %4824  ;;  %v5067_v26 = vsel %vm5066_vm9, %v7780_v34, %v5063_v32  ;;  %vm5084_vm14 = vweird.f32 %v11302_v30 }
 0x8f5   : > { %v4915_v10 = vmul.f32 %v11306_v54, %v11306_v54  ;;  %v11317_v40 = vadd.f32 %v4619_v21, %v10886_v56  ;;  %v4883_v49 = vmul.f32 %v4825_v43, %v8611_v52  ;;  %v5360_v17 = vmul.f32 %v5067_v26, %v4976_v62 }
 0x8f6   : > { %v5071_v35 = vmul.f32 0.5, %v5070_v33 }
 0x8f7   : > { %v4947_v18 = vsub.f32 %v4883_v49, %v4915_v10  ;;  %4726 = vadd.xlane.f32.xlu1 %v11317_v40  ;;  %v4802_v7 = vmul.f32 %v11317_v40, %v11317_v40  ;;  %v5397_v48 = vmul.f32 %v11253_v29, %v5360_v17 }
 0x8f8   : > { %v5072_v6 = vsub.f32 1.5, %v5071_v35 }
 0x8f9   : > { %v11323_v20 = vadd.f32 1e-05, %v4947_v18  ;;  %4854 = vadd.xlane.f32.xlu2 %v4802_v7  ;;  %v7784_v56 = vpop.eup %7783  ;;  %v11336_v63 = vadd.f32 %v11257_v41, %v5397_v48 }
 0x8fa   : > { %v5073_v55 = vmul.f32 %v7782_v14, %v5072_v6  ;;  %v4621_v28 = vpop.f32.mrf.mxu3  ;;  %v4699_v34 = vpop.xlane.xlu0 %4698  ;;  %v5079_v16 = vmul.f32 %v7784_v56, %v11302_v30  ;;  %vm5085_vm13 = vweird.f32 %v7784_v56 }
 0x8fb   : > { %7785 = vrsqrt.f32 %v11323_v20  ;;  %v4622_v32 = vadd.f32 %v11095_v22, %v4621_v28  ;;  %v11333_v21 = vmul.f32 %v4699_v34, %v8611_v52  ;;  %5508 = vmatmul.f32.gmra.mxu0 %v11336_v63  ;;  %vm5086_vm15 = vmor %vm5084_vm14, %vm5085_vm13  ;;  %vm5094_vm1 = vweird.f32 %v11323_v20 }
 0x8fc   : > { %v4827_v2 = vpop.xlane.xlu1 %4826  ;;  %v5077_v51 = vsel %vm5076_vm12, %v7782_v14, %v5073_v55  ;;  %v5080_v33 = vmul.f32 %v7784_v56, %v5079_v16  ;;  %v5812_v16 = vld [vmem:[#allocation5 + $0x768] sm:$0xff] }
 0x8fd   : > { %v4884_v43 = vmul.f32 %v4827_v2, %v8611_v52  ;;  %v5361_v62 = vmul.f32 %v5077_v51, %v4977_v42  ;;  %v11340_v8 = vadd.f32 %v4622_v32, %v10909_v3  ;;  %v4916_v27 = vmul.f32 %v11333_v21, %v11333_v21  ;;  %v5637_v42 = vld [vmem:[#allocation5 + $0x6a8] sm:$0xff]  ;;  %5822 = vmatpush.msra.mxu2 %v5812_v16 }
 0x8fe   : > { %v5081_v10 = vmul.f32 0.5, %v5080_v33  ;;  %5663 = vmatpush.msrb.mxu1 %v5637_v42  ;;  %v4978_v51 = vsub.f32 %v11132_v11, %v11285_v5 }
 0x8ff   : > { %v5398_v49 = vmul.f32 %v11253_v29, %v5361_v62  ;;  %v4948_v35 = vsub.f32 %v4884_v43, %v4916_v27  ;;  %4728 = vadd.xlane.f32.xlu0 %v11340_v8  ;;  %v4803_v14 = vmul.f32 %v11340_v8, %v11340_v8 }
 0x900   : > { %v5082_v18 = vsub.f32 1.5, %v5081_v10 }
 0x901   : > { %v7786_v26 = vpop.eup %7785  ;;  %v11350_v7 = vadd.f32 1e-05, %v4948_v35  ;;  %4856 = vadd.xlane.f32.xlu1 %v4803_v14  ;;  %v11353_v48 = vadd.f32 %v11257_v41, %v5398_v49 }
 0x902   : > { %v5089_v3 = vmul.f32 %v7786_v26, %v11323_v20  ;;  %v4701_v17 = vpop.xlane.xlu2 %4700  ;;  %v4624_v6 = vpop.f32.mrf.mxu3  ;;  %v5083_v55 = vmul.f32 %v7784_v56, %v5082_v18  ;;  %vm5095_vm0 = vweird.f32 %v7786_v26 }
 0x903   : > { %v11356_v28 = vmul.f32 %v4701_v17, %v8611_v52  ;;  %v4625_v34 = vadd.f32 %v11095_v22, %v4624_v6  ;;  %7787 = vrsqrt.f32 %v11350_v7  ;;  %5511 = vmatmul.f32.gmra.mxu0 %v11353_v48  ;;  %v4979_v17 = vsub.f32 %v11140_v15, %v11306_v54  ;;  %vm5096_vm2 = vmor %vm5094_vm1, %vm5095_vm0 }
 0x904   : > { %v5090_v32 = vmul.f32 %v7786_v26, %v5089_v3  ;;  %v4829_v2 = vpop.xlane.xlu0 %4828  ;;  %v5087_v27 = vsel %vm5086_vm15, %v7784_v56, %v5083_v55  ;;  %vm5104_vm4 = vweird.f32 %v11350_v7 }
 0x905   : > { %v4917_v33 = vmul.f32 %v11356_v28, %v11356_v28  ;;  %v11367_v43 = vadd.f32 %v4625_v34, %v10924_v45  ;;  %v4885_v62 = vmul.f32 %v4829_v2, %v8611_v52  ;;  %v5362_v5 = vmul.f32 %v5087_v27, %v4978_v51 }
 0x906   : > { %v5091_v30 = vmul.f32 0.5, %v5090_v32 }
 0x907   : > { %v4949_v10 = vsub.f32 %v4885_v62, %v4917_v33  ;;  %4730 = vadd.xlane.f32.xlu2 %v11367_v43  ;;  %v4804_v11 = vmul.f32 %v11367_v43, %v11367_v43  ;;  %v5399_v45 = vmul.f32 %v11253_v29, %v5362_v5 }
 0x908   : > { %v5092_v49 = vsub.f32 1.5, %v5091_v30 }
 0x909   : > { %v11374_v35 = vadd.f32 1e-05, %v4949_v10  ;;  %4858 = vadd.xlane.f32.xlu0 %v4804_v11  ;;  %v7788_v14 = vpop.eup %7787  ;;  %v11387_v42 = vadd.f32 %v11257_v41, %v5399_v45 }
 0x90a   : > { %v5093_v18 = vmul.f32 %v7786_v26, %v5092_v49  ;;  %v4703_v3 = vpop.xlane.xlu1 %4702  ;;  %v4627_v56 = vpop.f32.mrf.mxu3  ;;  %v5099_v6 = vmul.f32 %v7788_v14, %v11350_v7  ;;  %vm5105_vm3 = vweird.f32 %v7788_v14 }
 0x90b   : > { %7789 = vrsqrt.f32 %v11374_v35  ;;  %v11383_v55 = vmul.f32 %v4703_v3, %v8611_v52  ;;  %v4628_v34 = vadd.f32 %v11095_v22, %v4627_v56  ;;  %5514 = vmatmul.f32.gmra.mxu0 %v11387_v42  ;;  %vm5106_vm5 = vmor %vm5104_vm4, %vm5105_vm3  ;;  %vm5114_vm7 = vweird.f32 %v11374_v35 }
 0x90c   : > { %v4831_v16 = vpop.xlane.xlu2 %4830  ;;  %v5097_v20 = vsel %vm5096_vm2, %v7786_v26, %v5093_v18  ;;  %v5100_v32 = vmul.f32 %v7788_v14, %v5099_v6  ;;  %v5811_v6 = vld [vmem:[#allocation5 + $0x760] sm:$0xff] }
 0x90d   : > { %v4886_v2 = vmul.f32 %v4831_v16, %v8611_v52  ;;  %v5363_v51 = vmul.f32 %v5097_v20, %v4979_v17  ;;  %v4918_v15 = vmul.f32 %v11383_v55, %v11383_v55  ;;  %v11393_v54 = vadd.f32 %v4628_v34, %v10947_v53  ;;  %v5636_v17 = vld [vmem:[#allocation5 + $0x6a0] sm:$0xff]  ;;  %5823 = vmatpush.msra.mxu2 %v5811_v6 }
 0x90e   : > { %v5101_v33 = vmul.f32 0.5, %v5100_v32  ;;  %5664 = vmatpush.msrb.mxu1 %v5636_v17  ;;  %v4980_v20 = vsub.f32 %v11148_v31, %v11333_v21 }
 0x90f   : > { %v5400_v62 = vmul.f32 %v11253_v29, %v5363_v51  ;;  %v4950_v30 = vsub.f32 %v4886_v2, %v4918_v15  ;;  %4732 = vadd.xlane.f32.xlu1 %v11393_v54  ;;  %v4805_v26 = vmul.f32 %v11393_v54, %v11393_v54 }
 0x910   : > { %v5102_v10 = vsub.f32 1.5, %v5101_v33 }
 0x911   : > { %v7790_v27 = vpop.eup %7789  ;;  %v11401_v5 = vadd.f32 1e-05, %v4950_v30  ;;  %4860 = vadd.xlane.f32.xlu2 %v4805_v26  ;;  %v11404_v45 = vadd.f32 %v11257_v41, %v5400_v62 }
 0x912   : > { %v5109_v11 = vmul.f32 %v7790_v27, %v11374_v35  ;;  %v4630_v53 = vpop.f32.mrf.mxu3  ;;  %v4705_v49 = vpop.xlane.xlu0 %4704  ;;  %v5103_v18 = vmul.f32 %v7788_v14, %v5102_v10  ;;  %vm5115_vm6 = vweird.f32 %v7790_v27 }
 0x913   : > { %v4631_v3 = vadd.f32 %v11095_v22, %v4630_v53  ;;  %v11408_v56 = vmul.f32 %v4705_v49, %v8611_v52  ;;  %7791 = vrsqrt.f32 %v11401_v5  ;;  %5517 = vmatmul.f32.gmra.mxu0 %v11404_v45  ;;  %v4981_v53 = vsub.f32 %v11156_v57, %v11356_v28  ;;  %vm5116_vm8 = vmor %vm5114_vm7, %vm5115_vm6 }
 0x914   : > { %v5110_v34 = vmul.f32 %v7790_v27, %v5109_v11  ;;  %v4833_v16 = vpop.xlane.xlu1 %4832  ;;  %v5107_v15 = vsel %vm5106_vm5, %v7788_v14, %v5103_v18  ;;  %vm5124_vm10 = vweird.f32 %v11401_v5 }
 0x915   : > { %v11416_v32 = vadd.f32 %v4631_v3, %v10962_v61  ;;  %v4919_v2 = vmul.f32 %v11408_v56, %v11408_v56  ;;  %v4887_v51 = vmul.f32 %v4833_v16, %v8611_v52  ;;  %v5364_v21 = vmul.f32 %v5107_v15, %v4980_v20 }
 0x916   : > { %v5111_v7 = vmul.f32 0.5, %v5110_v34 }
 0x917   : > { %v4951_v33 = vsub.f32 %v4887_v51, %v4919_v2  ;;  %4734 = vadd.xlane.f32.xlu0 %v11416_v32  ;;  %v4806_v31 = vmul.f32 %v11416_v32, %v11416_v32  ;;  %v5401_v30 = vmul.f32 %v11253_v29, %v5364_v21 }
 0x918   : > { %v5112_v62 = vsub.f32 1.5, %v5111_v7 }
 0x919   : > { %v11425_v61 = vadd.f32 1e-05, %v4951_v33  ;;  %4862 = vadd.xlane.f32.xlu1 %v4806_v31  ;;  %v7792_v26 = vpop.eup %7791  ;;  %v11438_v17 = vadd.f32 %v11257_v41, %v5401_v30 }
 0x91a   : > { %v5113_v10 = vmul.f32 %v7790_v27, %v5112_v62  ;;  %v4707_v11 = vpop.xlane.xlu2 %4706  ;;  %v4633_v14 = vpop.f32.mrf.mxu3  ;;  %v5119_v49 = vmul.f32 %v7792_v26, %v11401_v5  ;;  %vm5125_vm9 = vweird.f32 %v7792_v26 }
 0x91b   : > { %7793 = vrsqrt.f32 %v11425_v61  ;;  %v11434_v18 = vmul.f32 %v4707_v11, %v8611_v52  ;;  %v4634_v3 = vadd.f32 %v11095_v22, %v4633_v14  ;;  %5520 = vmatmul.f32.gmra.mxu0 %v11438_v17  ;;  %vm5126_vm11 = vmor %vm5124_vm10, %vm5125_vm9  ;;  %vm5134_vm13 = vweird.f32 %v11425_v61 }
 0x91c   : > { %v4835_v6 = vpop.xlane.xlu0 %4834  ;;  %v5117_v35 = vsel %vm5116_vm8, %v7790_v27, %v5113_v10  ;;  %v5120_v34 = vmul.f32 %v7792_v26, %v5119_v49  ;;  %v5810_v49 = vld [vmem:[#allocation5 + $0x758] sm:$0xff] }
 0x91d   : > { %v4888_v16 = vmul.f32 %v4835_v6, %v8611_v52  ;;  %v5365_v20 = vmul.f32 %v5117_v35, %v4981_v53  ;;  %v4920_v57 = vmul.f32 %v11434_v18, %v11434_v18  ;;  %v11444_v28 = vadd.f32 %v4634_v3, %v10985_v47  ;;  %v5635_v53 = vld [vmem:[#allocation5 + $0x698] sm:$0xff]  ;;  %5824 = vmatpush.msra.mxu2 %v5810_v49 }
 0x91e   : > { %v5121_v2 = vmul.f32 0.5, %v5120_v34  ;;  %5665 = vmatpush.msrb.mxu1 %v5635_v53  ;;  %v4982_v35 = vsub.f32 %v11164_v39, %v11383_v55 }
 0x91f   : > { %v5402_v51 = vmul.f32 %v11253_v29, %v5365_v20  ;;  %v4952_v7 = vsub.f32 %v4888_v16, %v4920_v57  ;;  %4736 = vadd.xlane.f32.xlu2 %v11444_v28  ;;  %v4807_v27 = vmul.f32 %v11444_v28, %v11444_v28 }
 0x920   : > { %v5122_v33 = vsub.f32 1.5, %v5121_v2 }
 0x921   : > { %v7794_v15 = vpop.eup %7793  ;;  %v11452_v21 = vadd.f32 1e-05, %v4952_v7  ;;  %4864 = vadd.xlane.f32.xlu0 %v4807_v27  ;;  %v11455_v30 = vadd.f32 %v11257_v41, %v5402_v51 }
 0x922   : > { %v5129_v31 = vmul.f32 %v7794_v15, %v11425_v61  ;;  %v4709_v47 = vpop.xlane.xlu1 %4708  ;;  %v4636_v62 = vpop.f32.mrf.mxu3  ;;  %v5123_v10 = vmul.f32 %v7792_v26, %v5122_v33  ;;  %vm5135_vm12 = vweird.f32 %v7794_v15 }
 0x923   : > { %v11458_v11 = vmul.f32 %v4709_v47, %v8611_v52  ;;  %v4637_v14 = vadd.f32 %v11095_v22, %v4636_v62  ;;  %7795 = vrsqrt.f32 %v11452_v21  ;;  %5523 = vmatmul.f32.gmra.mxu0 %v11455_v30  ;;  %vm5136_vm14 = vmor %vm5134_vm13, %vm5135_vm12  ;;  %v11484_v62 = vld [vmem:[#allocation7 + $0xb] ss:$0 sm:$0xff]  ;;  %vm5144_vm0 = vweird.f32 %v11452_v21 }
 0x924   : > { %v5130_v3 = vmul.f32 %v7794_v15, %v5129_v31  ;;  %v4837_v6 = vpop.xlane.xlu2 %4836  ;;  %v5127_v20 = vsel %vm5126_vm11, %v7792_v26, %v5123_v10  ;;  %v4983_v31 = vsub.f32 %v11172_v59, %v11408_v56 }
 0x925   : > { %v4921_v34 = vmul.f32 %v11458_v11, %v11458_v11  ;;  %v11469_v22 = vadd.f32 %v4637_v14, %v11000_v25  ;;  %v4889_v16 = vmul.f32 %v4837_v6, %v8611_v52  ;;  %v5366_v55 = vmul.f32 %v5127_v20, %v4982_v35 }
 0x926   : > { %v5131_v5 = vmul.f32 0.5, %v5130_v3 }
 0x927   : > { %v4953_v57 = vsub.f32 %v4889_v16, %v4921_v34  ;;  %4738 = vadd.xlane.f32.xlu1 %v11469_v22  ;;  %v4808_v39 = vmul.f32 %v11469_v22, %v11469_v22  ;;  %v5403_v25 = vmul.f32 %v11253_v29, %v5366_v55 }
 0x928   : > { %v5132_v2 = vsub.f32 1.5, %v5131_v5 }
 0x929   : > { %v11476_v51 = vadd.f32 1e-05, %v4953_v57  ;;  %4866 = vadd.xlane.f32.xlu2 %v4808_v39  ;;  %v7796_v7 = vpop.eup %7795  ;;  %v11491_v53 = vadd.f32 %v11257_v41, %v5403_v25 }
 0x92a   : > { %v5133_v27 = vmul.f32 %v7794_v15, %v5132_v2  ;;  %v4639_v33 = vpop.f32.mrf.mxu3  ;;  %v4711_v26 = vpop.xlane.xlu0 %4710  ;;  %v5139_v47 = vmul.f32 %v7796_v7, %v11452_v21  ;;  %vm5145_vm15 = vweird.f32 %v7796_v7 }
 0x92b   : > { %7797 = vrsqrt.f32 %v11476_v51  ;;  %v4640_v10 = vadd.f32 %v11484_v62, %v4639_v33  ;;  %v11488_v14 = vmul.f32 %v4711_v26, %v8611_v52  ;;  %5526 = vmatmul.f32.gmra.mxu0 %v11491_v53  ;;  %vm5146_vm1 = vmor %vm5144_vm0, %vm5145_vm15  ;;  %vm5154_vm3 = vweird.f32 %v11476_v51 }
 0x92c   : > { %v4839_v61 = vpop.xlane.xlu1 %4838  ;;  %v5137_v49 = vsel %vm5136_vm14, %v7794_v15, %v5133_v27  ;;  %v5140_v3 = vmul.f32 %v7796_v7, %v5139_v47  ;;  %v5809_v47 = vld [vmem:[#allocation5 + $0x750] sm:$0xff] }
 0x92d   : > { %v4890_v59 = vmul.f32 %v4839_v61, %v8611_v52  ;;  %v5367_v56 = vmul.f32 %v5137_v49, %v4983_v31  ;;  %v11495_v6 = vadd.f32 %v4640_v10, %v11021_v58  ;;  %v4922_v35 = vmul.f32 %v11488_v14, %v11488_v14  ;;  %v5634_v31 = vld [vmem:[#allocation5 + $0x690] sm:$0xff]  ;;  %5825 = vmatpush.msra.mxu2 %v5809_v47 }
 0x92e   : > { %v5141_v34 = vmul.f32 0.5, %v5140_v3  ;;  %5666 = vmatpush.msrb.mxu1 %v5634_v31  ;;  %v4984_v49 = vsub.f32 %v11180_v9, %v11434_v18 }
 0x92f   : > { %v5404_v16 = vmul.f32 %v11253_v29, %v5367_v56  ;;  %v4954_v5 = vsub.f32 %v4890_v59, %v4922_v35  ;;  %4740 = vadd.xlane.f32.xlu0 %v11495_v6  ;;  %v4809_v15 = vmul.f32 %v11495_v6, %v11495_v6 }
 0x930   : > { %v5142_v57 = vsub.f32 1.5, %v5141_v34 }
 0x931   : > { %v7798_v20 = vpop.eup %7797  ;;  %v11505_v39 = vadd.f32 1e-05, %v4954_v5  ;;  %4868 = vadd.xlane.f32.xlu1 %v4809_v15  ;;  %v11508_v25 = vadd.f32 %v11257_v41, %v5404_v16 }
 0x932   : > { %v5149_v58 = vmul.f32 %v7798_v20, %v11476_v51  ;;  %v4713_v55 = vpop.xlane.xlu2 %4712  ;;  %v4642_v2 = vpop.f32.mrf.mxu3  ;;  %v5143_v27 = vmul.f32 %v7796_v7, %v5142_v57  ;;  %vm5155_vm2 = vweird.f32 %v7798_v20 }
 0x933   : > { %v11511_v33 = vmul.f32 %v4713_v55, %v8611_v52  ;;  %v4643_v26 = vadd.f32 %v11484_v62, %v4642_v2  ;;  %7799 = vrsqrt.f32 %v11505_v39  ;;  %5529 = vmatmul.f32.gmra.mxu0 %v11508_v25  ;;  %v4985_v55 = vsub.f32 %v11188_v60, %v11458_v11  ;;  %vm5156_vm4 = vmor %vm5154_vm3, %vm5155_vm2 }
 0x934   : > { %v5150_v10 = vmul.f32 %v7798_v20, %v5149_v58  ;;  %v4841_v61 = vpop.xlane.xlu0 %4840  ;;  %v5147_v35 = vsel %vm5146_vm1, %v7796_v7, %v5143_v27  ;;  %vm5164_vm6 = vweird.f32 %v11505_v39 }
 0x935   : > { %v4923_v3 = vmul.f32 %v11511_v33, %v11511_v33  ;;  %v11522_v59 = vadd.f32 %v4643_v26, %v11035_v36  ;;  %v4891_v56 = vmul.f32 %v4841_v61, %v8611_v52  ;;  %v5368_v18 = vmul.f32 %v5147_v35, %v4984_v49 }
 0x936   : > { %v5151_v21 = vmul.f32 0.5, %v5150_v10 }
 0x937   : > { %v4955_v34 = vsub.f32 %v4891_v56, %v4923_v3  ;;  %4742 = vadd.xlane.f32.xlu2 %v11522_v59  ;;  %v4810_v9 = vmul.f32 %v11522_v59, %v11522_v59  ;;  %v5405_v36 = vmul.f32 %v11253_v29, %v5368_v18 }
 0x938   : > { %v5152_v16 = vsub.f32 1.5, %v5151_v21 }
 0x939   : > { %v11529_v5 = vadd.f32 1e-05, %v4955_v34  ;;  %4870 = vadd.xlane.f32.xlu0 %v4810_v9  ;;  %v7800_v15 = vpop.eup %7799  ;;  %v11542_v31 = vadd.f32 %v11257_v41, %v5405_v36 }
 0x93a   : > { %v5153_v57 = vmul.f32 %v7798_v20, %v5152_v16  ;;  %v4715_v58 = vpop.xlane.xlu1 %4714  ;;  %v4645_v7 = vpop.f32.mrf.mxu3  ;;  %v5159_v2 = vmul.f32 %v7800_v15, %v11505_v39  ;;  %vm5165_vm5 = vweird.f32 %v7800_v15 }
 0x93b   : > { %7801 = vrsqrt.f32 %v11529_v5  ;;  %v11538_v27 = vmul.f32 %v4715_v58, %v8611_v52  ;;  %v4646_v26 = vadd.f32 %v11484_v62, %v4645_v7  ;;  %5532 = vmatmul.f32.gmra.mxu0 %v11542_v31  ;;  %vm5166_vm7 = vmor %vm5164_vm6, %vm5165_vm5  ;;  %vm5174_vm9 = vweird.f32 %v11529_v5 }
 0x93c   : > { %v4843_v47 = vpop.xlane.xlu2 %4842  ;;  %v5157_v51 = vsel %vm5156_vm4, %v7798_v20, %v5153_v57  ;;  %v5160_v10 = vmul.f32 %v7800_v15, %v5159_v2  ;;  %v5808_v2 = vld [vmem:[#allocation5 + $0x748] sm:$0xff] }
 0x93d   : > { %v4892_v61 = vmul.f32 %v4843_v47, %v8611_v52  ;;  %v5369_v49 = vmul.f32 %v5157_v51, %v4985_v55  ;;  %v4924_v60 = vmul.f32 %v11538_v27, %v11538_v27  ;;  %v11548_v11 = vadd.f32 %v4646_v26, %v11045_v1  ;;  %v5633_v55 = vld [vmem:[#allocation5 + $0x688] sm:$0xff]  ;;  %5826 = vmatpush.msra.mxu2 %v5808_v2 }
 0x93e   : > { %v5161_v3 = vmul.f32 0.5, %v5160_v10  ;;  %5667 = vmatpush.msrb.mxu1 %v5633_v55  ;;  %v4986_v51 = vsub.f32 %v11196_v23, %v11488_v14 }
 0x93f   : > { %v5406_v56 = vmul.f32 %v11253_v29, %v5369_v49  ;;  %v4956_v21 = vsub.f32 %v4892_v61, %v4924_v60  ;;  %4744 = vadd.xlane.f32.xlu1 %v11548_v11  ;;  %v4811_v20 = vmul.f32 %v11548_v11, %v11548_v11 }
 0x940   : > { %v5162_v34 = vsub.f32 1.5, %v5161_v3 }
 0x941   : > { %v7802_v35 = vpop.eup %7801  ;;  %v11556_v18 = vadd.f32 1e-05, %v4956_v21  ;;  %4872 = vadd.xlane.f32.xlu2 %v4811_v20  ;;  %v11559_v36 = vadd.f32 %v11257_v41, %v5406_v56 }
 0x942   : > { %v5169_v9 = vmul.f32 %v7802_v35, %v11529_v5  ;;  %v4648_v1 = vpop.f32.mrf.mxu3  ;;  %v4717_v16 = vpop.xlane.xlu0 %4716  ;;  %v5163_v57 = vmul.f32 %v7800_v15, %v5162_v34  ;;  %vm5175_vm8 = vweird.f32 %v7802_v35 }
 0x943   : > { %v4649_v58 = vadd.f32 %v11484_v62, %v4648_v1  ;;  %v11563_v7 = vmul.f32 %v4717_v16, %v8611_v52  ;;  %7803 = vrsqrt.f32 %v11556_v18  ;;  %5535 = vmatmul.f32.gmra.mxu0 %v11559_v36  ;;  %v4987_v1 = vsub.f32 %v11204_v37, %v11511_v33  ;;  %vm5176_vm10 = vmor %vm5174_vm9, %vm5175_vm8 }
 0x944   : > { %v5170_v26 = vmul.f32 %v7802_v35, %v5169_v9  ;;  %v4845_v47 = vpop.xlane.xlu1 %4844  ;;  %v5167_v60 = vsel %vm5166_vm7, %v7800_v15, %v5163_v57  ;;  %vm5184_vm12 = vweird.f32 %v11556_v18 }
 0x945   : > { %v11571_v10 = vadd.f32 %v4649_v58, %v11052_v24  ;;  %v4925_v61 = vmul.f32 %v11563_v7, %v11563_v7  ;;  %v4893_v49 = vmul.f32 %v4845_v47, %v8611_v52  ;;  %v5370_v14 = vmul.f32 %v5167_v60, %v4986_v51 }
 0x946   : > { %v5171_v39 = vmul.f32 0.5, %v5170_v26 }
 0x947   : > { %v4957_v3 = vsub.f32 %v4893_v49, %v4925_v61  ;;  %4746 = vadd.xlane.f32.xlu0 %v11571_v10  ;;  %v4812_v23 = vmul.f32 %v11571_v10, %v11571_v10  ;;  %v5407_v21 = vmul.f32 %v11253_v29, %v5370_v14  ;;  %v5632_v61 = vld [vmem:[#allocation5 + $0x680] sm:$0xff] }
 0x948   : > { %v5172_v56 = vsub.f32 1.5, %v5171_v39  ;;  %5668 = vmatpush.msrb.mxu1 %v5632_v61 }
 0x949   : > { %v11580_v24 = vadd.f32 1e-05, %v4957_v3  ;;  %4874 = vadd.xlane.f32.xlu1 %v4812_v23  ;;  %v7804_v20 = vpop.eup %7803  ;;  %v11593_v55 = vadd.f32 %v11257_v41, %v5407_v21 }
 0x94a   : > { %v5173_v34 = vmul.f32 %v7802_v35, %v5172_v56  ;;  %v4719_v9 = vpop.xlane.xlu2 %4718  ;;  %v4651_v15 = vpop.f32.mrf.mxu3  ;;  %v5179_v16 = vmul.f32 %v7804_v20, %v11556_v18  ;;  %vm5185_vm11 = vweird.f32 %v7804_v20 }
 0x94b   : > { %7805 = vrsqrt.f32 %v11580_v24  ;;  %v11589_v57 = vmul.f32 %v4719_v9, %v8611_v52  ;;  %v4652_v58 = vadd.f32 %v11484_v62, %v4651_v15  ;;  %5538 = vmatmul.f32.gmra.mxu0 %v11593_v55  ;;  %v5807_v9 = vld [vmem:[#allocation5 + $0x740] sm:$0xff]  ;;  %v4988_v15 = vsub.f32 %v11212_v4, %v11538_v27  ;;  %vm5186_vm13 = vmor %vm5184_vm12, %vm5185_vm11 }
 0x94c   : > { %v4847_v2 = vpop.xlane.xlu0 %4846  ;;  %v5177_v5 = vsel %vm5176_vm10, %v7802_v35, %v5173_v34  ;;  %v5180_v26 = vmul.f32 %v7804_v20, %v5179_v16  ;;  %5827 = vmatpush.msra.mxu2 %v5807_v9  ;;  %vm5194_vm15 = vweird.f32 %v11580_v24 }
 0x94d   : > { %v4894_v47 = vmul.f32 %v4847_v2, %v8611_v52  ;;  %v5371_v51 = vmul.f32 %v5177_v5, %v4987_v1  ;;  %v4926_v37 = vmul.f32 %v11589_v57, %v11589_v57  ;;  %v11599_v33 = vadd.f32 %v4652_v58, %v11061_v50 }
 0x94e   : > { %v5181_v49 = vmul.f32 0.5, %v5180_v26 }
 0x94f   : > { %v5408_v62 = vmul.f32 %v11253_v29, %v5371_v51  ;;  %v4958_v39 = vsub.f32 %v4894_v47, %v4926_v37  ;;  %4748 = vadd.xlane.f32.xlu2 %v11599_v33  ;;  %v4813_v35 = vmul.f32 %v11599_v33, %v11599_v33 }
 0x950   : > { %v5182_v3 = vsub.f32 1.5, %v5181_v49 }
 0x951   : > { %v7806_v60 = vpop.eup %7805  ;;  %v5022_v50 = vadd.f32 1e-05, %v4958_v39  ;;  %4876 = vadd.xlane.f32.xlu0 %v4813_v35  ;;  %v11608_v56 = vadd.f32 %v11257_v41, %v5408_v62 }
 0x952   : > { %v5189_v23 = vmul.f32 %v7806_v60, %v11580_v24  ;;  %v4721_v14 = vpop.xlane.xlu1 %4720  ;;  %v5183_v21 = vmul.f32 %v7804_v20, %v5182_v3  ;;  %vm5195_vm14 = vweird.f32 %v7806_v60 }
 0x953   : > { %v11612_v34 = vmul.f32 %v4721_v14, %v8611_v52  ;;  %7807 = vrsqrt.f32 %v5022_v50  ;;  %5541 = vmatmul.f32.gmra.mxu0 %v11608_v56  ;;  %vm5196_vm0 = vmor %vm5194_vm15, %vm5195_vm14  ;;  %vm5204_vm2 = vweird.f32 %v5022_v50 }
 0x954   : > { %v5190_v1 = vmul.f32 %v7806_v60, %v5189_v23  ;;  %v4849_v16 = vpop.xlane.xlu2 %4848  ;;  %v5187_v5 = vsel %vm5186_vm13, %v7804_v20, %v5183_v21  ;;  %v4989_v20 = vsub.f32 %v11221_v0, %v11563_v7 }
 0x955   : > { %v4927_v58 = vmul.f32 %v11612_v34, %v11612_v34  ;;  %v4895_v2 = vmul.f32 %v4849_v16, %v8611_v52  ;;  %v5372_v18 = vmul.f32 %v5187_v5, %v4988_v15  ;;  %v5806_v5 = vld [vmem:[#allocation5 + $0x738] sm:$0xff] }
 0x956   : > { %v5191_v26 = vmul.f32 0.5, %v5190_v1  ;;  %5828 = vmatpush.msra.mxu2 %v5806_v5 }
 0x957   : > { %v4959_v47 = vsub.f32 %v4895_v2, %v4927_v58  ;;  %v5409_v4 = vmul.f32 %v11253_v29, %v5372_v18 }
 0x958   : > { %v5192_v51 = vsub.f32 1.5, %v5191_v26 }
 0x959   : > { %v5023_v27 = vadd.f32 1e-05, %v4959_v47  ;;  %v7808_v37 = vpop.eup %7807  ;;  %v11623_v62 = vadd.f32 %v11257_v41, %v5409_v4  ;;  %v11640_v47 = vld [vmem:[#allocation7 + $0xc] ss:$0 sm:$0xff] }
 0x95a   : > { %v5193_v61 = vmul.f32 %v7806_v60, %v5192_v51  ;;  %v4723_v49 = vpop.xlane.xlu0 %4722  ;;  %v5199_v39 = vmul.f32 %v7808_v37, %v5022_v50  ;;  %vm5205_vm1 = vweird.f32 %v7808_v37 }
 0x95b   : > { %7809 = vrsqrt.f32 %v5023_v27  ;;  %v11628_v35 = vmul.f32 %v4723_v49, %v8611_v52  ;;  %5544 = vmatmul.f32.gmra.mxu0 %v11623_v62  ;;  %vm5206_vm3 = vmor %vm5204_vm2, %vm5205_vm1  ;;  %vm5214_vm5 = vweird.f32 %v5023_v27 }
 0x95c   : > { %v4851_v3 = vpop.xlane.xlu1 %4850  ;;  %v5197_v23 = vsel %vm5196_vm0, %v7806_v60, %v5193_v61  ;;  %v5200_v14 = vmul.f32 %v7808_v37, %v5199_v39  ;;  %v4990_v61 = vsub.f32 %v11234_v13, %v11589_v57 }
 0x95d   : > { %v4896_v21 = vmul.f32 %v4851_v3, %v8611_v52  ;;  %v5373_v9 = vmul.f32 %v5197_v23, %v4989_v20  ;;  %v4928_v24 = vmul.f32 %v11628_v35, %v11628_v35 }
 0x95e   : > { %v5201_v15 = vmul.f32 0.5, %v5200_v14 }
 0x95f   : > { %v5410_v0 = vmul.f32 %v11253_v29, %v5373_v9  ;;  %v4960_v7 = vsub.f32 %v4896_v21, %v4928_v24 }
 0x960   : > { %v5202_v16 = vsub.f32 1.5, %v5201_v15 }
 0x961   : > { %v7810_v1 = vpop.eup %7809  ;;  %v11635_v2 = vadd.f32 1e-05, %v4960_v7  ;;  %v11638_v60 = vadd.f32 %v11257_v41, %v5410_v0 }
 0x962   : > { %v5209_v58 = vmul.f32 %v7810_v1, %v5023_v27  ;;  %v5203_v26 = vmul.f32 %v7808_v37, %v5202_v16  ;;  %v4725_v18 = vpop.xlane.xlu2 %4724  ;;  %vm5215_vm4 = vweird.f32 %v7810_v1 }
 0x963   : > { %7811 = vrsqrt.f32 %v11635_v2  ;;  %v11644_v4 = vmul.f32 %v4725_v18, %v8611_v52  ;;  %5547 = vmatmul.f32.gmra.mxu0 %v11638_v60  ;;  %vm5216_vm6 = vmor %vm5214_vm5, %vm5215_vm4  ;;  %vm5224_vm8 = vweird.f32 %v11635_v2 }
 0x964   : > { %v5210_v51 = vmul.f32 %v7810_v1, %v5209_v58  ;;  %v4853_v49 = vpop.xlane.xlu0 %4852  ;;  %v5207_v39 = vsel %vm5206_vm3, %v7808_v37, %v5203_v26  ;;  %v4991_v26 = vsub.f32 %v11246_v44, %v11612_v34 }
 0x965   : > { %v4929_v50 = vmul.f32 %v11644_v4, %v11644_v4  ;;  %v4897_v23 = vmul.f32 %v4853_v49, %v8611_v52  ;;  %v5374_v21 = vmul.f32 %v5207_v39, %v4990_v61 }
 0x966   : > { %v5211_v3 = vmul.f32 0.5, %v5210_v51 }
 0x967   : > { %v4961_v24 = vsub.f32 %v4897_v23, %v4929_v50  ;;  %v5411_v13 = vmul.f32 %v11253_v29, %v5374_v21  ;;  %v11668_v50 = vld [vmem:[#allocation8 + $0x3] ss:$0 sm:$0xff]  ;;  %v11671_v21 = vld [vmem:[#allocation10 + $0x3] ss:$0 sm:$0xff] }
 0x968   : > { %v5503_v20 = vpop.f32.mrf.mxu0  ;;  %v5212_v9 = vsub.f32 1.5, %v5211_v3 }
 0x969   : > { %v5504_v14 = vadd.f32 %v11640_v47, %v5503_v20  ;;  %v7812_v57 = vpop.eup %7811  ;;  %v5025_v37 = vadd.f32 1e-05, %v4961_v24  ;;  %v11659_v5 = vadd.f32 %v11257_v41, %v5411_v13  ;;  %v5805_v24 = vld [vmem:[#allocation5 + $0x730] sm:$0xff] }
 0x96a   : > { %v5213_v0 = vmul.f32 %v7810_v1, %v5212_v9  ;;  %v4727_v7 = vpop.xlane.xlu1 %4726  ;;  %v5219_v16 = vmul.f32 %v7812_v57, %v11635_v2  ;;  %vm5225_vm7 = vweird.f32 %v7812_v57  ;;  %5829 = vmatpush.msra.mxu2 %v5805_v24  ;;  %v4993_v24 = vsub.f32 %v11292_v46, %v11644_v4 }
 0x96b   : > { %v5599_v15 = vmax.f32 %v5504_v14, 0.0  ;;  %v11656_v58 = vmul.f32 %v4727_v7, %v8611_v52  ;;  %7813 = vrsqrt.f32 %v5025_v37  ;;  %5550 = vmatmul.f32.gmra.mxu0 %v11659_v5  ;;  %v4992_v7 = vsub.f32 %v11266_v19, %v11628_v35  ;;  %vm5226_vm9 = vmor %vm5224_vm8, %vm5225_vm7 }
 0x96c   : > { %v4855_v29 = vpop.xlane.xlu2 %4854  ;;  %v5217_v18 = vsel %vm5216_vm6, %v7810_v1, %v5213_v0  ;;  %v5220_v51 = vmul.f32 %v7812_v57, %v5219_v16  ;;  %vm5234_vm11 = vweird.f32 %v5025_v37 }
 0x96d   : > { %5669 = vmatmul.f32.vlgmr.msrb.gmra.mxu1 %v5599_v15  ;;  %v4930_v27 = vmul.f32 %v11656_v58, %v11656_v58  ;;  %v4898_v61 = vmul.f32 %v4855_v29, %v8611_v52  ;;  %v5375_v49 = vmul.f32 %v5217_v18, %v4991_v26 }
 0x96e   : > { %v5221_v20 = vmul.f32 0.5, %v5220_v51 }
 0x96f   : > { %v4962_v39 = vsub.f32 %v4898_v61, %v4930_v27  ;;  %v5412_v44 = vmul.f32 %v11668_v50, %v5375_v49 }
 0x970   : > { %v5506_v41 = vpop.f32.mrf.mxu0  ;;  %v5222_v34 = vsub.f32 1.5, %v5221_v20 }
 0x971   : > { %v5507_v3 = vadd.f32 %v11640_v47, %v5506_v41  ;;  %v5026_v1 = vadd.f32 1e-05, %v4962_v39  ;;  %v7814_v23 = vpop.eup %7813  ;;  %v11674_v9 = vadd.f32 %v11671_v21, %v5412_v44 }
 0x972   : > { %v5223_v15 = vmul.f32 %v7812_v57, %v5222_v34  ;;  %v5229_v13 = vmul.f32 %v7814_v23, %v5025_v37  ;;  %v4729_v0 = vpop.xlane.xlu0 %4728  ;;  %vm5235_vm10 = vweird.f32 %v7814_v23 }
 0x973   : > { %v5600_v14 = vmax.f32 %v5507_v3, 0.0  ;;  %7815 = vrsqrt.f32 %v5026_v1  ;;  %v11680_v16 = vmul.f32 %v4729_v0, %v8611_v52  ;;  %5553 = vmatmul.f32.gmra.mxu0 %v11674_v9  ;;  %vm5236_vm12 = vmor %vm5234_vm11, %vm5235_vm10  ;;  %vm5244_vm14 = vweird.f32 %v5026_v1 }
 0x974   : > { %v5230_v26 = vmul.f32 %v7814_v23, %v5229_v13  ;;  %v4857_v29 = vpop.xlane.xlu1 %4856  ;;  %v5227_v18 = vsel %vm5226_vm9, %v7812_v57, %v5223_v15 }
 0x975   : > { %5672 = vmatmul.f32.gmra.mxu1 %v5600_v14  ;;  %v4931_v51 = vmul.f32 %v11680_v16, %v11680_v16  ;;  %v4899_v2 = vmul.f32 %v4857_v29, %v8611_v52  ;;  %v5376_v27 = vmul.f32 %v5227_v18, %v4992_v7 }
 0x976   : > { %v5231_v61 = vmul.f32 0.5, %v5230_v26 }
 0x977   : > { %v4963_v49 = vsub.f32 %v4899_v2, %v4931_v51  ;;  %v5413_v19 = vmul.f32 %v11668_v50, %v5376_v27 }
 0x978   : > { %v5232_v20 = vsub.f32 1.5, %v5231_v61  ;;  %v5509_v34 = vpop.f32.mrf.mxu0 }
 0x979   : > { %v7816_v35 = vpop.eup %7815  ;;  %v11687_v41 = vadd.f32 1e-05, %v4963_v49  ;;  %v11690_v57 = vadd.f32 %v11671_v21, %v5413_v19  ;;  %v5510_v13 = vadd.f32 %v11640_v47, %v5509_v34 }
 0x97a   : > { %v5239_v39 = vmul.f32 %v7816_v35, %v5026_v1  ;;  %v4731_v3 = vpop.xlane.xlu2 %4730  ;;  %v5233_v44 = vmul.f32 %v7814_v23, %v5232_v20  ;;  %vm5245_vm13 = vweird.f32 %v7816_v35  ;;  %v4994_v20 = vsub.f32 %v11317_v40, %v11656_v58 }
 0x97b   : > { %v11693_v14 = vmul.f32 %v4731_v3, %v8611_v52  ;;  %7817 = vrsqrt.f32 %v11687_v41  ;;  %v5601_v18 = vmax.f32 %v5510_v13, 0.0  ;;  %5556 = vmatmul.f32.gmra.mxu0 %v11690_v57  ;;  %vm5246_vm15 = vmor %vm5244_vm14, %vm5245_vm13  ;;  %vm5254_vm1 = vweird.f32 %v11687_v41 }
 0x97c   : > { %v5240_v15 = vmul.f32 %v7816_v35, %v5239_v39  ;;  %v4859_v0 = vpop.xlane.xlu0 %4858  ;;  %v5237_v37 = vsel %vm5236_vm12, %v7814_v23, %v5233_v44  ;;  %v5804_v23 = vld [vmem:[#allocation5 + $0x728] sm:$0xff] }
 0x97d   : > { %v4932_v7 = vmul.f32 %v11693_v14, %v11693_v14  ;;  %v4900_v26 = vmul.f32 %v4859_v0, %v8611_v52  ;;  %v5377_v51 = vmul.f32 %v5237_v37, %v4993_v24  ;;  %5675 = vmatmul.f32.gmra.mxu1 %v5601_v18  ;;  %5830 = vmatpush.msra.mxu2 %v5804_v23 }
 0x97e   : > { %v5241_v29 = vmul.f32 0.5, %v5240_v15 }
 0x97f   : > { %v4964_v2 = vsub.f32 %v4900_v26, %v4932_v7  ;;  %v5414_v4 = vmul.f32 %v11668_v50, %v5377_v51 }
 0x980   : > { %v5242_v46 = vsub.f32 1.5, %v5241_v29  ;;  %v5512_v3 = vpop.f32.mrf.mxu0 }
 0x981   : > { %v11704_v27 = vadd.f32 1e-05, %v4964_v2  ;;  %v7818_v61 = vpop.eup %7817  ;;  %v11707_v19 = vadd.f32 %v11671_v21, %v5414_v4  ;;  %v5513_v34 = vadd.f32 %v11640_v47, %v5512_v3 }
 0x982   : > { %v5243_v49 = vmul.f32 %v7816_v35, %v5242_v46  ;;  %v5249_v39 = vmul.f32 %v7818_v61, %v11687_v41  ;;  %v4733_v44 = vpop.xlane.xlu1 %4732  ;;  %vm5255_vm0 = vweird.f32 %v7818_v61 }
 0x983   : > { %7819 = vrsqrt.f32 %v11704_v27  ;;  %v11715_v24 = vmul.f32 %v4733_v44, %v8611_v52  ;;  %v5602_v7 = vmax.f32 %v5513_v34, 0.0  ;;  %5559 = vmatmul.f32.gmra.mxu0 %v11707_v19  ;;  %vm5256_vm2 = vmor %vm5254_vm1, %vm5255_vm0  ;;  %vm5264_vm4 = vweird.f32 %v11704_v27 }
 0x984   : > { %v5247_v1 = vsel %vm5246_vm15, %v7816_v35, %v5243_v49  ;;  %v5250_v15 = vmul.f32 %v7818_v61, %v5249_v39  ;;  %v4861_v13 = vpop.xlane.xlu2 %4860  ;;  %v4995_v39 = vsub.f32 %v11340_v8, %v11680_v16 }
 0x985   : > { %v5378_v0 = vmul.f32 %v5247_v1, %v4994_v20  ;;  %v4933_v40 = vmul.f32 %v11715_v24, %v11715_v24  ;;  %v4901_v58 = vmul.f32 %v4861_v13, %v8611_v52  ;;  %5678 = vmatmul.f32.gmra.mxu1 %v5602_v7 }
 0x986   : > { %v5251_v26 = vmul.f32 0.5, %v5250_v15 }
 0x987   : > { %v5415_v37 = vmul.f32 %v11668_v50, %v5378_v0  ;;  %v4965_v29 = vsub.f32 %v4901_v58, %v4933_v40 }
 0x988   : > { %v5252_v51 = vsub.f32 1.5, %v5251_v26  ;;  %v5515_v23 = vpop.f32.mrf.mxu0 }
 0x989   : > { %v7820_v18 = vpop.eup %7819  ;;  %v11723_v2 = vadd.f32 1e-05, %v4965_v29  ;;  %v11726_v4 = vadd.f32 %v11671_v21, %v5415_v37  ;;  %v5516_v44 = vadd.f32 %v11640_v47, %v5515_v23 }
 0x98a   : > { %v5259_v35 = vmul.f32 %v7820_v18, %v11704_v27  ;;  %v4735_v46 = vpop.xlane.xlu0 %4734  ;;  %v5253_v49 = vmul.f32 %v7818_v61, %v5252_v51  ;;  %vm5265_vm3 = vweird.f32 %v7820_v18  ;;  %v4996_v51 = vsub.f32 %v11367_v43, %v11693_v14 }
 0x98b   : > { %v11730_v20 = vmul.f32 %v4735_v46, %v8611_v52  ;;  %7821 = vrsqrt.f32 %v11723_v2  ;;  %v5603_v0 = vmax.f32 %v5516_v44, 0.0  ;;  %5562 = vmatmul.f32.gmra.mxu0 %v11726_v4  ;;  %vm5266_vm5 = vmor %vm5264_vm4, %vm5265_vm3  ;;  %vm5274_vm7 = vweird.f32 %v11723_v2 }
 0x98c   : > { %v5260_v3 = vmul.f32 %v7820_v18, %v5259_v35  ;;  %v4863_v34 = vpop.xlane.xlu1 %4862  ;;  %v5257_v41 = vsel %vm5256_vm2, %v7818_v61, %v5253_v49  ;;  %v5803_v61 = vld [vmem:[#allocation5 + $0x720] sm:$0xff] }
 0x98d   : > { %v4934_v1 = vmul.f32 %v11730_v20, %v11730_v20  ;;  %v4902_v15 = vmul.f32 %v4863_v34, %v8611_v52  ;;  %v5379_v7 = vmul.f32 %v5257_v41, %v4995_v39  ;;  %5681 = vmatmul.f32.gmra.mxu1 %v5603_v0  ;;  %5831 = vmatpush.msra.mxu2 %v5803_v61 }
 0x98e   : > { %v5261_v13 = vmul.f32 0.5, %v5260_v3 }
 0x98f   : > { %v4966_v40 = vsub.f32 %v4902_v15, %v4934_v1  ;;  %v5416_v16 = vmul.f32 %v11668_v50, %v5379_v7 }
 0x990   : > { %v5262_v8 = vsub.f32 1.5, %v5261_v13  ;;  %v5518_v46 = vpop.f32.mrf.mxu0 }
 0x991   : > { %v11741_v58 = vadd.f32 1e-05, %v4966_v40  ;;  %v7822_v26 = vpop.eup %7821  ;;  %v11745_v29 = vadd.f32 %v11671_v21, %v5416_v16  ;;  %v5519_v23 = vadd.f32 %v11640_v47, %v5518_v46 }
 0x992   : > { %v5263_v37 = vmul.f32 %v7820_v18, %v5262_v8  ;;  %v5269_v35 = vmul.f32 %v7822_v26, %v11723_v2  ;;  %v4737_v49 = vpop.xlane.xlu2 %4736  ;;  %vm5275_vm6 = vweird.f32 %v7822_v26 }
 0x993   : > { %7823 = vrsqrt.f32 %v11741_v58  ;;  %v11753_v39 = vmul.f32 %v4737_v49, %v8611_v52  ;;  %v5604_v1 = vmax.f32 %v5519_v23, 0.0  ;;  %5565 = vmatmul.f32.gmra.mxu0 %v11745_v29  ;;  %vm5276_vm8 = vmor %vm5274_vm7, %vm5275_vm6  ;;  %vm5284_vm10 = vweird.f32 %v11741_v58 }
 0x994   : > { %v5267_v27 = vsel %vm5266_vm5, %v7820_v18, %v5263_v37  ;;  %v5270_v3 = vmul.f32 %v7822_v26, %v5269_v35  ;;  %v4865_v44 = vpop.xlane.xlu0 %4864  ;;  %v4997_v35 = vsub.f32 %v11393_v54, %v11715_v24 }
 0x995   : > { %v5380_v34 = vmul.f32 %v5267_v27, %v4996_v51  ;;  %v4935_v43 = vmul.f32 %v11753_v39, %v11753_v39  ;;  %v4903_v14 = vmul.f32 %v4865_v44, %v8611_v52  ;;  %5684 = vmatmul.f32.gmra.mxu1 %v5604_v1 }
 0x996   : > { %v5271_v15 = vmul.f32 0.5, %v5270_v3 }
 0x997   : > { %v5417_v41 = vmul.f32 %v11668_v50, %v5380_v34  ;;  %v4967_v13 = vsub.f32 %v4903_v14, %v4935_v43 }
 0x998   : > { %v5272_v7 = vsub.f32 1.5, %v5271_v15  ;;  %v5521_v61 = vpop.f32.mrf.mxu0 }
 0x999   : > { %v7824_v0 = vpop.eup %7823  ;;  %v11761_v40 = vadd.f32 1e-05, %v4967_v13  ;;  %v11764_v16 = vadd.f32 %v11671_v21, %v5417_v41  ;;  %v5522_v49 = vadd.f32 %v11640_v47, %v5521_v61 }
 0x99a   : > { %v5279_v18 = vmul.f32 %v7824_v0, %v11741_v58  ;;  %v4739_v8 = vpop.xlane.xlu1 %4738  ;;  %v5273_v37 = vmul.f32 %v7822_v26, %v5272_v7  ;;  %vm5285_vm9 = vweird.f32 %v7824_v0  ;;  %v4998_v7 = vsub.f32 %v11416_v32, %v11730_v20 }
 0x99b   : > { %v11768_v51 = vmul.f32 %v4739_v8, %v8611_v52  ;;  %7825 = vrsqrt.f32 %v11761_v40  ;;  %v5605_v34 = vmax.f32 %v5522_v49, 0.0  ;;  %5568 = vmatmul.f32.gmra.mxu0 %v11764_v16  ;;  %vm5286_vm11 = vmor %vm5284_vm10, %vm5285_vm9  ;;  %vm5294_vm13 = vweird.f32 %v11761_v40 }
 0x99c   : > { %v5280_v46 = vmul.f32 %v7824_v0, %v5279_v18  ;;  %v4867_v23 = vpop.xlane.xlu2 %4866  ;;  %v5277_v2 = vsel %vm5276_vm8, %v7822_v26, %v5273_v37  ;;  %v5802_v26 = vld [vmem:[#allocation5 + $0x718] sm:$0xff] }
 0x99d   : > { %v4936_v27 = vmul.f32 %v11768_v51, %v11768_v51  ;;  %v4904_v3 = vmul.f32 %v4867_v23, %v8611_v52  ;;  %v5381_v1 = vmul.f32 %v5277_v2, %v4997_v35  ;;  %5687 = vmatmul.f32.gmra.mxu1 %v5605_v34  ;;  %5832 = vmatpush.msra.mxu2 %v5802_v26 }
 0x99e   : > { %v5281_v44 = vmul.f32 0.5, %v5280_v46 }
 0x99f   : > { %v4968_v43 = vsub.f32 %v4904_v3, %v4936_v27  ;;  %v5418_v24 = vmul.f32 %v11668_v50, %v5381_v1 }
 0x9a0   : > { %v5282_v54 = vsub.f32 1.5, %v5281_v44  ;;  %v5524_v8 = vpop.f32.mrf.mxu0 }
 0x9a1   : > { %v11779_v14 = vadd.f32 1e-05, %v4968_v43  ;;  %v7826_v15 = vpop.eup %7825  ;;  %v11783_v13 = vadd.f32 %v11671_v21, %v5418_v24  ;;  %v5525_v61 = vadd.f32 %v11640_v47, %v5524_v8 }
 0x9a2   : > { %v5283_v41 = vmul.f32 %v7824_v0, %v5282_v54  ;;  %v5289_v18 = vmul.f32 %v7826_v15, %v11761_v40  ;;  %v4741_v37 = vpop.xlane.xlu0 %4740  ;;  %vm5295_vm12 = vweird.f32 %v7826_v15 }
 0x9a3   : > { %7827 = vrsqrt.f32 %v11779_v14  ;;  %v11791_v35 = vmul.f32 %v4741_v37, %v8611_v52  ;;  %v5606_v27 = vmax.f32 %v5525_v61, 0.0  ;;  %5571 = vmatmul.f32.gmra.mxu0 %v11783_v13  ;;  %vm5296_vm14 = vmor %vm5294_vm13, %vm5295_vm12  ;;  %vm5304_vm0 = vweird.f32 %v11779_v14 }
 0x9a4   : > { %v5287_v58 = vsel %vm5286_vm11, %v7824_v0, %v5283_v41  ;;  %v5290_v46 = vmul.f32 %v7826_v15, %v5289_v18  ;;  %v4869_v49 = vpop.xlane.xlu1 %4868  ;;  %v4999_v18 = vsub.f32 %v11444_v28, %v11753_v39 }
 0x9a5   : > { %v5382_v23 = vmul.f32 %v5287_v58, %v4998_v7  ;;  %v4937_v32 = vmul.f32 %v11791_v35, %v11791_v35  ;;  %v4905_v20 = vmul.f32 %v4869_v49, %v8611_v52  ;;  %5690 = vmatmul.f32.gmra.mxu1 %v5606_v27 }
 0x9a6   : > { %v5291_v3 = vmul.f32 0.5, %v5290_v46 }
 0x9a7   : > { %v5419_v2 = vmul.f32 %v11668_v50, %v5382_v23  ;;  %v4969_v44 = vsub.f32 %v4905_v20, %v4937_v32 }
 0x9a8   : > { %v5292_v1 = vsub.f32 1.5, %v5291_v3  ;;  %v5527_v26 = vpop.f32.mrf.mxu0 }
 0x9a9   : > { %v7828_v34 = vpop.eup %7827  ;;  %v11799_v43 = vadd.f32 1e-05, %v4969_v44  ;;  %v11802_v24 = vadd.f32 %v11671_v21, %v5419_v2  ;;  %v5528_v37 = vadd.f32 %v11640_v47, %v5527_v26 }
 0x9aa   : > { %v5299_v0 = vmul.f32 %v7828_v34, %v11779_v14  ;;  %v4743_v54 = vpop.xlane.xlu2 %4742  ;;  %v5293_v41 = vmul.f32 %v7826_v15, %v5292_v1  ;;  %vm5305_vm15 = vweird.f32 %v7828_v34  ;;  %v5000_v1 = vsub.f32 %v11469_v22, %v11768_v51 }
 0x9ab   : > { %v11806_v7 = vmul.f32 %v4743_v54, %v8611_v52  ;;  %7829 = vrsqrt.f32 %v11799_v43  ;;  %v5607_v23 = vmax.f32 %v5528_v37, 0.0  ;;  %5574 = vmatmul.f32.gmra.mxu0 %v11802_v24  ;;  %vm5306_vm1 = vmor %vm5304_vm0, %vm5305_vm15  ;;  %vm5314_vm3 = vweird.f32 %v11799_v43 }
 0x9ac   : > { %v5300_v8 = vmul.f32 %v7828_v34, %v5299_v0  ;;  %v4871_v61 = vpop.xlane.xlu0 %4870  ;;  %v5297_v40 = vsel %vm5296_vm14, %v7826_v15, %v5293_v41  ;;  %v5801_v15 = vld [vmem:[#allocation5 + $0x710] sm:$0xff] }
 0x9ad   : > { %v4938_v58 = vmul.f32 %v11806_v7, %v11806_v7  ;;  %v4906_v46 = vmul.f32 %v4871_v61, %v8611_v52  ;;  %v5383_v27 = vmul.f32 %v5297_v40, %v4999_v18  ;;  %5693 = vmatmul.f32.gmra.mxu1 %v5607_v23  ;;  %5833 = vmatpush.msra.mxu2 %v5801_v15 }
 0x9ae   : > { %v5301_v49 = vmul.f32 0.5, %v5300_v8 }
 0x9af   : > { %v4970_v32 = vsub.f32 %v4906_v46, %v4938_v58  ;;  %v5420_v39 = vmul.f32 %v11668_v50, %v5383_v27 }
 0x9b0   : > { %v5302_v28 = vsub.f32 1.5, %v5301_v49  ;;  %v5530_v54 = vpop.f32.mrf.mxu0 }
 0x9b1   : > { %v11817_v20 = vadd.f32 1e-05, %v4970_v32  ;;  %v7830_v3 = vpop.eup %7829  ;;  %v11821_v44 = vadd.f32 %v11671_v21, %v5420_v39  ;;  %v5531_v26 = vadd.f32 %v11640_v47, %v5530_v54  ;;  %v5001_v54 = vsub.f32 %v11495_v6, %v11791_v35 }
 0x9b2   : > { %v5303_v2 = vmul.f32 %v7828_v34, %v5302_v28  ;;  %v5309_v0 = vmul.f32 %v7830_v3, %v11799_v43  ;;  %v4745_v41 = vpop.xlane.xlu1 %4744  ;;  %vm5315_vm2 = vweird.f32 %v7830_v3 }
 0x9b3   : > { %7831 = vrsqrt.f32 %v11817_v20  ;;  %v11829_v18 = vmul.f32 %v4745_v41, %v8611_v52  ;;  %v5608_v58 = vmax.f32 %v5531_v26, 0.0  ;;  %5577 = vmatmul.f32.gmra.mxu0 %v11821_v44  ;;  %vm5316_vm4 = vmor %vm5314_vm3, %vm5315_vm2  ;;  %vm5324_vm6 = vweird.f32 %v11817_v20 }
 0x9b4   : > { %v5307_v14 = vsel %vm5306_vm1, %v7828_v34, %v5303_v2  ;;  %v5310_v8 = vmul.f32 %v7830_v3, %v5309_v0  ;;  %v4873_v37 = vpop.xlane.xlu2 %4872  ;;  %v5800_v0 = vld [vmem:[#allocation5 + $0x708] sm:$0xff] }
 0x9b5   : > { %v5384_v61 = vmul.f32 %v5307_v14, %v5000_v1  ;;  %v4939_v22 = vmul.f32 %v11829_v18, %v11829_v18  ;;  %v4907_v51 = vmul.f32 %v4873_v37, %v8611_v52  ;;  %5696 = vmatmul.f32.gmra.mxu1 %v5608_v58  ;;  %5834 = vmatpush.msra.mxu2 %v5800_v0 }
 0x9b6   : > { %v5311_v46 = vmul.f32 0.5, %v5310_v8 }
 0x9b7   : > { %v5421_v40 = vmul.f32 %v11668_v50, %v5384_v61  ;;  %v4971_v49 = vsub.f32 %v4907_v51, %v4939_v22 }
 0x9b8   : > { %v5312_v27 = vsub.f32 1.5, %v5311_v46  ;;  %v5533_v15 = vpop.f32.mrf.mxu0  ;;  %v5799_v46 = vld [vmem:[#allocation5 + $0x700] sm:$0xff] }
 0x9b9   : > { %v7832_v23 = vpop.eup %7831  ;;  %v11837_v32 = vadd.f32 1e-05, %v4971_v49  ;;  %v11840_v39 = vadd.f32 %v11671_v21, %v5421_v40  ;;  %v5534_v26 = vadd.f32 %v11640_v47, %v5533_v15  ;;  %5835 = vmatpush.msra.mxu2 %v5799_v46 }
 0x9ba   : > { %v5319_v34 = vmul.f32 %v7832_v23, %v11817_v20  ;;  %v4747_v28 = vpop.xlane.xlu0 %4746  ;;  %v5313_v2 = vmul.f32 %v7830_v3, %v5312_v27  ;;  %vm5325_vm5 = vweird.f32 %v7832_v23 }
 0x9bb   : > { %v11844_v1 = vmul.f32 %v4747_v28, %v8611_v52  ;;  %7833 = vrsqrt.f32 %v11837_v32  ;;  %v5609_v58 = vmax.f32 %v5534_v26, 0.0  ;;  %5580 = vmatmul.f32.gmra.mxu0 %v11840_v39  ;;  %vm5326_vm7 = vmor %vm5324_vm6, %vm5325_vm5  ;;  %vm5334_vm9 = vweird.f32 %v11837_v32 }
 0x9bc   : > { %v5320_v41 = vmul.f32 %v7832_v23, %v5319_v34  ;;  %v4875_v14 = vpop.xlane.xlu1 %4874  ;;  %v5317_v37 = vsel %vm5316_vm4, %v7830_v3, %v5313_v2  ;;  %v5002_v34 = vsub.f32 %v11522_v59, %v11806_v7 }
 0x9bd   : > { %v4940_v8 = vmul.f32 %v11844_v1, %v11844_v1  ;;  %v4908_v43 = vmul.f32 %v4875_v14, %v8611_v52  ;;  %v5385_v22 = vmul.f32 %v5317_v37, %v5001_v54  ;;  %5699 = vmatmul.f32.gmra.mxu1 %v5609_v58 }
 0x9be   : > { %v5321_v61 = vmul.f32 0.5, %v5320_v41 }
 0x9bf   : > { %v4972_v6 = vsub.f32 %v4908_v43, %v4940_v8  ;;  %v5422_v51 = vmul.f32 %v11668_v50, %v5385_v22 }
 0x9c0   : > { %v5322_v35 = vsub.f32 1.5, %v5321_v61  ;;  %v5536_v2 = vpop.f32.mrf.mxu0 }
 0x9c1   : > { %v5036_v40 = vadd.f32 1e-05, %v4972_v6  ;;  %v7834_v49 = vpop.eup %7833  ;;  %v11857_v3 = vadd.f32 %v11671_v21, %v5422_v51  ;;  %v5537_v0 = vadd.f32 %v11640_v47, %v5536_v2 }
 0x9c2   : > { %v5323_v27 = vmul.f32 %v7832_v23, %v5322_v35  ;;  %v5329_v28 = vmul.f32 %v7834_v49, %v11837_v32  ;;  %v4749_v15 = vpop.xlane.xlu2 %4748  ;;  %vm5335_vm8 = vweird.f32 %v7834_v49 }
 0x9c3   : > { %7835 = vrsqrt.f32 %v5036_v40  ;;  %v11864_v54 = vmul.f32 %v4749_v15, %v8611_v52  ;;  %v5610_v8 = vmax.f32 %v5537_v0, 0.0  ;;  %5583 = vmatmul.f32.gmra.mxu0 %v11857_v3  ;;  %vm5336_vm10 = vmor %vm5334_vm9, %vm5335_vm8  ;;  %vm5344_vm12 = vweird.f32 %v5036_v40 }
 0x9c4   : > { %v5327_v41 = vsel %vm5326_vm7, %v7832_v23, %v5323_v27  ;;  %v5330_v26 = vmul.f32 %v7834_v49, %v5329_v28  ;;  %v4877_v20 = vpop.xlane.xlu0 %4876  ;;  %v5003_v27 = vsub.f32 %v11548_v11, %v11829_v18  ;;  %v5004_v18 = vsub.f32 %v11571_v10, %v11844_v1 }
 0x9c5   : > { %v5386_v14 = vmul.f32 %v5327_v41, %v5002_v34  ;;  %v4941_v43 = vmul.f32 %v11864_v54, %v11864_v54  ;;  %v4909_v59 = vmul.f32 %v4877_v20, %v8611_v52  ;;  %5702 = vmatmul.f32.gmra.mxu1 %v5610_v8 }
 0x9c6   : > { %v5331_v7 = vmul.f32 0.5, %v5330_v26 }
 0x9c7   : > { %v5423_v37 = vmul.f32 %v11668_v50, %v5386_v14  ;;  %v4973_v61 = vsub.f32 %v4909_v59, %v4941_v43 }
 0x9c8   : > { %v5332_v22 = vsub.f32 1.5, %v5331_v7  ;;  %v5539_v46 = vpop.f32.mrf.mxu0 }
 0x9c9   : > { %v7836_v58 = vpop.eup %7835  ;;  %v5037_v6 = vadd.f32 1e-05, %v4973_v61  ;;  %v11872_v35 = vadd.f32 %v11671_v21, %v5423_v37  ;;  %v5540_v28 = vadd.f32 %v11640_v47, %v5539_v46 }
 0x9ca   : > { %v5339_v23 = vmul.f32 %v7836_v58, %v5036_v40  ;;  %v5333_v51 = vmul.f32 %v7834_v49, %v5332_v22  ;;  %vm5345_vm11 = vweird.f32 %v7836_v58 }
 0x9cb   : > { %7837 = vrsqrt.f32 %v5037_v6  ;;  %v5611_v0 = vmax.f32 %v5540_v28, 0.0  ;;  %5586 = vmatmul.f32.gmra.mxu0 %v11872_v35  ;;  %vm5346_vm13 = vmor %vm5344_vm12, %vm5345_vm11  ;;  %vm5354_vm15 = vweird.f32 %v5037_v6 }
 0x9cc   : > { %v5340_v34 = vmul.f32 %v7836_v58, %v5339_v23  ;;  %v5337_v2 = vsel %vm5336_vm10, %v7834_v49, %v5333_v51 }
 0x9cd   : > { %v5387_v41 = vmul.f32 %v5337_v2, %v5003_v27  ;;  %5705 = vmatmul.f32.gmra.mxu1 %v5611_v0 }
 0x9ce   : > { %v5341_v15 = vmul.f32 0.5, %v5340_v34 }
 0x9cf   : > { %v5424_v32 = vmul.f32 %v11668_v50, %v5387_v41  ;;  %v11900_v41 = vld [vmem:[#allocation7 + $0xd] ss:$0 sm:$0xff] }
 0x9d0   : > { %v5342_v26 = vsub.f32 1.5, %v5341_v15  ;;  %v5542_v8 = vpop.f32.mrf.mxu0 }
 0x9d1   : > { %v7838_v20 = vpop.eup %7837  ;;  %v11881_v11 = vadd.f32 %v11671_v21, %v5424_v32  ;;  %v5543_v43 = vadd.f32 %v11640_v47, %v5542_v8 }
 0x9d2   : > { %v5343_v14 = vmul.f32 %v7836_v58, %v5342_v26  ;;  %v5349_v49 = vmul.f32 %v7838_v20, %v5037_v6  ;;  %vm5355_vm14 = vweird.f32 %v7838_v20 }
 0x9d3   : > { %v5612_v61 = vmax.f32 %v5543_v43, 0.0  ;;  %5589 = vmatmul.f32.gmra.mxu0 %v11881_v11  ;;  %vm5356_vm0 = vmor %vm5354_vm15, %vm5355_vm14 }
 0x9d4   : > { %v5347_v59 = vsel %vm5346_vm13, %v7836_v58, %v5343_v14  ;;  %v5350_v7 = vmul.f32 %v7838_v20, %v5349_v49  ;;  %v5005_v58 = vsub.f32 %v11599_v33, %v11864_v54 }
 0x9d5   : > { %v5388_v37 = vmul.f32 %v5347_v59, %v5004_v18  ;;  %5708 = vmatmul.f32.gmra.mxu1 %v5612_v61 }
 0x9d6   : > { %v5351_v22 = vmul.f32 0.5, %v5350_v7 }
 0x9d7   : > { %v5425_v40 = vmul.f32 %v11668_v50, %v5388_v37 }
 0x9d8   : > { %v5352_v23 = vsub.f32 1.5, %v5351_v22  ;;  %v5545_v1 = vpop.f32.mrf.mxu0 }
 0x9d9   : > { %v11889_v51 = vadd.f32 %v11671_v21, %v5425_v40  ;;  %v5546_v46 = vadd.f32 %v11640_v47, %v5545_v1  ;;  %v6758_v1 = vld [vmem:[#allocation5 + $0x7f0] sm:$0xff] }
 0x9da   : > { %v5353_v10 = vmul.f32 %v7838_v20, %v5352_v23 }
 0x9db   : > { %v5613_v34 = vmax.f32 %v5546_v46, 0.0  ;;  %5592 = vmatmul.f32.gmra.mxu0 %v11889_v51 }
 0x9dc   : > { %v5357_v27 = vsel %vm5356_vm0, %v7838_v20, %v5353_v10 }
 0x9dd   : > { %v5389_v28 = vmul.f32 %v5357_v27, %v5005_v58  ;;  %5711 = vmatmul.f32.gmra.mxu1 %v5613_v34 }
 0x9df   : > { %v5426_v2 = vmul.f32 %v11668_v50, %v5389_v28 }
 0x9e0   : > { %v5548_v0 = vpop.f32.mrf.mxu0 }
 0x9e1   : > { %v11897_v15 = vadd.f32 %v11671_v21, %v5426_v2  ;;  %v5549_v6 = vadd.f32 %v11640_v47, %v5548_v0  ;;  %v6759_v21 = vld [vmem:[#allocation5 + $0x7f8] sm:$0xff] }
 0x9e2   : > { %6765 = vmatpush.msra.mxu3 %v6759_v21 }
 0x9e3   : > { %v5614_v33 = vmax.f32 %v5549_v6, 0.0  ;;  %5595 = vmatmul.f32.gmra.mxu0 %v11897_v15 }
 0x9e4   : > { %6766 = vmatpush.msra.mxu3 %v6758_v1 }
 0x9e5   : > { %5714 = vmatmul.f32.gmra.mxu1 %v5614_v33 }
 0x9e8   : > { %v5551_v32 = vpop.f32.mrf.mxu0 }
 0x9e9   : > { %v5552_v14 = vadd.f32 %v11640_v47, %v5551_v32 }
 0x9ea   : > { %v5670_v54 = vpop.f32.mrf.mxu1 }
 0x9eb   : > { %v5671_v26 = vadd.f32 %v11900_v41, %v5670_v54  ;;  %v5615_v50 = vmax.f32 %v5552_v14, 0.0 }
 0x9ed   : > { %v5766_v20 = vmax.f32 %v5671_v26, 0.0  ;;  %5717 = vmatmul.f32.gmra.mxu1 %v5615_v50 }
 0x9ef   : > { %5836 = vmatmul.f32.vlgmr.msra.gmra.mxu2 %v5766_v20  ;;  %v6757_v20 = vld [vmem:[#allocation5 + $0x7e8] sm:$0xff] }
 0x9f0   : > { %v5554_v8 = vpop.f32.mrf.mxu0  ;;  %6767 = vmatpush.msra.mxu3 %v6757_v20 }
 0x9f1   : > { %v5555_v43 = vadd.f32 %v11640_v47, %v5554_v8 }
 0x9f2   : > { %v5673_v18 = vpop.f32.mrf.mxu1 }
 0x9f3   : > { %v5674_v49 = vadd.f32 %v11900_v41, %v5673_v18  ;;  %v5616_v7 = vmax.f32 %v5555_v43, 0.0 }
 0x9f5   : > { %v5767_v59 = vmax.f32 %v5674_v49, 0.0  ;;  %5720 = vmatmul.f32.gmra.mxu1 %v5616_v7 }
 0x9f7   : > { %5839 = vmatmul.f32.gmra.mxu2 %v5767_v59 }
 0x9f8   : > { %v5557_v37 = vpop.f32.mrf.mxu0 }
 0x9f9   : > { %v5558_v61 = vadd.f32 %v11640_v47, %v5557_v37 }
 0x9fa   : > { %v5676_v22 = vpop.f32.mrf.mxu1 }
 0x9fb   : > { %v5617_v40 = vmax.f32 %v5558_v61, 0.0  ;;  %v5677_v23 = vadd.f32 %v11900_v41, %v5676_v22 }
 0x9fd   : > { %v5768_v10 = vmax.f32 %v5677_v23, 0.0  ;;  %5723 = vmatmul.f32.gmra.mxu1 %v5617_v40  ;;  %v6756_v40 = vld [vmem:[#allocation5 + $0x7e0] sm:$0xff] }
 0x9fe   : > { %6768 = vmatpush.msra.mxu3 %v6756_v40 }
 0x9ff   : > { %5842 = vmatmul.f32.gmra.mxu2 %v5768_v10 }
 0xa00   : > { %v5560_v58 = vpop.f32.mrf.mxu0 }
 0xa01   : > { %v5561_v46 = vadd.f32 %v11640_v47, %v5560_v58 }
 0xa02   : > { %v5679_v27 = vpop.f32.mrf.mxu1 }
 0xa03   : > { %v5618_v34 = vmax.f32 %v5561_v46, 0.0  ;;  %v5680_v28 = vadd.f32 %v11900_v41, %v5679_v27 }
 0xa05   : > { %v5769_v2 = vmax.f32 %v5680_v28, 0.0  ;;  %5726 = vmatmul.f32.gmra.mxu1 %v5618_v34 }
 0xa07   : > { %5845 = vmatmul.f32.gmra.mxu2 %v5769_v2 }
 0xa08   : > { %v5563_v0 = vpop.f32.mrf.mxu0 }
 0xa09   : > { %v5564_v6 = vadd.f32 %v11640_v47, %v5563_v0 }
 0xa0a   : > { %v5682_v33 = vpop.f32.mrf.mxu1 }
 0xa0b   : > { %v5619_v54 = vmax.f32 %v5564_v6, 0.0  ;;  %v5683_v26 = vadd.f32 %v11900_v41, %v5682_v33 }
 0xa0d   : > { %v5770_v32 = vmax.f32 %v5683_v26, 0.0  ;;  %5729 = vmatmul.f32.gmra.mxu1 %v5619_v54  ;;  %v6755_v54 = vld [vmem:[#allocation5 + $0x7d8] sm:$0xff] }
 0xa0e   : > { %6769 = vmatpush.msra.mxu3 %v6755_v54 }
 0xa0f   : > { %5848 = vmatmul.f32.gmra.mxu2 %v5770_v32 }
 0xa10   : > { %v5566_v14 = vpop.f32.mrf.mxu0 }
 0xa11   : > { %v5567_v50 = vadd.f32 %v11640_v47, %v5566_v14 }
 0xa12   : > { %v5685_v21 = vpop.f32.mrf.mxu1 }
 0xa13   : > { %v5620_v18 = vmax.f32 %v5567_v50, 0.0  ;;  %v5686_v49 = vadd.f32 %v11900_v41, %v5685_v21 }
 0xa15   : > { %v5771_v8 = vmax.f32 %v5686_v49, 0.0  ;;  %5732 = vmatmul.f32.gmra.mxu1 %v5620_v18 }
 0xa17   : > { %5851 = vmatmul.f32.gmra.mxu2 %v5771_v8 }
 0xa18   : > { %v5569_v43 = vpop.f32.mrf.mxu0 }
 0xa19   : > { %v5570_v59 = vadd.f32 %v11640_v47, %v5569_v43 }
 0xa1a   : > { %v5688_v7 = vpop.f32.mrf.mxu1 }
 0xa1b   : > { %v5621_v37 = vmax.f32 %v5570_v59, 0.0  ;;  %v5689_v61 = vadd.f32 %v11900_v41, %v5688_v7 }
 0xa1d   : > { %v5772_v22 = vmax.f32 %v5689_v61, 0.0  ;;  %5735 = vmatmul.f32.gmra.mxu1 %v5621_v37  ;;  %v6754_v37 = vld [vmem:[#allocation5 + $0x7d0] sm:$0xff] }
 0xa1e   : > { %6770 = vmatpush.msra.mxu3 %v6754_v37 }
 0xa1f   : > { %5854 = vmatmul.f32.gmra.mxu2 %v5772_v22  ;;  %v7931_v22 = vld [vmem:[#allocation7 + $0xc] ss:$0 sm:$0xff] }
 0xa20   : > { %v5572_v23 = vpop.f32.mrf.mxu0 }
 0xa21   : > { %v5573_v10 = vadd.f32 %v11640_v47, %v5572_v23 }
 0xa22   : > { %v5691_v1 = vpop.f32.mrf.mxu1 }
 0xa23   : > { %v5622_v58 = vmax.f32 %v5573_v10, 0.0  ;;  %v5692_v46 = vadd.f32 %v11900_v41, %v5691_v1 }
 0xa25   : > { %v5773_v27 = vmax.f32 %v5692_v46, 0.0  ;;  %5738 = vmatmul.f32.gmra.mxu1 %v5622_v58 }
 0xa27   : > { %5857 = vmatmul.f32.gmra.mxu2 %v5773_v27 }
 0xa28   : > { %v5575_v34 = vpop.f32.mrf.mxu0 }
 0xa29   : > { %v5576_v28 = vadd.f32 %v11640_v47, %v5575_v34 }
 0xa2a   : > { %v5694_v2 = vpop.f32.mrf.mxu1 }
 0xa2b   : > { %v5623_v0 = vmax.f32 %v5576_v28, 0.0  ;;  %v5695_v6 = vadd.f32 %v11900_v41, %v5694_v2 }
 0xa2d   : > { %v5774_v33 = vmax.f32 %v5695_v6, 0.0  ;;  %5741 = vmatmul.f32.gmra.mxu1 %v5623_v0  ;;  %v6753_v0 = vld [vmem:[#allocation5 + $0x7c8] sm:$0xff] }
 0xa2e   : > { %6771 = vmatpush.msra.mxu3 %v6753_v0 }
 0xa2f   : > { %5860 = vmatmul.f32.gmra.mxu2 %v5774_v33 }
 0xa30   : > { %v5578_v26 = vpop.f32.mrf.mxu0 }
 0xa31   : > { %v5579_v32 = vadd.f32 %v11640_v47, %v5578_v26 }
 0xa32   : > { %v5697_v20 = vpop.f32.mrf.mxu1 }
 0xa33   : > { %v5624_v14 = vmax.f32 %v5579_v32, 0.0  ;;  %v5698_v50 = vadd.f32 %v11900_v41, %v5697_v20 }
 0xa35   : > { %v5775_v21 = vmax.f32 %v5698_v50, 0.0  ;;  %5744 = vmatmul.f32.gmra.mxu1 %v5624_v14 }
 0xa37   : > { %5863 = vmatmul.f32.gmra.mxu2 %v5775_v21 }
 0xa38   : > { %v5581_v18 = vpop.f32.mrf.mxu0 }
 0xa39   : > { %v5582_v49 = vadd.f32 %v11640_v47, %v5581_v18 }
 0xa3a   : > { %v5700_v8 = vpop.f32.mrf.mxu1 }
 0xa3b   : > { %v5625_v43 = vmax.f32 %v5582_v49, 0.0  ;;  %v5701_v59 = vadd.f32 %v11900_v41, %v5700_v8 }
 0xa3d   : > { %v5776_v7 = vmax.f32 %v5701_v59, 0.0  ;;  %5747 = vmatmul.f32.gmra.mxu1 %v5625_v43  ;;  %v6752_v43 = vld [vmem:[#allocation5 + $0x7c0] sm:$0xff] }
 0xa3e   : > { %6772 = vmatpush.msra.mxu3 %v6752_v43 }
 0xa3f   : > { %5866 = vmatmul.f32.gmra.mxu2 %v5776_v7 }
 0xa40   : > { %v5584_v61 = vpop.f32.mrf.mxu0 }
 0xa41   : > { %v5585_v40 = vadd.f32 %v7931_v22, %v5584_v61 }
 0xa42   : > { %v5703_v23 = vpop.f32.mrf.mxu1 }
 0xa43   : > { %v5626_v10 = vmax.f32 %v5585_v40, 0.0  ;;  %v5704_v1 = vadd.f32 %v11900_v41, %v5703_v23 }
 0xa45   : > { %v5777_v58 = vmax.f32 %v5704_v1, 0.0  ;;  %5750 = vmatmul.f32.gmra.mxu1 %v5626_v10  ;;  %v11930_v1 = vld [vmem:[#allocation7 + $0xe] ss:$0 sm:$0xff] }
 0xa47   : > { %5869 = vmatmul.f32.gmra.mxu2 %v5777_v58 }
 0xa48   : > { %v5587_v47 = vpop.f32.mrf.mxu0 }
 0xa49   : > { %v5588_v46 = vadd.f32 %v7931_v22, %v5587_v47 }
 0xa4a   : > { %v5706_v27 = vpop.f32.mrf.mxu1 }
 0xa4b   : > { %v5627_v34 = vmax.f32 %v5588_v46, 0.0  ;;  %v5707_v28 = vadd.f32 %v11900_v41, %v5706_v27  ;;  %v6751_v27 = vld [vmem:[#allocation5 + $0x7b8] sm:$0xff] }
 0xa4c   : > { %6773 = vmatpush.msra.mxu3 %v6751_v27 }
 0xa4d   : > { %v5778_v2 = vmax.f32 %v5707_v28, 0.0  ;;  %5753 = vmatmul.f32.gmra.mxu1 %v5627_v34 }
 0xa4f   : > { %5872 = vmatmul.f32.gmra.mxu2 %v5778_v2 }
 0xa50   : > { %v5590_v6 = vpop.f32.mrf.mxu0 }
 0xa51   : > { %v5591_v33 = vadd.f32 %v7931_v22, %v5590_v6 }
 0xa52   : > { %v5709_v54 = vpop.f32.mrf.mxu1 }
 0xa53   : > { %v5628_v26 = vmax.f32 %v5591_v33, 0.0  ;;  %v5710_v32 = vadd.f32 %v11900_v41, %v5709_v54  ;;  %v6926_v33 = vld [vmem:[#allocation5 + $0x878] sm:$0xff] }
 0xa54   : > { %6932 = vmatpush.msra.mxu0 %v6926_v33 }
 0xa55   : > { %v5779_v20 = vmax.f32 %v5710_v32, 0.0  ;;  %5756 = vmatmul.f32.gmra.mxu1 %v5628_v26 }
 0xa57   : > { %5875 = vmatmul.f32.gmra.mxu2 %v5779_v20 }
 0xa58   : > { %v5593_v14 = vpop.f32.mrf.mxu0 }
 0xa59   : > { %v5594_v50 = vadd.f32 %v7931_v22, %v5593_v14 }
 0xa5a   : > { %v5712_v21 = vpop.f32.mrf.mxu1 }
 0xa5b   : > { %v5629_v18 = vmax.f32 %v5594_v50, 0.0  ;;  %v5713_v49 = vadd.f32 %v11900_v41, %v5712_v21  ;;  %v6750_v21 = vld [vmem:[#allocation5 + $0x7b0] sm:$0xff] }
 0xa5c   : > { %6774 = vmatpush.msra.mxu3 %v6750_v21 }
 0xa5d   : > { %v5780_v8 = vmax.f32 %v5713_v49, 0.0  ;;  %5759 = vmatmul.f32.gmra.mxu1 %v5629_v18 }
 0xa5f   : > { %5878 = vmatmul.f32.gmra.mxu2 %v5780_v8 }
 0xa60   : > { %v5596_v59 = vpop.f32.mrf.mxu0 }
 0xa61   : > { %v5597_v7 = vadd.f32 %v7931_v22, %v5596_v59 }
 0xa62   : > { %v5715_v37 = vpop.f32.mrf.mxu1 }
 0xa63   : > { %v5630_v61 = vmax.f32 %v5597_v7, 0.0  ;;  %v5716_v40 = vadd.f32 %v11900_v41, %v5715_v37  ;;  %v6925_v7 = vld [vmem:[#allocation5 + $0x870] sm:$0xff] }
 0xa64   : > { %6933 = vmatpush.msra.mxu0 %v6925_v7 }
 0xa65   : > { %v5781_v23 = vmax.f32 %v5716_v40, 0.0  ;;  %5762 = vmatmul.f32.gmra.mxu1 %v5630_v61 }
 0xa67   : > { %5881 = vmatmul.f32.gmra.mxu2 %v5781_v23 }
 0xa6a   : > { %v5718_v10 = vpop.f32.mrf.mxu1 }
 0xa6b   : > { %v5719_v58 = vadd.f32 %v11900_v41, %v5718_v10 }
 0xa6d   : > { %v5782_v47 = vmax.f32 %v5719_v58, 0.0 }
 0xa6f   : > { %5884 = vmatmul.f32.gmra.mxu2 %v5782_v47 }
 0xa72   : > { %v5837_v46 = vpop.f32.mrf.mxu2  ;;  %v5721_v28 = vpop.f32.mrf.mxu1 }
 0xa73   : > { %v5838_v34 = vadd.f32 %v11930_v1, %v5837_v46  ;;  %v5722_v0 = vadd.f32 %v11900_v41, %v5721_v28 }
 0xa75   : > { %v11935_v22 = vadd.f32 %v5838_v34, %v11272_v38  ;;  %v5783_v6 = vmax.f32 %v5722_v0, 0.0 }
 0xa77   : > { %5965 = vadd.xlane.f32.xlu1 %v11935_v22  ;;  %v6061_v2 = vmul.f32 %v11935_v22, %v11935_v22  ;;  %5887 = vmatmul.f32.gmra.mxu2 %v5783_v6 }
 0xa79   : > { %6093 = vadd.xlane.f32.xlu2 %v6061_v2 }
 0xa7a   : > { %v5840_v54 = vpop.f32.mrf.mxu2  ;;  %v5724_v38 = vpop.f32.mrf.mxu1 }
 0xa7b   : > { %v5841_v26 = vadd.f32 %v11930_v1, %v5840_v54  ;;  %v5725_v20 = vadd.f32 %v11900_v41, %v5724_v38 }
 0xa7d   : > { %v11943_v32 = vadd.f32 %v5841_v26, %v11299_v12  ;;  %v5784_v50 = vmax.f32 %v5725_v20, 0.0 }
 0xa7f   : > { %5967 = vadd.xlane.f32.xlu0 %v11943_v32  ;;  %v6062_v14 = vmul.f32 %v11943_v32, %v11943_v32  ;;  %5890 = vmatmul.f32.gmra.mxu2 %v5784_v50 }
 0xa81   : > { %6095 = vadd.xlane.f32.xlu1 %v6062_v14 }
 0xa82   : > { %v5727_v18 = vpop.f32.mrf.mxu1  ;;  %v5843_v49 = vpop.f32.mrf.mxu2 }
 0xa83   : > { %v5728_v8 = vadd.f32 %v11900_v41, %v5727_v18  ;;  %v5844_v12 = vadd.f32 %v11930_v1, %v5843_v49 }
 0xa85   : > { %v5785_v43 = vmax.f32 %v5728_v8, 0.0  ;;  %v11952_v59 = vadd.f32 %v5844_v12, %v11336_v63  ;;  %v6749_v63 = vld [vmem:[#allocation5 + $0x7a8] sm:$0xff] }
 0xa86   : > { %6775 = vmatpush.msra.mxu3 %v6749_v63 }
 0xa87   : > { %5969 = vadd.xlane.f32.xlu2 %v11952_v59  ;;  %5893 = vmatmul.f32.gmra.mxu2 %v5785_v43  ;;  %v6063_v37 = vmul.f32 %v11952_v59, %v11952_v59 }
 0xa89   : > { %6097 = vadd.xlane.f32.xlu0 %v6063_v37 }
 0xa8a   : > { %v5730_v61 = vpop.f32.mrf.mxu1  ;;  %v5846_v40 = vpop.f32.mrf.mxu2 }
 0xa8b   : > { %v5731_v23 = vadd.f32 %v11900_v41, %v5730_v61  ;;  %v5847_v10 = vadd.f32 %v11930_v1, %v5846_v40 }
 0xa8d   : > { %v5786_v58 = vmax.f32 %v5731_v23, 0.0  ;;  %v11960_v47 = vadd.f32 %v5847_v10, %v11353_v48  ;;  %v6924_v48 = vld [vmem:[#allocation5 + $0x868] sm:$0xff] }
 0xa8e   : > { %6934 = vmatpush.msra.mxu0 %v6924_v48 }
 0xa8f   : > { %5971 = vadd.xlane.f32.xlu1 %v11960_v47  ;;  %5896 = vmatmul.f32.gmra.mxu2 %v5786_v58  ;;  %v6064_v46 = vmul.f32 %v11960_v47, %v11960_v47 }
 0xa91   : > { %6099 = vadd.xlane.f32.xlu2 %v6064_v46 }
 0xa92   : > { %v5733_v27 = vpop.f32.mrf.mxu1  ;;  %v5849_v34 = vpop.f32.mrf.mxu2 }
 0xa93   : > { %v5734_v28 = vadd.f32 %v11900_v41, %v5733_v27  ;;  %v5850_v2 = vadd.f32 %v11930_v1, %v5849_v34 }
 0xa95   : > { %v5787_v0 = vmax.f32 %v5734_v28, 0.0  ;;  %v11968_v6 = vadd.f32 %v5850_v2, %v11387_v42  ;;  %v6748_v42 = vld [vmem:[#allocation5 + $0x7a0] sm:$0xff] }
 0xa96   : > { %6776 = vmatpush.msra.mxu3 %v6748_v42 }
 0xa97   : > { %5973 = vadd.xlane.f32.xlu0 %v11968_v6  ;;  %5899 = vmatmul.f32.gmra.mxu2 %v5787_v0  ;;  %v6065_v33 = vmul.f32 %v11968_v6, %v11968_v6 }
 0xa99   : > { %6101 = vadd.xlane.f32.xlu1 %v6065_v33 }
 0xa9a   : > { %v5736_v54 = vpop.f32.mrf.mxu1  ;;  %v5852_v26 = vpop.f32.mrf.mxu2 }
 0xa9b   : > { %v5737_v38 = vadd.f32 %v11900_v41, %v5736_v54  ;;  %v5853_v20 = vadd.f32 %v11930_v1, %v5852_v26 }
 0xa9d   : > { %v5788_v14 = vmax.f32 %v5737_v38, 0.0  ;;  %v11976_v50 = vadd.f32 %v5853_v20, %v11404_v45  ;;  %v6923_v45 = vld [vmem:[#allocation5 + $0x860] sm:$0xff] }
 0xa9e   : > { %6935 = vmatpush.msra.mxu0 %v6923_v45 }
 0xa9f   : > { %5975 = vadd.xlane.f32.xlu2 %v11976_v50  ;;  %5902 = vmatmul.f32.gmra.mxu2 %v5788_v14  ;;  %v6066_v21 = vmul.f32 %v11976_v50, %v11976_v50 }
 0xaa1   : > { %6103 = vadd.xlane.f32.xlu0 %v6066_v21 }
 0xaa2   : > { %v5739_v18 = vpop.f32.mrf.mxu1  ;;  %v5855_v49 = vpop.f32.mrf.mxu2 }
 0xaa3   : > { %v5740_v8 = vadd.f32 %v11900_v41, %v5739_v18  ;;  %v5856_v12 = vadd.f32 %v11930_v1, %v5855_v49 }
 0xaa5   : > { %v5789_v43 = vmax.f32 %v5740_v8, 0.0  ;;  %v11984_v7 = vadd.f32 %v5856_v12, %v11438_v17  ;;  %v6747_v17 = vld [vmem:[#allocation5 + $0x798] sm:$0xff] }
 0xaa6   : > { %6777 = vmatpush.msra.mxu3 %v6747_v17 }
 0xaa7   : > { %5977 = vadd.xlane.f32.xlu1 %v11984_v7  ;;  %5905 = vmatmul.f32.gmra.mxu2 %v5789_v43  ;;  %v6067_v37 = vmul.f32 %v11984_v7, %v11984_v7 }
 0xaa9   : > { %6105 = vadd.xlane.f32.xlu2 %v6067_v37 }
 0xaaa   : > { %v5742_v61 = vpop.f32.mrf.mxu1  ;;  %v5858_v40 = vpop.f32.mrf.mxu2 }
 0xaab   : > { %v5743_v23 = vadd.f32 %v11900_v41, %v5742_v61  ;;  %v5859_v10 = vadd.f32 %v11930_v1, %v5858_v40 }
 0xaad   : > { %v5790_v58 = vmax.f32 %v5743_v23, 0.0  ;;  %v11992_v63 = vadd.f32 %v5859_v10, %v11455_v30  ;;  %v6922_v30 = vld [vmem:[#allocation5 + $0x858] sm:$0xff] }
 0xaae   : > { %6936 = vmatpush.msra.mxu0 %v6922_v30 }
 0xaaf   : > { %5979 = vadd.xlane.f32.xlu0 %v11992_v63  ;;  %5908 = vmatmul.f32.gmra.mxu2 %v5790_v58  ;;  %v6068_v46 = vmul.f32 %v11992_v63, %v11992_v63 }
 0xab1   : > { %6107 = vadd.xlane.f32.xlu1 %v6068_v46 }
 0xab2   : > { %v5745_v27 = vpop.f32.mrf.mxu1  ;;  %v5861_v34 = vpop.f32.mrf.mxu2 }
 0xab3   : > { %v5746_v28 = vadd.f32 %v11900_v41, %v5745_v27  ;;  %v5862_v2 = vadd.f32 %v11930_v1, %v5861_v34 }
 0xab5   : > { %v5791_v0 = vmax.f32 %v5746_v28, 0.0  ;;  %v12000_v48 = vadd.f32 %v5862_v2, %v11491_v53  ;;  %v6746_v53 = vld [vmem:[#allocation5 + $0x790] sm:$0xff] }
 0xab6   : > { %6778 = vmatpush.msra.mxu3 %v6746_v53 }
 0xab7   : > { %5981 = vadd.xlane.f32.xlu2 %v12000_v48  ;;  %5911 = vmatmul.f32.gmra.mxu2 %v5791_v0  ;;  %v6069_v33 = vmul.f32 %v12000_v48, %v12000_v48 }
 0xab9   : > { %6109 = vadd.xlane.f32.xlu0 %v6069_v33 }
 0xaba   : > { %v5748_v54 = vpop.f32.mrf.mxu1  ;;  %v5864_v26 = vpop.f32.mrf.mxu2 }
 0xabb   : > { %v5749_v38 = vadd.f32 %v11900_v41, %v5748_v54  ;;  %v5865_v20 = vadd.f32 %v11930_v1, %v5864_v26 }
 0xabd   : > { %v5792_v14 = vmax.f32 %v5749_v38, 0.0  ;;  %v12008_v42 = vadd.f32 %v5865_v20, %v11508_v25  ;;  %v6921_v25 = vld [vmem:[#allocation5 + $0x850] sm:$0xff] }
 0xabe   : > { %6937 = vmatpush.msra.mxu0 %v6921_v25 }
 0xabf   : > { %5983 = vadd.xlane.f32.xlu1 %v12008_v42  ;;  %5914 = vmatmul.f32.gmra.mxu2 %v5792_v14  ;;  %v6070_v21 = vmul.f32 %v12008_v42, %v12008_v42 }
 0xac1   : > { %6111 = vadd.xlane.f32.xlu2 %v6070_v21 }
 0xac2   : > { %v5751_v18 = vpop.f32.mrf.mxu1  ;;  %v5867_v49 = vpop.f32.mrf.mxu2 }
 0xac3   : > { %v5752_v8 = vadd.f32 %v11900_v41, %v5751_v18  ;;  %v5868_v12 = vadd.f32 %v11930_v1, %v5867_v49  ;;  %v6920_v18 = vld [vmem:[#allocation5 + $0x848] sm:$0xff] }
 0xac4   : > { %6938 = vmatpush.msra.mxu0 %v6920_v18 }
 0xac5   : > { %v5793_v43 = vmax.f32 %v5752_v8, 0.0  ;;  %v12016_v45 = vadd.f32 %v5868_v12, %v11542_v31  ;;  %v6745_v31 = vld [vmem:[#allocation5 + $0x788] sm:$0xff] }
 0xac6   : > { %6779 = vmatpush.msra.mxu3 %v6745_v31 }
 0xac7   : > { %5985 = vadd.xlane.f32.xlu0 %v12016_v45  ;;  %5917 = vmatmul.f32.gmra.mxu2 %v5793_v43  ;;  %v6071_v37 = vmul.f32 %v12016_v45, %v12016_v45 }
 0xac9   : > { %6113 = vadd.xlane.f32.xlu1 %v6071_v37  ;;  %v6744_v37 = vld [vmem:[#allocation5 + $0x780] sm:$0xff] }
 0xaca   : > { %v5754_v61 = vpop.f32.mrf.mxu1  ;;  %v5870_v40 = vpop.f32.mrf.mxu2  ;;  %6780 = vmatpush.msra.mxu3 %v6744_v37 }
 0xacb   : > { %v5755_v23 = vadd.f32 %v11900_v41, %v5754_v61  ;;  %v5871_v10 = vadd.f32 %v11930_v1, %v5870_v40 }
 0xacd   : > { %v5794_v58 = vmax.f32 %v5755_v23, 0.0  ;;  %v12024_v17 = vadd.f32 %v5871_v10, %v11559_v36 }
 0xacf   : > { %5987 = vadd.xlane.f32.xlu2 %v12024_v17  ;;  %5920 = vmatmul.f32.gmra.mxu2 %v5794_v58  ;;  %v6072_v46 = vmul.f32 %v12024_v17, %v12024_v17 }
 0xad1   : > { %6115 = vadd.xlane.f32.xlu0 %v6072_v46 }
 0xad2   : > { %v5757_v27 = vpop.f32.mrf.mxu1  ;;  %v5873_v34 = vpop.f32.mrf.mxu2 }
 0xad3   : > { %v5758_v28 = vadd.f32 %v11900_v41, %v5757_v27  ;;  %v5874_v2 = vadd.f32 %v11930_v1, %v5873_v34 }
 0xad5   : > { %v5795_v0 = vmax.f32 %v5758_v28, 0.0  ;;  %v12032_v30 = vadd.f32 %v5874_v2, %v11593_v55 }
 0xad7   : > { %5989 = vadd.xlane.f32.xlu1 %v12032_v30  ;;  %5923 = vmatmul.f32.gmra.mxu2 %v5795_v0  ;;  %v6073_v36 = vmul.f32 %v12032_v30, %v12032_v30 }
 0xad9   : > { %6117 = vadd.xlane.f32.xlu2 %v6073_v36 }
 0xada   : > { %v5760_v33 = vpop.f32.mrf.mxu1  ;;  %v5876_v54 = vpop.f32.mrf.mxu2 }
 0xadb   : > { %v5761_v26 = vadd.f32 %v11900_v41, %v5760_v33  ;;  %v5877_v38 = vadd.f32 %v11930_v1, %v5876_v54 }
 0xadd   : > { %v5796_v20 = vmax.f32 %v5761_v26, 0.0  ;;  %v12040_v14 = vadd.f32 %v5877_v38, %v11608_v56  ;;  %v6919_v26 = vld [vmem:[#allocation5 + $0x840] sm:$0xff] }
 0xade   : > { %6939 = vmatpush.msra.mxu0 %v6919_v26 }
 0xadf   : > { %5991 = vadd.xlane.f32.xlu0 %v12040_v14  ;;  %5926 = vmatmul.f32.gmra.mxu2 %v5796_v20  ;;  %v6074_v55 = vmul.f32 %v12040_v14, %v12040_v14 }
 0xae1   : > { %6119 = vadd.xlane.f32.xlu1 %v6074_v55 }
 0xae2   : > { %v5763_v53 = vpop.f32.mrf.mxu1  ;;  %v5879_v21 = vpop.f32.mrf.mxu2 }
 0xae3   : > { %v5764_v49 = vadd.f32 %v11900_v41, %v5763_v53  ;;  %v5880_v8 = vadd.f32 %v11930_v1, %v5879_v21 }
 0xae5   : > { %v5797_v12 = vmax.f32 %v5764_v49, 0.0  ;;  %v12048_v43 = vadd.f32 %v5880_v8, %v11623_v62 }
 0xae7   : > { %5993 = vadd.xlane.f32.xlu2 %v12048_v43  ;;  %5929 = vmatmul.f32.gmra.mxu2 %v5797_v12  ;;  %v6075_v61 = vmul.f32 %v12048_v43, %v12048_v43 }
 0xae9   : > { %6121 = vadd.xlane.f32.xlu0 %v6075_v61 }
 0xaea   : > { %v5966_v56 = vpop.xlane.xlu1 %5965  ;;  %v5882_v10 = vpop.f32.mrf.mxu2 }
 0xaeb   : > { %v6029_v25 = vmul.f32 %v5966_v56, %v8611_v52  ;;  %v5883_v62 = vadd.f32 %v11930_v1, %v5882_v10 }
 0xaec   : > { %v6094_v40 = vpop.xlane.xlu2 %6093 }
 0xaed   : > { %v6189_v23 = vmul.f32 %v6029_v25, %v6029_v25  ;;  %v6157_v41 = vmul.f32 %v6094_v40, %v8611_v52  ;;  %v12057_v46 = vadd.f32 %v5883_v62, %v11638_v60  ;;  %v12085_v62 = vld [vmem:[#allocation8 + $0x4] ss:$0 sm:$0xff] }
 0xaef   : > { %v6221_v58 = vsub.f32 %v6157_v41, %v6189_v23  ;;  %5995 = vadd.xlane.f32.xlu1 %v12057_v46  ;;  %v6076_v34 = vmul.f32 %v12057_v46, %v12057_v46 }
 0xaf1   : > { %v6285_v31 = vadd.f32 1e-05, %v6221_v58  ;;  %6123 = vadd.xlane.f32.xlu2 %v6076_v34  ;;  %v6253_v58 = vsub.f32 %v11935_v22, %v6029_v25 }
 0xaf2   : > { %v5968_v27 = vpop.xlane.xlu0 %5967  ;;  %v5885_v33 = vpop.f32.mrf.mxu2 }
 0xaf3   : > { %7839 = vrsqrt.f32 %v6285_v31  ;;  %v12063_v28 = vmul.f32 %v5968_v27, %v8611_v52  ;;  %v5886_v60 = vadd.f32 %v11930_v1, %v5885_v33  ;;  %vm6323_vm2 = vweird.f32 %v6285_v31 }
 0xaf4   : > { %v6096_v2 = vpop.xlane.xlu1 %6095 }
 0xaf5   : > { %v6190_v0 = vmul.f32 %v12063_v28, %v12063_v28  ;;  %v6158_v36 = vmul.f32 %v6096_v2, %v8611_v52  ;;  %v12070_v55 = vadd.f32 %v5886_v60, %v11659_v5  ;;  %v12091_v60 = vld [vmem:[#allocation10 + $0x4] ss:$0 sm:$0xff] }
 0xaf7   : > { %v6222_v54 = vsub.f32 %v6158_v36, %v6190_v0  ;;  %5997 = vadd.xlane.f32.xlu0 %v12070_v55  ;;  %v6077_v18 = vmul.f32 %v12070_v55, %v12070_v55 }
 0xaf9   : > { %v7840_v38 = vpop.eup %7839  ;;  %v6286_v53 = vadd.f32 1e-05, %v6222_v54  ;;  %6125 = vadd.xlane.f32.xlu1 %v6077_v18 }
 0xafa   : > { %v6318_v20 = vmul.f32 %v7840_v38, %v6285_v31  ;;  %v5970_v8 = vpop.xlane.xlu2 %5969  ;;  %v5888_v12 = vpop.f32.mrf.mxu2  ;;  %vm6324_vm1 = vweird.f32 %v7840_v38 }
 0xafb   : > { %7841 = vrsqrt.f32 %v6286_v53  ;;  %v12076_v37 = vmul.f32 %v5970_v8, %v8611_v52  ;;  %v5889_v5 = vadd.f32 %v11930_v1, %v5888_v12  ;;  %vm6325_vm3 = vmor %vm6323_vm2, %vm6324_vm1  ;;  %vm6333_vm5 = vweird.f32 %v6286_v53 }
 0xafc   : > { %v6319_v21 = vmul.f32 %v7840_v38, %v6318_v20  ;;  %v6098_v61 = vpop.xlane.xlu0 %6097 }
 0xafd   : > { %v6191_v41 = vmul.f32 %v12076_v37, %v12076_v37  ;;  %v12082_v10 = vadd.f32 %v5889_v5, %v11674_v9  ;;  %v6159_v34 = vmul.f32 %v6098_v61, %v8611_v52 }
 0xafe   : > { %v6320_v49 = vmul.f32 0.5, %v6319_v21  ;;  %v6918_v21 = vld [vmem:[#allocation5 + $0x838] sm:$0xff] }
 0xaff   : > { %5999 = vadd.xlane.f32.xlu2 %v12082_v10  ;;  %v6078_v31 = vmul.f32 %v12082_v10, %v12082_v10  ;;  %v6223_v33 = vsub.f32 %v6159_v34, %v6191_v41  ;;  %6940 = vmatpush.msra.mxu0 %v6918_v21 }
 0xb00   : > { %v6321_v56 = vsub.f32 1.5, %v6320_v49 }
 0xb01   : > { %v7842_v40 = vpop.eup %7841  ;;  %6127 = vadd.xlane.f32.xlu0 %v6078_v31  ;;  %v12094_v25 = vadd.f32 1e-05, %v6223_v33 }
 0xb02   : > { %v6322_v23 = vmul.f32 %v7840_v38, %v6321_v56  ;;  %v6328_v27 = vmul.f32 %v7842_v40, %v6286_v53  ;;  %v5972_v54 = vpop.xlane.xlu1 %5971  ;;  %v5891_v26 = vpop.f32.mrf.mxu2  ;;  %vm6334_vm4 = vweird.f32 %v7842_v40 }
 0xb03   : > { %v5892_v20 = vadd.f32 %v11930_v1, %v5891_v26  ;;  %7843 = vrsqrt.f32 %v12094_v25  ;;  %vm6335_vm6 = vmor %vm6333_vm5, %vm6334_vm4  ;;  %vm6343_vm8 = vweird.f32 %v12094_v25 }
 0xb04   : > { %v6326_v2 = vsel %vm6325_vm3, %v7840_v38, %v6322_v23  ;;  %v6329_v36 = vmul.f32 %v7842_v40, %v6328_v27  ;;  %v12097_v38 = vmul.f32 %v5972_v54, %v8611_v52  ;;  %v6100_v49 = vpop.xlane.xlu2 %6099  ;;  %v6254_v23 = vsub.f32 %v11943_v32, %v12063_v28 }
 0xb05   : > { %v6637_v0 = vmul.f32 %v6326_v2, %v6253_v58  ;;  %v12107_v56 = vadd.f32 %v5892_v20, %v11690_v57  ;;  %v6160_v5 = vmul.f32 %v6100_v49, %v8611_v52 }
 0xb06   : > { %v6330_v22 = vmul.f32 0.5, %v6329_v36  ;;  %v6192_v12 = vmul.f32 %v12097_v38, %v12097_v38 }
 0xb07   : > { %v6674_v9 = vmul.f32 %v12085_v62, %v6637_v0  ;;  %6001 = vadd.xlane.f32.xlu1 %v12107_v56  ;;  %v6079_v58 = vmul.f32 %v12107_v56, %v12107_v56  ;;  %v7093_v0 = vld [vmem:[#allocation5 + $0x8f8] sm:$0xff] }
 0xb08   : > { %v6331_v18 = vsub.f32 1.5, %v6330_v22  ;;  %v6224_v41 = vsub.f32 %v6160_v5, %v6192_v12  ;;  %7099 = vmatpush.msra.mxu1 %v7093_v0 }
 0xb09   : > { %v12102_v8 = vadd.f32 %v12091_v60, %v6674_v9  ;;  %6129 = vadd.xlane.f32.xlu2 %v6079_v58  ;;  %v7844_v2 = vpop.eup %7843 }
 0xb0a   : > { %v6332_v61 = vmul.f32 %v7842_v40, %v6331_v18  ;;  %v12116_v34 = vadd.f32 1e-05, %v6224_v41  ;;  %v5894_v31 = vpop.f32.mrf.mxu2  ;;  %v5974_v53 = vpop.xlane.xlu0 %5973  ;;  %v6338_v36 = vmul.f32 %v7844_v2, %v12094_v25  ;;  %vm6344_vm7 = vweird.f32 %v7844_v2 }
 0xb0b   : > { %6781 = vmatmul.f32.vlgmr.msra.gmra.mxu3 %v12102_v8  ;;  %v5895_v32 = vadd.f32 %v11930_v1, %v5894_v31  ;;  %v12122_v28 = vmul.f32 %v5974_v53, %v8611_v52  ;;  %v6917_v31 = vld [vmem:[#allocation5 + $0x830] sm:$0xff]  ;;  %vm6345_vm9 = vmor %vm6343_vm8, %vm6344_vm7 }
 0xb0c   : > { %v6336_v27 = vsel %vm6335_vm6, %v7842_v40, %v6332_v61  ;;  %7845 = vrsqrt.f32 %v12116_v34  ;;  %v6102_v33 = vpop.xlane.xlu1 %6101  ;;  %v6339_v9 = vmul.f32 %v7844_v2, %v6338_v36  ;;  %6941 = vmatpush.msra.mxu0 %v6917_v31  ;;  %v6255_v36 = vsub.f32 %v11952_v59, %v12076_v37 }
 0xb0d   : > { %v6638_v57 = vmul.f32 %v6336_v27, %v6254_v23  ;;  %v6161_v22 = vmul.f32 %v6102_v33, %v8611_v52  ;;  %v12127_v54 = vadd.f32 %v5895_v32, %v11707_v19  ;;  %v6193_v26 = vmul.f32 %v12122_v28, %v12122_v28 }
 0xb0e   : > { %v6340_v21 = vmul.f32 0.5, %v6339_v9  ;;  %vm6353_vm11 = vweird.f32 %v12116_v34 }
 0xb0f   : > { %v6675_v40 = vmul.f32 %v12085_v62, %v6638_v57  ;;  %v6225_v18 = vsub.f32 %v6161_v22, %v6193_v26  ;;  %6003 = vadd.xlane.f32.xlu0 %v12127_v54  ;;  %v6080_v49 = vmul.f32 %v12127_v54, %v12127_v54 }
 0xb10   : > { %v6341_v5 = vsub.f32 1.5, %v6340_v21 }
 0xb11   : > { %v12132_v20 = vadd.f32 %v12091_v60, %v6675_v40  ;;  %v12139_v61 = vadd.f32 1e-05, %v6225_v18  ;;  %6131 = vadd.xlane.f32.xlu1 %v6080_v49 }
 0xb12   : > { %v7846_v12 = vpop.eup %7845  ;;  %v5976_v23 = vpop.xlane.xlu2 %5975  ;;  %v6342_v58 = vmul.f32 %v7844_v2, %v6341_v5 }
 0xb13   : > { %6784 = vmatmul.f32.gmra.mxu3 %v12132_v20  ;;  %v6348_v19 = vmul.f32 %v7846_v12, %v12116_v34  ;;  %v5897_v41 = vpop.f32.mrf.mxu2  ;;  %v12142_v27 = vmul.f32 %v5976_v23, %v8611_v52  ;;  %7847 = vrsqrt.f32 %v12139_v61  ;;  %vm6354_vm10 = vweird.f32 %v7846_v12 }
 0xb14   : > { %v5898_v57 = vadd.f32 %v11930_v1, %v5897_v41  ;;  %v6104_v0 = vpop.xlane.xlu0 %6103  ;;  %v6346_v25 = vsel %vm6345_vm9, %v7844_v2, %v6342_v58  ;;  %v6256_v23 = vsub.f32 %v11960_v47, %v12097_v38  ;;  %vm6355_vm12 = vmor %vm6353_vm11, %vm6354_vm10  ;;  %vm6363_vm14 = vweird.f32 %v12139_v61 }
 0xb15   : > { %v6349_v53 = vmul.f32 %v7846_v12, %v6348_v19  ;;  %v6194_v32 = vmul.f32 %v12142_v27, %v12142_v27  ;;  %v6162_v40 = vmul.f32 %v6104_v0, %v8611_v52  ;;  %v6639_v21 = vmul.f32 %v6346_v25, %v6255_v36  ;;  %v7092_v19 = vld [vmem:[#allocation5 + $0x8f0] sm:$0xff] }
 0xb16   : > { %v12153_v33 = vadd.f32 %v5898_v57, %v11726_v4  ;;  %7100 = vmatpush.msra.mxu1 %v7092_v19 }
 0xb17   : > { %v6350_v9 = vmul.f32 0.5, %v6349_v53  ;;  %v6226_v22 = vsub.f32 %v6162_v40, %v6194_v32  ;;  %v6676_v18 = vmul.f32 %v12085_v62, %v6639_v21 }
 0xb18   : > { %6005 = vadd.xlane.f32.xlu2 %v12153_v33  ;;  %v6081_v26 = vmul.f32 %v12153_v33, %v12153_v33 }
 0xb19   : > { %v6351_v59 = vsub.f32 1.5, %v6350_v9  ;;  %v12159_v37 = vadd.f32 1e-05, %v6226_v22  ;;  %v7848_v4 = vpop.eup %7847  ;;  %v12172_v31 = vadd.f32 %v12091_v60, %v6676_v18 }
 0xb1a   : > { %6133 = vadd.xlane.f32.xlu0 %v6081_v26  ;;  %v5978_v5 = vpop.xlane.xlu1 %5977  ;;  %v6358_v41 = vmul.f32 %v7848_v4, %v12139_v61  ;;  %vm6364_vm13 = vweird.f32 %v7848_v4 }
 0xb1b   : > { %v6352_v49 = vmul.f32 %v7846_v12, %v6351_v59  ;;  %v5900_v2 = vpop.f32.mrf.mxu2  ;;  %7849 = vrsqrt.f32 %v12159_v37  ;;  %v12168_v58 = vmul.f32 %v5978_v5, %v8611_v52  ;;  %6787 = vmatmul.f32.gmra.mxu3 %v12172_v31  ;;  %vm6365_vm15 = vmor %vm6363_vm14, %vm6364_vm13  ;;  %vm6373_vm1 = vweird.f32 %v12159_v37 }
 0xb1c   : > { %v5901_v57 = vadd.f32 %v11930_v1, %v5900_v2  ;;  %v6106_v34 = vpop.xlane.xlu2 %6105  ;;  %v6359_v0 = vmul.f32 %v7848_v4, %v6358_v41 }
 0xb1d   : > { %v6356_v53 = vsel %vm6355_vm12, %v7846_v12, %v6352_v49  ;;  %v6163_v36 = vmul.f32 %v6106_v34, %v8611_v52  ;;  %v6195_v38 = vmul.f32 %v12168_v58, %v12168_v58  ;;  %v6257_v34 = vsub.f32 %v11968_v6, %v12122_v28 }
 0xb1e   : > { %v6640_v47 = vmul.f32 %v6356_v53, %v6256_v23  ;;  %v12178_v32 = vadd.f32 %v5901_v57, %v11745_v29  ;;  %v6360_v40 = vmul.f32 0.5, %v6359_v0  ;;  %v6916_v23 = vld [vmem:[#allocation5 + $0x828] sm:$0xff] }
 0xb1f   : > { %v6227_v25 = vsub.f32 %v6163_v36, %v6195_v38  ;;  %6942 = vmatpush.msra.mxu0 %v6916_v23 }
 0xb20   : > { %v6677_v9 = vmul.f32 %v12085_v62, %v6640_v47  ;;  %6007 = vadd.xlane.f32.xlu1 %v12178_v32  ;;  %v6082_v12 = vmul.f32 %v12178_v32, %v12178_v32  ;;  %v6361_v26 = vsub.f32 1.5, %v6360_v40 }
 0xb21   : > { %v7850_v22 = vpop.eup %7849  ;;  %v12186_v59 = vadd.f32 1e-05, %v6227_v25 }
 0xb22   : > { %v6368_v21 = vmul.f32 %v7850_v22, %v12159_v37  ;;  %6135 = vadd.xlane.f32.xlu2 %v6082_v12  ;;  %v5980_v18 = vpop.xlane.xlu0 %5979  ;;  %v12189_v49 = vadd.f32 %v12091_v60, %v6677_v9  ;;  %v6362_v5 = vmul.f32 %v7848_v4, %v6361_v26  ;;  %vm6374_vm0 = vweird.f32 %v7850_v22 }
 0xb23   : > { %v5903_v29 = vpop.f32.mrf.mxu2  ;;  %v12193_v19 = vmul.f32 %v5980_v18, %v8611_v52  ;;  %7851 = vrsqrt.f32 %v12186_v59  ;;  %vm6375_vm2 = vmor %vm6373_vm1, %vm6374_vm0  ;;  %vm6383_vm4 = vweird.f32 %v12186_v59 }
 0xb24   : > { %v5904_v2 = vadd.f32 %v11930_v1, %v5903_v29  ;;  %v6369_v41 = vmul.f32 %v7850_v22, %v6368_v21  ;;  %v6108_v57 = vpop.xlane.xlu1 %6107  ;;  %6790 = vmatmul.f32.gmra.mxu3 %v12189_v49  ;;  %v6366_v61 = vsel %vm6365_vm15, %v7848_v4, %v6362_v5  ;;  %v7091_v21 = vld [vmem:[#allocation5 + $0x8e8] sm:$0xff]  ;;  %v6258_v29 = vsub.f32 %v11976_v50, %v12142_v27 }
 0xb25   : > { %v6196_v0 = vmul.f32 %v12193_v19, %v12193_v19  ;;  %v6164_v36 = vmul.f32 %v6108_v57, %v8611_v52  ;;  %v6641_v28 = vmul.f32 %v6366_v61, %v6257_v34  ;;  %7101 = vmatpush.msra.mxu1 %v7091_v21 }
 0xb26   : > { %v12201_v53 = vadd.f32 %v5904_v2, %v11764_v16  ;;  %v6370_v47 = vmul.f32 0.5, %v6369_v41 }
 0xb27   : > { %v6228_v38 = vsub.f32 %v6164_v36, %v6196_v0  ;;  %v6678_v9 = vmul.f32 %v12085_v62, %v6641_v28 }
 0xb28   : > { %6009 = vadd.xlane.f32.xlu0 %v12201_v53  ;;  %v6083_v6 = vmul.f32 %v12201_v53, %v12201_v53  ;;  %v6371_v40 = vsub.f32 1.5, %v6370_v47 }
 0xb29   : > { %v12210_v16 = vadd.f32 1e-05, %v6228_v38  ;;  %v7852_v25 = vpop.eup %7851  ;;  %v12223_v23 = vadd.f32 %v12091_v60, %v6678_v9 }
 0xb2a   : > { %6137 = vadd.xlane.f32.xlu1 %v6083_v6  ;;  %v6372_v12 = vmul.f32 %v7850_v22, %v6371_v40  ;;  %v5982_v26 = vpop.xlane.xlu2 %5981  ;;  %v6378_v18 = vmul.f32 %v7852_v25, %v12186_v59  ;;  %vm6384_vm3 = vweird.f32 %v7852_v25 }
 0xb2b   : > { %v5906_v4 = vpop.f32.mrf.mxu2  ;;  %7853 = vrsqrt.f32 %v12210_v16  ;;  %v12219_v5 = vmul.f32 %v5982_v26, %v8611_v52  ;;  %vm6385_vm5 = vmor %vm6383_vm4, %vm6384_vm3  ;;  %vm6393_vm7 = vweird.f32 %v12210_v16 }
 0xb2c   : > { %v5907_v2 = vadd.f32 %v11930_v1, %v5906_v4  ;;  %v6110_v37 = vpop.xlane.xlu0 %6109  ;;  %v6376_v41 = vsel %vm6375_vm2, %v7850_v22, %v6372_v12  ;;  %v6379_v57 = vmul.f32 %v7852_v25, %v6378_v18  ;;  %6793 = vmatmul.f32.gmra.mxu3 %v12223_v23 }
 0xb2d   : > { %v6165_v34 = vmul.f32 %v6110_v37, %v8611_v52  ;;  %v6642_v50 = vmul.f32 %v6376_v41, %v6258_v29  ;;  %v6197_v27 = vmul.f32 %v12219_v5, %v12219_v5  ;;  %v6915_v29 = vld [vmem:[#allocation5 + $0x820] sm:$0xff]  ;;  %v6259_v37 = vsub.f32 %v11984_v7, %v12168_v58 }
 0xb2e   : > { %v12229_v0 = vadd.f32 %v5907_v2, %v11783_v13  ;;  %v6380_v36 = vmul.f32 0.5, %v6379_v57  ;;  %6943 = vmatpush.msra.mxu0 %v6915_v29 }
 0xb2f   : > { %v6679_v47 = vmul.f32 %v12085_v62, %v6642_v50  ;;  %v6229_v61 = vsub.f32 %v6165_v34, %v6197_v27 }
 0xb30   : > { %6011 = vadd.xlane.f32.xlu2 %v12229_v0  ;;  %v6084_v22 = vmul.f32 %v12229_v0, %v12229_v0  ;;  %v6381_v6 = vsub.f32 1.5, %v6380_v36 }
 0xb31   : > { %v7854_v38 = vpop.eup %7853  ;;  %v12237_v40 = vadd.f32 1e-05, %v6229_v61  ;;  %v12240_v12 = vadd.f32 %v12091_v60, %v6679_v47 }
 0xb32   : > { %v6388_v28 = vmul.f32 %v7854_v38, %v12210_v16  ;;  %6139 = vadd.xlane.f32.xlu0 %v6084_v22  ;;  %v5984_v13 = vpop.xlane.xlu1 %5983  ;;  %v6382_v26 = vmul.f32 %v7852_v25, %v6381_v6  ;;  %vm6394_vm6 = vweird.f32 %v7854_v38 }
 0xb33   : > { %v5909_v9 = vpop.f32.mrf.mxu2  ;;  %v12243_v4 = vmul.f32 %v5984_v13, %v8611_v52  ;;  %7855 = vrsqrt.f32 %v12237_v40  ;;  %v6260_v13 = vsub.f32 %v11992_v63, %v12193_v19  ;;  %vm6395_vm8 = vmor %vm6393_vm7, %vm6394_vm6  ;;  %vm6403_vm10 = vweird.f32 %v12237_v40 }
 0xb34   : > { %v5910_v21 = vadd.f32 %v11930_v1, %v5909_v9  ;;  %v6389_v18 = vmul.f32 %v7854_v38, %v6388_v28  ;;  %v6112_v2 = vpop.xlane.xlu2 %6111  ;;  %6796 = vmatmul.f32.gmra.mxu3 %v12240_v12  ;;  %v6386_v59 = vsel %vm6385_vm5, %v7852_v25, %v6382_v26  ;;  %v7090_v28 = vld [vmem:[#allocation5 + $0x8e0] sm:$0xff] }
 0xb35   : > { %v6198_v41 = vmul.f32 %v12243_v4, %v12243_v4  ;;  %v6166_v34 = vmul.f32 %v6112_v2, %v8611_v52  ;;  %v6643_v58 = vmul.f32 %v6386_v59, %v6259_v37  ;;  %7102 = vmatpush.msra.mxu1 %v7090_v28 }
 0xb36   : > { %v12254_v57 = vadd.f32 %v5910_v21, %v11802_v24  ;;  %v6390_v50 = vmul.f32 0.5, %v6389_v18 }
 0xb37   : > { %v6230_v27 = vsub.f32 %v6166_v34, %v6198_v41  ;;  %v6680_v24 = vmul.f32 %v12085_v62, %v6643_v58 }
 0xb38   : > { %6013 = vadd.xlane.f32.xlu1 %v12254_v57  ;;  %v6085_v7 = vmul.f32 %v12254_v57, %v12254_v57  ;;  %v6391_v36 = vsub.f32 1.5, %v6390_v50 }
 0xb39   : > { %v12261_v47 = vadd.f32 1e-05, %v6230_v27  ;;  %v7856_v61 = vpop.eup %7855  ;;  %v12274_v29 = vadd.f32 %v12091_v60, %v6680_v24 }
 0xb3a   : > { %6141 = vadd.xlane.f32.xlu2 %v6085_v7  ;;  %v6392_v22 = vmul.f32 %v7854_v38, %v6391_v36  ;;  %v5986_v25 = vpop.xlane.xlu0 %5985  ;;  %v6398_v9 = vmul.f32 %v7856_v61, %v12237_v40  ;;  %vm6404_vm9 = vweird.f32 %v7856_v61 }
 0xb3b   : > { %v5912_v6 = vpop.f32.mrf.mxu2  ;;  %7857 = vrsqrt.f32 %v12261_v47  ;;  %v12271_v21 = vmul.f32 %v5986_v25, %v8611_v52  ;;  %vm6405_vm11 = vmor %vm6403_vm10, %vm6404_vm9  ;;  %vm6413_vm13 = vweird.f32 %v12261_v47 }
 0xb3c   : > { %v5913_v26 = vadd.f32 %v11930_v1, %v5912_v6  ;;  %v6114_v16 = vpop.xlane.xlu1 %6113  ;;  %v6396_v18 = vsel %vm6395_vm8, %v7854_v38, %v6392_v22  ;;  %v6399_v2 = vmul.f32 %v7856_v61, %v6398_v9  ;;  %6799 = vmatmul.f32.gmra.mxu3 %v12274_v29 }
 0xb3d   : > { %v6167_v37 = vmul.f32 %v6114_v16, %v8611_v52  ;;  %v6644_v63 = vmul.f32 %v6396_v18, %v6260_v13  ;;  %v6199_v41 = vmul.f32 %v12271_v21, %v12271_v21  ;;  %v6914_v13 = vld [vmem:[#allocation5 + $0x818] sm:$0xff]  ;;  %v6261_v16 = vsub.f32 %v12000_v48, %v12219_v5 }
 0xb3e   : > { %v12278_v19 = vadd.f32 %v5913_v26, %v11821_v44  ;;  %v6400_v34 = vmul.f32 0.5, %v6399_v2  ;;  %6944 = vmatpush.msra.mxu0 %v6914_v13 }
 0xb3f   : > { %v6681_v50 = vmul.f32 %v12085_v62, %v6644_v63  ;;  %v6231_v59 = vsub.f32 %v6167_v37, %v6199_v41 }
 0xb40   : > { %6015 = vadd.xlane.f32.xlu0 %v12278_v19  ;;  %v6086_v38 = vmul.f32 %v12278_v19, %v12278_v19  ;;  %v6401_v7 = vsub.f32 1.5, %v6400_v34 }
 0xb41   : > { %v7858_v27 = vpop.eup %7857  ;;  %v12288_v58 = vadd.f32 1e-05, %v6231_v59  ;;  %v12291_v22 = vadd.f32 %v12091_v60, %v6681_v50 }
 0xb42   : > { %v6408_v44 = vmul.f32 %v7858_v27, %v12261_v47  ;;  %6143 = vadd.xlane.f32.xlu1 %v6086_v38  ;;  %v5988_v36 = vpop.xlane.xlu2 %5987  ;;  %v6402_v6 = vmul.f32 %v7856_v61, %v6401_v7  ;;  %vm6414_vm12 = vweird.f32 %v7858_v27  ;;  %v7089_v7 = vld [vmem:[#allocation5 + $0x8d8] sm:$0xff] }
 0xb43   : > { %v5915_v24 = vpop.f32.mrf.mxu2  ;;  %v12294_v25 = vmul.f32 %v5988_v36, %v8611_v52  ;;  %7859 = vrsqrt.f32 %v12288_v58  ;;  %vm6415_vm14 = vmor %vm6413_vm13, %vm6414_vm12  ;;  %7103 = vmatpush.msra.mxu1 %v7089_v7  ;;  %vm6423_vm0 = vweird.f32 %v12288_v58 }
 0xb44   : > { %v5916_v28 = vadd.f32 %v11930_v1, %v5915_v24  ;;  %v6409_v9 = vmul.f32 %v7858_v27, %v6408_v44  ;;  %v6116_v26 = vpop.xlane.xlu0 %6115  ;;  %6802 = vmatmul.f32.gmra.mxu3 %v12291_v22  ;;  %v6406_v40 = vsel %vm6405_vm11, %v7856_v61, %v6402_v6  ;;  %v6262_v44 = vsub.f32 %v12008_v42, %v12243_v4  ;;  %v12323_v6 = vld [vmem:[#allocation7 + $0xe] ss:$0 sm:$0xff] }
 0xb45   : > { %v6200_v18 = vmul.f32 %v12294_v25, %v12294_v25  ;;  %v6168_v1 = vmul.f32 %v6116_v26, %v8611_v52  ;;  %v6645_v5 = vmul.f32 %v6406_v40, %v6261_v16 }
 0xb46   : > { %v12305_v2 = vadd.f32 %v5916_v28, %v11840_v39  ;;  %v6410_v37 = vmul.f32 0.5, %v6409_v9 }
 0xb47   : > { %v6232_v63 = vsub.f32 %v6168_v1, %v6200_v18  ;;  %v6682_v39 = vmul.f32 %v12085_v62, %v6645_v5 }
 0xb48   : > { %6017 = vadd.xlane.f32.xlu2 %v12305_v2  ;;  %v6087_v48 = vmul.f32 %v12305_v2, %v12305_v2  ;;  %v6411_v41 = vsub.f32 1.5, %v6410_v37 }
 0xb49   : > { %v12312_v34 = vadd.f32 1e-05, %v6232_v63  ;;  %v7860_v50 = vpop.eup %7859  ;;  %v12327_v47 = vadd.f32 %v12091_v60, %v6682_v39 }
 0xb4a   : > { %6145 = vadd.xlane.f32.xlu0 %v6087_v48  ;;  %v6412_v59 = vmul.f32 %v7858_v27, %v6411_v41  ;;  %v5990_v38 = vpop.xlane.xlu1 %5989  ;;  %v6418_v36 = vmul.f32 %v7860_v50, %v12288_v58  ;;  %vm6424_vm15 = vweird.f32 %v7860_v50 }
 0xb4b   : > { %v5918_v61 = vpop.f32.mrf.mxu2  ;;  %7861 = vrsqrt.f32 %v12312_v34  ;;  %v12321_v24 = vmul.f32 %v5990_v38, %v8611_v52  ;;  %vm6425_vm1 = vmor %vm6423_vm0, %vm6424_vm15  ;;  %vm6433_vm3 = vweird.f32 %v12312_v34 }
 0xb4c   : > { %v5919_v28 = vadd.f32 %v12323_v6, %v5918_v61  ;;  %v6118_v13 = vpop.xlane.xlu2 %6117  ;;  %v6416_v9 = vsel %vm6415_vm14, %v7858_v27, %v6412_v59  ;;  %v6419_v26 = vmul.f32 %v7860_v50, %v6418_v36  ;;  %6805 = vmatmul.f32.gmra.mxu3 %v12327_v47 }
 0xb4d   : > { %v6169_v42 = vmul.f32 %v6118_v13, %v8611_v52  ;;  %v6646_v4 = vmul.f32 %v6416_v9, %v6262_v44  ;;  %v6201_v16 = vmul.f32 %v12321_v24, %v12321_v24  ;;  %v6913_v44 = vld [vmem:[#allocation5 + $0x810] sm:$0xff]  ;;  %v6263_v13 = vsub.f32 %v12016_v45, %v12271_v21 }
 0xb4e   : > { %v12333_v18 = vadd.f32 %v5919_v28, %v11857_v3  ;;  %v6420_v1 = vmul.f32 0.5, %v6419_v26  ;;  %6945 = vmatpush.msra.mxu0 %v6913_v44 }
 0xb4f   : > { %v6683_v37 = vmul.f32 %v12085_v62, %v6646_v4  ;;  %v6233_v40 = vsub.f32 %v6169_v42, %v6201_v16 }
 0xb50   : > { %6019 = vadd.xlane.f32.xlu1 %v12333_v18  ;;  %v6088_v27 = vmul.f32 %v12333_v18, %v12333_v18  ;;  %v6421_v48 = vsub.f32 1.5, %v6420_v1 }
 0xb51   : > { %v7862_v63 = vpop.eup %7861  ;;  %v12341_v41 = vadd.f32 1e-05, %v6233_v40  ;;  %v12344_v59 = vadd.f32 %v12091_v60, %v6683_v37 }
 0xb52   : > { %v6428_v5 = vmul.f32 %v7862_v63, %v12312_v34  ;;  %6147 = vadd.xlane.f32.xlu2 %v6088_v27  ;;  %v5992_v39 = vpop.xlane.xlu0 %5991  ;;  %v6422_v38 = vmul.f32 %v7860_v50, %v6421_v48  ;;  %vm6434_vm2 = vweird.f32 %v7862_v63 }
 0xb53   : > { %v5921_v3 = vpop.f32.mrf.mxu2  ;;  %v12348_v7 = vmul.f32 %v5992_v39, %v8611_v52  ;;  %7863 = vrsqrt.f32 %v12341_v41  ;;  %vm6435_vm4 = vmor %vm6433_vm3, %vm6434_vm2  ;;  %vm6443_vm6 = vweird.f32 %v12341_v41 }
 0xb54   : > { %v5922_v61 = vadd.f32 %v12323_v6, %v5921_v3  ;;  %v6429_v36 = vmul.f32 %v7862_v63, %v6428_v5  ;;  %v6120_v28 = vpop.xlane.xlu1 %6119  ;;  %6808 = vmatmul.f32.gmra.mxu3 %v12344_v59  ;;  %v6426_v58 = vsel %vm6425_vm1, %v7860_v50, %v6422_v38  ;;  %v7088_v5 = vld [vmem:[#allocation5 + $0x8d0] sm:$0xff]  ;;  %v6264_v3 = vsub.f32 %v12024_v17, %v12294_v25 }
 0xb55   : > { %v6202_v26 = vmul.f32 %v12348_v7, %v12348_v7  ;;  %v6170_v42 = vmul.f32 %v6120_v28, %v8611_v52  ;;  %v6647_v21 = vmul.f32 %v6426_v58, %v6263_v13  ;;  %7104 = vmatpush.msra.mxu1 %v7088_v5 }
 0xb56   : > { %v12356_v9 = vadd.f32 %v5922_v61, %v11872_v35  ;;  %v6430_v4 = vmul.f32 0.5, %v6429_v36 }
 0xb57   : > { %v6234_v16 = vsub.f32 %v6170_v42, %v6202_v26  ;;  %v6684_v37 = vmul.f32 %v12085_v62, %v6647_v21 }
 0xb58   : > { %6021 = vadd.xlane.f32.xlu0 %v12356_v9  ;;  %v6089_v45 = vmul.f32 %v12356_v9, %v12356_v9  ;;  %v6431_v1 = vsub.f32 1.5, %v6430_v4 }
 0xb59   : > { %v12365_v35 = vadd.f32 1e-05, %v6234_v16  ;;  %v7864_v40 = vpop.eup %7863  ;;  %v12378_v44 = vadd.f32 %v12091_v60, %v6684_v37 }
 0xb5a   : > { %6149 = vadd.xlane.f32.xlu1 %v6089_v45  ;;  %v6432_v27 = vmul.f32 %v7862_v63, %v6431_v1  ;;  %v5994_v48 = vpop.xlane.xlu2 %5993  ;;  %v6438_v39 = vmul.f32 %v7864_v40, %v12341_v41  ;;  %vm6444_vm5 = vweird.f32 %v7864_v40 }
 0xb5b   : > { %v5924_v50 = vpop.f32.mrf.mxu2  ;;  %7865 = vrsqrt.f32 %v12365_v35  ;;  %v12374_v38 = vmul.f32 %v5994_v48, %v8611_v52  ;;  %vm6445_vm7 = vmor %vm6443_vm6, %vm6444_vm5  ;;  %vm6453_vm9 = vweird.f32 %v12365_v35 }
 0xb5c   : > { %v5925_v61 = vadd.f32 %v12323_v6, %v5924_v50  ;;  %v6122_v34 = vpop.xlane.xlu0 %6121  ;;  %v6436_v36 = vsel %vm6435_vm4, %v7862_v63, %v6432_v27  ;;  %v6439_v28 = vmul.f32 %v7864_v40, %v6438_v39  ;;  %6811 = vmatmul.f32.gmra.mxu3 %v12378_v44 }
 0xb5d   : > { %v6171_v13 = vmul.f32 %v6122_v34, %v8611_v52  ;;  %v6648_v17 = vmul.f32 %v6436_v36, %v6264_v3  ;;  %v6203_v25 = vmul.f32 %v12374_v38, %v12374_v38  ;;  %v6912_v3 = vld [vmem:[#allocation5 + $0x808] sm:$0xff]  ;;  %v6265_v34 = vsub.f32 %v12032_v30, %v12321_v24 }
 0xb5e   : > { %v12384_v26 = vadd.f32 %v5925_v61, %v11881_v11  ;;  %v6440_v42 = vmul.f32 0.5, %v6439_v28  ;;  %6946 = vmatpush.msra.mxu0 %v6912_v3 }
 0xb5f   : > { %v6685_v4 = vmul.f32 %v12085_v62, %v6648_v17  ;;  %v6235_v58 = vsub.f32 %v6171_v13, %v6203_v25 }
 0xb60   : > { %6023 = vadd.xlane.f32.xlu2 %v12384_v26  ;;  %v6090_v63 = vmul.f32 %v12384_v26, %v12384_v26  ;;  %v6441_v45 = vsub.f32 1.5, %v6440_v42 }
 0xb61   : > { %v7866_v16 = vpop.eup %7865  ;;  %v12392_v1 = vadd.f32 1e-05, %v6235_v58  ;;  %v12395_v27 = vadd.f32 %v12091_v60, %v6685_v4 }
 0xb62   : > { %v6448_v21 = vmul.f32 %v7866_v16, %v12365_v35  ;;  %6151 = vadd.xlane.f32.xlu0 %v6090_v63  ;;  %v5996_v11 = vpop.xlane.xlu1 %5995  ;;  %v6442_v48 = vmul.f32 %v7864_v40, %v6441_v45  ;;  %vm6454_vm8 = vweird.f32 %v7866_v16 }
 0xb63   : > { %v5927_v37 = vpop.f32.mrf.mxu2  ;;  %v12398_v50 = vmul.f32 %v5996_v11, %v8611_v52  ;;  %7867 = vrsqrt.f32 %v12392_v1  ;;  %v6266_v11 = vsub.f32 %v12040_v14, %v12348_v7  ;;  %vm6455_vm10 = vmor %vm6453_vm9, %vm6454_vm8  ;;  %vm6463_vm12 = vweird.f32 %v12392_v1 }
 0xb64   : > { %v5928_v5 = vadd.f32 %v12323_v6, %v5927_v37  ;;  %v6449_v39 = vmul.f32 %v7866_v16, %v6448_v21  ;;  %v6124_v61 = vpop.xlane.xlu2 %6123  ;;  %6814 = vmatmul.f32.gmra.mxu3 %v12395_v27  ;;  %v6446_v41 = vsel %vm6445_vm7, %v7864_v40, %v6442_v48  ;;  %v7087_v21 = vld [vmem:[#allocation5 + $0x8c8] sm:$0xff] }
 0xb65   : > { %v6204_v36 = vmul.f32 %v12398_v50, %v12398_v50  ;;  %v6172_v13 = vmul.f32 %v6124_v61, %v8611_v52  ;;  %v6649_v24 = vmul.f32 %v6446_v41, %v6265_v34  ;;  %7105 = vmatpush.msra.mxu1 %v7087_v21 }
 0xb66   : > { %v12409_v28 = vadd.f32 %v5928_v5, %v11889_v51  ;;  %v6450_v17 = vmul.f32 0.5, %v6449_v39 }
 0xb67   : > { %v6236_v25 = vsub.f32 %v6172_v13, %v6204_v36  ;;  %v6686_v51 = vmul.f32 %v12085_v62, %v6649_v24 }
 0xb68   : > { %6025 = vadd.xlane.f32.xlu1 %v12409_v28  ;;  %v6091_v30 = vmul.f32 %v12409_v28, %v12409_v28  ;;  %v6451_v42 = vsub.f32 1.5, %v6450_v17 }
 0xb69   : > { %v12416_v4 = vadd.f32 1e-05, %v6236_v25  ;;  %v7868_v58 = vpop.eup %7867  ;;  %v12429_v3 = vadd.f32 %v12091_v60, %v6686_v51 }
 0xb6a   : > { %6153 = vadd.xlane.f32.xlu2 %v6091_v30  ;;  %v6452_v63 = vmul.f32 %v7866_v16, %v6451_v42  ;;  %v5998_v40 = vpop.xlane.xlu0 %5997  ;;  %v6458_v37 = vmul.f32 %v7868_v58, %v12392_v1  ;;  %vm6464_vm11 = vweird.f32 %v7868_v58 }
 0xb6b   : > { %v5930_v45 = vpop.f32.mrf.mxu2  ;;  %7869 = vrsqrt.f32 %v12416_v4  ;;  %v12426_v5 = vmul.f32 %v5998_v40, %v8611_v52  ;;  %v6267_v40 = vsub.f32 %v12048_v43, %v12374_v38  ;;  %vm6465_vm13 = vmor %vm6463_vm12, %vm6464_vm11  ;;  %vm6473_vm15 = vweird.f32 %v12416_v4 }
 0xb6c   : > { %v5931_v48 = vadd.f32 %v12323_v6, %v5930_v45  ;;  %v6126_v35 = vpop.xlane.xlu1 %6125  ;;  %v6456_v39 = vsel %vm6455_vm10, %v7866_v16, %v6452_v63  ;;  %v6459_v61 = vmul.f32 %v7868_v58, %v6458_v37  ;;  %6817 = vmatmul.f32.gmra.mxu3 %v12429_v3  ;;  %v6911_v45 = vld [vmem:[#allocation5 + $0x800] sm:$0xff] }
 0xb6d   : > { %v6173_v34 = vmul.f32 %v6126_v35, %v8611_v52  ;;  %v6650_v14 = vmul.f32 %v6456_v39, %v6266_v11  ;;  %v6205_v36 = vmul.f32 %v12426_v5, %v12426_v5  ;;  %6947 = vmatpush.msra.mxu0 %v6911_v45 }
 0xb6e   : > { %v12433_v7 = vadd.f32 %v5931_v48, %v11897_v15  ;;  %v6460_v6 = vmul.f32 0.5, %v6459_v61 }
 0xb6f   : > { %v6687_v13 = vmul.f32 %v12085_v62, %v6650_v14  ;;  %v6237_v17 = vsub.f32 %v6173_v34, %v6205_v36 }
 0xb70   : > { %6027 = vadd.xlane.f32.xlu0 %v12433_v7  ;;  %v6092_v16 = vmul.f32 %v12433_v7, %v12433_v7  ;;  %v6461_v25 = vsub.f32 1.5, %v6460_v6 }
 0xb71   : > { %v7870_v41 = vpop.eup %7869  ;;  %v6301_v30 = vadd.f32 1e-05, %v6237_v17  ;;  %v12444_v42 = vadd.f32 %v12091_v60, %v6687_v13 }
 0xb72   : > { %v6468_v15 = vmul.f32 %v7870_v41, %v12416_v4  ;;  %6155 = vadd.xlane.f32.xlu1 %v6092_v16  ;;  %v6000_v24 = vpop.xlane.xlu2 %5999  ;;  %v6462_v51 = vmul.f32 %v7868_v58, %v6461_v25  ;;  %vm6474_vm14 = vweird.f32 %v7870_v41  ;;  %v7086_v16 = vld [vmem:[#allocation5 + $0x8c0] sm:$0xff] }
 0xb73   : > { %v12448_v63 = vmul.f32 %v6000_v24, %v8611_v52  ;;  %7871 = vrsqrt.f32 %v6301_v30  ;;  %vm6475_vm0 = vmor %vm6473_vm15, %vm6474_vm14  ;;  %7106 = vmatpush.msra.mxu1 %v7086_v16  ;;  %vm6483_vm2 = vweird.f32 %v6301_v30  ;;  %v12483_v16 = vld [vmem:[#allocation7 + $0xf] ss:$0 sm:$0xff] }
 0xb74   : > { %v6469_v21 = vmul.f32 %v7870_v41, %v6468_v15  ;;  %v6128_v11 = vpop.xlane.xlu0 %6127  ;;  %v6466_v35 = vsel %vm6465_vm13, %v7868_v58, %v6462_v51  ;;  %6820 = vmatmul.f32.gmra.mxu3 %v12444_v42  ;;  %v6268_v58 = vsub.f32 %v12057_v46, %v12398_v50 }
 0xb75   : > { %v6206_v37 = vmul.f32 %v12448_v63, %v12448_v63  ;;  %v6174_v48 = vmul.f32 %v6128_v11, %v8611_v52  ;;  %v6651_v1 = vmul.f32 %v6466_v35, %v6267_v40 }
 0xb76   : > { %v6470_v39 = vmul.f32 0.5, %v6469_v21 }
 0xb77   : > { %v6238_v61 = vsub.f32 %v6174_v48, %v6206_v37  ;;  %v6688_v43 = vmul.f32 %v12085_v62, %v6651_v1 }
 0xb78   : > { %v6471_v34 = vsub.f32 1.5, %v6470_v39 }
 0xb79   : > { %v6302_v38 = vadd.f32 1e-05, %v6238_v61  ;;  %v7872_v14 = vpop.eup %7871  ;;  %v12459_v13 = vadd.f32 %v12091_v60, %v6688_v43  ;;  %v6269_v43 = vsub.f32 %v12070_v55, %v12426_v5 }
 0xb7a   : > { %v6472_v36 = vmul.f32 %v7870_v41, %v6471_v34  ;;  %v6002_v6 = vpop.xlane.xlu1 %6001  ;;  %v6478_v17 = vmul.f32 %v7872_v14, %v6301_v30  ;;  %vm6484_vm1 = vweird.f32 %v7872_v14 }
 0xb7b   : > { %7873 = vrsqrt.f32 %v6302_v38  ;;  %v12464_v25 = vmul.f32 %v6002_v6, %v8611_v52  ;;  %vm6485_vm3 = vmor %vm6483_vm2, %vm6484_vm1  ;;  %vm6493_vm5 = vweird.f32 %v6302_v38 }
 0xb7c   : > { %v6130_v15 = vpop.xlane.xlu2 %6129  ;;  %v6476_v24 = vsel %vm6475_vm0, %v7870_v41, %v6472_v36  ;;  %v6479_v51 = vmul.f32 %v7872_v14, %v6478_v17  ;;  %6823 = vmatmul.f32.gmra.mxu3 %v12459_v13 }
 0xb7d   : > { %v6175_v4 = vmul.f32 %v6130_v15, %v8611_v52  ;;  %v6652_v45 = vmul.f32 %v6476_v24, %v6268_v58  ;;  %v6207_v40 = vmul.f32 %v12464_v25, %v12464_v25 }
 0xb7e   : > { %v6480_v46 = vmul.f32 0.5, %v6479_v51 }
 0xb7f   : > { %v6689_v50 = vmul.f32 %v12085_v62, %v6652_v45  ;;  %v6239_v21 = vsub.f32 %v6175_v4, %v6207_v40 }
 0xb80   : > { %v6481_v37 = vsub.f32 1.5, %v6480_v46 }
 0xb81   : > { %v7874_v11 = vpop.eup %7873  ;;  %v6303_v35 = vadd.f32 1e-05, %v6239_v21  ;;  %v12472_v41 = vadd.f32 %v12091_v60, %v6689_v50 }
 0xb82   : > { %v6488_v48 = vmul.f32 %v7874_v11, %v6302_v38  ;;  %v6482_v39 = vmul.f32 %v7872_v14, %v6481_v37  ;;  %v6004_v1 = vpop.xlane.xlu0 %6003  ;;  %vm6494_vm4 = vweird.f32 %v7874_v11 }
 0xb83   : > { %7875 = vrsqrt.f32 %v6303_v35  ;;  %v12475_v34 = vmul.f32 %v6004_v1, %v8611_v52  ;;  %vm6495_vm6 = vmor %vm6493_vm5, %vm6494_vm4  ;;  %vm6503_vm8 = vweird.f32 %v6303_v35 }
 0xb84   : > { %v6489_v61 = vmul.f32 %v7874_v11, %v6488_v48  ;;  %v6132_v36 = vpop.xlane.xlu1 %6131  ;;  %v6486_v6 = vsel %vm6485_vm3, %v7872_v14, %v6482_v39  ;;  %6826 = vmatmul.f32.gmra.mxu3 %v12472_v41  ;;  %v7085_v48 = vld [vmem:[#allocation5 + $0x8b8] sm:$0xff] }
 0xb85   : > { %v6208_v17 = vmul.f32 %v12475_v34, %v12475_v34  ;;  %v6176_v30 = vmul.f32 %v6132_v36, %v8611_v52  ;;  %v6653_v15 = vmul.f32 %v6486_v6, %v6269_v43  ;;  %7107 = vmatpush.msra.mxu1 %v7085_v48 }
 0xb86   : > { %v6490_v58 = vmul.f32 0.5, %v6489_v61 }
 0xb87   : > { %v6240_v51 = vsub.f32 %v6176_v30, %v6208_v17  ;;  %v6690_v4 = vmul.f32 %v12085_v62, %v6653_v15  ;;  %v6270_v62 = vsub.f32 %v12082_v10, %v12448_v63  ;;  %v12502_v17 = vld [vmem:[#allocation8 + $0x4] ss:$0 sm:$0xff]  ;;  %v12505_v15 = vld [vmem:[#allocation10 + $0x4] ss:$0 sm:$0xff] }
 0xb88   : > { %v6491_v24 = vsub.f32 1.5, %v6490_v58 }
 0xb89   : > { %v7876_v55 = vpop.eup %7875  ;;  %v12486_v14 = vadd.f32 1e-05, %v6240_v51  ;;  %v12493_v37 = vadd.f32 %v12091_v60, %v6690_v4 }
 0xb8a   : > { %v6492_v5 = vmul.f32 %v7874_v11, %v6491_v24  ;;  %v6498_v50 = vmul.f32 %v7876_v55, %v6303_v35  ;;  %vm6504_vm7 = vweird.f32 %v7876_v55 }
 0xb8b   : > { %v6006_v40 = vpop.xlane.xlu2 %6005  ;;  %7877 = vrsqrt.f32 %v12486_v14  ;;  %vm6505_vm9 = vmor %vm6503_vm8, %vm6504_vm7  ;;  %vm6513_vm11 = vweird.f32 %v12486_v14 }
 0xb8c   : > { %v12490_v21 = vmul.f32 %v6006_v40, %v8611_v52  ;;  %v6496_v1 = vsel %vm6495_vm6, %v7874_v11, %v6492_v5  ;;  %v6499_v61 = vmul.f32 %v7876_v55, %v6498_v50  ;;  %6829 = vmatmul.f32.gmra.mxu3 %v12493_v37  ;;  %v6271_v50 = vsub.f32 %v12107_v56, %v12464_v25 }
 0xb8d   : > { %v6134_v38 = vpop.xlane.xlu0 %6133  ;;  %v6654_v60 = vmul.f32 %v6496_v1, %v6270_v62 }
 0xb8e   : > { %v6782_v45 = vpop.f32.mrf.mxu3  ;;  %v6209_v43 = vmul.f32 %v12490_v21, %v12490_v21  ;;  %v6177_v36 = vmul.f32 %v6134_v38, %v8611_v52  ;;  %v6500_v6 = vmul.f32 0.5, %v6499_v61 }
 0xb8f   : > { %v6783_v46 = vadd.f32 %v12483_v16, %v6782_v45  ;;  %v6691_v10 = vmul.f32 %v12502_v17, %v6654_v60 }
 0xb90   : > { %v6241_v58 = vsub.f32 %v6177_v36, %v6209_v43  ;;  %v6501_v63 = vsub.f32 1.5, %v6500_v6 }
 0xb91   : > { %v6878_v39 = vmax.f32 %v6783_v46, 0.0  ;;  %v7878_v30 = vpop.eup %7877  ;;  %v12508_v24 = vadd.f32 %v12505_v15, %v6691_v10 }
 0xb92   : > { %v6305_v11 = vadd.f32 1e-05, %v6241_v58  ;;  %v6502_v51 = vmul.f32 %v7876_v55, %v6501_v63  ;;  %v6508_v4 = vmul.f32 %v7878_v30, %v12486_v14  ;;  %vm6514_vm10 = vweird.f32 %v7878_v30 }
 0xb93   : > { %6948 = vmatmul.f32.vlgmr.msra.gmra.mxu0 %v6878_v39  ;;  %v6008_v45 = vpop.xlane.xlu1 %6007  ;;  %vm6515_vm12 = vmor %vm6513_vm11, %vm6514_vm10 }
 0xb94   : > { %7879 = vrsqrt.f32 %v6305_v11  ;;  %v12512_v40 = vmul.f32 %v6008_v45, %v8611_v52  ;;  %v6509_v48 = vmul.f32 %v7878_v30, %v6508_v4  ;;  %v6506_v38 = vsel %vm6505_vm9, %v7876_v55, %v6502_v51  ;;  %6832 = vmatmul.f32.gmra.mxu3 %v12508_v24  ;;  %v7084_v4 = vld [vmem:[#allocation5 + $0x8b0] sm:$0xff] }
 0xb95   : > { %v6136_v62 = vpop.xlane.xlu2 %6135  ;;  %v6655_v43 = vmul.f32 %v6506_v38, %v6271_v50  ;;  %v6272_v45 = vsub.f32 %v12127_v54, %v12475_v34  ;;  %7108 = vmatpush.msra.mxu1 %v7084_v4  ;;  %vm6523_vm14 = vweird.f32 %v6305_v11 }
 0xb96   : > { %v6785_v5 = vpop.f32.mrf.mxu3  ;;  %v6210_v35 = vmul.f32 %v12512_v40, %v12512_v40  ;;  %v6178_v39 = vmul.f32 %v6136_v62, %v8611_v52  ;;  %v6510_v61 = vmul.f32 0.5, %v6509_v48 }
 0xb97   : > { %v6786_v46 = vadd.f32 %v12483_v16, %v6785_v5  ;;  %v6692_v56 = vmul.f32 %v12502_v17, %v6655_v43 }
 0xb98   : > { %v6242_v36 = vsub.f32 %v6178_v39, %v6210_v35  ;;  %v6511_v6 = vsub.f32 1.5, %v6510_v61 }
 0xb99   : > { %v6879_v1 = vmax.f32 %v6786_v46, 0.0  ;;  %v12527_v51 = vadd.f32 %v12505_v15, %v6692_v56 }
 0xb9a   : > { %v7880_v60 = vpop.eup %7879  ;;  %v6306_v58 = vadd.f32 1e-05, %v6242_v36  ;;  %v6512_v10 = vmul.f32 %v7878_v30, %v6511_v6 }
 0xb9b   : > { %6951 = vmatmul.f32.gmra.mxu0 %v6879_v1  ;;  %v6518_v25 = vmul.f32 %v7880_v60, %v6305_v11  ;;  %v6010_v55 = vpop.xlane.xlu0 %6009  ;;  %vm6524_vm13 = vweird.f32 %v7880_v60 }
 0xb9c   : > { %v12524_v63 = vmul.f32 %v6010_v55, %v8611_v52  ;;  %7881 = vrsqrt.f32 %v6306_v58  ;;  %v6516_v48 = vsel %vm6515_vm12, %v7878_v30, %v6512_v10  ;;  %6835 = vmatmul.f32.gmra.mxu3 %v12527_v51  ;;  %v6273_v30 = vsub.f32 %v12153_v33, %v12490_v21  ;;  %vm6525_vm15 = vmor %vm6523_vm14, %vm6524_vm13 }
 0xb9d   : > { %v6519_v5 = vmul.f32 %v7880_v60, %v6518_v25  ;;  %v6138_v46 = vpop.xlane.xlu1 %6137  ;;  %v6656_v38 = vmul.f32 %v6516_v48, %v6272_v45  ;;  %vm6533_vm1 = vweird.f32 %v6306_v58 }
 0xb9e   : > { %v6211_v50 = vmul.f32 %v12524_v63, %v12524_v63  ;;  %v6179_v14 = vmul.f32 %v6138_v46, %v8611_v52  ;;  %v6788_v1 = vpop.f32.mrf.mxu3 }
 0xb9f   : > { %v6520_v62 = vmul.f32 0.5, %v6519_v5  ;;  %v6693_v54 = vmul.f32 %v12502_v17, %v6656_v38  ;;  %v6789_v36 = vadd.f32 %v12483_v16, %v6788_v1 }
 0xba0   : > { %v6243_v35 = vsub.f32 %v6179_v14, %v6211_v50 }
 0xba1   : > { %v6521_v39 = vsub.f32 1.5, %v6520_v62  ;;  %v12540_v6 = vadd.f32 %v12505_v15, %v6693_v54  ;;  %v6880_v55 = vmax.f32 %v6789_v36, 0.0 }
 0xba2   : > { %v12536_v34 = vadd.f32 1e-05, %v6243_v35  ;;  %v7882_v61 = vpop.eup %7881 }
 0xba3   : > { %v6522_v43 = vmul.f32 %v7880_v60, %v6521_v39  ;;  %v6528_v56 = vmul.f32 %v7882_v61, %v6306_v58  ;;  %v6012_v25 = vpop.xlane.xlu2 %6011  ;;  %6954 = vmatmul.f32.gmra.mxu0 %v6880_v55  ;;  %vm6534_vm0 = vweird.f32 %v7882_v61 }
 0xba4   : > { %7883 = vrsqrt.f32 %v12536_v34  ;;  %v12546_v10 = vmul.f32 %v6012_v25, %v8611_v52  ;;  %6838 = vmatmul.f32.gmra.mxu3 %v12540_v6  ;;  %vm6535_vm2 = vmor %vm6533_vm1, %vm6534_vm0  ;;  %vm6543_vm4 = vweird.f32 %v12536_v34 }
 0xba5   : > { %v6526_v4 = vsel %vm6525_vm15, %v7880_v60, %v6522_v43  ;;  %v6529_v45 = vmul.f32 %v7882_v61, %v6528_v56  ;;  %v6140_v11 = vpop.xlane.xlu0 %6139  ;;  %v6274_v56 = vsub.f32 %v12178_v32, %v12512_v40 }
 0xba6   : > { %v6657_v5 = vmul.f32 %v6526_v4, %v6273_v30  ;;  %v6212_v46 = vmul.f32 %v12546_v10, %v12546_v10  ;;  %v6180_v33 = vmul.f32 %v6140_v11, %v8611_v52  ;;  %v7083_v30 = vld [vmem:[#allocation5 + $0x8a8] sm:$0xff] }
 0xba7   : > { %v6530_v21 = vmul.f32 0.5, %v6529_v45  ;;  %v6791_v38 = vpop.f32.mrf.mxu3  ;;  %7109 = vmatpush.msra.mxu1 %v7083_v30 }
 0xba8   : > { %v6694_v50 = vmul.f32 %v12502_v17, %v6657_v5  ;;  %v6244_v14 = vsub.f32 %v6180_v33, %v6212_v46  ;;  %v6792_v39 = vadd.f32 %v12483_v16, %v6791_v38 }
 0xba9   : > { %v6531_v62 = vsub.f32 1.5, %v6530_v21 }
 0xbaa   : > { %v7884_v48 = vpop.eup %7883  ;;  %v12554_v35 = vadd.f32 1e-05, %v6244_v14  ;;  %v12558_v1 = vadd.f32 %v12505_v15, %v6694_v50  ;;  %v6881_v55 = vmax.f32 %v6792_v39, 0.0 }
 0xbab   : > { %v6538_v60 = vmul.f32 %v7884_v48, %v12536_v34  ;;  %v6014_v54 = vpop.xlane.xlu1 %6013  ;;  %v6532_v43 = vmul.f32 %v7882_v61, %v6531_v62  ;;  %vm6544_vm3 = vweird.f32 %v7884_v48 }
 0xbac   : > { %v12561_v36 = vmul.f32 %v6014_v54, %v8611_v52  ;;  %7885 = vrsqrt.f32 %v12554_v35  ;;  %6841 = vmatmul.f32.gmra.mxu3 %v12558_v1  ;;  %6957 = vmatmul.f32.gmra.mxu0 %v6881_v55  ;;  %vm6545_vm5 = vmor %vm6543_vm4, %vm6544_vm3  ;;  %vm6553_vm7 = vweird.f32 %v12554_v35 }
 0xbad   : > { %v6539_v25 = vmul.f32 %v7884_v48, %v6538_v60  ;;  %v6142_v4 = vpop.xlane.xlu2 %6141  ;;  %v6536_v58 = vsel %vm6535_vm2, %v7882_v61, %v6532_v43  ;;  %v6275_v60 = vsub.f32 %v12201_v53, %v12524_v63 }
 0xbae   : > { %v6213_v45 = vmul.f32 %v12561_v36, %v12561_v36  ;;  %v6181_v11 = vmul.f32 %v6142_v4, %v8611_v52  ;;  %v6658_v46 = vmul.f32 %v6536_v58, %v6274_v56 }
 0xbaf   : > { %v6540_v5 = vmul.f32 0.5, %v6539_v25  ;;  %v6794_v50 = vpop.f32.mrf.mxu3 }
 0xbb0   : > { %v6245_v33 = vsub.f32 %v6181_v11, %v6213_v45  ;;  %v6695_v40 = vmul.f32 %v12502_v17, %v6658_v46  ;;  %v6795_v38 = vadd.f32 %v12483_v16, %v6794_v50 }
 0xbb1   : > { %v6541_v32 = vsub.f32 1.5, %v6540_v5 }
 0xbb2   : > { %v12571_v21 = vadd.f32 1e-05, %v6245_v33  ;;  %v7886_v14 = vpop.eup %7885  ;;  %v12576_v61 = vadd.f32 %v12505_v15, %v6695_v40  ;;  %v6882_v43 = vmax.f32 %v6795_v38, 0.0 }
 0xbb3   : > { %v6542_v62 = vmul.f32 %v7884_v48, %v6541_v32  ;;  %v6548_v39 = vmul.f32 %v7886_v14, %v12554_v35  ;;  %v6016_v54 = vpop.xlane.xlu0 %6015  ;;  %vm6554_vm6 = vweird.f32 %v7886_v14 }
 0xbb4   : > { %7887 = vrsqrt.f32 %v12571_v21  ;;  %v12583_v30 = vmul.f32 %v6016_v54, %v8611_v52  ;;  %6844 = vmatmul.f32.gmra.mxu3 %v12576_v61  ;;  %6960 = vmatmul.f32.gmra.mxu0 %v6882_v43  ;;  %vm6555_vm8 = vmor %vm6553_vm7, %vm6554_vm6  ;;  %vm6563_vm10 = vweird.f32 %v12571_v21 }
 0xbb5   : > { %v6546_v56 = vsel %vm6545_vm5, %v7884_v48, %v6542_v62  ;;  %v6549_v34 = vmul.f32 %v7886_v14, %v6548_v39  ;;  %v6144_v25 = vpop.xlane.xlu1 %6143  ;;  %v6276_v39 = vsub.f32 %v12229_v0, %v12546_v10 }
 0xbb6   : > { %v6659_v55 = vmul.f32 %v6546_v56, %v6275_v60  ;;  %v6214_v4 = vmul.f32 %v12583_v30, %v12583_v30  ;;  %v6182_v53 = vmul.f32 %v6144_v25, %v8611_v52  ;;  %v7082_v60 = vld [vmem:[#allocation5 + $0x8a0] sm:$0xff] }
 0xbb7   : > { %v6550_v63 = vmul.f32 0.5, %v6549_v34  ;;  %v6797_v46 = vpop.f32.mrf.mxu3  ;;  %7110 = vmatpush.msra.mxu1 %v7082_v60 }
 0xbb8   : > { %v6696_v45 = vmul.f32 %v12502_v17, %v6659_v55  ;;  %v6246_v11 = vsub.f32 %v6182_v53, %v6214_v4  ;;  %v6798_v32 = vadd.f32 %v12483_v16, %v6797_v46 }
 0xbb9   : > { %v6551_v5 = vsub.f32 1.5, %v6550_v63 }
 0xbba   : > { %v7888_v58 = vpop.eup %7887  ;;  %v12591_v33 = vadd.f32 1e-05, %v6246_v11  ;;  %v12595_v50 = vadd.f32 %v12505_v15, %v6696_v45  ;;  %v6883_v43 = vmax.f32 %v6798_v32, 0.0 }
 0xbbb   : > { %v6558_v48 = vmul.f32 %v7888_v58, %v12571_v21  ;;  %v6018_v40 = vpop.xlane.xlu2 %6017  ;;  %v6552_v62 = vmul.f32 %v7886_v14, %v6551_v5  ;;  %vm6564_vm9 = vweird.f32 %v7888_v58 }
 0xbbc   : > { %v12599_v38 = vmul.f32 %v6018_v40, %v8611_v52  ;;  %7889 = vrsqrt.f32 %v12591_v33  ;;  %6847 = vmatmul.f32.gmra.mxu3 %v12595_v50  ;;  %6963 = vmatmul.f32.gmra.mxu0 %v6883_v43  ;;  %vm6565_vm11 = vmor %vm6563_vm10, %vm6564_vm9  ;;  %vm6573_vm13 = vweird.f32 %v12591_v33 }
 0xbbd   : > { %v6559_v54 = vmul.f32 %v7888_v58, %v6558_v48  ;;  %v6146_v56 = vpop.xlane.xlu0 %6145  ;;  %v6556_v35 = vsel %vm6555_vm8, %v7886_v14, %v6552_v62  ;;  %v6277_v48 = vsub.f32 %v12254_v57, %v12561_v36 }
 0xbbe   : > { %v6215_v34 = vmul.f32 %v12599_v38, %v12599_v38  ;;  %v6183_v25 = vmul.f32 %v6146_v56, %v8611_v52  ;;  %v6660_v4 = vmul.f32 %v6556_v35, %v6276_v39 }
 0xbbf   : > { %v6560_v55 = vmul.f32 0.5, %v6559_v54  ;;  %v6800_v45 = vpop.f32.mrf.mxu3 }
 0xbc0   : > { %v6247_v53 = vsub.f32 %v6183_v25, %v6215_v34  ;;  %v6697_v10 = vmul.f32 %v12502_v17, %v6660_v4  ;;  %v6801_v46 = vadd.f32 %v12483_v16, %v6800_v45 }
 0xbc1   : > { %v6561_v0 = vsub.f32 1.5, %v6560_v55 }
 0xbc2   : > { %v12609_v63 = vadd.f32 1e-05, %v6247_v53  ;;  %v7890_v11 = vpop.eup %7889  ;;  %v12614_v14 = vadd.f32 %v12505_v15, %v6697_v10  ;;  %v6884_v62 = vmax.f32 %v6801_v46, 0.0 }
 0xbc3   : > { %v6562_v5 = vmul.f32 %v7888_v58, %v6561_v0  ;;  %v6568_v32 = vmul.f32 %v7890_v11, %v12591_v33  ;;  %v6020_v40 = vpop.xlane.xlu1 %6019  ;;  %vm6574_vm12 = vweird.f32 %v7890_v11 }
 0xbc4   : > { %7891 = vrsqrt.f32 %v12609_v63  ;;  %v12621_v60 = vmul.f32 %v6020_v40, %v8611_v52  ;;  %6850 = vmatmul.f32.gmra.mxu3 %v12614_v14  ;;  %6966 = vmatmul.f32.gmra.mxu0 %v6884_v62  ;;  %vm6575_vm14 = vmor %vm6573_vm13, %vm6574_vm12  ;;  %vm6583_vm0 = vweird.f32 %v12609_v63 }
 0xbc5   : > { %v6566_v39 = vsel %vm6565_vm11, %v7888_v58, %v6562_v5  ;;  %v6569_v21 = vmul.f32 %v7890_v11, %v6568_v32  ;;  %v6148_v54 = vpop.xlane.xlu2 %6147  ;;  %v6278_v32 = vsub.f32 %v12278_v19, %v12583_v30 }
 0xbc6   : > { %v6661_v43 = vmul.f32 %v6566_v39, %v6277_v48  ;;  %v6216_v56 = vmul.f32 %v12621_v60, %v12621_v60  ;;  %v6184_v57 = vmul.f32 %v6148_v54, %v8611_v52  ;;  %v7081_v48 = vld [vmem:[#allocation5 + $0x898] sm:$0xff] }
 0xbc7   : > { %v6570_v36 = vmul.f32 0.5, %v6569_v21  ;;  %v6803_v4 = vpop.f32.mrf.mxu3  ;;  %7111 = vmatpush.msra.mxu1 %v7081_v48 }
 0xbc8   : > { %v6698_v34 = vmul.f32 %v12502_v17, %v6661_v43  ;;  %v6248_v25 = vsub.f32 %v6184_v57, %v6216_v56  ;;  %v6804_v0 = vadd.f32 %v12483_v16, %v6803_v4 }
 0xbc9   : > { %v6571_v55 = vsub.f32 1.5, %v6570_v36 }
 0xbca   : > { %v7892_v35 = vpop.eup %7891  ;;  %v12629_v53 = vadd.f32 1e-05, %v6248_v25  ;;  %v12633_v45 = vadd.f32 %v12505_v15, %v6698_v34  ;;  %v6885_v62 = vmax.f32 %v6804_v0, 0.0 }
 0xbcb   : > { %v6578_v58 = vmul.f32 %v7892_v35, %v12609_v63  ;;  %v6022_v10 = vpop.xlane.xlu0 %6021  ;;  %v6572_v5 = vmul.f32 %v7890_v11, %v6571_v55  ;;  %vm6584_vm15 = vweird.f32 %v7892_v35 }
 0xbcc   : > { %v12637_v46 = vmul.f32 %v6022_v10, %v8611_v52  ;;  %7893 = vrsqrt.f32 %v12629_v53  ;;  %6853 = vmatmul.f32.gmra.mxu3 %v12633_v45  ;;  %6969 = vmatmul.f32.gmra.mxu0 %v6885_v62  ;;  %vm6585_vm1 = vmor %vm6583_vm0, %vm6584_vm15  ;;  %vm6593_vm3 = vweird.f32 %v12629_v53 }
 0xbcd   : > { %v6579_v40 = vmul.f32 %v7892_v35, %v6578_v58  ;;  %v6150_v39 = vpop.xlane.xlu1 %6149  ;;  %v6576_v33 = vsel %vm6575_vm14, %v7890_v11, %v6572_v5  ;;  %v6279_v58 = vsub.f32 %v12305_v2, %v12599_v38 }
 0xbce   : > { %v6217_v21 = vmul.f32 %v12637_v46, %v12637_v46  ;;  %v6185_v54 = vmul.f32 %v6150_v39, %v8611_v52  ;;  %v6662_v56 = vmul.f32 %v6576_v33, %v6278_v32 }
 0xbcf   : > { %v6580_v43 = vmul.f32 0.5, %v6579_v40  ;;  %v6806_v34 = vpop.f32.mrf.mxu3 }
 0xbd0   : > { %v6249_v57 = vsub.f32 %v6185_v54, %v6217_v21  ;;  %v6699_v30 = vmul.f32 %v12502_v17, %v6662_v56  ;;  %v6807_v4 = vadd.f32 %v12483_v16, %v6806_v34 }
 0xbd1   : > { %v6581_v19 = vsub.f32 1.5, %v6580_v43 }
 0xbd2   : > { %v12647_v36 = vadd.f32 1e-05, %v6249_v57  ;;  %v7894_v25 = vpop.eup %7893  ;;  %v12652_v11 = vadd.f32 %v12505_v15, %v6699_v30  ;;  %v6886_v5 = vmax.f32 %v6807_v4, 0.0 }
 0xbd3   : > { %v6582_v55 = vmul.f32 %v7892_v35, %v6581_v19  ;;  %v6588_v0 = vmul.f32 %v7894_v25, %v12629_v53  ;;  %v6024_v10 = vpop.xlane.xlu2 %6023  ;;  %vm6594_vm2 = vweird.f32 %v7894_v25 }
 0xbd4   : > { %7895 = vrsqrt.f32 %v12647_v36  ;;  %v12659_v48 = vmul.f32 %v6024_v10, %v8611_v52  ;;  %6856 = vmatmul.f32.gmra.mxu3 %v12652_v11  ;;  %6972 = vmatmul.f32.gmra.mxu0 %v6886_v5  ;;  %vm6595_vm4 = vmor %vm6593_vm3, %vm6594_vm2  ;;  %vm6603_vm6 = vweird.f32 %v12647_v36 }
 0xbd5   : > { %v6586_v32 = vsel %vm6585_vm1, %v7892_v35, %v6582_v55  ;;  %v6589_v63 = vmul.f32 %v7894_v25, %v6588_v0  ;;  %v6152_v40 = vpop.xlane.xlu0 %6151  ;;  %v6280_v0 = vsub.f32 %v12333_v18, %v12621_v60 }
 0xbd6   : > { %v6663_v62 = vmul.f32 %v6586_v32, %v6279_v58  ;;  %v6218_v39 = vmul.f32 %v12659_v48, %v12659_v48  ;;  %v6186_v2 = vmul.f32 %v6152_v40, %v8611_v52  ;;  %v7080_v58 = vld [vmem:[#allocation5 + $0x890] sm:$0xff] }
 0xbd7   : > { %v6590_v38 = vmul.f32 0.5, %v6589_v63  ;;  %v6809_v56 = vpop.f32.mrf.mxu3  ;;  %7112 = vmatpush.msra.mxu1 %v7080_v58  ;;  %v7079_v63 = vld [vmem:[#allocation5 + $0x888] sm:$0xff] }
 0xbd8   : > { %v6700_v21 = vmul.f32 %v12502_v17, %v6663_v62  ;;  %v6250_v54 = vsub.f32 %v6186_v2, %v6218_v39  ;;  %v6810_v19 = vadd.f32 %v12483_v16, %v6809_v56 }
 0xbd9   : > { %v6591_v43 = vsub.f32 1.5, %v6590_v38  ;;  %7113 = vmatpush.msra.mxu1 %v7079_v63 }
 0xbda   : > { %v7896_v33 = vpop.eup %7895  ;;  %v12667_v57 = vadd.f32 1e-05, %v6250_v54  ;;  %v12671_v34 = vadd.f32 %v12505_v15, %v6700_v21  ;;  %v6887_v5 = vmax.f32 %v6810_v19, 0.0  ;;  %v6281_v19 = vsub.f32 %v12356_v9, %v12637_v46  ;;  %v7078_v46 = vld [vmem:[#allocation5 + $0x880] sm:$0xff] }
 0xbdb   : > { %v6598_v35 = vmul.f32 %v7896_v33, %v12647_v36  ;;  %v6026_v30 = vpop.xlane.xlu1 %6025  ;;  %v6592_v55 = vmul.f32 %v7894_v25, %v6591_v43  ;;  %vm6604_vm5 = vweird.f32 %v7896_v33  ;;  %7114 = vmatpush.msra.mxu1 %v7078_v46 }
 0xbdc   : > { %v12675_v4 = vmul.f32 %v6026_v30, %v8611_v52  ;;  %7897 = vrsqrt.f32 %v12667_v57  ;;  %6859 = vmatmul.f32.gmra.mxu3 %v12671_v34  ;;  %6975 = vmatmul.f32.gmra.mxu0 %v6887_v5  ;;  %vm6605_vm7 = vmor %vm6603_vm6, %vm6604_vm5  ;;  %vm6613_vm9 = vweird.f32 %v12667_v57 }
 0xbdd   : > { %v6599_v10 = vmul.f32 %v7896_v33, %v6598_v35  ;;  %v6154_v32 = vpop.xlane.xlu2 %6153  ;;  %v6596_v62 = vsel %vm6595_vm4, %v7894_v25, %v6592_v55 }
 0xbde   : > { %v6219_v40 = vmul.f32 %v12675_v4, %v12675_v4  ;;  %v6187_v53 = vmul.f32 %v6154_v32, %v8611_v52  ;;  %v6664_v2 = vmul.f32 %v6596_v62, %v6280_v0 }
 0xbdf   : > { %v6600_v39 = vmul.f32 0.5, %v6599_v10  ;;  %v6812_v54 = vpop.f32.mrf.mxu3 }
 0xbe0   : > { %v6251_v18 = vsub.f32 %v6187_v53, %v6219_v40  ;;  %v6701_v38 = vmul.f32 %v12502_v17, %v6664_v2  ;;  %v6813_v35 = vadd.f32 %v12483_v16, %v6812_v54 }
 0xbe1   : > { %v6601_v60 = vsub.f32 1.5, %v6600_v39 }
 0xbe2   : > { %v6315_v21 = vadd.f32 1e-05, %v6251_v18  ;;  %v7898_v43 = vpop.eup %7897  ;;  %v12688_v25 = vadd.f32 %v12505_v15, %v6701_v38  ;;  %v6888_v58 = vmax.f32 %v6813_v35, 0.0 }
 0xbe3   : > { %v6602_v56 = vmul.f32 %v7896_v33, %v6601_v60  ;;  %v6608_v30 = vmul.f32 %v7898_v43, %v12667_v57  ;;  %v6028_v55 = vpop.xlane.xlu0 %6027  ;;  %vm6614_vm8 = vweird.f32 %v7898_v43 }
 0xbe4   : > { %7899 = vrsqrt.f32 %v6315_v21  ;;  %v12694_v0 = vmul.f32 %v6028_v55, %v8611_v52  ;;  %6862 = vmatmul.f32.gmra.mxu3 %v12688_v25  ;;  %6978 = vmatmul.f32.gmra.mxu0 %v6888_v58  ;;  %vm6615_vm10 = vmor %vm6613_vm9, %vm6614_vm8  ;;  %vm6623_vm12 = vweird.f32 %v6315_v21 }
 0xbe5   : > { %v6606_v10 = vsel %vm6605_vm7, %v7896_v33, %v6602_v56  ;;  %v6609_v5 = vmul.f32 %v7898_v43, %v6608_v30  ;;  %v6156_v36 = vpop.xlane.xlu1 %6155 }
 0xbe6   : > { %v6665_v32 = vmul.f32 %v6606_v10, %v6281_v19  ;;  %v6220_v63 = vmul.f32 %v12694_v0, %v12694_v0  ;;  %v6188_v9 = vmul.f32 %v6156_v36, %v8611_v52  ;;  %v6282_v52 = vsub.f32 %v12384_v26, %v12659_v48 }
 0xbe7   : > { %v6610_v40 = vmul.f32 0.5, %v6609_v5  ;;  %v6815_v33 = vpop.f32.mrf.mxu3 }
 0xbe8   : > { %v6702_v53 = vmul.f32 %v12502_v17, %v6665_v32  ;;  %v6252_v62 = vsub.f32 %v6188_v9, %v6220_v63  ;;  %v6816_v38 = vadd.f32 %v12483_v16, %v6815_v33 }
 0xbe9   : > { %v6611_v2 = vsub.f32 1.5, %v6610_v40 }
 0xbea   : > { %v7900_v39 = vpop.eup %7899  ;;  %v6316_v60 = vadd.f32 1e-05, %v6252_v62  ;;  %v12703_v54 = vadd.f32 %v12505_v15, %v6702_v53  ;;  %v6889_v19 = vmax.f32 %v6816_v38, 0.0 }
 0xbeb   : > { %v6618_v18 = vmul.f32 %v7900_v39, %v6315_v21  ;;  %v6612_v56 = vmul.f32 %v7898_v43, %v6611_v2  ;;  %vm6624_vm11 = vweird.f32 %v7900_v39 }
 0xbec   : > { %7901 = vrsqrt.f32 %v6316_v60  ;;  %6865 = vmatmul.f32.gmra.mxu3 %v12703_v54  ;;  %6981 = vmatmul.f32.gmra.mxu0 %v6889_v19  ;;  %vm6625_vm13 = vmor %vm6623_vm12, %vm6624_vm11  ;;  %vm6633_vm15 = vweird.f32 %v6316_v60 }
 0xbed   : > { %v6619_v35 = vmul.f32 %v7900_v39, %v6618_v18  ;;  %v6616_v30 = vsel %vm6615_vm10, %v7898_v43, %v6612_v56  ;;  %v6283_v43 = vsub.f32 %v12409_v28, %v12675_v4  ;;  %v6284_v4 = vsub.f32 %v12433_v7, %v12694_v0  ;;  %v12731_v7 = vld [vmem:[#allocation7 + $0x10] ss:$0 sm:$0xff] }
 0xbee   : > { %v6666_v58 = vmul.f32 %v6616_v30, %v6282_v52 }
 0xbef   : > { %v6620_v55 = vmul.f32 0.5, %v6619_v35  ;;  %v6818_v36 = vpop.f32.mrf.mxu3 }
 0xbf0   : > { %v6703_v5 = vmul.f32 %v12502_v17, %v6666_v58  ;;  %v6819_v26 = vadd.f32 %v12483_v16, %v6818_v36 }
 0xbf1   : > { %v6621_v10 = vsub.f32 1.5, %v6620_v55 }
 0xbf2   : > { %v7902_v32 = vpop.eup %7901  ;;  %v12712_v48 = vadd.f32 %v12505_v15, %v6703_v5  ;;  %v6890_v9 = vmax.f32 %v6819_v26, 0.0 }
 0xbf3   : > { %v6622_v57 = vmul.f32 %v7900_v39, %v6621_v10  ;;  %v6628_v63 = vmul.f32 %v7902_v32, %v6316_v60  ;;  %vm6634_vm14 = vweird.f32 %v7902_v32 }
 0xbf4   : > { %6868 = vmatmul.f32.gmra.mxu3 %v12712_v48  ;;  %6984 = vmatmul.f32.gmra.mxu0 %v6890_v9  ;;  %vm6635_vm0 = vmor %vm6633_vm15, %vm6634_vm14 }
 0xbf5   : > { %v6626_v46 = vsel %vm6625_vm13, %v7900_v39, %v6622_v57  ;;  %v6629_v40 = vmul.f32 %v7902_v32, %v6628_v63 }
 0xbf6   : > { %v6667_v53 = vmul.f32 %v6626_v46, %v6283_v43 }
 0xbf7   : > { %v6630_v62 = vmul.f32 0.5, %v6629_v40  ;;  %v6821_v33 = vpop.f32.mrf.mxu3 }
 0xbf8   : > { %v6704_v21 = vmul.f32 %v12502_v17, %v6667_v53  ;;  %v6822_v18 = vadd.f32 %v12483_v16, %v6821_v33 }
 0xbf9   : > { %v6631_v2 = vsub.f32 1.5, %v6630_v62 }
 0xbfa   : > { %v12720_v38 = vadd.f32 %v12505_v15, %v6704_v21  ;;  %v6891_v39 = vmax.f32 %v6822_v18, 0.0 }
 0xbfb   : > { %v6632_v28 = vmul.f32 %v7902_v32, %v6631_v2 }
 0xbfc   : > { %6871 = vmatmul.f32.gmra.mxu3 %v12720_v38  ;;  %6987 = vmatmul.f32.gmra.mxu0 %v6891_v39 }
 0xbfd   : > { %v6636_v56 = vsel %vm6635_vm0, %v7902_v32, %v6632_v28 }
 0xbfe   : > { %v6668_v52 = vmul.f32 %v6636_v56, %v6284_v4 }
 0xbff   : > { %v6824_v19 = vpop.f32.mrf.mxu3 }
 0xc00   : > { %v6705_v35 = vmul.f32 %v12502_v17, %v6668_v52  ;;  %v6825_v30 = vadd.f32 %v12483_v16, %v6824_v19 }
 0xc02   : > { %v12728_v55 = vadd.f32 %v12505_v15, %v6705_v35  ;;  %v6892_v58 = vmax.f32 %v6825_v30, 0.0 }
 0xc04   : > { %6874 = vmatmul.f32.gmra.mxu3 %v12728_v55  ;;  %6990 = vmatmul.f32.gmra.mxu0 %v6892_v58 }
 0xc07   : > { %v6827_v0 = vpop.f32.mrf.mxu3 }
 0xc08   : > { %v6828_v60 = vadd.f32 %v12483_v16, %v6827_v0 }
 0xc0a   : > { %v6893_v5 = vmax.f32 %v6828_v60, 0.0 }
 0xc0c   : > { %6993 = vmatmul.f32.gmra.mxu0 %v6893_v5 }
 0xc0f   : > { %v6830_v32 = vpop.f32.mrf.mxu3 }
 0xc10   : > { %v6949_v10 = vpop.f32.mrf.mxu0  ;;  %v6831_v15 = vadd.f32 %v12483_v16, %v6830_v32 }
 0xc11   : > { %v6950_v36 = vadd.f32 %v12731_v7, %v6949_v10 }
 0xc12   : > { %v6894_v57 = vmax.f32 %v6831_v15, 0.0 }
 0xc13   : > { %v7045_v17 = vmax.f32 %v6950_v36, 0.0 }
 0xc14   : > { %6996 = vmatmul.f32.gmra.mxu0 %v6894_v57 }
 0xc15   : > { %7115 = vmatmul.f32.vlgmr.msra.gmra.mxu1 %v7045_v17 }
 0xc17   : > { %v6833_v9 = vpop.f32.mrf.mxu3 }
 0xc18   : > { %v6952_v26 = vpop.f32.mrf.mxu0  ;;  %v6834_v46 = vadd.f32 %v12483_v16, %v6833_v9 }
 0xc19   : > { %v6953_v43 = vadd.f32 %v12731_v7, %v6952_v26 }
 0xc1a   : > { %v6895_v40 = vmax.f32 %v6834_v46, 0.0 }
 0xc1b   : > { %v7046_v63 = vmax.f32 %v6953_v43, 0.0 }
 0xc1c   : > { %6999 = vmatmul.f32.gmra.mxu0 %v6895_v40 }
 0xc1d   : > { %7118 = vmatmul.f32.gmra.mxu1 %v7046_v63 }
 0xc1f   : > { %v6836_v53 = vpop.f32.mrf.mxu3 }
 0xc20   : > { %v6837_v62 = vadd.f32 %v12483_v16, %v6836_v53  ;;  %v6955_v21 = vpop.f32.mrf.mxu0 }
 0xc21   : > { %v6956_v33 = vadd.f32 %v12731_v7, %v6955_v21 }
 0xc22   : > { %v6896_v2 = vmax.f32 %v6837_v62, 0.0 }
 0xc23   : > { %v7047_v18 = vmax.f32 %v6956_v33, 0.0 }
 0xc24   : > { %7002 = vmatmul.f32.gmra.mxu0 %v6896_v2 }
 0xc25   : > { %7121 = vmatmul.f32.gmra.mxu1 %v7047_v18 }
 0xc27   : > { %v6839_v28 = vpop.f32.mrf.mxu3 }
 0xc28   : > { %v6840_v4 = vadd.f32 %v12483_v16, %v6839_v28 }
 0xc29   : > { %v6958_v39 = vpop.f32.mrf.mxu0 }
 0xc2a   : > { %v6897_v56 = vmax.f32 %v6840_v4, 0.0  ;;  %v6959_v52 = vadd.f32 %v12731_v7, %v6958_v39 }
 0xc2c   : > { %v7048_v35 = vmax.f32 %v6959_v52, 0.0  ;;  %7005 = vmatmul.f32.gmra.mxu0 %v6897_v56 }
 0xc2e   : > { %7124 = vmatmul.f32.gmra.mxu1 %v7048_v35 }
 0xc2f   : > { %v6842_v19 = vpop.f32.mrf.mxu3 }
 0xc30   : > { %v6843_v30 = vadd.f32 %v12483_v16, %v6842_v19 }
 0xc31   : > { %v6961_v58 = vpop.f32.mrf.mxu0 }
 0xc32   : > { %v6898_v0 = vmax.f32 %v6843_v30, 0.0  ;;  %v6962_v60 = vadd.f32 %v12731_v7, %v6961_v58 }
 0xc34   : > { %v7049_v10 = vmax.f32 %v6962_v60, 0.0  ;;  %7008 = vmatmul.f32.gmra.mxu0 %v6898_v0 }
 0xc36   : > { %7127 = vmatmul.f32.gmra.mxu1 %v7049_v10 }
 0xc37   : > { %v6845_v5 = vpop.f32.mrf.mxu3 }
 0xc38   : > { %v6846_v36 = vadd.f32 %v12483_v16, %v6845_v5 }
 0xc39   : > { %v6964_v17 = vpop.f32.mrf.mxu0 }
 0xc3a   : > { %v6899_v32 = vmax.f32 %v6846_v36, 0.0  ;;  %v6965_v15 = vadd.f32 %v12731_v7, %v6964_v17 }
 0xc3c   : > { %v7050_v57 = vmax.f32 %v6965_v15, 0.0  ;;  %7011 = vmatmul.f32.gmra.mxu0 %v6899_v32 }
 0xc3e   : > { %7130 = vmatmul.f32.gmra.mxu1 %v7050_v57 }
 0xc3f   : > { %v6848_v26 = vpop.f32.mrf.mxu3 }
 0xc40   : > { %v6849_v43 = vadd.f32 %v12483_v16, %v6848_v26 }
 0xc41   : > { %v6967_v63 = vpop.f32.mrf.mxu0 }
 0xc42   : > { %v6900_v9 = vmax.f32 %v6849_v43, 0.0  ;;  %v6968_v46 = vadd.f32 %v12731_v7, %v6967_v63 }
 0xc44   : > { %v7051_v40 = vmax.f32 %v6968_v46, 0.0  ;;  %7014 = vmatmul.f32.gmra.mxu0 %v6900_v9 }
 0xc46   : > { %7133 = vmatmul.f32.gmra.mxu1 %v7051_v40 }
 0xc47   : > { %v6851_v53 = vpop.f32.mrf.mxu3 }
 0xc48   : > { %v6852_v62 = vadd.f32 %v12483_v16, %v6851_v53 }
 0xc49   : > { %v6970_v21 = vpop.f32.mrf.mxu0 }
 0xc4a   : > { %v6901_v2 = vmax.f32 %v6852_v62, 0.0  ;;  %v6971_v33 = vadd.f32 %v12731_v7, %v6970_v21 }
 0xc4c   : > { %v7052_v18 = vmax.f32 %v6971_v33, 0.0  ;;  %7017 = vmatmul.f32.gmra.mxu0 %v6901_v2 }
 0xc4e   : > { %7136 = vmatmul.f32.gmra.mxu1 %v7052_v18 }
 0xc4f   : > { %v6854_v28 = vpop.f32.mrf.mxu3 }
 0xc50   : > { %v6855_v4 = vadd.f32 %v12483_v16, %v6854_v28 }
 0xc51   : > { %v6973_v39 = vpop.f32.mrf.mxu0 }
 0xc52   : > { %v6902_v56 = vmax.f32 %v6855_v4, 0.0  ;;  %v6974_v52 = vadd.f32 %v12731_v7, %v6973_v39 }
 0xc54   : > { %v7053_v35 = vmax.f32 %v6974_v52, 0.0  ;;  %7020 = vmatmul.f32.gmra.mxu0 %v6902_v56 }
 0xc56   : > { %7139 = vmatmul.f32.gmra.mxu1 %v7053_v35 }
 0xc57   : > { %v6857_v19 = vpop.f32.mrf.mxu3 }
 0xc58   : > { %v6858_v30 = vadd.f32 %v12483_v16, %v6857_v19 }
 0xc59   : > { %v6976_v58 = vpop.f32.mrf.mxu0 }
 0xc5a   : > { %v6903_v0 = vmax.f32 %v6858_v30, 0.0  ;;  %v6977_v60 = vadd.f32 %v12731_v7, %v6976_v58  ;;  %v7935_v30 = vld [vmem:[#allocation7 + $0xf] ss:$0 sm:$0xff] }
 0xc5c   : > { %v7054_v10 = vmax.f32 %v6977_v60, 0.0  ;;  %7023 = vmatmul.f32.gmra.mxu0 %v6903_v0 }
 0xc5e   : > { %7142 = vmatmul.f32.gmra.mxu1 %v7054_v10 }
 0xc5f   : > { %v6860_v5 = vpop.f32.mrf.mxu3 }
 0xc60   : > { %v6861_v36 = vadd.f32 %v12483_v16, %v6860_v5 }
 0xc61   : > { %v6979_v17 = vpop.f32.mrf.mxu0 }
 0xc62   : > { %v6904_v32 = vmax.f32 %v6861_v36, 0.0  ;;  %v6980_v15 = vadd.f32 %v12731_v7, %v6979_v17  ;;  %v12763_v17 = vld [vmem:[#allocation7 + $0x11] ss:$0 sm:$0xff] }
 0xc64   : > { %v7055_v57 = vmax.f32 %v6980_v15, 0.0  ;;  %7026 = vmatmul.f32.gmra.mxu0 %v6904_v32 }
 0xc66   : > { %7145 = vmatmul.f32.gmra.mxu1 %v7055_v57 }
 0xc67   : > { %v6863_v26 = vpop.f32.mrf.mxu3 }
 0xc68   : > { %v6864_v43 = vadd.f32 %v12483_v16, %v6863_v26 }
 0xc69   : > { %v6982_v63 = vpop.f32.mrf.mxu0 }
 0xc6a   : > { %v6905_v9 = vmax.f32 %v6864_v43, 0.0  ;;  %v6983_v46 = vadd.f32 %v12731_v7, %v6982_v63 }
 0xc6c   : > { %v7056_v40 = vmax.f32 %v6983_v46, 0.0  ;;  %7029 = vmatmul.f32.gmra.mxu0 %v6905_v9 }
 0xc6e   : > { %7148 = vmatmul.f32.gmra.mxu1 %v7056_v40 }
 0xc6f   : > { %v6866_v53 = vpop.f32.mrf.mxu3 }
 0xc70   : > { %v6867_v62 = vadd.f32 %v12483_v16, %v6866_v53 }
 0xc71   : > { %v6985_v21 = vpop.f32.mrf.mxu0 }
 0xc72   : > { %v6906_v2 = vmax.f32 %v6867_v62, 0.0  ;;  %v6986_v33 = vadd.f32 %v12731_v7, %v6985_v21 }
 0xc74   : > { %v7057_v18 = vmax.f32 %v6986_v33, 0.0  ;;  %7032 = vmatmul.f32.gmra.mxu0 %v6906_v2 }
 0xc76   : > { %7151 = vmatmul.f32.gmra.mxu1 %v7057_v18 }
 0xc77   : > { %v6869_v28 = vpop.f32.mrf.mxu3 }
 0xc78   : > { %v6870_v4 = vadd.f32 %v12483_v16, %v6869_v28 }
 0xc79   : > { %v6988_v39 = vpop.f32.mrf.mxu0 }
 0xc7a   : > { %v6907_v56 = vmax.f32 %v6870_v4, 0.0  ;;  %v6989_v52 = vadd.f32 %v12731_v7, %v6988_v39 }
 0xc7c   : > { %v7058_v35 = vmax.f32 %v6989_v52, 0.0  ;;  %7035 = vmatmul.f32.gmra.mxu0 %v6907_v56 }
 0xc7e   : > { %7154 = vmatmul.f32.gmra.mxu1 %v7058_v35 }
 0xc7f   : > { %v6872_v19 = vpop.f32.mrf.mxu3 }
 0xc80   : > { %v6873_v58 = vadd.f32 %v7935_v30, %v6872_v19 }
 0xc81   : > { %v6991_v0 = vpop.f32.mrf.mxu0 }
 0xc82   : > { %v6908_v60 = vmax.f32 %v6873_v58, 0.0  ;;  %v6992_v10 = vadd.f32 %v12731_v7, %v6991_v0 }
 0xc84   : > { %v7059_v5 = vmax.f32 %v6992_v10, 0.0  ;;  %7038 = vmatmul.f32.gmra.mxu0 %v6908_v60 }
 0xc86   : > { %7157 = vmatmul.f32.gmra.mxu1 %v7059_v5 }
 0xc87   : > { %v6875_v36 = vpop.f32.mrf.mxu3 }
 0xc88   : > { %v6876_v16 = vadd.f32 %v7935_v30, %v6875_v36 }
 0xc89   : > { %v6994_v32 = vpop.f32.mrf.mxu0 }
 0xc8a   : > { %v6909_v15 = vmax.f32 %v6876_v16, 0.0  ;;  %v6995_v57 = vadd.f32 %v12731_v7, %v6994_v32 }
 0xc8c   : > { %v7060_v43 = vmax.f32 %v6995_v57, 0.0  ;;  %7041 = vmatmul.f32.gmra.mxu0 %v6909_v15 }
 0xc8e   : > { %7160 = vmatmul.f32.gmra.mxu1 %v7060_v43 }
 0xc91   : > { %v6997_v46 = vpop.f32.mrf.mxu0 }
 0xc92   : > { %v7116_v26 = vpop.f32.mrf.mxu1  ;;  %v6998_v40 = vadd.f32 %v12731_v7, %v6997_v46 }
 0xc93   : > { %v7117_v63 = vadd.f32 %v12763_v17, %v7116_v26 }
 0xc94   : > { %v7061_v53 = vmax.f32 %v6998_v40, 0.0 }
 0xc95   : > { %v7212_v9 = vadd.f32 %v7117_v63, %v12102_v8 }
 0xc96   : > { %7163 = vmatmul.f32.gmra.mxu1 %v7061_v53 }
 0xc97   : > { %7244 = vst [vmem:[%s12770_s24] sm:$0xff] %v7212_v9 }
 0xc99   : > { %v7000_v33 = vpop.f32.mrf.mxu0 }
 0xc9a   : > { %v7119_v62 = vpop.f32.mrf.mxu1  ;;  %v7001_v8 = vadd.f32 %v12731_v7, %v7000_v33 }
 0xc9b   : > { %v7120_v21 = vadd.f32 %v12763_v17, %v7119_v62 }
 0xc9c   : > { %v7062_v18 = vmax.f32 %v7001_v8, 0.0 }
 0xc9d   : > { %v7213_v2 = vadd.f32 %v7120_v21, %v12132_v20 }
 0xc9e   : > { %7166 = vmatmul.f32.gmra.mxu1 %v7062_v18 }
 0xc9f   : > { %7245 = vst [vmem:[%s12770_s24 + $0x8] sm:$0xff] %v7213_v2 }
 0xca1   : > { %v7003_v28 = vpop.f32.mrf.mxu0 }
 0xca2   : > { %v7004_v4 = vadd.f32 %v12731_v7, %v7003_v28  ;;  %v7122_v39 = vpop.f32.mrf.mxu1 }
 0xca3   : > { %v7123_v52 = vadd.f32 %v12763_v17, %v7122_v39 }
 0xca4   : > { %v7063_v56 = vmax.f32 %v7004_v4, 0.0 }
 0xca5   : > { %v7214_v35 = vadd.f32 %v7123_v52, %v12172_v31 }
 0xca6   : > { %7169 = vmatmul.f32.gmra.mxu1 %v7063_v56 }
 0xca7   : > { %7246 = vst [vmem:[%s12770_s24 + $0x10] sm:$0xff] %v7214_v35 }
 0xca9   : > { %v7006_v20 = vpop.f32.mrf.mxu0 }
 0xcaa   : > { %v7007_v19 = vadd.f32 %v12731_v7, %v7006_v20 }
 0xcab   : > { %v7125_v30 = vpop.f32.mrf.mxu1 }
 0xcac   : > { %v7064_v58 = vmax.f32 %v7007_v19, 0.0  ;;  %v7126_v0 = vadd.f32 %v12763_v17, %v7125_v30 }
 0xcae   : > { %v7215_v60 = vadd.f32 %v7126_v0, %v12189_v49  ;;  %7172 = vmatmul.f32.gmra.mxu1 %v7064_v58 }
 0xcb0   : > { %7247 = vst [vmem:[%s12770_s24 + $0x18] sm:$0xff] %v7215_v60 }
 0xcb1   : > { %v7009_v10 = vpop.f32.mrf.mxu0 }
 0xcb2   : > { %v7010_v5 = vadd.f32 %v12731_v7, %v7009_v10 }
 0xcb3   : > { %v7128_v36 = vpop.f32.mrf.mxu1 }
 0xcb4   : > { %v7065_v31 = vmax.f32 %v7010_v5, 0.0  ;;  %v7129_v16 = vadd.f32 %v12763_v17, %v7128_v36 }
 0xcb6   : > { %v7216_v32 = vadd.f32 %v7129_v16, %v12223_v23  ;;  %7175 = vmatmul.f32.gmra.mxu1 %v7065_v31 }
 0xcb8   : > { %7248 = vst [vmem:[%s12770_s24 + $0x20] sm:$0xff] %v7216_v32 }
 0xcb9   : > { %v7012_v15 = vpop.f32.mrf.mxu0 }
 0xcba   : > { %v7013_v57 = vadd.f32 %v12731_v7, %v7012_v15 }
 0xcbb   : > { %v7131_v26 = vpop.f32.mrf.mxu1 }
 0xcbc   : > { %v7066_v49 = vmax.f32 %v7013_v57, 0.0  ;;  %v7132_v43 = vadd.f32 %v12763_v17, %v7131_v26 }
 0xcbe   : > { %v7217_v63 = vadd.f32 %v7132_v43, %v12240_v12  ;;  %7178 = vmatmul.f32.gmra.mxu1 %v7066_v49 }
 0xcc0   : > { %7249 = vst [vmem:[%s12770_s24 + $0x28] sm:$0xff] %v7217_v63 }
 0xcc1   : > { %v7015_v9 = vpop.f32.mrf.mxu0 }
 0xcc2   : > { %v7016_v46 = vadd.f32 %v12731_v7, %v7015_v9 }
 0xcc3   : > { %v7134_v40 = vpop.f32.mrf.mxu1 }
 0xcc4   : > { %v7067_v23 = vmax.f32 %v7016_v46, 0.0  ;;  %v7135_v53 = vadd.f32 %v12763_v17, %v7134_v40 }
 0xcc6   : > { %v7218_v62 = vadd.f32 %v7135_v53, %v12274_v29  ;;  %7181 = vmatmul.f32.gmra.mxu1 %v7067_v23 }
 0xcc8   : > { %7250 = vst [vmem:[%s12770_s24 + $0x30] sm:$0xff] %v7218_v62 }
 0xcc9   : > { %v7018_v21 = vpop.f32.mrf.mxu0 }
 0xcca   : > { %v7019_v2 = vadd.f32 %v12731_v7, %v7018_v21 }
 0xccb   : > { %v7137_v33 = vpop.f32.mrf.mxu1 }
 0xccc   : > { %v7068_v12 = vmax.f32 %v7019_v2, 0.0  ;;  %v7138_v8 = vadd.f32 %v12763_v17, %v7137_v33 }
 0xcce   : > { %v7219_v18 = vadd.f32 %v7138_v8, %v12291_v22  ;;  %7184 = vmatmul.f32.gmra.mxu1 %v7068_v12 }
 0xcd0   : > { %7251 = vst [vmem:[%s12770_s24 + $0x38] sm:$0xff] %v7219_v18 }
 0xcd1   : > { %v7021_v28 = vpop.f32.mrf.mxu0 }
 0xcd2   : > { %v7022_v4 = vadd.f32 %v12731_v7, %v7021_v28 }
 0xcd3   : > { %v7140_v39 = vpop.f32.mrf.mxu1 }
 0xcd4   : > { %v7069_v29 = vmax.f32 %v7022_v4, 0.0  ;;  %v7141_v56 = vadd.f32 %v12763_v17, %v7140_v39 }
 0xcd6   : > { %v7220_v52 = vadd.f32 %v7141_v56, %v12327_v47  ;;  %7187 = vmatmul.f32.gmra.mxu1 %v7069_v29 }
 0xcd8   : > { %7252 = vst [vmem:[%s12770_s24 + $0x40] sm:$0xff] %v7220_v52 }
 0xcd9   : > { %v7024_v35 = vpop.f32.mrf.mxu0 }
 0xcda   : > { %v7025_v20 = vadd.f32 %v12731_v7, %v7024_v35 }
 0xcdb   : > { %v7143_v19 = vpop.f32.mrf.mxu1 }
 0xcdc   : > { %v7070_v22 = vmax.f32 %v7025_v20, 0.0  ;;  %v7144_v30 = vadd.f32 %v12763_v17, %v7143_v19 }
 0xcde   : > { %v7221_v58 = vadd.f32 %v7144_v30, %v12344_v59  ;;  %7190 = vmatmul.f32.gmra.mxu1 %v7070_v22 }
 0xce0   : > { %7253 = vst [vmem:[%s12770_s24 + $0x48] sm:$0xff] %v7221_v58 }
 0xce1   : > { %v7027_v0 = vpop.f32.mrf.mxu0 }
 0xce2   : > { %v7028_v60 = vadd.f32 %v12731_v7, %v7027_v0 }
 0xce3   : > { %v7146_v10 = vpop.f32.mrf.mxu1 }
 0xce4   : > { %v7071_v47 = vmax.f32 %v7028_v60, 0.0  ;;  %v7147_v5 = vadd.f32 %v12763_v17, %v7146_v10 }
 0xce6   : > { %v7222_v36 = vadd.f32 %v7147_v5, %v12378_v44  ;;  %7193 = vmatmul.f32.gmra.mxu1 %v7071_v47 }
 0xce8   : > { %7254 = vst [vmem:[%s12770_s24 + $0x50] sm:$0xff] %v7222_v36 }
 0xce9   : > { %v7030_v31 = vpop.f32.mrf.mxu0 }
 0xcea   : > { %v7031_v16 = vadd.f32 %v12731_v7, %v7030_v31 }
 0xceb   : > { %v7149_v32 = vpop.f32.mrf.mxu1 }
 0xcec   : > { %v7072_v59 = vmax.f32 %v7031_v16, 0.0  ;;  %v7150_v15 = vadd.f32 %v12763_v17, %v7149_v32 }
 0xcee   : > { %v7223_v57 = vadd.f32 %v7150_v15, %v12395_v27  ;;  %7196 = vmatmul.f32.gmra.mxu1 %v7072_v59 }
 0xcf0   : > { %7255 = vst [vmem:[%s12770_s24 + $0x58] sm:$0xff] %v7223_v57 }
 0xcf1   : > { %v7033_v26 = vpop.f32.mrf.mxu0 }
 0xcf2   : > { %v7034_v49 = vadd.f32 %v12731_v7, %v7033_v26 }
 0xcf3   : > { %v7152_v43 = vpop.f32.mrf.mxu1 }
 0xcf4   : > { %v7073_v44 = vmax.f32 %v7034_v49, 0.0  ;;  %v7153_v63 = vadd.f32 %v12763_v17, %v7152_v43 }
 0xcf6   : > { %v7224_v9 = vadd.f32 %v7153_v63, %v12429_v3  ;;  %7199 = vmatmul.f32.gmra.mxu1 %v7073_v44 }
 0xcf8   : > { %7256 = vst [vmem:[%s12770_s24 + $0x60] sm:$0xff] %v7224_v9 }
 0xcf9   : > { %v7036_v46 = vpop.f32.mrf.mxu0 }
 0xcfa   : > { %v7037_v40 = vadd.f32 %v12731_v7, %v7036_v46 }
 0xcfb   : > { %v7155_v23 = vpop.f32.mrf.mxu1 }
 0xcfc   : > { %v7074_v27 = vmax.f32 %v7037_v40, 0.0  ;;  %v7156_v53 = vadd.f32 %v12763_v17, %v7155_v23 }
 0xcfe   : > { %v7225_v62 = vadd.f32 %v7156_v53, %v12444_v42  ;;  %7202 = vmatmul.f32.gmra.mxu1 %v7074_v27 }
 0xd00   : > { %7257 = vst [vmem:[%s12770_s24 + $0x68] sm:$0xff] %v7225_v62 }
 0xd01   : > { %v7039_v21 = vpop.f32.mrf.mxu0 }
 0xd02   : > { %v7040_v2 = vadd.f32 %v12731_v7, %v7039_v21 }
 0xd03   : > { %v7158_v33 = vpop.f32.mrf.mxu1 }
 0xd04   : > { %v7075_v3 = vmax.f32 %v7040_v2, 0.0  ;;  %v7159_v12 = vadd.f32 %v12763_v17, %v7158_v33 }
 0xd06   : > { %v7226_v8 = vadd.f32 %v7159_v12, %v12459_v13  ;;  %7205 = vmatmul.f32.gmra.mxu1 %v7075_v3 }
 0xd08   : > { %7258 = vst [vmem:[%s12770_s24 + $0x70] sm:$0xff] %v7226_v8 }
 0xd09   : > { %v7042_v18 = vpop.f32.mrf.mxu0 }
 0xd0a   : > { %v7043_v28 = vadd.f32 %v12731_v7, %v7042_v18 }
 0xd0b   : > { %v7161_v42 = vpop.f32.mrf.mxu1 }
 0xd0c   : > { %v7076_v4 = vmax.f32 %v7043_v28, 0.0  ;;  %v7162_v39 = vadd.f32 %v12763_v17, %v7161_v42 }
 0xd0e   : > { %v7227_v29 = vadd.f32 %v7162_v39, %v12472_v41  ;;  %7208 = vmatmul.f32.gmra.mxu1 %v7076_v4 }
 0xd10   : > { %7259 = vst [vmem:[%s12770_s24 + $0x78] sm:$0xff] %v7227_v29 }
 0xd13   : > { %v7164_v56 = vpop.f32.mrf.mxu1 }
 0xd14   : > { %v7165_v52 = vadd.f32 %v12763_v17, %v7164_v56 }
 0xd16   : > { %v7228_v13 = vadd.f32 %v7165_v52, %v12493_v37 }
 0xd18   : > { %7260 = vst [vmem:[%s12770_s24 + $0x80] sm:$0xff] %v7228_v13 }
 0xd1b   : > { %v7167_v35 = vpop.f32.mrf.mxu1 }
 0xd1c   : > { %v7168_v7 = vadd.f32 %v12763_v17, %v7167_v35 }
 0xd1e   : > { %v7229_v20 = vadd.f32 %v7168_v7, %v12508_v24 }
 0xd20   : > { %7261 = vst [vmem:[%s12770_s24 + $0x88] sm:$0xff] %v7229_v20 }
 0xd23   : > { %v7170_v19 = vpop.f32.mrf.mxu1 }
 0xd24   : > { %v7171_v41 = vadd.f32 %v12763_v17, %v7170_v19 }
 0xd26   : > { %v7230_v22 = vadd.f32 %v7171_v41, %v12527_v51 }
 0xd28   : > { %7262 = vst [vmem:[%s12770_s24 + $0x90] sm:$0xff] %v7230_v22 }
 0xd2b   : > { %v7173_v30 = vpop.f32.mrf.mxu1 }
 0xd2c   : > { %v7174_v58 = vadd.f32 %v12763_v17, %v7173_v30 }
 0xd2e   : > { %v7231_v37 = vadd.f32 %v7174_v58, %v12540_v6 }
 0xd30   : > { %7263 = vst [vmem:[%s12770_s24 + $0x98] sm:$0xff] %v7231_v37 }
 0xd33   : > { %v7176_v0 = vpop.f32.mrf.mxu1 }
 0xd34   : > { %v7177_v60 = vadd.f32 %v12763_v17, %v7176_v0 }
 0xd36   : > { %v7232_v24 = vadd.f32 %v7177_v60, %v12558_v1 }
 0xd38   : > { %7264 = vst [vmem:[%s12770_s24 + $0xa0] sm:$0xff] %v7232_v24 }
 0xd3b   : > { %v7179_v10 = vpop.f32.mrf.mxu1 }
 0xd3c   : > { %v7180_v47 = vadd.f32 %v12763_v17, %v7179_v10 }
 0xd3e   : > { %v7233_v51 = vadd.f32 %v7180_v47, %v12576_v61 }
 0xd40   : > { %7265 = vst [vmem:[%s12770_s24 + $0xa8] sm:$0xff] %v7233_v51 }
 0xd43   : > { %v7182_v5 = vpop.f32.mrf.mxu1 }
 0xd44   : > { %v7183_v36 = vadd.f32 %v12763_v17, %v7182_v5 }
 0xd46   : > { %v7234_v6 = vadd.f32 %v7183_v36, %v12595_v50 }
 0xd48   : > { %7266 = vst [vmem:[%s12770_s24 + $0xb0] sm:$0xff] %v7234_v6 }
 0xd4b   : > { %v7185_v31 = vpop.f32.mrf.mxu1 }
 0xd4c   : > { %v7186_v16 = vadd.f32 %v12763_v17, %v7185_v31 }
 0xd4e   : > { %v7235_v1 = vadd.f32 %v7186_v16, %v12614_v14 }
 0xd50   : > { %7267 = vst [vmem:[%s12770_s24 + $0xb8] sm:$0xff] %v7235_v1 }
 0xd53   : > { %v7188_v32 = vpop.f32.mrf.mxu1 }
 0xd54   : > { %v7189_v59 = vadd.f32 %v12763_v17, %v7188_v32 }
 0xd56   : > { %v7236_v61 = vadd.f32 %v7189_v59, %v12633_v45 }
 0xd58   : > { %7268 = vst [vmem:[%s12770_s24 + $0xc0] sm:$0xff] %v7236_v61 }
 0xd5b   : > { %v7191_v15 = vpop.f32.mrf.mxu1 }
 0xd5c   : > { %v7192_v57 = vadd.f32 %v12763_v17, %v7191_v15 }
 0xd5e   : > { %v7237_v50 = vadd.f32 %v7192_v57, %v12652_v11 }
 0xd60   : > { %7269 = vst [vmem:[%s12770_s24 + $0xc8] sm:$0xff] %v7237_v50 }
 0xd63   : > { %v7194_v26 = vpop.f32.mrf.mxu1 }
 0xd64   : > { %v7195_v49 = vadd.f32 %v12763_v17, %v7194_v26 }
 0xd66   : > { %v7238_v14 = vadd.f32 %v7195_v49, %v12671_v34 }
 0xd68   : > { %7270 = vst [vmem:[%s12770_s24 + $0xd0] sm:$0xff] %v7238_v14 }
 0xd6b   : > { %v7197_v43 = vpop.f32.mrf.mxu1 }
 0xd6c   : > { %v7198_v44 = vadd.f32 %v12763_v17, %v7197_v43 }
 0xd6e   : > { %v7239_v45 = vadd.f32 %v7198_v44, %v12688_v25 }
 0xd70   : > { %7271 = vst [vmem:[%s12770_s24 + $0xd8] sm:$0xff] %v7239_v45 }
 0xd73   : > { %v7200_v63 = vpop.f32.mrf.mxu1 }
 0xd74   : > { %v7201_v11 = vadd.f32 %v12763_v17, %v7200_v63 }
 0xd76   : > { %v7240_v9 = vadd.f32 %v7201_v11, %v12703_v54 }
 0xd78   : > { %7272 = vst [vmem:[%s12770_s24 + $0xe0] sm:$0xff] %v7240_v9 }
 0xd7b   : > { %v7203_v46 = vpop.f32.mrf.mxu1 }
 0xd7c   : > { %v7204_v40 = vadd.f32 %v12763_v17, %v7203_v46 }
 0xd7e   : > { %v7241_v34 = vadd.f32 %v7204_v40, %v12712_v48 }
 0xd80   : > { %7273 = vst [vmem:[%s12770_s24 + $0xe8] sm:$0xff] %v7241_v34 }
 0xd83   : > { %v7206_v23 = vpop.f32.mrf.mxu1 }
 0xd84   : > { %v7207_v27 = vadd.f32 %v12763_v17, %v7206_v23 }
 0xd86   : > { %v7242_v25 = vadd.f32 %v7207_v27, %v12720_v38 }
 0xd88   : > { %7274 = vst [vmem:[%s12770_s24 + $0xf0] sm:$0xff] %v7242_v25 }
 0xd8b   : > { %v7209_v54 = vpop.f32.mrf.mxu1 }
 0xd8c   : > { %v7210_v53 = vadd.f32 %v12763_v17, %v7209_v54 }
 0xd8e   : > { %v7243_v48 = vadd.f32 %v7210_v53, %v12728_v55 }
 0xd90   : > { %7275 = vst [vmem:[%s12770_s24 + $0xf8] sm:$0xff] %v7243_v48 }
 0xd91   : > { %8113 = shalt.err (!%p8110_p10)
}
 0xd92   : > { %s8171_s6 = smov 128   ;;  %s8172_s23 = smov 8  }
 0xd93   : > { %7477 = dma.vmem_to_hbm [thread:$0]  (%p8290_p3), %s7290_s13, 4096, %s7292_s14, %s7277_s7, %s8171_s6, %s8171_s6, %s8172_s23  }
 0xd94 PF: > { %s7306_s24 = sand.u32 1, %s8148_s18   ;;  %p12944_p12 = scmp.ge.s32.totalorder %s8160_s21, 2 }
 0xd95   : > { %s7307_s29 = scalar_lea.sflag [#allocation4], %s7306_s24 }
 0xd96   : > { %p7497_p13 = pnand %p12944_p12, %p8238_p6 }
 0xd98   : > { %p7498_p0 = pneg %p7497_p13 }
 0xd9a   : > { %8143 = dma.done.wait (%p7498_p0), %s7307_s29, 4096  }
 0xd9b   : > { %8145 = vsyncadd (%p7498_p0), %s7307_s29, 4294963200  ;;  %p20_p5 = scmp.ge.s32.totalorder %s8280_s10, 4   ;;  %s12945_s18 = smov %s8152_s19 }
 0xd9c   : > { %s12946_s19 = smov %s8156_s20  ;;  %s12947_s20 = smov %s8296_s17 }
 0xd9d   : > { %s12948_s21 = smov %s8280_s10  ;;  %22 = sbr.rel (!%p20_p5) target bundleno = 7 (0x7), region = 143 }
 0xda2   :  { %7313 = vsyncpa [#allocation3], 1 }
 0xda3   :  { %7315 = vsyncpa [#allocation3 + $0x1], 1 }
 0xda4   :  { %7316 = vsyncpa [#allocation6], 1 }
 0xda5   :  { %7317 = vsyncpa [#allocation9], 1 }
 0xda6   :  { %7318 = vsyncpa [#allocation4], 1 }
 0xda7   :  { %7320 = vsyncpa [#allocation4 + $0x1], 1 }

</bundles_post_ra>
